<compile_context>
chip_gen: v7x
topology: tpu7x:2x2x1
jax: 0.10.0
libtpu: 0.0.40
codegen_flags: <defaults>
</compile_context>

<pallas_src>
import functools

import jax
import jax.numpy as jnp
from jax import lax
from jax.experimental import pallas as pl
from jax.experimental.pallas import tpu as pltpu

EPS = 1e-5  # nn.InstanceNorm2d default eps


def _vmem_limit_bytes(default=48 * 1024 * 1024):
    """Explicit scoped-VMEM limit with generation-aware headroom (v7x only has 64 MiB)."""
    try:
        cap = getattr(pltpu.get_tpu_info(), "vmem_capacity_bytes", None)
        if cap:
            return int(cap * 4 // 5)  # 80% of physical, leave headroom
    except Exception:
        pass
    return default


def _make_residual_block_kernel(H, W, C, K, mxu_dtype):
    p = K // 2
    HW = H * W
    inv_hw = 1.0 / float(HW)

    def reflect_halo(pad_ref):
        # pad_ref[p:p+H, p:p+W, :] must already hold the image. Rows first, then full
        # columns (so corners get the doubly-reflected value, matching ReflectionPad2d).
        for i in range(1, p + 1):
            pad_ref[p - i:p - i + 1, p:p + W, :] = pad_ref[p + i:p + i + 1, p:p + W, :]
            pad_ref[p + H - 1 + i:p + H + i, p:p + W, :] = (
                pad_ref[p + H - 1 - i:p + H - i, p:p + W, :])
        for j in range(1, p + 1):
            pad_ref[:, p - j:p - j + 1, :] = pad_ref[:, p + j:p + j + 1, :]
            pad_ref[:, p + W - 1 + j:p + W + j, :] = pad_ref[:, p + W - 1 - j:p + W - j, :]

    def conv_in_stage(pad_ref, patch_ref, wm_ref, b_ref, g_ref, be_ref):
        """'VALID' KxK conv on the padded VMEM tile (single im2col matmul) + affine IN."""
        reflect_halo(pad_ref)
        # im2col: gather the K*K taps into one (HW, K*K*C) VMEM matrix (tap-major, then ci,
        # matching w.reshape(K*K*C, C) row order).
        t = 0
        for kh in range(K):
            for kw in range(K):
                piece = pad_ref[kh:kh + H, kw:kw + W, :].reshape(HW, C)
                patch_ref[:, t * C:(t + 1) * C] = piece
                t += 1
        # One MXU matmul per stage, contraction depth K*K*C (9x deeper than per-tap).
        # bf16 operands on v6e/v7x double MXU throughput; accumulation stays f32.
        y = jnp.dot(patch_ref[...].astype(mxu_dtype), wm_ref[...].astype(mxu_dtype),
                    preferred_element_type=jnp.float32)
        y = y + b_ref[...].astype(jnp.float32)
        # Single-pass InstanceNorm statistics (sum + sum-of-squares, biased variance).
        s1 = jnp.sum(y, axis=0, keepdims=True)
        s2 = jnp.sum(y * y, axis=0, keepdims=True)
        mean = s1 * inv_hw
        var = jnp.maximum(s2 * inv_hw - mean * mean, 0.0)
        yn = (y - mean) * lax.rsqrt(var + EPS)
        return yn * g_ref[...].astype(jnp.float32) + be_ref[...].astype(jnp.float32)

    def kernel(x_ref, w1_ref, b1_ref, g1_ref, be1_ref,
               w2_ref, b2_ref, g2_ref, be2_ref,
               o_ref, pad_ref, patch_ref):
        x = x_ref[0].astype(jnp.float32)                    # (H, W, C)
        res = x.reshape(HW, C)                              # residual (kept on-chip)

        # ---- stage 1: relu(IN1(conv1(x))); intermediate never touches HBM ----
        pad_ref[p:p + H, p:p + W, :] = x
        y1 = jnp.maximum(
            conv_in_stage(pad_ref, patch_ref, w1_ref, b1_ref, g1_ref, be1_ref), 0.0)

        # write y1 back into the (reused) pad-scratch center, row by row
        # (avoids a lane-splitting reshape; H is small and static).
        for h in range(H):
            pad_ref[p + h, p:p + W, :] = y1[h * W:(h + 1) * W, :]

        # ---- stage 2: relu(IN2(conv2(y1)) + x) ----
        y2 = conv_in_stage(pad_ref, patch_ref, w2_ref, b2_ref, g2_ref, be2_ref)
        o_ref[0] = jnp.maximum(y2 + res, 0.0).astype(o_ref.dtype)

    return kernel


def residual_block_forward(x_nchw, params, mxu_dtype=jnp.float32):
    """Matches ResidualBlock.forward: relu(IN2(conv2(relu(IN1(conv1(x))))) + x).

    x_nchw: (N, C, H, W). Conv weights in HWIO (K, K, C, C); bias/gamma/beta as (1, C).
    """
    w1, b1, g1, be1, w2, b2, g2, be2 = params
    K = w1.shape[0]
    N, C, H, W = x_nchw.shape
    p = K // 2
    HW = H * W

    x = jnp.transpose(x_nchw, (0, 2, 3, 1))              # NCHW -> NHWC (channels in lanes)
    w1m = w1.reshape(K * K * C, C)                       # (kh, kw, ci) row-major = im2col order
    w2m = w2.reshape(K * K * C, C)

    kernel = _make_residual_block_kernel(H, W, C, K, mxu_dtype)
    vec_spec = pl.BlockSpec((1, C), lambda n: (0, 0))
    w_spec = pl.BlockSpec((K * K * C, C), lambda n: (0, 0))

    out = pl.pallas_call(
        kernel,
        out_shape=jax.ShapeDtypeStruct((N, HW, C), x.dtype),
        grid=(N,),
        in_specs=[
            pl.BlockSpec((1, H, W, C), lambda n: (n, 0, 0, 0)),
            w_spec, vec_spec, vec_spec, vec_spec,
            w_spec, vec_spec, vec_spec, vec_spec,
        ],
        out_specs=pl.BlockSpec((1, HW, C), lambda n: (n, 0, 0)),
        scratch_shapes=[
            pltpu.VMEM((H + 2 * p, W + 2 * p, C), jnp.float32),   # reflection-padded tile
            pltpu.VMEM((HW, K * K * C), jnp.float32),             # im2col patch matrix
        ],
        compiler_params=pltpu.CompilerParams(
            dimension_semantics=("parallel",),
            vmem_limit_bytes=_vmem_limit_bytes(),
        ),
    )(x, w1m, b1, g1, be1, w2m, b2, g2, be2)

    # (N, HW, C) -> (N, H, W, C) is a free reshape (same memory layout), then back to NCHW.
    return jnp.transpose(out.reshape(N, H, W, C), (0, 3, 1, 2))


def _ref_forward(x_nchw, params):
    """Pure-JAX reference (lax.conv) for numerical verification."""
    w1, b1, g1, be1, w2, b2, g2, be2 = params
    K = w1.shape[0]
    p = K // 2
    x = jnp.transpose(x_nchw, (0, 2, 3, 1))

    def conv_in(xin, w, b, g, beta):
        xp = jnp.pad(xin, ((0, 0), (p, p), (p, p), (0, 0)), mode="reflect")
        y = lax.conv_general_dilated(
            xp, w, (1, 1), "VALID", dimension_numbers=("NHWC", "HWIO", "NHWC"))
        y = y + b[0]
        mean = jnp.mean(y, axis=(1, 2), keepdims=True)
        var = jnp.mean((y - mean) ** 2, axis=(1, 2), keepdims=True)
        return (y - mean) * lax.rsqrt(var + EPS) * g[0] + beta[0]

    out = jnp.maximum(conv_in(x, w1, b1, g1, be1), 0.0)
    out = conv_in(out, w2, b2, g2, be2) + x
    out = jnp.maximum(out, 0.0)
    return jnp.transpose(out, (0, 3, 1, 2))


if __name__ == "__main__":
    N, C, H, W, K = 2, 4, 16, 16, 3  # small shapes: batch=2, channels=4, spatial=16
    key = jax.random.PRNGKey(0)
    ks = jax.random.split(key, 9)

    x = jax.random.normal(ks[0], (N, C, H, W), jnp.float32)

    # Deterministic synthetic parameters (conv weights in HWIO for the kernels).
    s = 0.2
    w1 = jax.random.normal(ks[1], (K, K, C, C), jnp.float32) * s
    b1 = jax.random.normal(ks[2], (1, C), jnp.float32) * s
    g1 = 1.0 + 0.1 * jax.random.normal(ks[3], (1, C), jnp.float32)
    be1 = 0.1 * jax.random.normal(ks[4], (1, C), jnp.float32)
    w2 = jax.random.normal(ks[5], (K, K, C, C), jnp.float32) * s
    b2 = jax.random.normal(ks[6], (1, C), jnp.float32) * s
    g2 = 1.0 + 0.1 * jax.random.normal(ks[7], (1, C), jnp.float32)
    be2 = 0.1 * jax.random.normal(ks[8], (1, C), jnp.float32)
    params = (w1, b1, g1, be1, w2, b2, g2, be2)

    ref = _ref_forward(x, params)

    # f32 MXU operands: exact check against the reference.
    fwd_f32 = jax.jit(functools.partial(residual_block_forward, mxu_dtype=jnp.float32))
    out = jax.block_until_ready(fwd_f32(x, params))
    assert out.shape == (N, C, H, W), out.shape
    assert jnp.allclose(out, ref, atol=1e-4, rtol=1e-4), float(jnp.max(jnp.abs(out - ref)))

    # bf16 MXU operands (v6e/v7x fast path), f32 accumulation + f32 IN/ReLU: loose check.
    fwd_bf16 = jax.jit(functools.partial(residual_block_forward, mxu_dtype=jnp.bfloat16))
    out_bf16 = jax.block_until_ready(fwd_bf16(x, params))
    assert out_bf16.shape == (N, C, H, W)
    assert float(jnp.max(jnp.abs(out_bf16 - ref))) < 0.25

    print("KERNEL_OK")
</pallas_src>

<mosaic_0001>
module attributes {stable_mosaic.version = 11 : i64} {
  func.func @kernel(%arg0: i32, %arg1: memref<1x16x16x4xf32, #tpu.memory_space<vmem>>, %arg2: memref<36x4xf32, #tpu.memory_space<vmem>>, %arg3: memref<1x4xf32, #tpu.memory_space<vmem>>, %arg4: memref<1x4xf32, #tpu.memory_space<vmem>>, %arg5: memref<1x4xf32, #tpu.memory_space<vmem>>, %arg6: memref<36x4xf32, #tpu.memory_space<vmem>>, %arg7: memref<1x4xf32, #tpu.memory_space<vmem>>, %arg8: memref<1x4xf32, #tpu.memory_space<vmem>>, %arg9: memref<1x4xf32, #tpu.memory_space<vmem>>, %arg10: memref<1x256x4xf32, #tpu.memory_space<vmem>>, %arg11: memref<18x18x4xf32, #tpu.memory_space<vmem>>, %arg12: memref<256x36xf32, #tpu.memory_space<vmem>>) attributes {dimension_semantics = [#tpu.dimension_semantics<parallel>], iteration_bounds = array<i64: 2>, scalar_prefetch = 0 : i64, scratch_operands = 2 : i64, tpu.core_type = #tpu.core_type<tc>, window_params = [{transform_indices = @transform_0, window_bounds = array<i64: 1, 16, 16, 4>}, {pipeline_mode = #tpu.pipeline_mode<synchronous>, transform_indices = @transform_1, window_bounds = array<i64: 36, 4>}, {pipeline_mode = #tpu.pipeline_mode<synchronous>, transform_indices = @transform_2, window_bounds = array<i64: 1, 4>}, {pipeline_mode = #tpu.pipeline_mode<synchronous>, transform_indices = @transform_3, window_bounds = array<i64: 1, 4>}, {pipeline_mode = #tpu.pipeline_mode<synchronous>, transform_indices = @transform_4, window_bounds = array<i64: 1, 4>}, {pipeline_mode = #tpu.pipeline_mode<synchronous>, transform_indices = @transform_5, window_bounds = array<i64: 36, 4>}, {pipeline_mode = #tpu.pipeline_mode<synchronous>, transform_indices = @transform_6, window_bounds = array<i64: 1, 4>}, {pipeline_mode = #tpu.pipeline_mode<synchronous>, transform_indices = @transform_7, window_bounds = array<i64: 1, 4>}, {pipeline_mode = #tpu.pipeline_mode<synchronous>, transform_indices = @transform_8, window_bounds = array<i64: 1, 4>}, {transform_indices = @transform_9, window_bounds = array<i64: 1, 256, 4>}]} {
    %c0 = arith.constant 0 : index
    %c0_0 = arith.constant 0 : index
    %c0_1 = arith.constant 0 : index
    %c0_2 = arith.constant 0 : index
    %0 = vector.load %arg1[%c0, %c0_0, %c0_1, %c0_2] : memref<1x16x16x4xf32, #tpu.memory_space<vmem>>, vector<1x16x16x4xf32>
    %1 = vector.shape_cast %0 : vector<1x16x16x4xf32> to vector<16x16x4xf32>
    %2 = vector.shape_cast %1 : vector<16x16x4xf32> to vector<256x4xf32>
    %c1 = arith.constant 1 : index
    %c1_3 = arith.constant 1 : index
    %c0_4 = arith.constant 0 : index
    %3 = vector.load %arg11[%c1, %c1_3, %c0_4] : memref<18x18x4xf32, #tpu.memory_space<vmem>>, vector<16x16x4xf32>
    tpu.vector_store %arg11[%c1, %c1_3, %c0_4], %1 {strides = array<i32>} : memref<18x18x4xf32, #tpu.memory_space<vmem>>, vector<16x16x4xf32>,
    %c2 = arith.constant 2 : index
    %c1_5 = arith.constant 1 : index
    %c0_6 = arith.constant 0 : index
    %4 = vector.load %arg11[%c2, %c1_5, %c0_6] : memref<18x18x4xf32, #tpu.memory_space<vmem>>, vector<1x16x4xf32>
    %c0_7 = arith.constant 0 : index
    %c1_8 = arith.constant 1 : index
    %c0_9 = arith.constant 0 : index
    %5 = vector.load %arg11[%c0_7, %c1_8, %c0_9] : memref<18x18x4xf32, #tpu.memory_space<vmem>>, vector<1x16x4xf32>
    tpu.vector_store %arg11[%c0_7, %c1_8, %c0_9], %4 {strides = array<i32>} : memref<18x18x4xf32, #tpu.memory_space<vmem>>, vector<1x16x4xf32>,
    %c15 = arith.constant 15 : index
    %c1_10 = arith.constant 1 : index
    %c0_11 = arith.constant 0 : index
    %6 = vector.load %arg11[%c15, %c1_10, %c0_11] : memref<18x18x4xf32, #tpu.memory_space<vmem>>, vector<1x16x4xf32>
    %c17 = arith.constant 17 : index
    %c1_12 = arith.constant 1 : index
    %c0_13 = arith.constant 0 : index
    %7 = vector.load %arg11[%c17, %c1_12, %c0_13] : memref<18x18x4xf32, #tpu.memory_space<vmem>>, vector<1x16x4xf32>
    tpu.vector_store %arg11[%c17, %c1_12, %c0_13], %6 {strides = array<i32>} : memref<18x18x4xf32, #tpu.memory_space<vmem>>, vector<1x16x4xf32>,
    %c0_14 = arith.constant 0 : index
    %c2_15 = arith.constant 2 : index
    %c0_16 = arith.constant 0 : index
    %8 = vector.load %arg11[%c0_14, %c2_15, %c0_16] : memref<18x18x4xf32, #tpu.memory_space<vmem>>, vector<18x1x4xf32>
    %c0_17 = arith.constant 0 : index
    %c0_18 = arith.constant 0 : index
    %c0_19 = arith.constant 0 : index
    %9 = vector.load %arg11[%c0_17, %c0_18, %c0_19] : memref<18x18x4xf32, #tpu.memory_space<vmem>>, vector<18x1x4xf32>
    tpu.vector_store %arg11[%c0_17, %c0_18, %c0_19], %8 {strides = array<i32>} : memref<18x18x4xf32, #tpu.memory_space<vmem>>, vector<18x1x4xf32>,
    %c0_20 = arith.constant 0 : index
    %c15_21 = arith.constant 15 : index
    %c0_22 = arith.constant 0 : index
    %10 = vector.load %arg11[%c0_20, %c15_21, %c0_22] : memref<18x18x4xf32, #tpu.memory_space<vmem>>, vector<18x1x4xf32>
    %c0_23 = arith.constant 0 : index
    %c17_24 = arith.constant 17 : index
    %c0_25 = arith.constant 0 : index
    %11 = vector.load %arg11[%c0_23, %c17_24, %c0_25] : memref<18x18x4xf32, #tpu.memory_space<vmem>>, vector<18x1x4xf32>
    tpu.vector_store %arg11[%c0_23, %c17_24, %c0_25], %10 {strides = array<i32>} : memref<18x18x4xf32, #tpu.memory_space<vmem>>, vector<18x1x4xf32>,
    %c0_26 = arith.constant 0 : index
    %c0_27 = arith.constant 0 : index
    %c0_28 = arith.constant 0 : index
    %12 = vector.load %arg11[%c0_26, %c0_27, %c0_28] : memref<18x18x4xf32, #tpu.memory_space<vmem>>, vector<16x16x4xf32>
    %13 = vector.shape_cast %12 : vector<16x16x4xf32> to vector<256x4xf32>
    %c0_29 = arith.constant 0 : index
    %c0_30 = arith.constant 0 : index
    %14 = vector.load %arg12[%c0_29, %c0_30] : memref<256x36xf32, #tpu.memory_space<vmem>>, vector<256x4xf32>
    tpu.vector_store %arg12[%c0_29, %c0_30], %13 {strides = array<i32>} : memref<256x36xf32, #tpu.memory_space<vmem>>, vector<256x4xf32>,
    %c0_31 = arith.constant 0 : index
    %c1_32 = arith.constant 1 : index
    %c0_33 = arith.constant 0 : index
    %15 = vector.load %arg11[%c0_31, %c1_32, %c0_33] : memref<18x18x4xf32, #tpu.memory_space<vmem>>, vector<16x16x4xf32>
    %16 = vector.shape_cast %15 : vector<16x16x4xf32> to vector<256x4xf32>
    %c0_34 = arith.constant 0 : index
    %c4 = arith.constant 4 : index
    %17 = vector.load %arg12[%c0_34, %c4] : memref<256x36xf32, #tpu.memory_space<vmem>>, vector<256x4xf32>
    tpu.vector_store %arg12[%c0_34, %c4], %16 {strides = array<i32>} : memref<256x36xf32, #tpu.memory_space<vmem>>, vector<256x4xf32>,
    %c0_35 = arith.constant 0 : index
    %c2_36 = arith.constant 2 : index
    %c0_37 = arith.constant 0 : index
    %18 = vector.load %arg11[%c0_35, %c2_36, %c0_37] : memref<18x18x4xf32, #tpu.memory_space<vmem>>, vector<16x16x4xf32>
    %19 = vector.shape_cast %18 : vector<16x16x4xf32> to vector<256x4xf32>
    %c0_38 = arith.constant 0 : index
    %c8 = arith.constant 8 : index
    %20 = vector.load %arg12[%c0_38, %c8] : memref<256x36xf32, #tpu.memory_space<vmem>>, vector<256x4xf32>
    tpu.vector_store %arg12[%c0_38, %c8], %19 {strides = array<i32>} : memref<256x36xf32, #tpu.memory_space<vmem>>, vector<256x4xf32>,
    %c1_39 = arith.constant 1 : index
    %c0_40 = arith.constant 0 : index
    %c0_41 = arith.constant 0 : index
    %21 = vector.load %arg11[%c1_39, %c0_40, %c0_41] : memref<18x18x4xf32, #tpu.memory_space<vmem>>, vector<16x16x4xf32>
    %22 = vector.shape_cast %21 : vector<16x16x4xf32> to vector<256x4xf32>
    %c0_42 = arith.constant 0 : index
    %c12 = arith.constant 12 : index
    %23 = vector.load %arg12[%c0_42, %c12] : memref<256x36xf32, #tpu.memory_space<vmem>>, vector<256x4xf32>
    tpu.vector_store %arg12[%c0_42, %c12], %22 {strides = array<i32>} : memref<256x36xf32, #tpu.memory_space<vmem>>, vector<256x4xf32>,
    %c1_43 = arith.constant 1 : index
    %c1_44 = arith.constant 1 : index
    %c0_45 = arith.constant 0 : index
    %24 = vector.load %arg11[%c1_43, %c1_44, %c0_45] : memref<18x18x4xf32, #tpu.memory_space<vmem>>, vector<16x16x4xf32>
    %25 = vector.shape_cast %24 : vector<16x16x4xf32> to vector<256x4xf32>
    %c0_46 = arith.constant 0 : index
    %c16 = arith.constant 16 : index
    %26 = vector.load %arg12[%c0_46, %c16] : memref<256x36xf32, #tpu.memory_space<vmem>>, vector<256x4xf32>
    tpu.vector_store %arg12[%c0_46, %c16], %25 {strides = array<i32>} : memref<256x36xf32, #tpu.memory_space<vmem>>, vector<256x4xf32>,
    %c1_47 = arith.constant 1 : index
    %c2_48 = arith.constant 2 : index
    %c0_49 = arith.constant 0 : index
    %27 = vector.load %arg11[%c1_47, %c2_48, %c0_49] : memref<18x18x4xf32, #tpu.memory_space<vmem>>, vector<16x16x4xf32>
    %28 = vector.shape_cast %27 : vector<16x16x4xf32> to vector<256x4xf32>
    %c0_50 = arith.constant 0 : index
    %c20 = arith.constant 20 : index
    %29 = vector.load %arg12[%c0_50, %c20] : memref<256x36xf32, #tpu.memory_space<vmem>>, vector<256x4xf32>
    tpu.vector_store %arg12[%c0_50, %c20], %28 {strides = array<i32>} : memref<256x36xf32, #tpu.memory_space<vmem>>, vector<256x4xf32>,
    %c2_51 = arith.constant 2 : index
    %c0_52 = arith.constant 0 : index
    %c0_53 = arith.constant 0 : index
    %30 = vector.load %arg11[%c2_51, %c0_52, %c0_53] : memref<18x18x4xf32, #tpu.memory_space<vmem>>, vector<16x16x4xf32>
    %31 = vector.shape_cast %30 : vector<16x16x4xf32> to vector<256x4xf32>
    %c0_54 = arith.constant 0 : index
    %c24 = arith.constant 24 : index
    %32 = vector.load %arg12[%c0_54, %c24] : memref<256x36xf32, #tpu.memory_space<vmem>>, vector<256x4xf32>
    tpu.vector_store %arg12[%c0_54, %c24], %31 {strides = array<i32>} : memref<256x36xf32, #tpu.memory_space<vmem>>, vector<256x4xf32>,
    %c2_55 = arith.constant 2 : index
    %c1_56 = arith.constant 1 : index
    %c0_57 = arith.constant 0 : index
    %33 = vector.load %arg11[%c2_55, %c1_56, %c0_57] : memref<18x18x4xf32, #tpu.memory_space<vmem>>, vector<16x16x4xf32>
    %34 = vector.shape_cast %33 : vector<16x16x4xf32> to vector<256x4xf32>
    %c0_58 = arith.constant 0 : index
    %c28 = arith.constant 28 : index
    %35 = vector.load %arg12[%c0_58, %c28] : memref<256x36xf32, #tpu.memory_space<vmem>>, vector<256x4xf32>
    tpu.vector_store %arg12[%c0_58, %c28], %34 {strides = array<i32>} : memref<256x36xf32, #tpu.memory_space<vmem>>, vector<256x4xf32>,
    %c2_59 = arith.constant 2 : index
    %c2_60 = arith.constant 2 : index
    %c0_61 = arith.constant 0 : index
    %36 = vector.load %arg11[%c2_59, %c2_60, %c0_61] : memref<18x18x4xf32, #tpu.memory_space<vmem>>, vector<16x16x4xf32>
    %37 = vector.shape_cast %36 : vector<16x16x4xf32> to vector<256x4xf32>
    %c0_62 = arith.constant 0 : index
    %c32 = arith.constant 32 : index
    %38 = vector.load %arg12[%c0_62, %c32] : memref<256x36xf32, #tpu.memory_space<vmem>>, vector<256x4xf32>
    tpu.vector_store %arg12[%c0_62, %c32], %37 {strides = array<i32>} : memref<256x36xf32, #tpu.memory_space<vmem>>, vector<256x4xf32>,
    %c0_63 = arith.constant 0 : index
    %c0_64 = arith.constant 0 : index
    %39 = vector.load %arg12[%c0_63, %c0_64] : memref<256x36xf32, #tpu.memory_space<vmem>>, vector<256x36xf32>
    %c0_65 = arith.constant 0 : index
    %c0_66 = arith.constant 0 : index
    %40 = vector.load %arg2[%c0_65, %c0_66] : memref<36x4xf32, #tpu.memory_space<vmem>>, vector<36x4xf32>
    %cst = arith.constant dense<0.000000e+00> : vector<256x4xf32>
    %41 = tpu.matmul %39, %40, %cst {dimension_numbers = #tpu.dot_dimension_numbers<[1], [0], [0], [1], [0, 0, 1, 1], [], []>} : vector<256x36xf32>, vector<36x4xf32>, vector<256x4xf32> -> vector<256x4xf32>
    %c0_67 = arith.constant 0 : index
    %c0_68 = arith.constant 0 : index
    %42 = vector.load %arg3[%c0_67, %c0_68] : memref<1x4xf32, #tpu.memory_space<vmem>>, vector<1x4xf32>
    %43 = vector.broadcast %42 : vector<1x4xf32> to vector<256x4xf32>
    %44 = arith.addf %41, %43 : vector<256x4xf32>
    %cst_69 = arith.constant dense<0.000000e+00> : vector<4xf32>
    %45 = vector.multi_reduction <add>, %44, %cst_69 [0] : vector<256x4xf32> to vector<4xf32>
    %46 = vector.shape_cast %45 : vector<4xf32> to vector<1x4xf32>
    %47 = arith.mulf %44, %44 : vector<256x4xf32>
    %cst_70 = arith.constant dense<0.000000e+00> : vector<4xf32>
    %48 = vector.multi_reduction <add>, %47, %cst_70 [0] : vector<256x4xf32> to vector<4xf32>
    %49 = vector.shape_cast %48 : vector<4xf32> to vector<1x4xf32>
    %cst_71 = arith.constant 3.906250e-03 : f32
    %50 = vector.broadcast %cst_71 : f32 to vector<1x4xf32>
    %51 = arith.mulf %46, %50 : vector<1x4xf32>
    %cst_72 = arith.constant 3.906250e-03 : f32
    %52 = vector.broadcast %cst_72 : f32 to vector<1x4xf32>
    %53 = arith.mulf %49, %52 : vector<1x4xf32>
    %54 = arith.mulf %51, %51 : vector<1x4xf32>
    %55 = arith.subf %53, %54 : vector<1x4xf32>
    %cst_73 = arith.constant 0.000000e+00 : f32
    %56 = vector.broadcast %cst_73 : f32 to vector<1x4xf32>
    %57 = arith.maximumf %55, %56 : vector<1x4xf32>
    %58 = vector.broadcast %51 : vector<1x4xf32> to vector<256x4xf32>
    %59 = arith.subf %44, %58 : vector<256x4xf32>
    %cst_74 = arith.constant 9.99999974E-6 : f32
    %60 = vector.broadcast %cst_74 : f32 to vector<1x4xf32>
    %61 = arith.addf %57, %60 : vector<1x4xf32>
    %62 = math.rsqrt %61 : vector<1x4xf32>
    %63 = vector.broadcast %62 : vector<1x4xf32> to vector<256x4xf32>
    %64 = arith.mulf %59, %63 : vector<256x4xf32>
    %c0_75 = arith.constant 0 : index
    %c0_76 = arith.constant 0 : index
    %65 = vector.load %arg4[%c0_75, %c0_76] : memref<1x4xf32, #tpu.memory_space<vmem>>, vector<1x4xf32>
    %66 = vector.broadcast %65 : vector<1x4xf32> to vector<256x4xf32>
    %67 = arith.mulf %64, %66 : vector<256x4xf32>
    %c0_77 = arith.constant 0 : index
    %c0_78 = arith.constant 0 : index
    %68 = vector.load %arg5[%c0_77, %c0_78] : memref<1x4xf32, #tpu.memory_space<vmem>>, vector<1x4xf32>
    %69 = vector.broadcast %68 : vector<1x4xf32> to vector<256x4xf32>
    %70 = arith.addf %67, %69 : vector<256x4xf32>
    %cst_79 = arith.constant 0.000000e+00 : f32
    %71 = vector.broadcast %cst_79 : f32 to vector<256x4xf32>
    %72 = arith.maximumf %70, %71 : vector<256x4xf32>
    %73 = vector.extract_strided_slice %72 {offsets = [0, 0], sizes = [16, 4], strides = [1, 1]} : vector<256x4xf32> to vector<16x4xf32>
    %c1_80 = arith.constant 1 : index
    %c1_81 = arith.constant 1 : index
    %c0_82 = arith.constant 0 : index
    %74 = vector.load %arg11[%c1_80, %c1_81, %c0_82] : memref<18x18x4xf32, #tpu.memory_space<vmem>>, vector<1x16x4xf32>
    %75 = vector.shape_cast %74 : vector<1x16x4xf32> to vector<16x4xf32>
    %76 = vector.shape_cast %73 : vector<16x4xf32> to vector<1x16x4xf32>
    tpu.vector_store %arg11[%c1_80, %c1_81, %c0_82], %76 {strides = array<i32>} : memref<18x18x4xf32, #tpu.memory_space<vmem>>, vector<1x16x4xf32>,
    %77 = vector.extract_strided_slice %72 {offsets = [16, 0], sizes = [16, 4], strides = [1, 1]} : vector<256x4xf32> to vector<16x4xf32>
    %c2_83 = arith.constant 2 : index
    %c1_84 = arith.constant 1 : index
    %c0_85 = arith.constant 0 : index
    %78 = vector.load %arg11[%c2_83, %c1_84, %c0_85] : memref<18x18x4xf32, #tpu.memory_space<vmem>>, vector<1x16x4xf32>
    %79 = vector.shape_cast %78 : vector<1x16x4xf32> to vector<16x4xf32>
    %80 = vector.shape_cast %77 : vector<16x4xf32> to vector<1x16x4xf32>
    tpu.vector_store %arg11[%c2_83, %c1_84, %c0_85], %80 {strides = array<i32>} : memref<18x18x4xf32, #tpu.memory_space<vmem>>, vector<1x16x4xf32>,
    %81 = vector.extract_strided_slice %72 {offsets = [32, 0], sizes = [16, 4], strides = [1, 1]} : vector<256x4xf32> to vector<16x4xf32>
    %c3 = arith.constant 3 : index
    %c1_86 = arith.constant 1 : index
    %c0_87 = arith.constant 0 : index
    %82 = vector.load %arg11[%c3, %c1_86, %c0_87] : memref<18x18x4xf32, #tpu.memory_space<vmem>>, vector<1x16x4xf32>
    %83 = vector.shape_cast %82 : vector<1x16x4xf32> to vector<16x4xf32>
    %84 = vector.shape_cast %81 : vector<16x4xf32> to vector<1x16x4xf32>
    tpu.vector_store %arg11[%c3, %c1_86, %c0_87], %84 {strides = array<i32>} : memref<18x18x4xf32, #tpu.memory_space<vmem>>, vector<1x16x4xf32>,
    %85 = vector.extract_strided_slice %72 {offsets = [48, 0], sizes = [16, 4], strides = [1, 1]} : vector<256x4xf32> to vector<16x4xf32>
    %c4_88 = arith.constant 4 : index
    %c1_89 = arith.constant 1 : index
    %c0_90 = arith.constant 0 : index
    %86 = vector.load %arg11[%c4_88, %c1_89, %c0_90] : memref<18x18x4xf32, #tpu.memory_space<vmem>>, vector<1x16x4xf32>
    %87 = vector.shape_cast %86 : vector<1x16x4xf32> to vector<16x4xf32>
    %88 = vector.shape_cast %85 : vector<16x4xf32> to vector<1x16x4xf32>
    tpu.vector_store %arg11[%c4_88, %c1_89, %c0_90], %88 {strides = array<i32>} : memref<18x18x4xf32, #tpu.memory_space<vmem>>, vector<1x16x4xf32>,
    %89 = vector.extract_strided_slice %72 {offsets = [64, 0], sizes = [16, 4], strides = [1, 1]} : vector<256x4xf32> to vector<16x4xf32>
    %c5 = arith.constant 5 : index
    %c1_91 = arith.constant 1 : index
    %c0_92 = arith.constant 0 : index
    %90 = vector.load %arg11[%c5, %c1_91, %c0_92] : memref<18x18x4xf32, #tpu.memory_space<vmem>>, vector<1x16x4xf32>
    %91 = vector.shape_cast %90 : vector<1x16x4xf32> to vector<16x4xf32>
    %92 = vector.shape_cast %89 : vector<16x4xf32> to vector<1x16x4xf32>
    tpu.vector_store %arg11[%c5, %c1_91, %c0_92], %92 {strides = array<i32>} : memref<18x18x4xf32, #tpu.memory_space<vmem>>, vector<1x16x4xf32>,
    %93 = vector.extract_strided_slice %72 {offsets = [80, 0], sizes = [16, 4], strides = [1, 1]} : vector<256x4xf32> to vector<16x4xf32>
    %c6 = arith.constant 6 : index
    %c1_93 = arith.constant 1 : index
    %c0_94 = arith.constant 0 : index
    %94 = vector.load %arg11[%c6, %c1_93, %c0_94] : memref<18x18x4xf32, #tpu.memory_space<vmem>>, vector<1x16x4xf32>
    %95 = vector.shape_cast %94 : vector<1x16x4xf32> to vector<16x4xf32>
    %96 = vector.shape_cast %93 : vector<16x4xf32> to vector<1x16x4xf32>
    tpu.vector_store %arg11[%c6, %c1_93, %c0_94], %96 {strides = array<i32>} : memref<18x18x4xf32, #tpu.memory_space<vmem>>, vector<1x16x4xf32>,
    %97 = vector.extract_strided_slice %72 {offsets = [96, 0], sizes = [16, 4], strides = [1, 1]} : vector<256x4xf32> to vector<16x4xf32>
    %c7 = arith.constant 7 : index
    %c1_95 = arith.constant 1 : index
    %c0_96 = arith.constant 0 : index
    %98 = vector.load %arg11[%c7, %c1_95, %c0_96] : memref<18x18x4xf32, #tpu.memory_space<vmem>>, vector<1x16x4xf32>
    %99 = vector.shape_cast %98 : vector<1x16x4xf32> to vector<16x4xf32>
    %100 = vector.shape_cast %97 : vector<16x4xf32> to vector<1x16x4xf32>
    tpu.vector_store %arg11[%c7, %c1_95, %c0_96], %100 {strides = array<i32>} : memref<18x18x4xf32, #tpu.memory_space<vmem>>, vector<1x16x4xf32>,
    %101 = vector.extract_strided_slice %72 {offsets = [112, 0], sizes = [16, 4], strides = [1, 1]} : vector<256x4xf32> to vector<16x4xf32>
    %c8_97 = arith.constant 8 : index
    %c1_98 = arith.constant 1 : index
    %c0_99 = arith.constant 0 : index
    %102 = vector.load %arg11[%c8_97, %c1_98, %c0_99] : memref<18x18x4xf32, #tpu.memory_space<vmem>>, vector<1x16x4xf32>
    %103 = vector.shape_cast %102 : vector<1x16x4xf32> to vector<16x4xf32>
    %104 = vector.shape_cast %101 : vector<16x4xf32> to vector<1x16x4xf32>
    tpu.vector_store %arg11[%c8_97, %c1_98, %c0_99], %104 {strides = array<i32>} : memref<18x18x4xf32, #tpu.memory_space<vmem>>, vector<1x16x4xf32>,
    %105 = vector.extract_strided_slice %72 {offsets = [128, 0], sizes = [16, 4], strides = [1, 1]} : vector<256x4xf32> to vector<16x4xf32>
    %c9 = arith.constant 9 : index
    %c1_100 = arith.constant 1 : index
    %c0_101 = arith.constant 0 : index
    %106 = vector.load %arg11[%c9, %c1_100, %c0_101] : memref<18x18x4xf32, #tpu.memory_space<vmem>>, vector<1x16x4xf32>
    %107 = vector.shape_cast %106 : vector<1x16x4xf32> to vector<16x4xf32>
    %108 = vector.shape_cast %105 : vector<16x4xf32> to vector<1x16x4xf32>
    tpu.vector_store %arg11[%c9, %c1_100, %c0_101], %108 {strides = array<i32>} : memref<18x18x4xf32, #tpu.memory_space<vmem>>, vector<1x16x4xf32>,
    %109 = vector.extract_strided_slice %72 {offsets = [144, 0], sizes = [16, 4], strides = [1, 1]} : vector<256x4xf32> to vector<16x4xf32>
    %c10 = arith.constant 10 : index
    %c1_102 = arith.constant 1 : index
    %c0_103 = arith.constant 0 : index
    %110 = vector.load %arg11[%c10, %c1_102, %c0_103] : memref<18x18x4xf32, #tpu.memory_space<vmem>>, vector<1x16x4xf32>
    %111 = vector.shape_cast %110 : vector<1x16x4xf32> to vector<16x4xf32>
    %112 = vector.shape_cast %109 : vector<16x4xf32> to vector<1x16x4xf32>
    tpu.vector_store %arg11[%c10, %c1_102, %c0_103], %112 {strides = array<i32>} : memref<18x18x4xf32, #tpu.memory_space<vmem>>, vector<1x16x4xf32>,
    %113 = vector.extract_strided_slice %72 {offsets = [160, 0], sizes = [16, 4], strides = [1, 1]} : vector<256x4xf32> to vector<16x4xf32>
    %c11 = arith.constant 11 : index
    %c1_104 = arith.constant 1 : index
    %c0_105 = arith.constant 0 : index
    %114 = vector.load %arg11[%c11, %c1_104, %c0_105] : memref<18x18x4xf32, #tpu.memory_space<vmem>>, vector<1x16x4xf32>
    %115 = vector.shape_cast %114 : vector<1x16x4xf32> to vector<16x4xf32>
    %116 = vector.shape_cast %113 : vector<16x4xf32> to vector<1x16x4xf32>
    tpu.vector_store %arg11[%c11, %c1_104, %c0_105], %116 {strides = array<i32>} : memref<18x18x4xf32, #tpu.memory_space<vmem>>, vector<1x16x4xf32>,
    %117 = vector.extract_strided_slice %72 {offsets = [176, 0], sizes = [16, 4], strides = [1, 1]} : vector<256x4xf32> to vector<16x4xf32>
    %c12_106 = arith.constant 12 : index
    %c1_107 = arith.constant 1 : index
    %c0_108 = arith.constant 0 : index
    %118 = vector.load %arg11[%c12_106, %c1_107, %c0_108] : memref<18x18x4xf32, #tpu.memory_space<vmem>>, vector<1x16x4xf32>
    %119 = vector.shape_cast %118 : vector<1x16x4xf32> to vector<16x4xf32>
    %120 = vector.shape_cast %117 : vector<16x4xf32> to vector<1x16x4xf32>
    tpu.vector_store %arg11[%c12_106, %c1_107, %c0_108], %120 {strides = array<i32>} : memref<18x18x4xf32, #tpu.memory_space<vmem>>, vector<1x16x4xf32>,
    %121 = vector.extract_strided_slice %72 {offsets = [192, 0], sizes = [16, 4], strides = [1, 1]} : vector<256x4xf32> to vector<16x4xf32>
    %c13 = arith.constant 13 : index
    %c1_109 = arith.constant 1 : index
    %c0_110 = arith.constant 0 : index
    %122 = vector.load %arg11[%c13, %c1_109, %c0_110] : memref<18x18x4xf32, #tpu.memory_space<vmem>>, vector<1x16x4xf32>
    %123 = vector.shape_cast %122 : vector<1x16x4xf32> to vector<16x4xf32>
    %124 = vector.shape_cast %121 : vector<16x4xf32> to vector<1x16x4xf32>
    tpu.vector_store %arg11[%c13, %c1_109, %c0_110], %124 {strides = array<i32>} : memref<18x18x4xf32, #tpu.memory_space<vmem>>, vector<1x16x4xf32>,
    %125 = vector.extract_strided_slice %72 {offsets = [208, 0], sizes = [16, 4], strides = [1, 1]} : vector<256x4xf32> to vector<16x4xf32>
    %c14 = arith.constant 14 : index
    %c1_111 = arith.constant 1 : index
    %c0_112 = arith.constant 0 : index
    %126 = vector.load %arg11[%c14, %c1_111, %c0_112] : memref<18x18x4xf32, #tpu.memory_space<vmem>>, vector<1x16x4xf32>
    %127 = vector.shape_cast %126 : vector<1x16x4xf32> to vector<16x4xf32>
    %128 = vector.shape_cast %125 : vector<16x4xf32> to vector<1x16x4xf32>
    tpu.vector_store %arg11[%c14, %c1_111, %c0_112], %128 {strides = array<i32>} : memref<18x18x4xf32, #tpu.memory_space<vmem>>, vector<1x16x4xf32>,
    %129 = vector.extract_strided_slice %72 {offsets = [224, 0], sizes = [16, 4], strides = [1, 1]} : vector<256x4xf32> to vector<16x4xf32>
    %c15_113 = arith.constant 15 : index
    %c1_114 = arith.constant 1 : index
    %c0_115 = arith.constant 0 : index
    %130 = vector.load %arg11[%c15_113, %c1_114, %c0_115] : memref<18x18x4xf32, #tpu.memory_space<vmem>>, vector<1x16x4xf32>
    %131 = vector.shape_cast %130 : vector<1x16x4xf32> to vector<16x4xf32>
    %132 = vector.shape_cast %129 : vector<16x4xf32> to vector<1x16x4xf32>
    tpu.vector_store %arg11[%c15_113, %c1_114, %c0_115], %132 {strides = array<i32>} : memref<18x18x4xf32, #tpu.memory_space<vmem>>, vector<1x16x4xf32>,
    %133 = vector.extract_strided_slice %72 {offsets = [240, 0], sizes = [16, 4], strides = [1, 1]} : vector<256x4xf32> to vector<16x4xf32>
    %c16_116 = arith.constant 16 : index
    %c1_117 = arith.constant 1 : index
    %c0_118 = arith.constant 0 : index
    %134 = vector.load %arg11[%c16_116, %c1_117, %c0_118] : memref<18x18x4xf32, #tpu.memory_space<vmem>>, vector<1x16x4xf32>
    %135 = vector.shape_cast %134 : vector<1x16x4xf32> to vector<16x4xf32>
    %136 = vector.shape_cast %133 : vector<16x4xf32> to vector<1x16x4xf32>
    tpu.vector_store %arg11[%c16_116, %c1_117, %c0_118], %136 {strides = array<i32>} : memref<18x18x4xf32, #tpu.memory_space<vmem>>, vector<1x16x4xf32>,
    %c2_119 = arith.constant 2 : index
    %c1_120 = arith.constant 1 : index
    %c0_121 = arith.constant 0 : index
    %137 = vector.load %arg11[%c2_119, %c1_120, %c0_121] : memref<18x18x4xf32, #tpu.memory_space<vmem>>, vector<1x16x4xf32>
    %c0_122 = arith.constant 0 : index
    %c1_123 = arith.constant 1 : index
    %c0_124 = arith.constant 0 : index
    %138 = vector.load %arg11[%c0_122, %c1_123, %c0_124] : memref<18x18x4xf32, #tpu.memory_space<vmem>>, vector<1x16x4xf32>
    tpu.vector_store %arg11[%c0_122, %c1_123, %c0_124], %137 {strides = array<i32>} : memref<18x18x4xf32, #tpu.memory_space<vmem>>, vector<1x16x4xf32>,
    %c15_125 = arith.constant 15 : index
    %c1_126 = arith.constant 1 : index
    %c0_127 = arith.constant 0 : index
    %139 = vector.load %arg11[%c15_125, %c1_126, %c0_127] : memref<18x18x4xf32, #tpu.memory_space<vmem>>, vector<1x16x4xf32>
    %c17_128 = arith.constant 17 : index
    %c1_129 = arith.constant 1 : index
    %c0_130 = arith.constant 0 : index
    %140 = vector.load %arg11[%c17_128, %c1_129, %c0_130] : memref<18x18x4xf32, #tpu.memory_space<vmem>>, vector<1x16x4xf32>
    tpu.vector_store %arg11[%c17_128, %c1_129, %c0_130], %139 {strides = array<i32>} : memref<18x18x4xf32, #tpu.memory_space<vmem>>, vector<1x16x4xf32>,
    %c0_131 = arith.constant 0 : index
    %c2_132 = arith.constant 2 : index
    %c0_133 = arith.constant 0 : index
    %141 = vector.load %arg11[%c0_131, %c2_132, %c0_133] : memref<18x18x4xf32, #tpu.memory_space<vmem>>, vector<18x1x4xf32>
    %c0_134 = arith.constant 0 : index
    %c0_135 = arith.constant 0 : index
    %c0_136 = arith.constant 0 : index
    %142 = vector.load %arg11[%c0_134, %c0_135, %c0_136] : memref<18x18x4xf32, #tpu.memory_space<vmem>>, vector<18x1x4xf32>
    tpu.vector_store %arg11[%c0_134, %c0_135, %c0_136], %141 {strides = array<i32>} : memref<18x18x4xf32, #tpu.memory_space<vmem>>, vector<18x1x4xf32>,
    %c0_137 = arith.constant 0 : index
    %c15_138 = arith.constant 15 : index
    %c0_139 = arith.constant 0 : index
    %143 = vector.load %arg11[%c0_137, %c15_138, %c0_139] : memref<18x18x4xf32, #tpu.memory_space<vmem>>, vector<18x1x4xf32>
    %c0_140 = arith.constant 0 : index
    %c17_141 = arith.constant 17 : index
    %c0_142 = arith.constant 0 : index
    %144 = vector.load %arg11[%c0_140, %c17_141, %c0_142] : memref<18x18x4xf32, #tpu.memory_space<vmem>>, vector<18x1x4xf32>
    tpu.vector_store %arg11[%c0_140, %c17_141, %c0_142], %143 {strides = array<i32>} : memref<18x18x4xf32, #tpu.memory_space<vmem>>, vector<18x1x4xf32>,
    %c0_143 = arith.constant 0 : index
    %c0_144 = arith.constant 0 : index
    %c0_145 = arith.constant 0 : index
    %145 = vector.load %arg11[%c0_143, %c0_144, %c0_145] : memref<18x18x4xf32, #tpu.memory_space<vmem>>, vector<16x16x4xf32>
    %146 = vector.shape_cast %145 : vector<16x16x4xf32> to vector<256x4xf32>
    %c0_146 = arith.constant 0 : index
    %c0_147 = arith.constant 0 : index
    %147 = vector.load %arg12[%c0_146, %c0_147] : memref<256x36xf32, #tpu.memory_space<vmem>>, vector<256x4xf32>
    tpu.vector_store %arg12[%c0_146, %c0_147], %146 {strides = array<i32>} : memref<256x36xf32, #tpu.memory_space<vmem>>, vector<256x4xf32>,
    %c0_148 = arith.constant 0 : index
    %c1_149 = arith.constant 1 : index
    %c0_150 = arith.constant 0 : index
    %148 = vector.load %arg11[%c0_148, %c1_149, %c0_150] : memref<18x18x4xf32, #tpu.memory_space<vmem>>, vector<16x16x4xf32>
    %149 = vector.shape_cast %148 : vector<16x16x4xf32> to vector<256x4xf32>
    %c0_151 = arith.constant 0 : index
    %c4_152 = arith.constant 4 : index
    %150 = vector.load %arg12[%c0_151, %c4_152] : memref<256x36xf32, #tpu.memory_space<vmem>>, vector<256x4xf32>
    tpu.vector_store %arg12[%c0_151, %c4_152], %149 {strides = array<i32>} : memref<256x36xf32, #tpu.memory_space<vmem>>, vector<256x4xf32>,
    %c0_153 = arith.constant 0 : index
    %c2_154 = arith.constant 2 : index
    %c0_155 = arith.constant 0 : index
    %151 = vector.load %arg11[%c0_153, %c2_154, %c0_155] : memref<18x18x4xf32, #tpu.memory_space<vmem>>, vector<16x16x4xf32>
    %152 = vector.shape_cast %151 : vector<16x16x4xf32> to vector<256x4xf32>
    %c0_156 = arith.constant 0 : index
    %c8_157 = arith.constant 8 : index
    %153 = vector.load %arg12[%c0_156, %c8_157] : memref<256x36xf32, #tpu.memory_space<vmem>>, vector<256x4xf32>
    tpu.vector_store %arg12[%c0_156, %c8_157], %152 {strides = array<i32>} : memref<256x36xf32, #tpu.memory_space<vmem>>, vector<256x4xf32>,
    %c1_158 = arith.constant 1 : index
    %c0_159 = arith.constant 0 : index
    %c0_160 = arith.constant 0 : index
    %154 = vector.load %arg11[%c1_158, %c0_159, %c0_160] : memref<18x18x4xf32, #tpu.memory_space<vmem>>, vector<16x16x4xf32>
    %155 = vector.shape_cast %154 : vector<16x16x4xf32> to vector<256x4xf32>
    %c0_161 = arith.constant 0 : index
    %c12_162 = arith.constant 12 : index
    %156 = vector.load %arg12[%c0_161, %c12_162] : memref<256x36xf32, #tpu.memory_space<vmem>>, vector<256x4xf32>
    tpu.vector_store %arg12[%c0_161, %c12_162], %155 {strides = array<i32>} : memref<256x36xf32, #tpu.memory_space<vmem>>, vector<256x4xf32>,
    %c1_163 = arith.constant 1 : index
    %c1_164 = arith.constant 1 : index
    %c0_165 = arith.constant 0 : index
    %157 = vector.load %arg11[%c1_163, %c1_164, %c0_165] : memref<18x18x4xf32, #tpu.memory_space<vmem>>, vector<16x16x4xf32>
    %158 = vector.shape_cast %157 : vector<16x16x4xf32> to vector<256x4xf32>
    %c0_166 = arith.constant 0 : index
    %c16_167 = arith.constant 16 : index
    %159 = vector.load %arg12[%c0_166, %c16_167] : memref<256x36xf32, #tpu.memory_space<vmem>>, vector<256x4xf32>
    tpu.vector_store %arg12[%c0_166, %c16_167], %158 {strides = array<i32>} : memref<256x36xf32, #tpu.memory_space<vmem>>, vector<256x4xf32>,
    %c1_168 = arith.constant 1 : index
    %c2_169 = arith.constant 2 : index
    %c0_170 = arith.constant 0 : index
    %160 = vector.load %arg11[%c1_168, %c2_169, %c0_170] : memref<18x18x4xf32, #tpu.memory_space<vmem>>, vector<16x16x4xf32>
    %161 = vector.shape_cast %160 : vector<16x16x4xf32> to vector<256x4xf32>
    %c0_171 = arith.constant 0 : index
    %c20_172 = arith.constant 20 : index
    %162 = vector.load %arg12[%c0_171, %c20_172] : memref<256x36xf32, #tpu.memory_space<vmem>>, vector<256x4xf32>
    tpu.vector_store %arg12[%c0_171, %c20_172], %161 {strides = array<i32>} : memref<256x36xf32, #tpu.memory_space<vmem>>, vector<256x4xf32>,
    %c2_173 = arith.constant 2 : index
    %c0_174 = arith.constant 0 : index
    %c0_175 = arith.constant 0 : index
    %163 = vector.load %arg11[%c2_173, %c0_174, %c0_175] : memref<18x18x4xf32, #tpu.memory_space<vmem>>, vector<16x16x4xf32>
    %164 = vector.shape_cast %163 : vector<16x16x4xf32> to vector<256x4xf32>
    %c0_176 = arith.constant 0 : index
    %c24_177 = arith.constant 24 : index
    %165 = vector.load %arg12[%c0_176, %c24_177] : memref<256x36xf32, #tpu.memory_space<vmem>>, vector<256x4xf32>
    tpu.vector_store %arg12[%c0_176, %c24_177], %164 {strides = array<i32>} : memref<256x36xf32, #tpu.memory_space<vmem>>, vector<256x4xf32>,
    %c2_178 = arith.constant 2 : index
    %c1_179 = arith.constant 1 : index
    %c0_180 = arith.constant 0 : index
    %166 = vector.load %arg11[%c2_178, %c1_179, %c0_180] : memref<18x18x4xf32, #tpu.memory_space<vmem>>, vector<16x16x4xf32>
    %167 = vector.shape_cast %166 : vector<16x16x4xf32> to vector<256x4xf32>
    %c0_181 = arith.constant 0 : index
    %c28_182 = arith.constant 28 : index
    %168 = vector.load %arg12[%c0_181, %c28_182] : memref<256x36xf32, #tpu.memory_space<vmem>>, vector<256x4xf32>
    tpu.vector_store %arg12[%c0_181, %c28_182], %167 {strides = array<i32>} : memref<256x36xf32, #tpu.memory_space<vmem>>, vector<256x4xf32>,
    %c2_183 = arith.constant 2 : index
    %c2_184 = arith.constant 2 : index
    %c0_185 = arith.constant 0 : index
    %169 = vector.load %arg11[%c2_183, %c2_184, %c0_185] : memref<18x18x4xf32, #tpu.memory_space<vmem>>, vector<16x16x4xf32>
    %170 = vector.shape_cast %169 : vector<16x16x4xf32> to vector<256x4xf32>
    %c0_186 = arith.constant 0 : index
    %c32_187 = arith.constant 32 : index
    %171 = vector.load %arg12[%c0_186, %c32_187] : memref<256x36xf32, #tpu.memory_space<vmem>>, vector<256x4xf32>
    tpu.vector_store %arg12[%c0_186, %c32_187], %170 {strides = array<i32>} : memref<256x36xf32, #tpu.memory_space<vmem>>, vector<256x4xf32>,
    %c0_188 = arith.constant 0 : index
    %c0_189 = arith.constant 0 : index
    %172 = vector.load %arg12[%c0_188, %c0_189] : memref<256x36xf32, #tpu.memory_space<vmem>>, vector<256x36xf32>
    %c0_190 = arith.constant 0 : index
    %c0_191 = arith.constant 0 : index
    %173 = vector.load %arg6[%c0_190, %c0_191] : memref<36x4xf32, #tpu.memory_space<vmem>>, vector<36x4xf32>
    %cst_192 = arith.constant dense<0.000000e+00> : vector<256x4xf32>
    %174 = tpu.matmul %172, %173, %cst_192 {dimension_numbers = #tpu.dot_dimension_numbers<[1], [0], [0], [1], [0, 0, 1, 1], [], []>} : vector<256x36xf32>, vector<36x4xf32>, vector<256x4xf32> -> vector<256x4xf32>
    %c0_193 = arith.constant 0 : index
    %c0_194 = arith.constant 0 : index
    %175 = vector.load %arg7[%c0_193, %c0_194] : memref<1x4xf32, #tpu.memory_space<vmem>>, vector<1x4xf32>
    %176 = vector.broadcast %175 : vector<1x4xf32> to vector<256x4xf32>
    %177 = arith.addf %174, %176 : vector<256x4xf32>
    %cst_195 = arith.constant dense<0.000000e+00> : vector<4xf32>
    %178 = vector.multi_reduction <add>, %177, %cst_195 [0] : vector<256x4xf32> to vector<4xf32>
    %179 = vector.shape_cast %178 : vector<4xf32> to vector<1x4xf32>
    %180 = arith.mulf %177, %177 : vector<256x4xf32>
    %cst_196 = arith.constant dense<0.000000e+00> : vector<4xf32>
    %181 = vector.multi_reduction <add>, %180, %cst_196 [0] : vector<256x4xf32> to vector<4xf32>
    %182 = vector.shape_cast %181 : vector<4xf32> to vector<1x4xf32>
    %cst_197 = arith.constant 3.906250e-03 : f32
    %183 = vector.broadcast %cst_197 : f32 to vector<1x4xf32>
    %184 = arith.mulf %179, %183 : vector<1x4xf32>
    %cst_198 = arith.constant 3.906250e-03 : f32
    %185 = vector.broadcast %cst_198 : f32 to vector<1x4xf32>
    %186 = arith.mulf %182, %185 : vector<1x4xf32>
    %187 = arith.mulf %184, %184 : vector<1x4xf32>
    %188 = arith.subf %186, %187 : vector<1x4xf32>
    %cst_199 = arith.constant 0.000000e+00 : f32
    %189 = vector.broadcast %cst_199 : f32 to vector<1x4xf32>
    %190 = arith.maximumf %188, %189 : vector<1x4xf32>
    %191 = vector.broadcast %184 : vector<1x4xf32> to vector<256x4xf32>
    %192 = arith.subf %177, %191 : vector<256x4xf32>
    %cst_200 = arith.constant 9.99999974E-6 : f32
    %193 = vector.broadcast %cst_200 : f32 to vector<1x4xf32>
    %194 = arith.addf %190, %193 : vector<1x4xf32>
    %195 = math.rsqrt %194 : vector<1x4xf32>
    %196 = vector.broadcast %195 : vector<1x4xf32> to vector<256x4xf32>
    %197 = arith.mulf %192, %196 : vector<256x4xf32>
    %c0_201 = arith.constant 0 : index
    %c0_202 = arith.constant 0 : index
    %198 = vector.load %arg8[%c0_201, %c0_202] : memref<1x4xf32, #tpu.memory_space<vmem>>, vector<1x4xf32>
    %199 = vector.broadcast %198 : vector<1x4xf32> to vector<256x4xf32>
    %200 = arith.mulf %197, %199 : vector<256x4xf32>
    %c0_203 = arith.constant 0 : index
    %c0_204 = arith.constant 0 : index
    %201 = vector.load %arg9[%c0_203, %c0_204] : memref<1x4xf32, #tpu.memory_space<vmem>>, vector<1x4xf32>
    %202 = vector.broadcast %201 : vector<1x4xf32> to vector<256x4xf32>
    %203 = arith.addf %200, %202 : vector<256x4xf32>
    %204 = arith.addf %203, %2 : vector<256x4xf32>
    %cst_205 = arith.constant 0.000000e+00 : f32
    %205 = vector.broadcast %cst_205 : f32 to vector<256x4xf32>
    %206 = arith.maximumf %204, %205 : vector<256x4xf32>
    %c0_206 = arith.constant 0 : index
    %c0_207 = arith.constant 0 : index
    %c0_208 = arith.constant 0 : index
    %207 = vector.load %arg10[%c0_206, %c0_207, %c0_208] : memref<1x256x4xf32, #tpu.memory_space<vmem>>, vector<1x256x4xf32>
    %208 = vector.shape_cast %207 : vector<1x256x4xf32> to vector<256x4xf32>
    %209 = vector.shape_cast %206 : vector<256x4xf32> to vector<1x256x4xf32>
    tpu.vector_store %arg10[%c0_206, %c0_207, %c0_208], %209 {strides = array<i32>} : memref<1x256x4xf32, #tpu.memory_space<vmem>>, vector<1x256x4xf32>,
    return
  }
  func.func @transform_0(%arg0: i32) -> (i32, i32, i32, i32) {
    %c0_i32 = arith.constant 0 : i32
    %c0_i32_0 = arith.constant 0 : i32
    %c0_i32_1 = arith.constant 0 : i32
    %c0_i32_2 = arith.constant 0 : i32
    return %arg0, %c0_i32, %c0_i32_0, %c0_i32_1 : i32, i32, i32, i32
  }
  func.func @transform_1(%arg0: i32) -> (i32, i32) {
    %c0_i32 = arith.constant 0 : i32
    %c0_i32_0 = arith.constant 0 : i32
    %c0_i32_1 = arith.constant 0 : i32
    return %c0_i32, %c0_i32_0 : i32, i32
  }
  func.func @transform_2(%arg0: i32) -> (i32, i32) {
    %c0_i32 = arith.constant 0 : i32
    %c0_i32_0 = arith.constant 0 : i32
    %c0_i32_1 = arith.constant 0 : i32
    return %c0_i32, %c0_i32_0 : i32, i32
  }
  func.func @transform_3(%arg0: i32) -> (i32, i32) {
    %c0_i32 = arith.constant 0 : i32
    %c0_i32_0 = arith.constant 0 : i32
    %c0_i32_1 = arith.constant 0 : i32
    return %c0_i32, %c0_i32_0 : i32, i32
  }
  func.func @transform_4(%arg0: i32) -> (i32, i32) {
    %c0_i32 = arith.constant 0 : i32
    %c0_i32_0 = arith.constant 0 : i32
    %c0_i32_1 = arith.constant 0 : i32
    return %c0_i32, %c0_i32_0 : i32, i32
  }
  func.func @transform_5(%arg0: i32) -> (i32, i32) {
    %c0_i32 = arith.constant 0 : i32
    %c0_i32_0 = arith.constant 0 : i32
    %c0_i32_1 = arith.constant 0 : i32
    return %c0_i32, %c0_i32_0 : i32, i32
  }
  func.func @transform_6(%arg0: i32) -> (i32, i32) {
    %c0_i32 = arith.constant 0 : i32
    %c0_i32_0 = arith.constant 0 : i32
    %c0_i32_1 = arith.constant 0 : i32
    return %c0_i32, %c0_i32_0 : i32, i32
  }
  func.func @transform_7(%arg0: i32) -> (i32, i32) {
    %c0_i32 = arith.constant 0 : i32
    %c0_i32_0 = arith.constant 0 : i32
    %c0_i32_1 = arith.constant 0 : i32
    return %c0_i32, %c0_i32_0 : i32, i32
  }
  func.func @transform_8(%arg0: i32) -> (i32, i32) {
    %c0_i32 = arith.constant 0 : i32
    %c0_i32_0 = arith.constant 0 : i32
    %c0_i32_1 = arith.constant 0 : i32
    return %c0_i32, %c0_i32_0 : i32, i32
  }
  func.func @transform_9(%arg0: i32) -> (i32, i32, i32) {
    %c0_i32 = arith.constant 0 : i32
    %c0_i32_0 = arith.constant 0 : i32
    %c0_i32_1 = arith.constant 0 : i32
    return %arg0, %c0_i32, %c0_i32_0 : i32, i32, i32
  }
}

</mosaic_0001>

<bundles_post_ra>
// kernel: residual_block_forward.1
= control target key start
LH: loop header
LB: loop body
LE: loop exit
PB: predicated region body
PF: predicated region fallthrough
CT: control target
= control target key end

     0   :  { %s5752_s30 = smov 0   ;;  %s8798_s0 = inlined_call_operand.vmem [shape: f32[2,16,16,4], index: 0, kind: input, shape index: {}]   ;;  %s8799_s1 = inlined_call_operand.vmem [shape: f32[36,4], index: 1, kind: input, shape index: {}]   ;;  %s8800_s2 = inlined_call_operand.vmem [shape: f32[1,4], index: 2, kind: input, shape index: {}]   ;;  %s8801_s3 = inlined_call_operand.vmem [shape: f32[1,4], index: 3, kind: input, shape index: {}]   ;;  %s8802_s4 = inlined_call_operand.vmem [shape: f32[1,4], index: 4, kind: input, shape index: {}]   ;;  %s8803_s5 = inlined_call_operand.vmem [shape: f32[36,4], index: 5, kind: input, shape index: {}]   ;;  %s8804_s6 = inlined_call_operand.vmem [shape: f32[1,4], index: 6, kind: input, shape index: {}]   ;;  %s8805_s7 = inlined_call_operand.vmem [shape: f32[1,4], index: 7, kind: input, shape index: {}]   ;;  %s8806_s8 = inlined_call_operand.vmem [shape: f32[1,4], index: 8, kind: input, shape index: {}]   ;;  %s8807_s9 = inlined_call_operand.vmem [shape: f32[2,256,4], index: 9, kind: output, shape index: {}]  }
   0x1 LB: > { %s5375_s10 = sadd.s32 4294967295, %s5692_s30   ;;  %p5379_p0 = scmp.ge.s32.totalorder %s5692_s30, 1  ;;  %s5692_s30 = sphi %s5752_s30, %s19_s30  }
   0x2   : > { %p287_p1 = scmp.lt.s32.totalorder %s5692_s30, 3 }
   0x4   : > { %p288_p2 = pnand %p5379_p0, %p287_p1 }
   0x6   : > { %291 = sbr.rel (%p288_p2) target bundleno = 1887 (0x75f), region = 56 }
   0xd   : > { %p323_p3 = scmp.lt.s32.totalorder %s5375_s10, 1  ;;  %vm366_vm0 = vcmask 31744   ;;  %s5694_s15 = smov 4   ;;  %vm428_vm1 = vcmask 24576   ;;  %vm707_vm2 = vcmask 64544   ;;  %vm900_vm3 = vcmask 97344  }
   0xe   : > { %s5695_s16 = smov 8   ;;  %s5696_s17 = smov 12   ;;  %vm2232_vm4 = vcmask 1043456   ;;  %vm1093_vm5 = vcmask 130144   ;;  %vm1286_vm6 = vcmask 162944   ;;  %vm1479_vm7 = vcmask 195744  }
   0xf   : > { %s8905_s10 = smov (!%p323_p3, %s5375_s10), 1  ;;  %s5697_s18 = smov 16   ;;  %vm1672_vm8 = vcmask 228544   ;;  %vm1865_vm9 = vcmask 261344   ;;  %vm2058_vm10 = vcmask 294144   ;;  %vm2135_vm11 = vcmask 293888  }
  0x10   : > { %s5458_s11 = sshll.u32 %s8905_s10, 8  ;;  %s5698_s23 = smov 20  }
  0x11   : > { %s5768_s14 = scalar_lea.vmem %s8798_s0, %s5458_s11  ;;  %s5699_s28 = smov 24  }
  0x12   : > { %v5771_v0 = vld [vmem:[%s5768_s14 + $0x10] sm:$0xff]  ;;  %v5774_v1 = vld [vmem:[%s5768_s14] sm:$0xff]  ;;  %v5786_v3 = vld [vmem:[%s5768_s14 + $0x8] sm:$0xff]  ;;  %s5700_s29 = smov 28  }
  0x13   : > { %8840 = vst [vmem:[#allocation4_spill] sm:$0xff] %v5771_v0  ;;  %8841 = vst [vmem:[#allocation5_spill] sm:$0xff] %v5774_v1  ;;  %v5777_v2 = vld [vmem:[%s5768_s14 + $0x20] sm:$0xff]  ;;  %v5789_v4 = vld [vmem:[%s5768_s14 + $0x30] sm:$0xff] }
  0x14   : > { %8842 = vst [vmem:[#allocation6_spill] sm:$0xff] %v5777_v2  ;;  %369 = vst.msk [vmem:[#allocation2 + $0x31] sm:$0xff] %vm366_vm0, %v5771_v0  ;;  %v5792_v5 = vld [vmem:[%s5768_s14 + $0x18] sm:$0xff]  ;;  %v5801_v6 = vld [vmem:[%s5768_s14 + $0x40] sm:$0xff] }
  0x15   : > { %367 = vst.msk [vmem:[#allocation2 + $0x19] sm:$0xff] %vm366_vm0, %v5774_v1  ;;  %371 = vst.msk [vmem:[#allocation2 + $0x49] sm:$0xff] %vm366_vm0, %v5777_v2  ;;  %v5804_v7 = vld [vmem:[%s5768_s14 + $0x28] sm:$0xff]  ;;  %v5807_v8 = vld [vmem:[%s5768_s14 + $0x38] sm:$0xff] }
  0x16   : > { %8843 = vst [vmem:[#allocation7_spill] sm:$0xff] %v5786_v3  ;;  %8844 = vst [vmem:[#allocation8_spill] sm:$0xff] %v5789_v4  ;;  %v5816_v9 = vld [vmem:[%s5768_s14 + $0x48] sm:$0xff]  ;;  %v5819_v10 = vld [vmem:[%s5768_s14 + $0x50] sm:$0xff] }
  0x17   : > { %8845 = vst [vmem:[#allocation9_spill] sm:$0xff] %v5792_v5  ;;  %368 = vst.msk [vmem:[#allocation2 + $0x21] sm:$0xff] %vm366_vm0, %v5786_v3  ;;  %v5822_v11 = vld [vmem:[%s5768_s14 + $0x58] sm:$0xff]  ;;  %v5831_v12 = vld [vmem:[%s5768_s14 + $0x60] sm:$0xff] }
  0x18   : > { %373 = vst.msk [vmem:[#allocation2 + $0x61] sm:$0xff] %vm366_vm0, %v5789_v4  ;;  %370 = vst.msk [vmem:[#allocation2 + $0x39] sm:$0xff] %vm366_vm0, %v5792_v5  ;;  %v5834_v13 = vld [vmem:[%s5768_s14 + $0x68] sm:$0xff]  ;;  %v5837_v14 = vld [vmem:[%s5768_s14 + $0x70] sm:$0xff] }
  0x19   : > { %8846 = vst [vmem:[#allocation10_spill] sm:$0xff] %v5801_v6  ;;  %8847 = vst [vmem:[#allocation11_spill] sm:$0xff] %v5804_v7  ;;  %v5846_v15 = vld [vmem:[%s5768_s14 + $0x78] sm:$0xff]  ;;  %v5849_v16 = vld [vmem:[%s5768_s14 + $0x80] sm:$0xff] }
  0x1a   : > { %8848 = vst [vmem:[#allocation12_spill] sm:$0xff] %v5807_v8  ;;  %375 = vst.msk [vmem:[#allocation2 + $0x79] sm:$0xff] %vm366_vm0, %v5801_v6  ;;  %v5852_v17 = vld [vmem:[%s5768_s14 + $0x88] sm:$0xff]  ;;  %v5861_v18 = vld [vmem:[%s5768_s14 + $0x90] sm:$0xff] }
  0x1b   : > { %372 = vst.msk [vmem:[#allocation2 + $0x51] sm:$0xff] %vm366_vm0, %v5804_v7  ;;  %374 = vst.msk [vmem:[#allocation2 + $0x69] sm:$0xff] %vm366_vm0, %v5807_v8  ;;  %v5864_v19 = vld [vmem:[%s5768_s14 + $0x98] sm:$0xff]  ;;  %v5867_v20 = vld [vmem:[%s5768_s14 + $0xa0] sm:$0xff] }
  0x1c   : > { %8849 = vst [vmem:[#allocation13_spill] sm:$0xff] %v5816_v9  ;;  %8850 = vst [vmem:[#allocation14_spill] sm:$0xff] %v5819_v10  ;;  %v5876_v21 = vld [vmem:[%s5768_s14 + $0xa8] sm:$0xff]  ;;  %v5879_v22 = vld [vmem:[%s5768_s14 + $0xb0] sm:$0xff] }
  0x1d   : > { %8851 = vst [vmem:[#allocation15_spill] sm:$0xff] %v5822_v11  ;;  %376 = vst.msk [vmem:[#allocation2 + $0x81] sm:$0xff] %vm366_vm0, %v5816_v9  ;;  %v5882_v23 = vld [vmem:[%s5768_s14 + $0xb8] sm:$0xff]  ;;  %v5902_v27 = vld [vmem:[#allocation2 + $0x49] sm:$0xff] }
  0x1e   : > { %377 = vst.msk [vmem:[#allocation2 + $0x91] sm:$0xff] %vm366_vm0, %v5819_v10  ;;  %378 = vst.msk [vmem:[#allocation2 + $0x99] sm:$0xff] %vm366_vm0, %v5822_v11  ;;  %v5884_v24 = vld [vmem:[#allocation2 + $0x31] sm:$0xff]  ;;  %v5886_v25 = vld [vmem:[#allocation2 + $0x19] sm:$0xff] }
  0x1f   : > { %8852 = vst [vmem:[#allocation16_spill] sm:$0xff] %v5831_v12  ;;  %8853 = vst [vmem:[#allocation17_spill] sm:$0xff] %v5834_v13  ;;  %619 = vrot.lane.b32.xlu0 %v5884_v24, %s5694_s15  ;;  %615 = vrot.lane.b32.xlu1 %v5886_v25, %s5694_s15  ;;  %v5898_v26 = vld [vmem:[#allocation2 + $0x39] sm:$0xff]  ;;  %v5904_v28 = vld [vmem:[#allocation2 + $0x21] sm:$0xff] }
  0x20   : > { %8854 = vst [vmem:[#allocation18_spill] sm:$0xff] %v5837_v14  ;;  %379 = vst.msk [vmem:[#allocation2 + $0xa9] sm:$0xff] %vm366_vm0, %v5831_v12  ;;  %v5912_v29 = vld [vmem:[#allocation2 + $0x61] sm:$0xff]  ;;  %v5931_v33 = vld [vmem:[%s5768_s14 + $0xd0] sm:$0xff] }
  0x21   : > { %380 = vst.msk [vmem:[#allocation2 + $0xb1] sm:$0xff] %vm366_vm0, %v5834_v13  ;;  %381 = vst.msk [vmem:[#allocation2 + $0xc1] sm:$0xff] %vm366_vm0, %v5837_v14  ;;  %v5915_v30 = vld [vmem:[%s5768_s14 + $0xc0] sm:$0xff]  ;;  %v5918_v31 = vld [vmem:[%s5768_s14 + $0xc8] sm:$0xff] }
  0x22   : > { %8855 = vst [vmem:[#allocation19_spill] sm:$0xff] %v5846_v15  ;;  %8856 = vst [vmem:[#allocation20_spill] sm:$0xff] %v5849_v16  ;;  %v5924_v32 = vld [vmem:[#allocation2 + $0x79] sm:$0xff]  ;;  %v5936_v35 = vld [vmem:[#allocation2 + $0x51] sm:$0xff] }
  0x23   : > { %8857 = vst [vmem:[#allocation21_spill] sm:$0xff] %v5852_v17  ;;  %382 = vst.msk [vmem:[#allocation2 + $0xc9] sm:$0xff] %vm366_vm0, %v5846_v15  ;;  %623 = vrot.lane.b32.xlu0 %v5902_v27, %s5694_s15  ;;  %617 = vrot.lane.b32.xlu1 %v5904_v28, %s5694_s15  ;;  %v5934_v34 = vld [vmem:[%s5768_s14 + $0xd8] sm:$0xff]  ;;  %v5943_v36 = vld [vmem:[%s5768_s14 + $0xe0] sm:$0xff] }
  0x24   : > { %383 = vst.msk [vmem:[#allocation2 + $0xd9] sm:$0xff] %vm366_vm0, %v5849_v16  ;;  %384 = vst.msk [vmem:[#allocation2 + $0xe1] sm:$0xff] %vm366_vm0, %v5852_v17  ;;  %v5946_v37 = vld [vmem:[%s5768_s14 + $0xe8] sm:$0xff]  ;;  %v448_v39 = vld [vmem:[#allocation2 + $0x27] sm:$0x1] }
  0x25   : > { %8858 = vst [vmem:[#allocation22_spill] sm:$0xff] %v5861_v18  ;;  %8859 = vst [vmem:[#allocation23_spill] sm:$0xff] %v5864_v19  ;;  %v449_v40 = vld [vmem:[#allocation2 + $0x3f] sm:$0x1]  ;;  %v450_v41 = vld [vmem:[#allocation2 + $0x57] sm:$0x1] }
  0x26   : > { %8860 = vst [vmem:[#allocation24_spill] sm:$0xff] %v5867_v20  ;;  %385 = vst.msk [vmem:[#allocation2 + $0xf1] sm:$0xff] %vm366_vm0, %v5861_v18  ;;  %v451_v42 = vld [vmem:[#allocation2 + $0x6f] sm:$0x1]  ;;  %v452_v45 = vld [vmem:[#allocation2 + $0x87] sm:$0x1] }
  0x27   : > { %386 = vst.msk [vmem:[#allocation2 + $0xf9] sm:$0xff] %vm366_vm0, %v5864_v19  ;;  %387 = vst.msk [vmem:[#allocation2 + $0x109] sm:$0xff] %vm366_vm0, %v5867_v20  ;;  %627 = vrot.lane.b32.xlu0 %v5912_v29, %s5694_s15  ;;  %621 = vrot.lane.b32.xlu1 %v5898_v26, %s5694_s15  ;;  %v5959_v44 = vld [vmem:[#allocation2 + $0x69] sm:$0xff]  ;;  %v453_v46 = vld [vmem:[#allocation2 + $0x9f] sm:$0x1] }
  0x28   : > { %8861 = vst [vmem:[#allocation25_spill] sm:$0xff] %v5876_v21  ;;  %8862 = vst [vmem:[#allocation26_spill] sm:$0xff] %v5879_v22  ;;  %v454_v47 = vld [vmem:[#allocation2 + $0xb7] sm:$0x1]  ;;  %v5969_v50 = vld [vmem:[#allocation2 + $0x81] sm:$0xff] }
  0x29   : > { %8863 = vst [vmem:[#allocation27_spill] sm:$0xff] %v5882_v23  ;;  %388 = vst.msk [vmem:[#allocation2 + $0x111] sm:$0xff] %vm366_vm0, %v5876_v21  ;;  %v5977_v53 = vld [vmem:[#allocation2 + $0x91] sm:$0xff]  ;;  %v560_v54 = vld [vmem:[#allocation2 + $0x99] sm:$0xff] }
  0x2a   : > { %389 = vst.msk [vmem:[#allocation2 + $0x121] sm:$0xff] %vm366_vm0, %v5879_v22  ;;  %390 = vst.msk [vmem:[#allocation2 + $0x129] sm:$0xff] %vm366_vm0, %v5882_v23  ;;  %v455_v48 = vld [vmem:[#allocation2 + $0xcf] sm:$0x1]  ;;  %v412_v57 = vld [vmem:[#allocation2 + $0x32] sm:$0x1] }
  0x2b   : > { %402 = vst.msk [vmem:[#allocation2 + $0x1] sm:$0xff] %vm366_vm0, %v5884_v24  ;;  %403 = vst.msk [vmem:[#allocation2 + $0x9] sm:$0xff] %vm366_vm0, %v5898_v26  ;;  %631 = vrot.lane.b32.xlu0 %v5924_v32, %s5694_s15  ;;  %625 = vrot.lane.b32.xlu1 %v5936_v35, %s5694_s15  ;;  %v456_v51 = vld [vmem:[#allocation2 + $0xe7] sm:$0x1]  ;;  %v411_v58 = vld [vmem:[#allocation2 + $0x1a] sm:$0x1] }
  0x2c   : > { %8864 = vst [vmem:[#allocation28_spill] sm:$0xff] %v5915_v30  ;;  %8865 = vst [vmem:[#allocation29_spill] sm:$0xff] %v5918_v31  ;;  %v561_v59 = vld [vmem:[#allocation2 + $0xa9] sm:$0xff]  ;;  %v562_v62 = vld [vmem:[#allocation2 + $0xb1] sm:$0xff] }
  0x2d   : > { %391 = vst.msk [vmem:[#allocation2 + $0x139] sm:$0xff] %vm366_vm0, %v5915_v30  ;;  %392 = vst.msk [vmem:[#allocation2 + $0x141] sm:$0xff] %vm366_vm0, %v5918_v31  ;;  %v413_v61 = vld [vmem:[#allocation2 + $0x4a] sm:$0x1]  ;;  %v5988_v63 = vld [vmem:[#allocation2 + $0x20] sm:$0xff] }
  0x2e   : > { %8866 = vst [vmem:[#allocation30_spill] sm:$0xff] %v5931_v33  ;;  %8867 = vst [vmem:[#allocation31_spill] sm:$0xff] %v5934_v34  ;;  %v457_v52 = vld [vmem:[#allocation2 + $0xff] sm:$0x1]  ;;  %v6196_v12 = vld [vmem:[#allocation2 + $0x92] sm:$0xff] }
  0x2f   : > { %393 = vst.msk [vmem:[#allocation2 + $0x151] sm:$0xff] %vm366_vm0, %v5931_v33  ;;  %394 = vst.msk [vmem:[#allocation2 + $0x159] sm:$0xff] %vm366_vm0, %v5934_v34  ;;  %629 = vrot.lane.b32.xlu1 %v5959_v44, %s5694_s15  ;;  %v569_v34 = vld [vmem:[#allocation2 + $0x109] sm:$0xff]  ;;  %v6143_v18 = vld [vmem:[%s5768_s14 + $0xf8] sm:$0xff] }
  0x30   : > { %8868 = vst [vmem:[#allocation32_spill] sm:$0xff] %v5943_v36  ;;  %8869 = vst [vmem:[#allocation33_spill] sm:$0xff] %v5946_v37  ;;  %v458_v55 = vld [vmem:[#allocation2 + $0x117] sm:$0x1]  ;;  %v754_v10 = vld [vmem:[#allocation2 + $0xaa] sm:$0xff] }
  0x31   : > { %395 = vst.msk [vmem:[#allocation2 + $0x169] sm:$0xff] %vm366_vm0, %v5943_v36  ;;  %396 = vst.msk [vmem:[#allocation2 + $0x171] sm:$0xff] %vm366_vm0, %v5946_v37  ;;  %v459_v56 = vld [vmem:[#allocation2 + $0x12f] sm:$0x1]  ;;  %v571_v31 = vld [vmem:[#allocation2 + $0x121] sm:$0xff] }
  0x32   : > { %v447_v38 = vld [vmem:[#allocation2 + $0xf] sm:$0x1]  ;;  %466 = vst.msk [vmem:[#allocation2 + $0x29] sm:$0x1] %vm428_vm1, %v448_v39  ;;  %467 = vst.msk [vmem:[#allocation2 + $0x41] sm:$0x1] %vm428_vm1, %v449_v40 }
  0x33   : > { %465 = vst.msk [vmem:[#allocation2 + $0x11] sm:$0x1] %vm428_vm1, %v447_v38  ;;  %v547_v43 = vld [vmem:[#allocation2 + $0x1] sm:$0xff]  ;;  %468 = vst.msk [vmem:[#allocation2 + $0x59] sm:$0x1] %vm428_vm1, %v450_v41  ;;  %v548_v49 = vld [vmem:[#allocation2 + $0x9] sm:$0xff]  ;;  %633 = vrot.lane.b32.xlu1 %v5969_v50, %s5694_s15 }
  0x34   : > { %469 = vst.msk [vmem:[#allocation2 + $0x71] sm:$0x1] %vm428_vm1, %v451_v42  ;;  %470 = vst.msk [vmem:[#allocation2 + $0x89] sm:$0x1] %vm428_vm1, %v452_v45  ;;  %611 = vrot.lane.b32.xlu0 %v547_v43, %s5694_s15  ;;  %v460_v60 = vld [vmem:[#allocation2 + $0x147] sm:$0x1] }
  0x35   : > { %471 = vst.msk [vmem:[#allocation2 + $0xa1] sm:$0x1] %vm428_vm1, %v453_v46  ;;  %472 = vst.msk [vmem:[#allocation2 + $0xb9] sm:$0x1] %vm428_vm1, %v454_v47  ;;  %v414_v39 = vld [vmem:[#allocation2 + $0x62] sm:$0x1] }
  0x36   : > { %473 = vst.msk [vmem:[#allocation2 + $0xd1] sm:$0x1] %vm428_vm1, %v455_v48  ;;  %474 = vst.msk [vmem:[#allocation2 + $0xe9] sm:$0x1] %vm428_vm1, %v456_v51  ;;  %v461_v38 = vld [vmem:[#allocation2 + $0x15f] sm:$0x1] }
  0x37   : > { %475 = vst.msk [vmem:[#allocation2 + $0x101] sm:$0x1] %vm428_vm1, %v457_v52  ;;  %476 = vst.msk [vmem:[#allocation2 + $0x119] sm:$0x1] %vm428_vm1, %v458_v55  ;;  %637 = vrot.lane.b32.xlu1 %v560_v54, %s5694_s15  ;;  %v5993_v40 = vld [vmem:[#allocation2 + $0x38] sm:$0xff]  ;;  %v563_v41 = vld [vmem:[#allocation2 + $0xc1] sm:$0xff] }
  0x38   : > { %613 = vrot.lane.b32.xlu0 %v548_v49, %s5694_s15  ;;  %477 = vst.msk [vmem:[#allocation2 + $0x131] sm:$0x1] %vm428_vm1, %v459_v56  ;;  %431 = vst.msk [vmem:[#allocation2 + $0x30] sm:$0x1] %vm428_vm1, %v412_v57  ;;  %v462_v42 = vld [vmem:[#allocation2 + $0x177] sm:$0x1] }
  0x39   : > { %430 = vst.msk [vmem:[#allocation2 + $0x18] sm:$0x1] %vm428_vm1, %v411_v58  ;;  %478 = vst.msk [vmem:[#allocation2 + $0x149] sm:$0x1] %vm428_vm1, %v460_v60  ;;  %v415_v43 = vld [vmem:[#allocation2 + $0x7a] sm:$0x1] }
  0x3a   : > { %432 = vst.msk [vmem:[#allocation2 + $0x48] sm:$0x1] %vm428_vm1, %v413_v61  ;;  %479 = vst.msk [vmem:[#allocation2 + $0x161] sm:$0x1] %vm428_vm1, %v461_v38  ;;  %v6001_v45 = vld [vmem:[#allocation2 + $0x50] sm:$0xff]  ;;  %v6007_v48 = vld [vmem:[#allocation2 + $0x68] sm:$0xff] }
  0x3b   : > { %518 = vst.msk [vmem:[#allocation3 + $0x18] sm:$0xff] %vm366_vm0, %v5988_v63  ;;  %520 = vst.msk [vmem:[#allocation3 + $0x28] sm:$0xff] %vm366_vm0, %v5993_v40  ;;  %641 = vrot.lane.b32.xlu1 %v562_v62, %s5694_s15  ;;  %v410_v46 = vld [vmem:[#allocation2 + $0x2] sm:$0x1]  ;;  %v564_v47 = vld [vmem:[#allocation2 + $0xc9] sm:$0xff] }
  0x3c   : > { %635 = vrot.lane.b32.xlu0 %v5977_v53, %s5694_s15  ;;  %433 = vst.msk [vmem:[#allocation2 + $0x60] sm:$0x1] %vm428_vm1, %v414_v39  ;;  %480 = vst.msk [vmem:[#allocation2 + $0x179] sm:$0x1] %vm428_vm1, %v462_v42  ;;  %v484_v49 = vld [vmem:[#allocation2 + $0x8] sm:$0xff]  ;;  %v6012_v51 = vld [vmem:[#allocation2 + $0x80] sm:$0xff] }
  0x3d   : > { %434 = vst.msk [vmem:[#allocation2 + $0x78] sm:$0x1] %vm428_vm1, %v415_v43  ;;  %429 = vst.msk [vmem:[#allocation2] sm:$0x1] %vm428_vm1, %v410_v46  ;;  %v416_v52 = vld [vmem:[#allocation2 + $0x92] sm:$0x1] }
  0x3e   : > { %522 = vst.msk [vmem:[#allocation3 + $0x38] sm:$0xff] %vm366_vm0, %v6001_v45  ;;  %524 = vst.msk [vmem:[#allocation3 + $0x48] sm:$0xff] %vm366_vm0, %v6007_v48  ;;  %v6021_v56 = vld [vmem:[#allocation2 + $0x98] sm:$0xff]  ;;  %v566_v60 = vld [vmem:[#allocation2 + $0xe1] sm:$0xff] }
  0x3f   : > { %516 = vst.msk [vmem:[#allocation3 + $0x8] sm:$0xff] %vm366_vm0, %v484_v49  ;;  %v6014_v54 = vld [vmem:[#allocation2 + $0x30] sm:$0xff]  ;;  %526 = vst.msk [vmem:[#allocation3 + $0x58] sm:$0xff] %vm366_vm0, %v6012_v51  ;;  %645 = vrot.lane.b32.xlu1 %v564_v47, %s5694_s15  ;;  %v565_v57 = vld [vmem:[#allocation2 + $0xd9] sm:$0xff] }
  0x40   : > { %639 = vrot.lane.b32.xlu0 %v561_v59, %s5694_s15  ;;  %v6016_v55 = vld [vmem:[#allocation2 + $0x18] sm:$0xff]  ;;  %435 = vst.msk [vmem:[#allocation2 + $0x90] sm:$0x1] %vm428_vm1, %v416_v52  ;;  %v417_v59 = vld [vmem:[#allocation2 + $0xaa] sm:$0x1]  ;;  %v6036_v61 = vld [vmem:[#allocation2 + $0xb0] sm:$0xff] }
  0x41   : > { %519 = vst.msk [vmem:[#allocation3 + $0x20] sm:$0xff] %vm366_vm0, %v6014_v54  ;;  %517 = vst.msk [vmem:[#allocation3 + $0x10] sm:$0xff] %vm366_vm0, %v6016_v55  ;;  %v6029_v58 = vld [vmem:[#allocation2 + $0x48] sm:$0xff]  ;;  %v418_v62 = vld [vmem:[#allocation2 + $0xc2] sm:$0x1] }
  0x42   : > { %528 = vst.msk [vmem:[#allocation3 + $0x68] sm:$0xff] %vm366_vm0, %v6021_v56  ;;  %521 = vst.msk [vmem:[#allocation3 + $0x30] sm:$0xff] %vm366_vm0, %v6029_v58  ;;  %v6043_v39 = vld [vmem:[#allocation2 + $0xc8] sm:$0xff]  ;;  %v567_v42 = vld [vmem:[#allocation2 + $0xf1] sm:$0xff] }
  0x43   : > { %436 = vst.msk [vmem:[#allocation2 + $0xa8] sm:$0x1] %vm428_vm1, %v417_v59  ;;  %v6038_v38 = vld [vmem:[#allocation2 + $0x60] sm:$0xff]  ;;  %437 = vst.msk [vmem:[#allocation2 + $0xc0] sm:$0x1] %vm428_vm1, %v418_v62  ;;  %649 = vrot.lane.b32.xlu1 %v566_v60, %s5694_s15  ;;  %v6059_v59 = vld [vmem:[#allocation2 + $0xf8] sm:$0xff] }
  0x44   : > { %643 = vrot.lane.b32.xlu0 %v563_v41, %s5694_s15  ;;  %530 = vst.msk [vmem:[#allocation3 + $0x78] sm:$0xff] %vm366_vm0, %v6036_v61  ;;  %v419_v41 = vld [vmem:[#allocation2 + $0xda] sm:$0x1]  ;;  %523 = vst.msk [vmem:[#allocation3 + $0x40] sm:$0xff] %vm366_vm0, %v6038_v38  ;;  %v6050_v46 = vld [vmem:[#allocation2 + $0xe0] sm:$0xff] }
  0x45   : > { %v568_v43 = vld [vmem:[#allocation2 + $0xf9] sm:$0xff]  ;;  %532 = vst.msk [vmem:[#allocation3 + $0x88] sm:$0xff] %vm366_vm0, %v6043_v39  ;;  %v420_v47 = vld [vmem:[#allocation2 + $0xf2] sm:$0x1]  ;;  %534 = vst.msk [vmem:[#allocation3 + $0x98] sm:$0xff] %vm366_vm0, %v6050_v46 }
  0x46   : > { %438 = vst.msk [vmem:[#allocation2 + $0xd8] sm:$0x1] %vm428_vm1, %v419_v41  ;;  %v6054_v49 = vld [vmem:[#allocation2 + $0x78] sm:$0xff]  ;;  %v483_v52 = vld [vmem:[#allocation2] sm:$0xff]  ;;  %439 = vst.msk [vmem:[#allocation2 + $0xf0] sm:$0x1] %vm428_vm1, %v420_v47 }
  0x47   : > { %525 = vst.msk [vmem:[#allocation3 + $0x50] sm:$0xff] %vm366_vm0, %v6054_v49  ;;  %515 = vst.msk [vmem:[#allocation3] sm:$0xff] %vm366_vm0, %v483_v52  ;;  %v6066_v60 = vld [vmem:[#allocation2 + $0x110] sm:$0xff]  ;;  %v422_v62 = vld [vmem:[#allocation2 + $0x122] sm:$0x1]  ;;  %653 = vrot.lane.b32.xlu1 %v568_v43, %s5694_s15 }
  0x48   : > { %647 = vrot.lane.b32.xlu0 %v565_v57, %s5694_s15  ;;  %536 = vst.msk [vmem:[#allocation3 + $0xa8] sm:$0xff] %vm366_vm0, %v6059_v59  ;;  %v421_v57 = vld [vmem:[#allocation2 + $0x10a] sm:$0x1]  ;;  %v6068_v41 = vld [vmem:[#allocation2 + $0x90] sm:$0xff]  ;;  %538 = vst.msk [vmem:[#allocation3 + $0xb8] sm:$0xff] %vm366_vm0, %v6066_v60 }
  0x49   : > { %440 = vst.msk [vmem:[#allocation2 + $0x108] sm:$0x1] %vm428_vm1, %v421_v57  ;;  %441 = vst.msk [vmem:[#allocation2 + $0x120] sm:$0x1] %vm428_vm1, %v422_v62  ;;  %v6074_v47 = vld [vmem:[#allocation2 + $0x128] sm:$0xff]  ;;  %v6081_v52 = vld [vmem:[#allocation2 + $0x140] sm:$0xff] }
  0x4a   : > { %v423_v37 = vld [vmem:[#allocation2 + $0x13a] sm:$0x1]  ;;  %527 = vst.msk [vmem:[#allocation3 + $0x60] sm:$0xff] %vm366_vm0, %v6068_v41  ;;  %540 = vst.msk [vmem:[#allocation3 + $0xc8] sm:$0xff] %vm366_vm0, %v6074_v47  ;;  %v424_v36 = vld [vmem:[#allocation2 + $0x152] sm:$0x1] }
  0x4b   : > { %442 = vst.msk [vmem:[#allocation2 + $0x138] sm:$0x1] %vm428_vm1, %v423_v37  ;;  %v425_v57 = vld [vmem:[#allocation2 + $0x16a] sm:$0x1]  ;;  %443 = vst.msk [vmem:[#allocation2 + $0x150] sm:$0x1] %vm428_vm1, %v424_v36 }
  0x4c   : > { %651 = vrot.lane.b32.xlu0 %v567_v42, %s5694_s15  ;;  %v6085_v62 = vld [vmem:[#allocation2 + $0xa8] sm:$0xff]  ;;  %542 = vst.msk [vmem:[#allocation3 + $0xd8] sm:$0xff] %vm366_vm0, %v6081_v52  ;;  %v570_v37 = vld [vmem:[#allocation2 + $0x111] sm:$0xff]  ;;  %v6093_v33 = vld [vmem:[#allocation2 + $0xc0] sm:$0xff] }
  0x4d   : > { %444 = vst.msk [vmem:[#allocation2 + $0x168] sm:$0x1] %vm428_vm1, %v425_v57  ;;  %v6097_v42 = vld [vmem:[#allocation2 + $0xd8] sm:$0xff]  ;;  %v6103_v36 = vld [vmem:[#allocation2 + $0xf0] sm:$0xff]  ;;  %657 = vrot.lane.b32.xlu1 %v570_v37, %s5694_s15  ;;  %v574_v19 = vld [vmem:[#allocation2 + $0x141] sm:$0xff] }
  0x4e   : > { %529 = vst.msk [vmem:[#allocation3 + $0x70] sm:$0xff] %vm366_vm0, %v6085_v62  ;;  %531 = vst.msk [vmem:[#allocation3 + $0x80] sm:$0xff] %vm366_vm0, %v6093_v33  ;;  %v6099_v43 = vld [vmem:[#allocation2 + $0x158] sm:$0xff]  ;;  %v6108_v57 = vld [vmem:[%s5768_s14 + $0xf0] sm:$0xff]  ;;  %s5701_s14 = smov 32  }
  0x4f   : > { %533 = vst.msk [vmem:[#allocation3 + $0x90] sm:$0xff] %vm366_vm0, %v6097_v42  ;;  %544 = vst.msk [vmem:[#allocation3 + $0xe8] sm:$0xff] %vm366_vm0, %v6099_v43  ;;  %v572_v30 = vld [vmem:[#allocation2 + $0x129] sm:$0xff]  ;;  %v573_v20 = vld [vmem:[#allocation2 + $0x139] sm:$0xff] }
  0x50   : > { %8870 = vst [vmem:[#allocation34_spill] sm:$0xff] %v6108_v57  ;;  %655 = vrot.lane.b32.xlu0 %v569_v34, %s5694_s15  ;;  %535 = vst.msk [vmem:[#allocation3 + $0xa0] sm:$0xff] %vm366_vm0, %v6103_v36  ;;  %v6116_v23 = vld [vmem:[#allocation2 + $0x108] sm:$0xff]  ;;  %v6118_v22 = vld [vmem:[#allocation2 + $0x120] sm:$0xff] }
  0x51   : > { %397 = vst.msk [vmem:[#allocation2 + $0x181] sm:$0xff] %vm366_vm0, %v6108_v57  ;;  %537 = vst.msk [vmem:[#allocation3 + $0xb0] sm:$0xff] %vm366_vm0, %v6116_v23  ;;  %v6126_v37 = vld [vmem:[#allocation2 + $0x170] sm:$0xff]  ;;  %661 = vrot.lane.b32.xlu1 %v572_v30, %s5694_s15  ;;  %v6190_v13 = vld [vmem:[#allocation2 + $0x82] sm:$0xff] }
  0x52   : > { %539 = vst.msk [vmem:[#allocation3 + $0xc0] sm:$0xff] %vm366_vm0, %v6118_v22  ;;  %v6124_v34 = vld [vmem:[#allocation2 + $0x138] sm:$0xff]  ;;  %v6130_v57 = vld [vmem:[#allocation2 + $0x150] sm:$0xff]  ;;  %546 = vst.msk [vmem:[#allocation3 + $0xf8] sm:$0xff] %vm366_vm0, %v6126_v37 }
  0x53   : > { %541 = vst.msk [vmem:[#allocation3 + $0xd0] sm:$0xff] %vm366_vm0, %v6124_v34  ;;  %543 = vst.msk [vmem:[#allocation3 + $0xe0] sm:$0xff] %vm366_vm0, %v6130_v57  ;;  %v575_v30 = vld [vmem:[#allocation2 + $0x151] sm:$0xff]  ;;  %v577_v16 = vld [vmem:[#allocation2 + $0x169] sm:$0xff] }
  0x54   : > { %v6132_v21 = vld [vmem:[#allocation2 + $0x168] sm:$0xff]  ;;  %659 = vrot.lane.b32.xlu0 %v571_v31, %s5694_s15  ;;  %8871 = vst [vmem:[#allocation35_spill] sm:$0xff] %v6143_v18  ;;  %398 = vst.msk [vmem:[#allocation2 + $0x189] sm:$0xff] %vm366_vm0, %v6143_v18  ;;  %v576_v31 = vld [vmem:[#allocation2 + $0x159] sm:$0xff] }
  0x55   : > { %545 = vst.msk [vmem:[#allocation3 + $0xf0] sm:$0xff] %vm366_vm0, %v6132_v21  ;;  %665 = vrot.lane.b32.xlu1 %v574_v19, %s5694_s15  ;;  %v578_v15 = vld [vmem:[#allocation2 + $0x171] sm:$0xff]  ;;  %v6158_v19 = vld [vmem:[#allocation2 + $0x22] sm:$0xff]  ;;  %v6188_v18 = vld [vmem:[#allocation2 + $0x7a] sm:$0xff] }
  0x56   : > { %v741_v14 = vld [vmem:[#allocation2 + $0xa] sm:$0xff]  ;;  %v753_v11 = vld [vmem:[#allocation2 + $0x9a] sm:$0xff]  ;;  %v755_v9 = vld [vmem:[#allocation2 + $0xb2] sm:$0xff] }
  0x57   : > { %v756_v6 = vld [vmem:[#allocation2 + $0xc2] sm:$0xff]  ;;  %v757_v8 = vld [vmem:[#allocation2 + $0xca] sm:$0xff]  ;;  %v758_v4 = vld [vmem:[#allocation2 + $0xda] sm:$0xff] }
  0x58   : > { %v426_v17 = vld [vmem:[#allocation2 + $0x182] sm:$0x1]  ;;  %663 = vrot.lane.b32.xlu0 %v573_v20, %s5694_s15  ;;  %v760_v2 = vld [vmem:[#allocation2 + $0xf2] sm:$0xff] }
  0x59   : > { %445 = vst.msk [vmem:[#allocation2 + $0x180] sm:$0x1] %vm428_vm1, %v426_v17  ;;  %669 = vrot.lane.b32.xlu1 %v576_v31, %s5694_s15  ;;  %v740_v20 = vld [vmem:[#allocation2 + $0x2] sm:$0xff]  ;;  %v6156_v17 = vld [vmem:[#allocation2 + $0x1a] sm:$0xff] }
  0x5a   : > { %v6180_v31 = vld [vmem:[#allocation2 + $0x62] sm:$0xff] }
  0x5b   : > { %v759_v7 = vld [vmem:[#allocation2 + $0xe2] sm:$0xff] }
  0x5c   : > { %667 = vrot.lane.b32.xlu0 %v575_v30, %s5694_s15  ;;  %v6174_v30 = vld [vmem:[#allocation2 + $0x52] sm:$0xff] }
  0x5d   : > { %673 = vrot.lane.b32.xlu1 %v578_v15, %s5694_s15  ;;  %v6166_v15 = vld [vmem:[#allocation2 + $0x3a] sm:$0xff] }
  0x60   : > { %671 = vrot.lane.b32.xlu0 %v577_v16, %s5694_s15  ;;  %v6164_v16 = vld [vmem:[#allocation2 + $0x32] sm:$0xff] }
  0x61   : > { %806 = vrot.lane.b32.xlu1 %v741_v14, %s5695_s16  ;;  %v6172_v14 = vld [vmem:[#allocation2 + $0x4a] sm:$0xff] }
  0x64   : > { %804 = vrot.lane.b32.xlu0 %v740_v20, %s5695_s16  ;;  %v6182_v20 = vld [vmem:[#allocation2 + $0x6a] sm:$0xff] }
  0x65   : > { %810 = vrot.lane.b32.xlu1 %v6158_v19, %s5695_s16 }
  0x68   : > { %808 = vrot.lane.b32.xlu0 %v6156_v17, %s5695_s16 }
  0x69   : > { %814 = vrot.lane.b32.xlu1 %v6166_v15, %s5695_s16 }
  0x6c   : > { %812 = vrot.lane.b32.xlu0 %v6164_v16, %s5695_s16 }
  0x6d   : > { %818 = vrot.lane.b32.xlu1 %v6174_v30, %s5695_s16 }
  0x70   : > { %816 = vrot.lane.b32.xlu0 %v6172_v14, %s5695_s16 }
  0x71   : > { %822 = vrot.lane.b32.xlu1 %v6182_v20, %s5695_s16 }
  0x74   : > { %820 = vrot.lane.b32.xlu0 %v6180_v31, %s5695_s16 }
  0x75   : > { %826 = vrot.lane.b32.xlu1 %v6190_v13, %s5695_s16 }
  0x78   : > { %824 = vrot.lane.b32.xlu0 %v6188_v18, %s5695_s16 }
  0x79   : > { %830 = vrot.lane.b32.xlu1 %v753_v11, %s5695_s16  ;;  %v761_v11 = vld [vmem:[#allocation2 + $0xfa] sm:$0xff] }
  0x7c   : > { %828 = vrot.lane.b32.xlu0 %v6196_v12, %s5695_s16 }
  0x7d   : > { %834 = vrot.lane.b32.xlu1 %v755_v9, %s5695_s16  ;;  %v763_v9 = vld [vmem:[#allocation2 + $0x112] sm:$0xff] }
  0x80   : > { %832 = vrot.lane.b32.xlu0 %v754_v10, %s5695_s16  ;;  %v762_v10 = vld [vmem:[#allocation2 + $0x10a] sm:$0xff] }
  0x81   : > { %838 = vrot.lane.b32.xlu1 %v757_v8, %s5695_s16  ;;  %v765_v8 = vld [vmem:[#allocation2 + $0x12a] sm:$0xff] }
  0x84   : > { %836 = vrot.lane.b32.xlu0 %v756_v6, %s5695_s16  ;;  %v764_v6 = vld [vmem:[#allocation2 + $0x122] sm:$0xff] }
  0x85   : > { %842 = vrot.lane.b32.xlu1 %v759_v7, %s5695_s16  ;;  %v767_v7 = vld [vmem:[#allocation2 + $0x142] sm:$0xff] }
  0x88   : > { %840 = vrot.lane.b32.xlu0 %v758_v4, %s5695_s16  ;;  %v766_v4 = vld [vmem:[#allocation2 + $0x13a] sm:$0xff] }
  0x89   : > { %846 = vrot.lane.b32.xlu1 %v761_v11, %s5695_s16  ;;  %v769_v11 = vld [vmem:[#allocation2 + $0x15a] sm:$0xff] }
  0x8c   : > { %844 = vrot.lane.b32.xlu0 %v760_v2, %s5695_s16  ;;  %v768_v2 = vld [vmem:[#allocation2 + $0x152] sm:$0xff] }
  0x8d   : > { %850 = vrot.lane.b32.xlu1 %v763_v9, %s5695_s16 }
  0x90   : > { %848 = vrot.lane.b32.xlu0 %v762_v10, %s5695_s16 }
  0x91   : > { %854 = vrot.lane.b32.xlu1 %v765_v8, %s5695_s16  ;;  %v620_v5 = vpop.permute.xlu0 %619  ;;  %v616_v0 = vpop.permute.xlu1 %615 }
  0x92   : > { %712 = vst.msk [vmem:[#allocation3 + $0x20] sm:$0xff] %vm707_vm2, %v620_v5  ;;  %710 = vst.msk [vmem:[#allocation3 + $0x10] sm:$0xff] %vm707_vm2, %v616_v0  ;;  %v771_v5 = vld [vmem:[#allocation2 + $0x172] sm:$0xff] }
  0x94   : > { %852 = vrot.lane.b32.xlu0 %v764_v6, %s5695_s16  ;;  %v770_v6 = vld [vmem:[#allocation2 + $0x16a] sm:$0xff] }
  0x95   : > { %858 = vrot.lane.b32.xlu1 %v767_v7, %s5695_s16  ;;  %v624_v10 = vpop.permute.xlu0 %623  ;;  %v618_v9 = vpop.permute.xlu1 %617 }
  0x96   : > { %714 = vst.msk [vmem:[#allocation3 + $0x30] sm:$0xff] %vm707_vm2, %v624_v10  ;;  %711 = vst.msk [vmem:[#allocation3 + $0x18] sm:$0xff] %vm707_vm2, %v618_v9 }
  0x98   : > { %856 = vrot.lane.b32.xlu0 %v766_v4, %s5695_s16 }
  0x99   : > { %862 = vrot.lane.b32.xlu1 %v769_v11, %s5695_s16  ;;  %v628_v8 = vpop.permute.xlu0 %627  ;;  %v622_v0 = vpop.permute.xlu1 %621 }
  0x9a   : > { %716 = vst.msk [vmem:[#allocation3 + $0x40] sm:$0xff] %vm707_vm2, %v628_v8  ;;  %713 = vst.msk [vmem:[#allocation3 + $0x28] sm:$0xff] %vm707_vm2, %v622_v0 }
  0x9c   : > { %860 = vrot.lane.b32.xlu0 %v768_v2, %s5695_s16 }
  0x9d   : > { %866 = vrot.lane.b32.xlu1 %v771_v5, %s5695_s16  ;;  %v632_v4 = vpop.permute.xlu0 %631  ;;  %v626_v7 = vpop.permute.xlu1 %625 }
  0x9e   : > { %718 = vst.msk [vmem:[#allocation3 + $0x50] sm:$0xff] %vm707_vm2, %v632_v4  ;;  %715 = vst.msk [vmem:[#allocation3 + $0x38] sm:$0xff] %vm707_vm2, %v626_v7 }
  0xa0   : > { %864 = vrot.lane.b32.xlu0 %v770_v6, %s5695_s16 }
  0xa1   : > { %999 = vrot.lane.b32.xlu1 %v5988_v63, %s5696_s17  ;;  %v630_v11 = vpop.permute.xlu1 %629 }
  0xa2   : > { %717 = vst.msk [vmem:[#allocation3 + $0x48] sm:$0xff] %vm707_vm2, %v630_v11 }
  0xa4   : > { %997 = vrot.lane.b32.xlu0 %v6016_v55, %s5696_s17 }
  0xa5   : > { %1003 = vrot.lane.b32.xlu1 %v5993_v40, %s5696_s17  ;;  %v634_v9 = vpop.permute.xlu1 %633 }
  0xa6   : > { %v612_v2 = vpop.permute.xlu0 %611  ;;  %719 = vst.msk [vmem:[#allocation3 + $0x58] sm:$0xff] %vm707_vm2, %v634_v9 }
  0xa7   : > { %708 = vst.msk [vmem:[#allocation3] sm:$0xff] %vm707_vm2, %v612_v2 }
  0xa8   : > { %1001 = vrot.lane.b32.xlu0 %v6014_v54, %s5696_s17 }
  0xa9   : > { %1007 = vrot.lane.b32.xlu1 %v6001_v45, %s5696_s17  ;;  %v638_v55 = vpop.permute.xlu1 %637 }
  0xaa   : > { %v614_v10 = vpop.permute.xlu0 %613  ;;  %721 = vst.msk [vmem:[#allocation3 + $0x68] sm:$0xff] %vm707_vm2, %v638_v55 }
  0xab   : > { %709 = vst.msk [vmem:[#allocation3 + $0x8] sm:$0xff] %vm707_vm2, %v614_v10 }
  0xac   : > { %1005 = vrot.lane.b32.xlu0 %v6029_v58, %s5696_s17 }
  0xad   : > { %1011 = vrot.lane.b32.xlu1 %v6007_v48, %s5696_s17  ;;  %v642_v5 = vpop.permute.xlu1 %641 }
  0xae   : > { %v636_v63 = vpop.permute.xlu0 %635  ;;  %723 = vst.msk [vmem:[#allocation3 + $0x78] sm:$0xff] %vm707_vm2, %v642_v5 }
  0xaf   : > { %720 = vst.msk [vmem:[#allocation3 + $0x60] sm:$0xff] %vm707_vm2, %v636_v63 }
  0xb0   : > { %1009 = vrot.lane.b32.xlu0 %v6038_v38, %s5696_s17 }
  0xb1   : > { %1015 = vrot.lane.b32.xlu1 %v6012_v51, %s5696_s17  ;;  %v646_v0 = vpop.permute.xlu1 %645 }
  0xb2   : > { %v640_v6 = vpop.permute.xlu0 %639  ;;  %725 = vst.msk [vmem:[#allocation3 + $0x88] sm:$0xff] %vm707_vm2, %v646_v0 }
  0xb3   : > { %722 = vst.msk [vmem:[#allocation3 + $0x70] sm:$0xff] %vm707_vm2, %v640_v6 }
  0xb4   : > { %1013 = vrot.lane.b32.xlu0 %v6054_v49, %s5696_s17 }
  0xb5   : > { %1019 = vrot.lane.b32.xlu1 %v6021_v56, %s5696_s17  ;;  %v650_v7 = vpop.permute.xlu1 %649 }
  0xb6   : > { %v644_v8 = vpop.permute.xlu0 %643  ;;  %727 = vst.msk [vmem:[#allocation3 + $0x98] sm:$0xff] %vm707_vm2, %v650_v7 }
  0xb7   : > { %724 = vst.msk [vmem:[#allocation3 + $0x80] sm:$0xff] %vm707_vm2, %v644_v8 }
  0xb8   : > { %1017 = vrot.lane.b32.xlu0 %v6068_v41, %s5696_s17 }
  0xb9   : > { %1023 = vrot.lane.b32.xlu1 %v6036_v61, %s5696_s17  ;;  %v654_v11 = vpop.permute.xlu1 %653 }
  0xba   : > { %v648_v4 = vpop.permute.xlu0 %647  ;;  %729 = vst.msk [vmem:[#allocation3 + $0xa8] sm:$0xff] %vm707_vm2, %v654_v11 }
  0xbb   : > { %726 = vst.msk [vmem:[#allocation3 + $0x90] sm:$0xff] %vm707_vm2, %v648_v4 }
  0xbc   : > { %1021 = vrot.lane.b32.xlu0 %v6085_v62, %s5696_s17 }
  0xbd   : > { %1027 = vrot.lane.b32.xlu1 %v6043_v39, %s5696_s17 }
  0xbe   : > { %v652_v2 = vpop.permute.xlu0 %651 }
  0xbf   : > { %728 = vst.msk [vmem:[#allocation3 + $0xa0] sm:$0xff] %vm707_vm2, %v652_v2  ;;  %v658_v9 = vpop.permute.xlu1 %657 }
  0xc0   : > { %1025 = vrot.lane.b32.xlu0 %v6093_v33, %s5696_s17  ;;  %731 = vst.msk [vmem:[#allocation3 + $0xb8] sm:$0xff] %vm707_vm2, %v658_v9 }
  0xc1   : > { %1031 = vrot.lane.b32.xlu1 %v6050_v46, %s5696_s17 }
  0xc2   : > { %v656_v10 = vpop.permute.xlu0 %655 }
  0xc3   : > { %730 = vst.msk [vmem:[#allocation3 + $0xb0] sm:$0xff] %vm707_vm2, %v656_v10  ;;  %v662_v55 = vpop.permute.xlu1 %661 }
  0xc4   : > { %1029 = vrot.lane.b32.xlu0 %v6097_v42, %s5696_s17  ;;  %733 = vst.msk [vmem:[#allocation3 + $0xc8] sm:$0xff] %vm707_vm2, %v662_v55  ;;  %v2125_v55 = vld [vmem:[%s8799_s1 + $0x10] sm:$0xff] }
  0xc5   : > { %1035 = vrot.lane.b32.xlu1 %v6059_v59, %s5696_s17 }
  0xc6   : > { %v660_v63 = vpop.permute.xlu0 %659 }
  0xc7   : > { %732 = vst.msk [vmem:[#allocation3 + $0xc0] sm:$0xff] %vm707_vm2, %v660_v63  ;;  %v666_v5 = vpop.permute.xlu1 %665 }
  0xc8   : > { %1033 = vrot.lane.b32.xlu0 %v6103_v36, %s5696_s17  ;;  %735 = vst.msk [vmem:[#allocation3 + $0xd8] sm:$0xff] %vm707_vm2, %v666_v5 }
  0xc9   : > { %1039 = vrot.lane.b32.xlu1 %v6066_v60, %s5696_s17 }
  0xca   : > { %v664_v6 = vpop.permute.xlu0 %663 }
  0xcb   : > { %734 = vst.msk [vmem:[#allocation3 + $0xd0] sm:$0xff] %vm707_vm2, %v664_v6  ;;  %v670_v0 = vpop.permute.xlu1 %669  ;;  %v2126_v6 = vld [vmem:[%s8799_s1 + $0x18] sm:$0xff] }
  0xcc   : > { %1037 = vrot.lane.b32.xlu0 %v6116_v23, %s5696_s17  ;;  %737 = vst.msk [vmem:[#allocation3 + $0xe8] sm:$0xff] %vm707_vm2, %v670_v0 }
  0xcd   : > { %1043 = vrot.lane.b32.xlu1 %v6074_v47, %s5696_s17 }
  0xce   : > { %v668_v8 = vpop.permute.xlu0 %667 }
  0xcf   : > { %736 = vst.msk [vmem:[#allocation3 + $0xe0] sm:$0xff] %vm707_vm2, %v668_v8  ;;  %v674_v7 = vpop.permute.xlu1 %673 }
  0xd0   : > { %1041 = vrot.lane.b32.xlu0 %v6118_v22, %s5696_s17  ;;  %739 = vst.msk [vmem:[#allocation3 + $0xf8] sm:$0xff] %vm707_vm2, %v674_v7 }
  0xd1   : > { %1047 = vrot.lane.b32.xlu1 %v6081_v52, %s5696_s17  ;;  %v964_v52 = vld [vmem:[#allocation2 + $0x188] sm:$0xff] }
  0xd2   : > { %v672_v4 = vpop.permute.xlu0 %671 }
  0xd3   : > { %738 = vst.msk [vmem:[#allocation3 + $0xf0] sm:$0xff] %vm707_vm2, %v672_v4  ;;  %v807_v60 = vpop.permute.xlu1 %806 }
  0xd4   : > { %1045 = vrot.lane.b32.xlu0 %v6124_v34, %s5696_s17  ;;  %902 = vst.msk [vmem:[#allocation3 + $0x8] sm:$0xff] %vm900_vm3, %v807_v60  ;;  %v963_v34 = vld [vmem:[#allocation2 + $0x180] sm:$0xff] }
  0xd5   : > { %1051 = vrot.lane.b32.xlu1 %v6099_v43, %s5696_s17 }
  0xd6   : > { %v805_v23 = vpop.permute.xlu0 %804 }
  0xd7   : > { %901 = vst.msk [vmem:[#allocation3] sm:$0xff] %vm900_vm3, %v805_v23  ;;  %v811_v47 = vpop.permute.xlu1 %810 }
  0xd8   : > { %1049 = vrot.lane.b32.xlu0 %v6130_v57, %s5696_s17  ;;  %904 = vst.msk [vmem:[#allocation3 + $0x18] sm:$0xff] %vm900_vm3, %v811_v47 }
  0xd9   : > { %1055 = vrot.lane.b32.xlu1 %v6126_v37, %s5696_s17 }
  0xda   : > { %v809_v22 = vpop.permute.xlu0 %808 }
  0xdb   : > { %903 = vst.msk [vmem:[#allocation3 + $0x10] sm:$0xff] %vm900_vm3, %v809_v22  ;;  %v815_v11 = vpop.permute.xlu1 %814  ;;  %v1707_v22 = vld [vmem:[#allocation2 + $0x49] sm:$0xff] }
  0xdc   : > { %1053 = vrot.lane.b32.xlu0 %v6132_v21, %s5696_s17  ;;  %906 = vst.msk [vmem:[#allocation3 + $0x28] sm:$0xff] %vm900_vm3, %v815_v11 }
  0xdd   : > { %1059 = vrot.lane.b32.xlu1 %v964_v52, %s5696_s17 }
  0xde   : > { %v813_v2 = vpop.permute.xlu0 %812 }
  0xdf   : > { %905 = vst.msk [vmem:[#allocation3 + $0x20] sm:$0xff] %vm900_vm3, %v813_v2  ;;  %v819_v57 = vpop.permute.xlu1 %818 }
  0xe0   : > { %1057 = vrot.lane.b32.xlu0 %v963_v34, %s5696_s17  ;;  %908 = vst.msk [vmem:[#allocation3 + $0x38] sm:$0xff] %vm900_vm3, %v819_v57 }
  0xe1   : > { %1192 = vrot.lane.b32.xlu1 %v5904_v28, %s5697_s18 }
  0xe2   : > { %v817_v43 = vpop.permute.xlu0 %816 }
  0xe3   : > { %907 = vst.msk [vmem:[#allocation3 + $0x30] sm:$0xff] %vm900_vm3, %v817_v43  ;;  %v823_v37 = vpop.permute.xlu1 %822  ;;  %v1709_v43 = vld [vmem:[#allocation2 + $0x61] sm:$0xff] }
  0xe4   : > { %1190 = vrot.lane.b32.xlu0 %v5886_v25, %s5697_s18  ;;  %910 = vst.msk [vmem:[#allocation3 + $0x48] sm:$0xff] %vm900_vm3, %v823_v37 }
  0xe5   : > { %1196 = vrot.lane.b32.xlu1 %v5898_v26, %s5697_s18 }
  0xe6   : > { %v821_v21 = vpop.permute.xlu0 %820 }
  0xe7   : > { %909 = vst.msk [vmem:[#allocation3 + $0x40] sm:$0xff] %vm900_vm3, %v821_v21  ;;  %v827_v9 = vpop.permute.xlu1 %826 }
  0xe8   : > { %1194 = vrot.lane.b32.xlu0 %v5884_v24, %s5697_s18  ;;  %912 = vst.msk [vmem:[#allocation3 + $0x58] sm:$0xff] %vm900_vm3, %v827_v9 }
  0xe9   : > { %1200 = vrot.lane.b32.xlu1 %v5936_v35, %s5697_s18 }
  0xea   : > { %v825_v10 = vpop.permute.xlu0 %824 }
  0xeb   : > { %911 = vst.msk [vmem:[#allocation3 + $0x50] sm:$0xff] %vm900_vm3, %v825_v10  ;;  %v831_v28 = vpop.permute.xlu1 %830 }
  0xec   : > { %1198 = vrot.lane.b32.xlu0 %v5902_v27, %s5697_s18  ;;  %914 = vst.msk [vmem:[#allocation3 + $0x68] sm:$0xff] %vm900_vm3, %v831_v28 }
  0xed   : > { %1204 = vrot.lane.b32.xlu1 %v5959_v44, %s5697_s18  ;;  %v2123_v44 = vld [vmem:[%s8799_s1] sm:$0xff] }
  0xee   : > { %v829_v25 = vpop.permute.xlu0 %828 }
  0xef   : > { %913 = vst.msk [vmem:[#allocation3 + $0x60] sm:$0xff] %vm900_vm3, %v829_v25  ;;  %v835_v26 = vpop.permute.xlu1 %834  ;;  %v1711_v25 = vld [vmem:[#allocation2 + $0x79] sm:$0xff] }
  0xf0   : > { %1202 = vrot.lane.b32.xlu0 %v5912_v29, %s5697_s18  ;;  %916 = vst.msk [vmem:[#allocation3 + $0x78] sm:$0xff] %vm900_vm3, %v835_v26  ;;  %v2124_v29 = vld [vmem:[%s8799_s1 + $0x8] sm:$0xff] }
  0xf1   : > { %1208 = vrot.lane.b32.xlu1 %v5969_v50, %s5697_s18  ;;  %v5650_v63 = vpack.c.bf16 %v2124_v29, %v2123_v44  ;;  %v1713_v44 = vld [vmem:[#allocation2 + $0x91] sm:$0xff] }
  0xf2   : > { %v833_v24 = vpop.permute.xlu0 %832 }
  0xf3   : > { %915 = vst.msk [vmem:[#allocation3 + $0x70] sm:$0xff] %vm900_vm3, %v833_v24  ;;  %v839_v35 = vpop.permute.xlu1 %838  ;;  %5651 = vmatprep.subr.bf16.mxu0 %v5650_v63 }
  0xf4   : > { %1206 = vrot.lane.b32.xlu0 %v5924_v32, %s5697_s18  ;;  %918 = vst.msk [vmem:[#allocation3 + $0x88] sm:$0xff] %vm900_vm3, %v839_v35  ;;  %5653 = vmatpush3.bf16.msra.mxu0 %v5650_v63 }
  0xf5   : > { %1383 = vrot.lane.b32.xlu1 %v6156_v17, %s5698_s23  ;;  %v5654_v17 = vpack.c.bf16 %v2126_v6, %v2125_v55 }
  0xf6   : > { %v837_v27 = vpop.permute.xlu0 %836 }
  0xf7   : > { %917 = vst.msk [vmem:[#allocation3 + $0x80] sm:$0xff] %vm900_vm3, %v837_v27  ;;  %v843_v50 = vpop.permute.xlu1 %842  ;;  %5655 = vmatprep.subr.bf16.mxu0 %v5654_v17 }
  0xf8   : > { %1210 = vrot.lane.b32.xlu0 %v5977_v53, %s5697_s18  ;;  %920 = vst.msk [vmem:[#allocation3 + $0x98] sm:$0xff] %vm900_vm3, %v843_v50  ;;  %v1705_v53 = vld [vmem:[#allocation2 + $0x31] sm:$0xff]  ;;  %5657 = vmatpush3.bf16.msra.mxu0 %v5654_v17 }
  0xf9   : > { %1576 = vrot.lane.b32.xlu1 %v6014_v54, %s5699_s28  ;;  %v2127_v54 = vld [vmem:[%s8799_s1 + $0x20] sm:$0xf] }
  0xfa   : > { %v841_v32 = vpop.permute.xlu0 %840  ;;  %5542 = vmatprep.subr.msk.mxu0 %vm2232_vm4, %v2127_v54 }
  0xfb   : > { %919 = vst.msk [vmem:[#allocation3 + $0x90] sm:$0xff] %vm900_vm3, %v841_v32  ;;  %v847_v8 = vpop.permute.xlu1 %846 }
  0xfc   : > { %1385 = vrot.lane.b32.xlu0 %v6158_v19, %s5698_s23  ;;  %922 = vst.msk [vmem:[#allocation3 + $0xa8] sm:$0xff] %vm900_vm3, %v847_v8  ;;  %v1706_v19 = vld [vmem:[#allocation2 + $0x39] sm:$0xff]  ;;  %5543 = vmatpush3.msk.msra.mxu0 %vm2232_vm4, %v2127_v54 }
  0xfd   : > { %1769 = vrot.lane.b32.xlu1 %v1705_v53, %s5700_s29 }
  0xfe   : > { %v845_v5 = vpop.permute.xlu0 %844 }
  0xff   : > { %921 = vst.msk [vmem:[#allocation3 + $0xa0] sm:$0xff] %vm900_vm3, %v845_v5  ;;  %v851_v4 = vpop.permute.xlu1 %850  ;;  %v1715_v5 = vld [vmem:[#allocation2 + $0xa9] sm:$0xff] }
 0x100   : > { %1578 = vrot.lane.b32.xlu0 %v5993_v40, %s5699_s28  ;;  %924 = vst.msk [vmem:[#allocation3 + $0xb8] sm:$0xff] %vm900_vm3, %v851_v4 }
 0x101   : > { %1962 = vrot.lane.b32.xlu1 %v6164_v16, %s5701_s14 }
 0x102   : > { %v849_v0 = vpop.permute.xlu0 %848 }
 0x103   : > { %923 = vst.msk [vmem:[#allocation3 + $0xb0] sm:$0xff] %vm900_vm3, %v849_v0  ;;  %v855_v7 = vpop.permute.xlu1 %854  ;;  %v1908_v0 = vld [vmem:[#allocation2 + $0xaa] sm:$0xff] }
 0x104   : > { %1771 = vrot.lane.b32.xlu0 %v1706_v19, %s5700_s29  ;;  %926 = vst.msk [vmem:[#allocation3 + $0xc8] sm:$0xff] %vm900_vm3, %v855_v7  ;;  %v1716_v19 = vld [vmem:[#allocation2 + $0xb1] sm:$0xff] }
 0x105   : > { %1964 = vrot.lane.b32.xlu1 %v6166_v15, %s5701_s14  ;;  %v1909_v7 = vld [vmem:[#allocation2 + $0xb2] sm:$0xff] }
 0x106   : > { %v853_v40 = vpop.permute.xlu0 %852 }
 0x107   : > { %925 = vst.msk [vmem:[#allocation3 + $0xc0] sm:$0xff] %vm900_vm3, %v853_v40  ;;  %v859_v60 = vpop.permute.xlu1 %858 }
 0x108   : > { %1387 = vrot.lane.b32.xlu0 %v6164_v16, %s5698_s23  ;;  %928 = vst.msk [vmem:[#allocation3 + $0xd8] sm:$0xff] %vm900_vm3, %v859_v60  ;;  %v1708_v16 = vld [vmem:[#allocation2 + $0x51] sm:$0xff] }
 0x109   : > { %1580 = vrot.lane.b32.xlu1 %v6029_v58, %s5699_s28 }
 0x10a   : > { %v857_v23 = vpop.permute.xlu0 %856 }
 0x10b   : > { %927 = vst.msk [vmem:[#allocation3 + $0xd0] sm:$0xff] %vm900_vm3, %v857_v23  ;;  %v863_v52 = vpop.permute.xlu1 %862 }
 0x10c   : > { %1389 = vrot.lane.b32.xlu0 %v6166_v15, %s5698_s23  ;;  %930 = vst.msk [vmem:[#allocation3 + $0xe8] sm:$0xff] %vm900_vm3, %v863_v52  ;;  %v1717_v52 = vld [vmem:[#allocation2 + $0xc1] sm:$0xff] }
 0x10d   : > { %1773 = vrot.lane.b32.xlu1 %v1707_v22, %s5700_s29 }
 0x10e   : > { %v861_v47 = vpop.permute.xlu0 %860 }
 0x10f   : > { %929 = vst.msk [vmem:[#allocation3 + $0xe0] sm:$0xff] %vm900_vm3, %v861_v47  ;;  %v867_v2 = vpop.permute.xlu1 %866 }
 0x110   : > { %1582 = vrot.lane.b32.xlu0 %v6001_v45, %s5699_s28  ;;  %932 = vst.msk [vmem:[#allocation3 + $0xf8] sm:$0xff] %vm900_vm3, %v867_v2  ;;  %v1718_v2 = vld [vmem:[#allocation2 + $0xc9] sm:$0xff] }
 0x111   : > { %1966 = vrot.lane.b32.xlu1 %v6172_v14, %s5701_s14 }
 0x112   : > { %v865_v34 = vpop.permute.xlu0 %864 }
 0x113   : > { %931 = vst.msk [vmem:[#allocation3 + $0xf0] sm:$0xff] %vm900_vm3, %v865_v34  ;;  %v1000_v58 = vpop.permute.xlu1 %999 }
 0x114   : > { %1775 = vrot.lane.b32.xlu0 %v1708_v16, %s5700_s29  ;;  %1095 = vst.msk [vmem:[#allocation3 + $0x8] sm:$0xff] %vm1093_vm5, %v1000_v58  ;;  %v1910_v58 = vld [vmem:[#allocation2 + $0xc2] sm:$0xff] }
 0x115   : > { %1968 = vrot.lane.b32.xlu1 %v6174_v30, %s5701_s14 }
 0x116   : > { %v998_v15 = vpop.permute.xlu0 %997 }
 0x117   : > { %1094 = vst.msk [vmem:[#allocation3] sm:$0xff] %vm1093_vm5, %v998_v15  ;;  %v1004_v45 = vpop.permute.xlu1 %1003 }
 0x118   : > { %1391 = vrot.lane.b32.xlu0 %v6172_v14, %s5698_s23  ;;  %1097 = vst.msk [vmem:[#allocation3 + $0x18] sm:$0xff] %vm1093_vm5, %v1004_v45  ;;  %v1710_v14 = vld [vmem:[#allocation2 + $0x69] sm:$0xff] }
 0x119   : > { %1584 = vrot.lane.b32.xlu1 %v6038_v38, %s5699_s28 }
 0x11a   : > { %v1002_v11 = vpop.permute.xlu0 %1001 }
 0x11b   : > { %1096 = vst.msk [vmem:[#allocation3 + $0x10] sm:$0xff] %vm1093_vm5, %v1002_v11  ;;  %v1008_v57 = vpop.permute.xlu1 %1007  ;;  %v1911_v11 = vld [vmem:[#allocation2 + $0xca] sm:$0xff] }
 0x11c   : > { %1393 = vrot.lane.b32.xlu0 %v6174_v30, %s5698_s23  ;;  %1099 = vst.msk [vmem:[#allocation3 + $0x28] sm:$0xff] %vm1093_vm5, %v1008_v57 }
 0x11d   : > { %1777 = vrot.lane.b32.xlu1 %v1709_v43, %s5700_s29 }
 0x11e   : > { %v1006_v21 = vpop.permute.xlu0 %1005 }
 0x11f   : > { %1098 = vst.msk [vmem:[#allocation3 + $0x20] sm:$0xff] %vm1093_vm5, %v1006_v21  ;;  %v1012_v37 = vpop.permute.xlu1 %1011  ;;  %v6526_v21 = vld [vmem:[#allocation2 + $0x169] sm:$0xff] }
 0x120   : > { %1586 = vrot.lane.b32.xlu0 %v6007_v48, %s5699_s28  ;;  %1101 = vst.msk [vmem:[#allocation3 + $0x38] sm:$0xff] %vm1093_vm5, %v1012_v37 }
 0x121   : > { %1970 = vrot.lane.b32.xlu1 %v6180_v31, %s5701_s14  ;;  %408 = vst.msk [vmem:[#allocation2 + $0x199] sm:$0xff] %vm366_vm0, %v6526_v21 }
 0x122   : > { %v1010_v10 = vpop.permute.xlu0 %1009 }
 0x123   : > { %1100 = vst.msk [vmem:[#allocation3 + $0x30] sm:$0xff] %vm1093_vm5, %v1010_v10  ;;  %v1016_v38 = vpop.permute.xlu1 %1015  ;;  %v6534_v10 = vld [vmem:[#allocation2 + $0x171] sm:$0xff] }
 0x124   : > { %1779 = vrot.lane.b32.xlu0 %v1710_v14, %s5700_s29  ;;  %1103 = vst.msk [vmem:[#allocation3 + $0x48] sm:$0xff] %vm1093_vm5, %v1016_v38  ;;  %v1719_v38 = vld [vmem:[#allocation2 + $0xd9] sm:$0xff] }
 0x125   : > { %1972 = vrot.lane.b32.xlu1 %v6182_v20, %s5701_s14  ;;  %409 = vst.msk [vmem:[#allocation2 + $0x1a1] sm:$0xff] %vm366_vm0, %v6534_v10 }
 0x126   : > { %v1014_v30 = vpop.permute.xlu0 %1013 }
 0x127   : > { %1102 = vst.msk [vmem:[#allocation3 + $0x40] sm:$0xff] %vm1093_vm5, %v1014_v30  ;;  %v1020_v48 = vpop.permute.xlu1 %1019 }
 0x128   : > { %1395 = vrot.lane.b32.xlu0 %v6180_v31, %s5698_s23  ;;  %1105 = vst.msk [vmem:[#allocation3 + $0x58] sm:$0xff] %vm1093_vm5, %v1020_v48  ;;  %v1712_v31 = vld [vmem:[#allocation2 + $0x81] sm:$0xff] }
 0x129   : > { %1588 = vrot.lane.b32.xlu1 %v6054_v49, %s5699_s28 }
 0x12a   : > { %v1018_v9 = vpop.permute.xlu0 %1017 }
 0x12b   : > { %1104 = vst.msk [vmem:[#allocation3 + $0x50] sm:$0xff] %vm1093_vm5, %v1018_v9  ;;  %v1024_v28 = vpop.permute.xlu1 %1023  ;;  %v1720_v9 = vld [vmem:[#allocation2 + $0xe1] sm:$0xff] }
 0x12c   : > { %1397 = vrot.lane.b32.xlu0 %v6182_v20, %s5698_s23  ;;  %1107 = vst.msk [vmem:[#allocation3 + $0x68] sm:$0xff] %vm1093_vm5, %v1024_v28 }
 0x12d   : > { %1781 = vrot.lane.b32.xlu1 %v1711_v25, %s5700_s29 }
 0x12e   : > { %v1022_v24 = vpop.permute.xlu0 %1021 }
 0x12f   : > { %1106 = vst.msk [vmem:[#allocation3 + $0x60] sm:$0xff] %vm1093_vm5, %v1022_v24  ;;  %v1028_v26 = vpop.permute.xlu1 %1027 }
 0x130   : > { %1590 = vrot.lane.b32.xlu0 %v6012_v51, %s5699_s28  ;;  %1109 = vst.msk [vmem:[#allocation3 + $0x78] sm:$0xff] %vm1093_vm5, %v1028_v26 }
 0x131   : > { %1974 = vrot.lane.b32.xlu1 %v6188_v18, %s5701_s14 }
 0x132   : > { %v1026_v27 = vpop.permute.xlu0 %1025 }
 0x133   : > { %1108 = vst.msk [vmem:[#allocation3 + $0x70] sm:$0xff] %vm1093_vm5, %v1026_v27  ;;  %v1032_v49 = vpop.permute.xlu1 %1031  ;;  %v1913_v27 = vld [vmem:[#allocation2 + $0xe2] sm:$0xff] }
 0x134   : > { %1783 = vrot.lane.b32.xlu0 %v1712_v31, %s5700_s29  ;;  %1111 = vst.msk [vmem:[#allocation3 + $0x88] sm:$0xff] %vm1093_vm5, %v1032_v49 }
 0x135   : > { %1976 = vrot.lane.b32.xlu1 %v6190_v13, %s5701_s14 }
 0x136   : > { %v1030_v20 = vpop.permute.xlu0 %1029 }
 0x137   : > { %1110 = vst.msk [vmem:[#allocation3 + $0x80] sm:$0xff] %vm1093_vm5, %v1030_v20  ;;  %v1036_v51 = vpop.permute.xlu1 %1035 }
 0x138   : > { %1399 = vrot.lane.b32.xlu0 %v6188_v18, %s5698_s23  ;;  %1113 = vst.msk [vmem:[#allocation3 + $0x98] sm:$0xff] %vm1093_vm5, %v1036_v51  ;;  %v1714_v18 = vld [vmem:[#allocation2 + $0x99] sm:$0xff] }
 0x139   : > { %1592 = vrot.lane.b32.xlu1 %v6068_v41, %s5699_s28 }
 0x13a   : > { %v1034_v35 = vpop.permute.xlu0 %1033 }
 0x13b   : > { %1112 = vst.msk [vmem:[#allocation3 + $0x90] sm:$0xff] %vm1093_vm5, %v1034_v35  ;;  %v1040_v29 = vpop.permute.xlu1 %1039 }
 0x13c   : > { %1401 = vrot.lane.b32.xlu0 %v6190_v13, %s5698_s23  ;;  %1115 = vst.msk [vmem:[#allocation3 + $0xa8] sm:$0xff] %vm1093_vm5, %v1040_v29  ;;  %v1329_v13 = vld [vmem:[#allocation2 + $0x92] sm:$0xff] }
 0x13d   : > { %1785 = vrot.lane.b32.xlu1 %v1713_v44, %s5700_s29  ;;  %v463_v44 = vld [vmem:[#allocation2 + $0x18f] sm:$0x1]  ;;  %v1721_v29 = vld [vmem:[#allocation2 + $0xf1] sm:$0xff] }
 0x13e   : > { %v1038_v63 = vpop.permute.xlu0 %1037  ;;  %481 = vst.msk [vmem:[#allocation2 + $0x191] sm:$0x1] %vm428_vm1, %v463_v44 }
 0x13f   : > { %1114 = vst.msk [vmem:[#allocation3 + $0xa0] sm:$0xff] %vm1093_vm5, %v1038_v63  ;;  %v1044_v32 = vpop.permute.xlu1 %1043 }
 0x140   : > { %1594 = vrot.lane.b32.xlu0 %v6021_v56, %s5699_s28  ;;  %1117 = vst.msk [vmem:[#allocation3 + $0xb8] sm:$0xff] %vm1093_vm5, %v1044_v32  ;;  %v1907_v56 = vld [vmem:[#allocation2 + $0x9a] sm:$0xff] }
 0x141   : > { %1978 = vrot.lane.b32.xlu1 %v6196_v12, %s5701_s14 }
 0x142   : > { %v1042_v50 = vpop.permute.xlu0 %1041 }
 0x143   : > { %1116 = vst.msk [vmem:[#allocation3 + $0xb0] sm:$0xff] %vm1093_vm5, %v1042_v50  ;;  %v1048_v41 = vpop.permute.xlu1 %1047  ;;  %v427_v50 = vld [vmem:[#allocation2 + $0x19a] sm:$0x1] }
 0x144   : > { %1787 = vrot.lane.b32.xlu0 %v1714_v18, %s5700_s29  ;;  %1119 = vst.msk [vmem:[#allocation3 + $0xc8] sm:$0xff] %vm1093_vm5, %v1048_v41 }
 0x145   : > { %1403 = vrot.lane.b32.xlu1 %v1329_v13, %s5698_s23  ;;  %446 = vst.msk [vmem:[#allocation2 + $0x198] sm:$0x1] %vm428_vm1, %v427_v50 }
 0x146   : > { %v1046_v55 = vpop.permute.xlu0 %1045 }
 0x147   : > { %1118 = vst.msk [vmem:[#allocation3 + $0xc0] sm:$0xff] %vm1093_vm5, %v1046_v55  ;;  %v1052_v6 = vpop.permute.xlu1 %1051 }
 0x148   : > { %1212 = vrot.lane.b32.xlu0 %v1714_v18, %s5697_s18  ;;  %1121 = vst.msk [vmem:[#allocation3 + $0xd8] sm:$0xff] %vm1093_vm5, %v1052_v6 }
 0x149   : > { %1405 = vrot.lane.b32.xlu1 %v1907_v56, %s5698_s23 }
 0x14a   : > { %v1050_v17 = vpop.permute.xlu0 %1049 }
 0x14b   : > { %1120 = vst.msk [vmem:[#allocation3 + $0xd0] sm:$0xff] %vm1093_vm5, %v1050_v17  ;;  %v1056_v12 = vpop.permute.xlu1 %1055  ;;  %v464_v17 = vld [vmem:[#allocation2 + $0x1a7] sm:$0x1] }
 0x14c   : > { %1980 = vrot.lane.b32.xlu0 %v1907_v56, %s5701_s14  ;;  %1123 = vst.msk [vmem:[#allocation3 + $0xe8] sm:$0xff] %vm1093_vm5, %v1056_v12  ;;  %v1915_v12 = vld [vmem:[#allocation2 + $0xfa] sm:$0xff] }
 0x14d   : > { %1598 = vrot.lane.b32.xlu1 %v6036_v61, %s5699_s28  ;;  %482 = vst.msk [vmem:[#allocation2 + $0x1a9] sm:$0x1] %vm428_vm1, %v464_v17  ;;  %v1537_v17 = vld [vmem:[#allocation2 + $0x158] sm:$0xff] }
 0x14e   : > { %v1054_v53 = vpop.permute.xlu0 %1053 }
 0x14f   : > { %1122 = vst.msk [vmem:[#allocation3 + $0xe0] sm:$0xff] %vm1093_vm5, %v1054_v53  ;;  %v1060_v8 = vpop.permute.xlu1 %1059 }
 0x150   : > { %1596 = vrot.lane.b32.xlu0 %v6085_v62, %s5699_s28  ;;  %1125 = vst.msk [vmem:[#allocation3 + $0xf8] sm:$0xff] %vm1093_vm5, %v1060_v8  ;;  %v1530_v8 = vld [vmem:[#allocation2 + $0x108] sm:$0xff] }
 0x151   : > { %1214 = vrot.lane.b32.xlu1 %v1715_v5, %s5697_s18 }
 0x152   : > { %v1058_v54 = vpop.permute.xlu0 %1057 }
 0x153   : > { %1124 = vst.msk [vmem:[#allocation3 + $0xf0] sm:$0xff] %vm1093_vm5, %v1058_v54  ;;  %v1193_v4 = vpop.permute.xlu1 %1192  ;;  %v1531_v54 = vld [vmem:[#allocation2 + $0x110] sm:$0xff] }
 0x154   : > { %1789 = vrot.lane.b32.xlu0 %v1715_v5, %s5700_s29  ;;  %1288 = vst.msk [vmem:[#allocation3 + $0x8] sm:$0xff] %vm1286_vm6, %v1193_v4 }
 0x155   : > { %1982 = vrot.lane.b32.xlu1 %v1908_v0, %s5701_s14 }
 0x156   : > { %v1191_v40 = vpop.permute.xlu0 %1190 }
 0x157   : > { %1287 = vst.msk [vmem:[#allocation3] sm:$0xff] %vm1286_vm6, %v1191_v40  ;;  %v1197_v61 = vpop.permute.xlu1 %1196  ;;  %v1723_v40 = vld [vmem:[#allocation2 + $0x109] sm:$0xff] }
 0x158   : > { %1791 = vrot.lane.b32.xlu0 %v1716_v19, %s5700_s29  ;;  %1290 = vst.msk [vmem:[#allocation3 + $0x18] sm:$0xff] %vm1286_vm6, %v1197_v61 }
 0x159   : > { %1407 = vrot.lane.b32.xlu1 %v1908_v0, %s5698_s23 }
 0x15a   : > { %v1195_v62 = vpop.permute.xlu0 %1194 }
 0x15b   : > { %1289 = vst.msk [vmem:[#allocation3 + $0x10] sm:$0xff] %vm1286_vm6, %v1195_v62  ;;  %v1201_v23 = vpop.permute.xlu1 %1200 }
 0x15c   : > { %1216 = vrot.lane.b32.xlu0 %v1716_v19, %s5697_s18  ;;  %1292 = vst.msk [vmem:[#allocation3 + $0x28] sm:$0xff] %vm1286_vm6, %v1201_v23  ;;  %v1724_v23 = vld [vmem:[#allocation2 + $0x111] sm:$0xff] }
 0x15d   : > { %1409 = vrot.lane.b32.xlu1 %v1909_v7, %s5698_s23 }
 0x15e   : > { %v1199_v60 = vpop.permute.xlu0 %1198 }
 0x15f   : > { %1291 = vst.msk [vmem:[#allocation3 + $0x20] sm:$0xff] %vm1286_vm6, %v1199_v60  ;;  %v1205_v22 = vpop.permute.xlu1 %1204  ;;  %v1916_v60 = vld [vmem:[#allocation2 + $0x10a] sm:$0xff] }
 0x160   : > { %1984 = vrot.lane.b32.xlu0 %v1909_v7, %s5701_s14  ;;  %1294 = vst.msk [vmem:[#allocation3 + $0x38] sm:$0xff] %vm1286_vm6, %v1205_v22 }
 0x161   : > { %1602 = vrot.lane.b32.xlu1 %v6043_v39, %s5699_s28 }
 0x162   : > { %v1203_v47 = vpop.permute.xlu0 %1202 }
 0x163   : > { %1293 = vst.msk [vmem:[#allocation3 + $0x30] sm:$0xff] %vm1286_vm6, %v1203_v47  ;;  %v1209_v16 = vpop.permute.xlu1 %1208 }
 0x164   : > { %1600 = vrot.lane.b32.xlu0 %v6093_v33, %s5699_s28  ;;  %1296 = vst.msk [vmem:[#allocation3 + $0x48] sm:$0xff] %vm1286_vm6, %v1209_v16 }
 0x165   : > { %1218 = vrot.lane.b32.xlu1 %v1717_v52, %s5697_s18 }
 0x166   : > { %v1207_v34 = vpop.permute.xlu0 %1206 }
 0x167   : > { %1295 = vst.msk [vmem:[#allocation3 + $0x40] sm:$0xff] %vm1286_vm6, %v1207_v34  ;;  %v1384_v15 = vpop.permute.xlu1 %1383  ;;  %v1917_v34 = vld [vmem:[#allocation2 + $0x112] sm:$0xff] }
 0x168   : > { %1793 = vrot.lane.b32.xlu0 %v1717_v52, %s5700_s29  ;;  %1480 = vst.msk [vmem:[#allocation3] sm:$0xff] %vm1479_vm7, %v1384_v15 }
 0x169   : > { %1986 = vrot.lane.b32.xlu1 %v1910_v58, %s5701_s14 }
 0x16a   : > { %v1211_v45 = vpop.permute.xlu0 %1210 }
 0x16b   : > { %1297 = vst.msk [vmem:[#allocation3 + $0x50] sm:$0xff] %vm1286_vm6, %v1211_v45  ;;  %v1577_v33 = vpop.permute.xlu1 %1576  ;;  %v1532_v45 = vld [vmem:[#allocation2 + $0x120] sm:$0xff] }
 0x16c   : > { %1795 = vrot.lane.b32.xlu0 %v1718_v2, %s5700_s29  ;;  %1673 = vst.msk [vmem:[#allocation3] sm:$0xff] %vm1672_vm8, %v1577_v33  ;;  %v1533_v33 = vld [vmem:[#allocation2 + $0x128] sm:$0xff] }
 0x16d   : > { %1411 = vrot.lane.b32.xlu1 %v1910_v58, %s5698_s23 }
 0x16e   : > { %v1386_v39 = vpop.permute.xlu0 %1385 }
 0x16f   : > { %1481 = vst.msk [vmem:[#allocation3 + $0x8] sm:$0xff] %vm1479_vm7, %v1386_v39  ;;  %v1770_v43 = vpop.permute.xlu1 %1769 }
 0x170   : > { %1220 = vrot.lane.b32.xlu0 %v1718_v2, %s5697_s18  ;;  %1866 = vst.msk [vmem:[#allocation3] sm:$0xff] %vm1865_vm9, %v1770_v43 }
 0x171   : > { %1413 = vrot.lane.b32.xlu1 %v1911_v11, %s5698_s23 }
 0x172   : > { %v1579_v57 = vpop.permute.xlu0 %1578 }
 0x173   : > { %1674 = vst.msk [vmem:[#allocation3 + $0x8] sm:$0xff] %vm1672_vm8, %v1579_v57  ;;  %v1963_v14 = vpop.permute.xlu1 %1962  ;;  %v1725_v57 = vld [vmem:[#allocation2 + $0x121] sm:$0xff] }
 0x174   : > { %1988 = vrot.lane.b32.xlu0 %v1911_v11, %s5701_s14  ;;  %2059 = vst.msk [vmem:[#allocation3] sm:$0xff] %vm2058_vm10, %v1963_v14 }
 0x175   : > { %1606 = vrot.lane.b32.xlu1 %v6050_v46, %s5699_s28 }
 0x176   : > { %v1772_v37 = vpop.permute.xlu0 %1771 }
 0x177   : > { %1867 = vst.msk [vmem:[#allocation3 + $0x8] sm:$0xff] %vm1865_vm9, %v1772_v37  ;;  %v1965_v30 = vpop.permute.xlu1 %1964 }
 0x178   : > { %1604 = vrot.lane.b32.xlu0 %v6097_v42, %s5699_s28  ;;  %2060 = vst.msk [vmem:[#allocation3 + $0x8] sm:$0xff] %vm2058_vm10, %v1965_v30  ;;  %v1912_v42 = vld [vmem:[#allocation2 + $0xda] sm:$0xff]  ;;  %v1918_v30 = vld [vmem:[#allocation2 + $0x122] sm:$0xff] }
 0x179   : > { %1222 = vrot.lane.b32.xlu1 %v1719_v38, %s5697_s18 }
 0x17a   : > { %v1388_v48 = vpop.permute.xlu0 %1387 }
 0x17b   : > { %1482 = vst.msk [vmem:[#allocation3 + $0x10] sm:$0xff] %vm1479_vm7, %v1388_v48  ;;  %v1581_v25 = vpop.permute.xlu1 %1580  ;;  %v2091_v46 = vld [vmem:[#allocation3] sm:$0xff] }
 0x17c   : > { %1797 = vrot.lane.b32.xlu0 %v1719_v38, %s5700_s29  ;;  %1675 = vst.msk [vmem:[#allocation3 + $0x10] sm:$0xff] %vm1672_vm8, %v1581_v25  ;;  %5544 = vmatprep.mubr.msk.f32.mxu0 %vm2135_vm11, %v2091_v46  ;;  %v1726_v38 = vld [vmem:[#allocation2 + $0x129] sm:$0xff] }
 0x17d   : > { %1990 = vrot.lane.b32.xlu1 %v1912_v42, %s5701_s14  ;;  %v1919_v46 = vld [vmem:[#allocation2 + $0x12a] sm:$0xff] }
 0x17e   : > { %v1390_v28 = vpop.permute.xlu0 %1389 }
 0x17f   : > { %1483 = vst.msk [vmem:[#allocation3 + $0x18] sm:$0xff] %vm1479_vm7, %v1390_v28  ;;  %v1774_v24 = vpop.permute.xlu1 %1773  ;;  %v2092_v26 = vld [vmem:[#allocation3 + $0x8] sm:$0xff] }
 0x180   : > { %1799 = vrot.lane.b32.xlu0 %v1720_v9, %s5700_s29  ;;  %1868 = vst.msk [vmem:[#allocation3 + $0x10] sm:$0xff] %vm1865_vm9, %v1774_v24  ;;  %5545 = vmatmul.mubr.msk.f32.vlgmr.msra.gmra.mrb[0].mxu0 %vm2135_vm11, %v2092_v26  ;;  %v1534_v26 = vld [vmem:[#allocation2 + $0x138] sm:$0xff] }
 0x181   : > { %1415 = vrot.lane.b32.xlu1 %v1912_v42, %s5698_s23 }
 0x182   : > { %v1583_v31 = vpop.permute.xlu0 %1582 }
 0x183   : > { %1676 = vst.msk [vmem:[#allocation3 + $0x18] sm:$0xff] %vm1672_vm8, %v1583_v31  ;;  %v1967_v49 = vpop.permute.xlu1 %1966 }
 0x184   : > { %1224 = vrot.lane.b32.xlu0 %v1720_v9, %s5697_s18  ;;  %2061 = vst.msk [vmem:[#allocation3 + $0x10] sm:$0xff] %vm2058_vm10, %v1967_v49 }
 0x185   : > { %1417 = vrot.lane.b32.xlu1 %v1913_v27, %s5698_s23 }
 0x186   : > { %v1776_v20 = vpop.permute.xlu0 %1775 }
 0x187   : > { %1869 = vst.msk [vmem:[#allocation3 + $0x18] sm:$0xff] %vm1865_vm9, %v1776_v20  ;;  %v1969_v51 = vpop.permute.xlu1 %1968 }
 0x188   : > { %1992 = vrot.lane.b32.xlu0 %v1913_v27, %s5701_s14  ;;  %2062 = vst.msk [vmem:[#allocation3 + $0x18] sm:$0xff] %vm2058_vm10, %v1969_v51  ;;  %v1535_v27 = vld [vmem:[#allocation2 + $0x140] sm:$0xff] }
 0x189   : > { %1610 = vrot.lane.b32.xlu1 %v6059_v59, %s5699_s28  ;;  %v1722_v59 = vld [vmem:[#allocation2 + $0xf9] sm:$0xff] }
 0x18a   : > { %v1392_v35 = vpop.permute.xlu0 %1391 }
 0x18b   : > { %1484 = vst.msk [vmem:[#allocation3 + $0x20] sm:$0xff] %vm1479_vm7, %v1392_v35  ;;  %v1585_v63 = vpop.permute.xlu1 %1584  ;;  %v2093_v32 = vld [vmem:[#allocation3 + $0x10] sm:$0xff] }
 0x18c   : > { %1608 = vrot.lane.b32.xlu0 %v6103_v36, %s5699_s28  ;;  %1677 = vst.msk [vmem:[#allocation3 + $0x20] sm:$0xff] %vm1672_vm8, %v1585_v63  ;;  %5547 = vmatprep.mubr.msk.f32.mxu0 %vm2135_vm11, %v2093_v32  ;;  %v1914_v36 = vld [vmem:[#allocation2 + $0xf2] sm:$0xff]  ;;  %v1728_v63 = vld [vmem:[#allocation2 + $0x141] sm:$0xff] }
 0x18d   : > { %1226 = vrot.lane.b32.xlu1 %v1721_v29, %s5697_s18  ;;  %v1727_v35 = vld [vmem:[#allocation2 + $0x139] sm:$0xff] }
 0x18e   : > { %v1394_v18 = vpop.permute.xlu0 %1393 }
 0x18f   : > { %1485 = vst.msk [vmem:[#allocation3 + $0x28] sm:$0xff] %vm1479_vm7, %v1394_v18  ;;  %v1778_v13 = vpop.permute.xlu1 %1777  ;;  %v2094_v55 = vld [vmem:[#allocation3 + $0x18] sm:$0xff]  ;;  %v1920_v18 = vld [vmem:[#allocation2 + $0x13a] sm:$0xff] }
 0x190   : > { %1801 = vrot.lane.b32.xlu0 %v1721_v29, %s5700_s29  ;;  %1870 = vst.msk [vmem:[#allocation3 + $0x20] sm:$0xff] %vm1865_vm9, %v1778_v13  ;;  %5548 = vmatmul.mubr.msk.f32.gmra.mrb[2].mxu0 %vm2135_vm11, %v2094_v55 }
 0x191   : > { %1994 = vrot.lane.b32.xlu1 %v1914_v36, %s5701_s14 }
 0x192   : > { %v1587_v41 = vpop.permute.xlu0 %1586 }
 0x193   : > { %1678 = vst.msk [vmem:[#allocation3 + $0x28] sm:$0xff] %vm1672_vm8, %v1587_v41  ;;  %v1971_v56 = vpop.permute.xlu1 %1970  ;;  %v1921_v41 = vld [vmem:[#allocation2 + $0x142] sm:$0xff] }
 0x194   : > { %1803 = vrot.lane.b32.xlu0 %v1722_v59, %s5700_s29  ;;  %2063 = vst.msk [vmem:[#allocation3 + $0x20] sm:$0xff] %vm2058_vm10, %v1971_v56 }
 0x195   : > { %1419 = vrot.lane.b32.xlu1 %v1914_v36, %s5698_s23 }
 0x196   : > { %v1780_v6 = vpop.permute.xlu0 %1779 }
 0x197   : > { %1871 = vst.msk [vmem:[#allocation3 + $0x28] sm:$0xff] %vm1865_vm9, %v1780_v6  ;;  %v1973_v53 = vpop.permute.xlu1 %1972  ;;  %v1536_v6 = vld [vmem:[#allocation2 + $0x150] sm:$0xff] }
 0x198   : > { %1228 = vrot.lane.b32.xlu0 %v1722_v59, %s5697_s18  ;;  %2064 = vst.msk [vmem:[#allocation3 + $0x28] sm:$0xff] %vm2058_vm10, %v1973_v53 }
 0x199   : > { %1421 = vrot.lane.b32.xlu1 %v1915_v12, %s5698_s23 }
 0x19a   : > { %v1396_v5 = vpop.permute.xlu0 %1395 }
 0x19b   : > { %1486 = vst.msk [vmem:[#allocation3 + $0x30] sm:$0xff] %vm1479_vm7, %v1396_v5  ;;  %v1589_v19 = vpop.permute.xlu1 %1588  ;;  %v2095_v4 = vld [vmem:[#allocation3 + $0x20] sm:$0xff] }
 0x19c   : > { %1996 = vrot.lane.b32.xlu0 %v1915_v12, %s5701_s14  ;;  %1679 = vst.msk [vmem:[#allocation3 + $0x30] sm:$0xff] %vm1672_vm8, %v1589_v19  ;;  %5550 = vmatprep.mubr.msk.f32.mxu0 %vm2135_vm11, %v2095_v4  ;;  %v1922_v4 = vld [vmem:[#allocation2 + $0x152] sm:$0xff] }
 0x19d   : > { %1614 = vrot.lane.b32.xlu1 %v1531_v54, %s5699_s28 }
 0x19e   : > { %v1398_v0 = vpop.permute.xlu0 %1397 }
 0x19f   : > { %1487 = vst.msk [vmem:[#allocation3 + $0x38] sm:$0xff] %vm1479_vm7, %v1398_v0  ;;  %v1782_v61 = vpop.permute.xlu1 %1781  ;;  %v2096_v7 = vld [vmem:[#allocation3 + $0x28] sm:$0xff] }
 0x1a0   : > { %1612 = vrot.lane.b32.xlu0 %v1530_v8, %s5699_s28  ;;  %1872 = vst.msk [vmem:[#allocation3 + $0x30] sm:$0xff] %vm1865_vm9, %v1782_v61  ;;  %5551 = vmatmul.mubr.msk.f32.gmra.mrb[4].mxu0 %vm2135_vm11, %v2096_v7  ;;  %v1729_v8 = vld [vmem:[#allocation2 + $0x151] sm:$0xff]  ;;  %v1730_v0 = vld [vmem:[#allocation2 + $0x159] sm:$0xff] }
 0x1a1   : > { %1230 = vrot.lane.b32.xlu1 %v1723_v40, %s5697_s18 }
 0x1a2   : > { %v1591_v62 = vpop.permute.xlu0 %1590 }
 0x1a3   : > { %1680 = vst.msk [vmem:[#allocation3 + $0x38] sm:$0xff] %vm1672_vm8, %v1591_v62  ;;  %v1975_v22 = vpop.permute.xlu1 %1974 }
 0x1a4   : > { %1805 = vrot.lane.b32.xlu0 %v1723_v40, %s5700_s29  ;;  %2065 = vst.msk [vmem:[#allocation3 + $0x30] sm:$0xff] %vm2058_vm10, %v1975_v22 }
 0x1a5   : > { %1998 = vrot.lane.b32.xlu1 %v1916_v60, %s5701_s14 }
 0x1a6   : > { %v1784_v47 = vpop.permute.xlu0 %1783 }
 0x1a7   : > { %1873 = vst.msk [vmem:[#allocation3 + $0x38] sm:$0xff] %vm1865_vm9, %v1784_v47  ;;  %v1977_v52 = vpop.permute.xlu1 %1976 }
 0x1a8   : > { %1807 = vrot.lane.b32.xlu0 %v1724_v23, %s5700_s29  ;;  %2066 = vst.msk [vmem:[#allocation3 + $0x38] sm:$0xff] %vm2058_vm10, %v1977_v52  ;;  %v1538_v52 = vld [vmem:[#allocation2 + $0x168] sm:$0xff] }
 0x1a9   : > { %1423 = vrot.lane.b32.xlu1 %v1916_v60, %s5698_s23  ;;  %v1923_v60 = vld [vmem:[#allocation2 + $0x15a] sm:$0xff] }
 0x1aa   : > { %v1400_v16 = vpop.permute.xlu0 %1399 }
 0x1ab   : > { %1488 = vst.msk [vmem:[#allocation3 + $0x40] sm:$0xff] %vm1479_vm7, %v1400_v16  ;;  %v1593_v58 = vpop.permute.xlu1 %1592  ;;  %v2097_v15 = vld [vmem:[#allocation3 + $0x30] sm:$0xff]  ;;  %v1539_v16 = vld [vmem:[#allocation2 + $0x170] sm:$0xff] }
 0x1ac   : > { %1232 = vrot.lane.b32.xlu0 %v1724_v23, %s5697_s18  ;;  %1681 = vst.msk [vmem:[#allocation3 + $0x40] sm:$0xff] %vm1672_vm8, %v1593_v58  ;;  %5553 = vmatprep.mubr.msk.f32.mxu0 %vm2135_vm11, %v2097_v15 }
 0x1ad   : > { %1425 = vrot.lane.b32.xlu1 %v1917_v34, %s5698_s23 }
 0x1ae   : > { %v1402_v2 = vpop.permute.xlu0 %1401 }
 0x1af   : > { %1489 = vst.msk [vmem:[#allocation3 + $0x48] sm:$0xff] %vm1479_vm7, %v1402_v2  ;;  %v1786_v11 = vpop.permute.xlu1 %1785  ;;  %v2098_v43 = vld [vmem:[#allocation3 + $0x38] sm:$0xff] }
 0x1b0   : > { %2000 = vrot.lane.b32.xlu0 %v1917_v34, %s5701_s14  ;;  %1874 = vst.msk [vmem:[#allocation3 + $0x40] sm:$0xff] %vm1865_vm9, %v1786_v11  ;;  %5554 = vmatmul.mubr.msk.f32.gmra.mrb[6].mxu0 %vm2135_vm11, %v2098_v43 }
 0x1b1   : > { %1618 = vrot.lane.b32.xlu1 %v1533_v33, %s5699_s28  ;;  %v1924_v33 = vld [vmem:[#allocation2 + $0x16a] sm:$0xff] }
 0x1b2   : > { %v1595_v39 = vpop.permute.xlu0 %1594 }
 0x1b3   : > { %1682 = vst.msk [vmem:[#allocation3 + $0x48] sm:$0xff] %vm1672_vm8, %v1595_v39  ;;  %v1979_v37 = vpop.permute.xlu1 %1978 }
 0x1b4   : > { %1616 = vrot.lane.b32.xlu0 %v1532_v45, %s5699_s28  ;;  %2067 = vst.msk [vmem:[#allocation3 + $0x40] sm:$0xff] %vm2058_vm10, %v1979_v37 }
 0x1b5   : > { %1234 = vrot.lane.b32.xlu1 %v1725_v57, %s5697_s18 }
 0x1b6   : > { %v1788_v14 = vpop.permute.xlu0 %1787 }
 0x1b7   : > { %1875 = vst.msk [vmem:[#allocation3 + $0x48] sm:$0xff] %vm1865_vm9, %v1788_v14  ;;  %v1404_v9 = vpop.permute.xlu1 %1403 }
 0x1b8   : > { %1809 = vrot.lane.b32.xlu0 %v1725_v57, %s5700_s29  ;;  %1490 = vst.msk [vmem:[#allocation3 + $0x50] sm:$0xff] %vm1479_vm7, %v1404_v9 }
 0x1b9   : > { %2002 = vrot.lane.b32.xlu1 %v1918_v30, %s5701_s14 }
 0x1ba   : > { %v1213_v48 = vpop.permute.xlu0 %1212 }
 0x1bb   : > { %1298 = vst.msk [vmem:[#allocation3 + $0x58] sm:$0xff] %vm1286_vm6, %v1213_v48  ;;  %v1406_v25 = vpop.permute.xlu1 %1405  ;;  %v2099_v28 = vld [vmem:[#allocation3 + $0x40] sm:$0xff]  ;;  %v1541_v48 = vld [vmem:[#allocation2 + $0x188] sm:$0xff] }
 0x1bc   : > { %1811 = vrot.lane.b32.xlu0 %v1726_v38, %s5700_s29  ;;  %1491 = vst.msk [vmem:[#allocation3 + $0x58] sm:$0xff] %vm1479_vm7, %v1406_v25  ;;  %5556 = vmatprep.mubr.msk.f32.mxu0 %vm2135_vm11, %v2099_v28 }
 0x1bd   : > { %1427 = vrot.lane.b32.xlu1 %v1918_v30, %s5698_s23  ;;  %v1540_v30 = vld [vmem:[#allocation2 + $0x180] sm:$0xff] }
 0x1be   : > { %v1981_v42 = vpop.permute.xlu0 %1980 }
 0x1bf   : > { %2068 = vst.msk [vmem:[#allocation3 + $0x48] sm:$0xff] %vm2058_vm10, %v1981_v42  ;;  %v1599_v31 = vpop.permute.xlu1 %1598 }
 0x1c0   : > { %1236 = vrot.lane.b32.xlu0 %v1726_v38, %s5697_s18  ;;  %1684 = vst.msk [vmem:[#allocation3 + $0x58] sm:$0xff] %vm1672_vm8, %v1599_v31  ;;  %v1926_v31 = vld [vmem:[#allocation2 + $0x182] sm:$0xff] }
 0x1c1   : > { %1429 = vrot.lane.b32.xlu1 %v1919_v46, %s5698_s23 }
 0x1c2   : > { %v1597_v24 = vpop.permute.xlu0 %1596 }
 0x1c3   : > { %1683 = vst.msk [vmem:[#allocation3 + $0x50] sm:$0xff] %vm1672_vm8, %v1597_v24  ;;  %v1215_v20 = vpop.permute.xlu1 %1214  ;;  %v1734_v24 = vld [vmem:[#allocation2 + $0x189] sm:$0xff] }
 0x1c4   : > { %2004 = vrot.lane.b32.xlu0 %v1919_v46, %s5701_s14  ;;  %1299 = vst.msk [vmem:[#allocation3 + $0x60] sm:$0xff] %vm1286_vm6, %v1215_v20 }
 0x1c5   : > { %1622 = vrot.lane.b32.xlu1 %v1535_v27, %s5699_s28 }
 0x1c6   : > { %v1790_v49 = vpop.permute.xlu0 %1789  ;;  %v2100_v51 = vld [vmem:[#allocation3 + $0x48] sm:$0xff] }
 0x1c7   : > { %1876 = vst.msk [vmem:[#allocation3 + $0x50] sm:$0xff] %vm1865_vm9, %v1790_v49  ;;  %5557 = vmatmul.mubr.msk.f32.gmra.mrb[8].mxu0 %vm2135_vm11, %v2100_v51  ;;  %v1983_v29 = vpop.permute.xlu1 %1982 }
 0x1c8   : > { %1620 = vrot.lane.b32.xlu0 %v1534_v26, %s5699_s28  ;;  %2069 = vst.msk [vmem:[#allocation3 + $0x50] sm:$0xff] %vm2058_vm10, %v1983_v29 }
 0x1c9   : > { %1238 = vrot.lane.b32.xlu1 %v1727_v35, %s5697_s18 }
 0x1ca   : > { %v1792_v44 = vpop.permute.xlu0 %1791 }
 0x1cb   : > { %1877 = vst.msk [vmem:[#allocation3 + $0x58] sm:$0xff] %vm1865_vm9, %v1792_v44  ;;  %v1408_v50 = vpop.permute.xlu1 %1407 }
 0x1cc   : > { %1813 = vrot.lane.b32.xlu0 %v1727_v35, %s5700_s29  ;;  %1492 = vst.msk [vmem:[#allocation3 + $0x60] sm:$0xff] %vm1479_vm7, %v1408_v50  ;;  %v1927_v35 = vld [vmem:[#allocation2 + $0x18a] sm:$0xff] }
 0x1cd   : > { %2006 = vrot.lane.b32.xlu1 %v1920_v18, %s5701_s14 }
 0x1ce   : > { %v1217_v32 = vpop.permute.xlu0 %1216 }
 0x1cf   : > { %1300 = vst.msk [vmem:[#allocation3 + $0x68] sm:$0xff] %vm1286_vm6, %v1217_v32  ;;  %v1410_v36 = vpop.permute.xlu1 %1409  ;;  %v2101_v13 = vld [vmem:[#allocation3 + $0x50] sm:$0xff] }
 0x1d0   : > { %1815 = vrot.lane.b32.xlu0 %v1728_v63, %s5700_s29  ;;  %1493 = vst.msk [vmem:[#allocation3 + $0x68] sm:$0xff] %vm1479_vm7, %v1410_v36  ;;  %5559 = vmatprep.mubr.msk.f32.mxu0 %vm2135_vm11, %v2101_v13  ;;  %v1735_v36 = vld [vmem:[#allocation2 + $0x199] sm:$0xff]  ;;  %v1736_v13 = vld [vmem:[#allocation2 + $0x1a1] sm:$0xff] }
 0x1d1   : > { %1431 = vrot.lane.b32.xlu1 %v1920_v18, %s5698_s23  ;;  %v1543_v18 = vld [vmem:[#allocation2 + $0x1a0] sm:$0xff] }
 0x1d2   : > { %v1985_v59 = vpop.permute.xlu0 %1984 }
 0x1d3   : > { %2070 = vst.msk [vmem:[#allocation3 + $0x58] sm:$0xff] %vm2058_vm10, %v1985_v59  ;;  %v1603_v56 = vpop.permute.xlu1 %1602 }
 0x1d4   : > { %1240 = vrot.lane.b32.xlu0 %v1728_v63, %s5697_s18  ;;  %1686 = vst.msk [vmem:[#allocation3 + $0x68] sm:$0xff] %vm1672_vm8, %v1603_v56  ;;  %v1542_v63 = vld [vmem:[#allocation2 + $0x198] sm:$0xff] }
 0x1d5   : > { %1433 = vrot.lane.b32.xlu1 %v1921_v41, %s5698_s23  ;;  %v1928_v56 = vld [vmem:[#allocation2 + $0x19a] sm:$0xff] }
 0x1d6   : > { %v1601_v55 = vpop.permute.xlu0 %1600 }
 0x1d7   : > { %1685 = vst.msk [vmem:[#allocation3 + $0x60] sm:$0xff] %vm1672_vm8, %v1601_v55  ;;  %v1219_v53 = vpop.permute.xlu1 %1218 }
 0x1d8   : > { %2008 = vrot.lane.b32.xlu0 %v1921_v41, %s5701_s14  ;;  %1301 = vst.msk [vmem:[#allocation3 + $0x70] sm:$0xff] %vm1286_vm6, %v1219_v53 }
 0x1d9   : > { %1626 = vrot.lane.b32.xlu1 %v1537_v17, %s5699_s28 }
 0x1da   : > { %v1794_v12 = vpop.permute.xlu0 %1793  ;;  %v2102_v5 = vld [vmem:[#allocation3 + $0x58] sm:$0xff] }
 0x1db   : > { %1878 = vst.msk [vmem:[#allocation3 + $0x60] sm:$0xff] %vm1865_vm9, %v1794_v12  ;;  %5560 = vmatmul.mubr.msk.f32.gmra.mrb[10].mxu0 %vm2135_vm11, %v2102_v5  ;;  %v1987_v19 = vpop.permute.xlu1 %1986 }
 0x1dc   : > { %1624 = vrot.lane.b32.xlu0 %v1536_v6, %s5699_s28  ;;  %2071 = vst.msk [vmem:[#allocation3 + $0x60] sm:$0xff] %vm2058_vm10, %v1987_v19  ;;  %v1929_v6 = vld [vmem:[#allocation2 + $0x1a2] sm:$0xff] }
 0x1dd   : > { %1242 = vrot.lane.b32.xlu1 %v1729_v8, %s5697_s18 }
 0x1de   : > { %v1796_v54 = vpop.permute.xlu0 %1795 }
 0x1df   : > { %1879 = vst.msk [vmem:[#allocation3 + $0x68] sm:$0xff] %vm1865_vm9, %v1796_v54  ;;  %v1412_v61 = vpop.permute.xlu1 %1411 }
 0x1e0   : > { %1817 = vrot.lane.b32.xlu0 %v1729_v8, %s5700_s29  ;;  %1494 = vst.msk [vmem:[#allocation3 + $0x70] sm:$0xff] %vm1479_vm7, %v1412_v61 }
 0x1e1   : > { %2010 = vrot.lane.b32.xlu1 %v1922_v4, %s5701_s14 }
 0x1e2   : > { %v1221_v40 = vpop.permute.xlu0 %1220 }
 0x1e3   : > { %1302 = vst.msk [vmem:[#allocation3 + $0x78] sm:$0xff] %vm1286_vm6, %v1221_v40  ;;  %v1414_v7 = vpop.permute.xlu1 %1413  ;;  %v2103_v23 = vld [vmem:[#allocation3 + $0x60] sm:$0xff] }
 0x1e4   : > { %1819 = vrot.lane.b32.xlu0 %v1730_v0, %s5700_s29  ;;  %1495 = vst.msk [vmem:[#allocation3 + $0x78] sm:$0xff] %vm1479_vm7, %v1414_v7  ;;  %5562 = vmatprep.mubr.msk.f32.mxu0 %vm2135_vm11, %v2103_v23 }
 0x1e5   : > { %1435 = vrot.lane.b32.xlu1 %v1922_v4, %s5698_s23 }
 0x1e6   : > { %v1989_v62 = vpop.permute.xlu0 %1988 }
 0x1e7   : > { %2072 = vst.msk [vmem:[#allocation3 + $0x68] sm:$0xff] %vm2058_vm10, %v1989_v62  ;;  %v1607_v47 = vpop.permute.xlu1 %1606 }
 0x1e8   : > { %1244 = vrot.lane.b32.xlu0 %v1730_v0, %s5697_s18  ;;  %1688 = vst.msk [vmem:[#allocation3 + $0x78] sm:$0xff] %vm1672_vm8, %v1607_v47 }
 0x1e9   : > { %1437 = vrot.lane.b32.xlu1 %v1923_v60, %s5698_s23 }
 0x1ea   : > { %v1605_v22 = vpop.permute.xlu0 %1604 }
 0x1eb   : > { %1687 = vst.msk [vmem:[#allocation3 + $0x70] sm:$0xff] %vm1672_vm8, %v1605_v22  ;;  %v1223_v2 = vpop.permute.xlu1 %1222 }
 0x1ec   : > { %2012 = vrot.lane.b32.xlu0 %v1923_v60, %s5701_s14  ;;  %1303 = vst.msk [vmem:[#allocation3 + $0x80] sm:$0xff] %vm1286_vm6, %v1223_v2 }
 0x1ed   : > { %1630 = vrot.lane.b32.xlu1 %v1539_v16, %s5699_s28 }
 0x1ee   : > { %v1798_v34 = vpop.permute.xlu0 %1797  ;;  %v2104_v58 = vld [vmem:[#allocation3 + $0x68] sm:$0xff] }
 0x1ef   : > { %1880 = vst.msk [vmem:[#allocation3 + $0x70] sm:$0xff] %vm1865_vm9, %v1798_v34  ;;  %5563 = vmatmul.mubr.msk.f32.gmra.mrb[12].mxu0 %vm2135_vm11, %v2104_v58  ;;  %v1991_v45 = vpop.permute.xlu1 %1990 }
 0x1f0   : > { %1628 = vrot.lane.b32.xlu0 %v1538_v52, %s5699_s28  ;;  %2073 = vst.msk [vmem:[#allocation3 + $0x70] sm:$0xff] %vm2058_vm10, %v1991_v45 }
 0x1f1   : > { %1246 = vrot.lane.b32.xlu1 %v6526_v21, %s5697_s18 }
 0x1f2   : > { %v1800_v15 = vpop.permute.xlu0 %1799 }
 0x1f3   : > { %1881 = vst.msk [vmem:[#allocation3 + $0x78] sm:$0xff] %vm1865_vm9, %v1800_v15  ;;  %v1416_v11 = vpop.permute.xlu1 %1415 }
 0x1f4   : > { %1821 = vrot.lane.b32.xlu0 %v6526_v21, %s5700_s29  ;;  %1496 = vst.msk [vmem:[#allocation3 + $0x80] sm:$0xff] %vm1479_vm7, %v1416_v11  ;;  %v1925_v21 = vld [vmem:[#allocation2 + $0x172] sm:$0xff] }
 0x1f5   : > { %2014 = vrot.lane.b32.xlu1 %v1924_v33, %s5701_s14 }
 0x1f6   : > { %v1225_v39 = vpop.permute.xlu0 %1224 }
 0x1f7   : > { %1304 = vst.msk [vmem:[#allocation3 + $0x88] sm:$0xff] %vm1286_vm6, %v1225_v39  ;;  %v1418_v57 = vpop.permute.xlu1 %1417  ;;  %v2105_v14 = vld [vmem:[#allocation3 + $0x70] sm:$0xff] }
 0x1f8   : > { %1823 = vrot.lane.b32.xlu0 %v6534_v10, %s5700_s29  ;;  %1497 = vst.msk [vmem:[#allocation3 + $0x88] sm:$0xff] %vm1479_vm7, %v1418_v57  ;;  %5565 = vmatprep.mubr.msk.f32.mxu0 %vm2135_vm11, %v2105_v14 }
 0x1f9   : > { %1439 = vrot.lane.b32.xlu1 %v1924_v33, %s5698_s23 }
 0x1fa   : > { %v1993_v43 = vpop.permute.xlu0 %1992 }
 0x1fb   : > { %2074 = vst.msk [vmem:[#allocation3 + $0x78] sm:$0xff] %vm2058_vm10, %v1993_v43  ;;  %v1611_v38 = vpop.permute.xlu1 %1610 }
 0x1fc   : > { %1248 = vrot.lane.b32.xlu0 %v6534_v10, %s5697_s18  ;;  %1690 = vst.msk [vmem:[#allocation3 + $0x88] sm:$0xff] %vm1672_vm8, %v1611_v38  ;;  %v1733_v10 = vld [vmem:[#allocation2 + $0x181] sm:$0xff] }
 0x1fd   : > { %1441 = vrot.lane.b32.xlu1 %v1925_v21, %s5698_s23 }
 0x1fe   : > { %v1609_v37 = vpop.permute.xlu0 %1608 }
 0x1ff   : > { %1689 = vst.msk [vmem:[#allocation3 + $0x80] sm:$0xff] %vm1672_vm8, %v1609_v37  ;;  %v1227_v42 = vpop.permute.xlu1 %1226 }
 0x200   : > { %2016 = vrot.lane.b32.xlu0 %v1925_v21, %s5701_s14  ;;  %1305 = vst.msk [vmem:[#allocation3 + $0x90] sm:$0xff] %vm1286_vm6, %v1227_v42 }
 0x201   : > { %1634 = vrot.lane.b32.xlu1 %v1541_v48, %s5699_s28 }
 0x202   : > { %v1802_v9 = vpop.permute.xlu0 %1801  ;;  %v2106_v25 = vld [vmem:[#allocation3 + $0x78] sm:$0xff] }
 0x203   : > { %1882 = vst.msk [vmem:[#allocation3 + $0x80] sm:$0xff] %vm1865_vm9, %v1802_v9  ;;  %5566 = vmatmul.mubr.msk.f32.gmra.mrb[14].mxu0 %vm2135_vm11, %v2106_v25  ;;  %v1995_v46 = vpop.permute.xlu1 %1994 }
 0x204   : > { %1632 = vrot.lane.b32.xlu0 %v1540_v30, %s5699_s28  ;;  %2075 = vst.msk [vmem:[#allocation3 + $0x80] sm:$0xff] %vm2058_vm10, %v1995_v46 }
 0x205   : > { %1250 = vrot.lane.b32.xlu1 %v1733_v10, %s5697_s18 }
 0x206   : > { %v1804_v28 = vpop.permute.xlu0 %1803 }
 0x207   : > { %1883 = vst.msk [vmem:[#allocation3 + $0x88] sm:$0xff] %vm1865_vm9, %v1804_v28  ;;  %v1420_v27 = vpop.permute.xlu1 %1419 }
 0x208   : > { %1825 = vrot.lane.b32.xlu0 %v1733_v10, %s5700_s29  ;;  %1498 = vst.msk [vmem:[#allocation3 + $0x90] sm:$0xff] %vm1479_vm7, %v1420_v27 }
 0x209   : > { %2018 = vrot.lane.b32.xlu1 %v1926_v31, %s5701_s14 }
 0x20a   : > { %v1229_v26 = vpop.permute.xlu0 %1228 }
 0x20b   : > { %1306 = vst.msk [vmem:[#allocation3 + $0x98] sm:$0xff] %vm1286_vm6, %v1229_v26  ;;  %v1422_v20 = vpop.permute.xlu1 %1421  ;;  %v2107_v51 = vld [vmem:[#allocation3 + $0x80] sm:$0xff] }
 0x20c   : > { %1827 = vrot.lane.b32.xlu0 %v1734_v24, %s5700_s29  ;;  %1499 = vst.msk [vmem:[#allocation3 + $0x98] sm:$0xff] %vm1479_vm7, %v1422_v20  ;;  %5568 = vmatprep.mubr.msk.f32.mxu0 %vm2135_vm11, %v2107_v51 }
 0x20d   : > { %1443 = vrot.lane.b32.xlu1 %v1926_v31, %s5698_s23 }
 0x20e   : > { %v1997_v49 = vpop.permute.xlu0 %1996 }
 0x20f   : > { %2076 = vst.msk [vmem:[#allocation3 + $0x88] sm:$0xff] %vm2058_vm10, %v1997_v49  ;;  %v1615_v29 = vpop.permute.xlu1 %1614 }
 0x210   : > { %1252 = vrot.lane.b32.xlu0 %v1734_v24, %s5697_s18  ;;  %1692 = vst.msk [vmem:[#allocation3 + $0x98] sm:$0xff] %vm1672_vm8, %v1615_v29 }
 0x211   : > { %1445 = vrot.lane.b32.xlu1 %v1927_v35, %s5698_s23 }
 0x212   : > { %v1613_v44 = vpop.permute.xlu0 %1612 }
 0x213   : > { %1691 = vst.msk [vmem:[#allocation3 + $0x90] sm:$0xff] %vm1672_vm8, %v1613_v44  ;;  %v1231_v50 = vpop.permute.xlu1 %1230 }
 0x214   : > { %2020 = vrot.lane.b32.xlu0 %v1927_v35, %s5701_s14  ;;  %1307 = vst.msk [vmem:[#allocation3 + $0xa0] sm:$0xff] %vm1286_vm6, %v1231_v50 }
 0x215   : > { %1638 = vrot.lane.b32.xlu1 %v1543_v18, %s5699_s28 }
 0x216   : > { %v1806_v32 = vpop.permute.xlu0 %1805  ;;  %v2108_v59 = vld [vmem:[#allocation3 + $0x88] sm:$0xff] }
 0x217   : > { %1884 = vst.msk [vmem:[#allocation3 + $0x90] sm:$0xff] %vm1865_vm9, %v1806_v32  ;;  %5569 = vmatmul.mubr.msk.f32.gmra.mrb[16].mxu0 %vm2135_vm11, %v2108_v59  ;;  %v1999_v55 = vpop.permute.xlu1 %1998 }
 0x218   : > { %1636 = vrot.lane.b32.xlu0 %v1542_v63, %s5699_s28  ;;  %2077 = vst.msk [vmem:[#allocation3 + $0x90] sm:$0xff] %vm2058_vm10, %v1999_v55 }
 0x219   : > { %1831 = vrot.lane.b32.xlu1 %v1736_v13, %s5700_s29 }
 0x21a   : > { %v1808_v41 = vpop.permute.xlu0 %1807 }
 0x21b   : > { %1885 = vst.msk [vmem:[#allocation3 + $0x98] sm:$0xff] %vm1865_vm9, %v1808_v41  ;;  %v1424_v12 = vpop.permute.xlu1 %1423 }
 0x21c   : > { %1829 = vrot.lane.b32.xlu0 %v1735_v36, %s5700_s29  ;;  %1500 = vst.msk [vmem:[#allocation3 + $0xa0] sm:$0xff] %vm1479_vm7, %v1424_v12 }
 0x21d   : > { %2024 = vrot.lane.b32.xlu1 %v1929_v6, %s5701_s14 }
 0x21e   : > { %v1233_v17 = vpop.permute.xlu0 %1232 }
 0x21f   : > { %1308 = vst.msk [vmem:[#allocation3 + $0xa8] sm:$0xff] %vm1286_vm6, %v1233_v17  ;;  %v1426_v5 = vpop.permute.xlu1 %1425  ;;  %v2109_v8 = vld [vmem:[#allocation3 + $0x90] sm:$0xff] }
 0x220   : > { %2022 = vrot.lane.b32.xlu0 %v1928_v56, %s5701_s14  ;;  %1501 = vst.msk [vmem:[#allocation3 + $0xa8] sm:$0xff] %vm1479_vm7, %v1426_v5  ;;  %5571 = vmatprep.mubr.msk.f32.mxu0 %vm2135_vm11, %v2109_v8 }
 0x222   : > { %v2001_v53 = vpop.permute.xlu0 %2000 }
 0x223   : > { %2078 = vst.msk [vmem:[#allocation3 + $0x98] sm:$0xff] %vm2058_vm10, %v2001_v53  ;;  %v1619_v19 = vpop.permute.xlu1 %1618 }
 0x224   : > { %1694 = vst.msk [vmem:[#allocation3 + $0xa8] sm:$0xff] %vm1672_vm8, %v1619_v19 }
 0x226   : > { %v1617_v54 = vpop.permute.xlu0 %1616 }
 0x227   : > { %1693 = vst.msk [vmem:[#allocation3 + $0xa0] sm:$0xff] %vm1672_vm8, %v1617_v54  ;;  %v1235_v4 = vpop.permute.xlu1 %1234 }
 0x228   : > { %1309 = vst.msk [vmem:[#allocation3 + $0xb0] sm:$0xff] %vm1286_vm6, %v1235_v4 }
 0x22a   : > { %v1810_v0 = vpop.permute.xlu0 %1809  ;;  %v2110_v40 = vld [vmem:[#allocation3 + $0x98] sm:$0xff] }
 0x22b   : > { %1886 = vst.msk [vmem:[#allocation3 + $0xa0] sm:$0xff] %vm1865_vm9, %v1810_v0  ;;  %5572 = vmatmul.mubr.msk.f32.gmra.mrb[18].mxu0 %vm2135_vm11, %v2110_v40  ;;  %v2003_v62 = vpop.permute.xlu1 %2002 }
 0x22c   : > { %2079 = vst.msk [vmem:[#allocation3 + $0xa0] sm:$0xff] %vm2058_vm10, %v2003_v62 }
 0x22e   : > { %v1812_v61 = vpop.permute.xlu0 %1811 }
 0x22f   : > { %1887 = vst.msk [vmem:[#allocation3 + $0xa8] sm:$0xff] %vm1865_vm9, %v1812_v61  ;;  %v1428_v23 = vpop.permute.xlu1 %1427 }
 0x230   : > { %1502 = vst.msk [vmem:[#allocation3 + $0xb0] sm:$0xff] %vm1479_vm7, %v1428_v23 }
 0x232   : > { %v1237_v7 = vpop.permute.xlu0 %1236 }
 0x233   : > { %1310 = vst.msk [vmem:[#allocation3 + $0xb8] sm:$0xff] %vm1286_vm6, %v1237_v7  ;;  %v1430_v22 = vpop.permute.xlu1 %1429  ;;  %v2111_v47 = vld [vmem:[#allocation3 + $0xa0] sm:$0xff] }
 0x234   : > { %1503 = vst.msk [vmem:[#allocation3 + $0xb8] sm:$0xff] %vm1479_vm7, %v1430_v22  ;;  %5574 = vmatprep.mubr.msk.f32.mxu0 %vm2135_vm11, %v2111_v47 }
 0x236   : > { %v2005_v60 = vpop.permute.xlu0 %2004 }
 0x237   : > { %2080 = vst.msk [vmem:[#allocation3 + $0xa8] sm:$0xff] %vm2058_vm10, %v2005_v60  ;;  %v1623_v16 = vpop.permute.xlu1 %1622 }
 0x238   : > { %1696 = vst.msk [vmem:[#allocation3 + $0xb8] sm:$0xff] %vm1672_vm8, %v1623_v16 }
 0x23a   : > { %v1621_v52 = vpop.permute.xlu0 %1620 }
 0x23b   : > { %1695 = vst.msk [vmem:[#allocation3 + $0xb0] sm:$0xff] %vm1672_vm8, %v1621_v52  ;;  %v1239_v2 = vpop.permute.xlu1 %1238 }
 0x23c   : > { %1311 = vst.msk [vmem:[#allocation3 + $0xc0] sm:$0xff] %vm1286_vm6, %v1239_v2 }
 0x23e   : > { %v1814_v34 = vpop.permute.xlu0 %1813  ;;  %v2112_v58 = vld [vmem:[#allocation3 + $0xa8] sm:$0xff] }
 0x23f   : > { %1888 = vst.msk [vmem:[#allocation3 + $0xb0] sm:$0xff] %vm1865_vm9, %v1814_v34  ;;  %5575 = vmatmul.mubr.msk.f32.gmra.mrb[20].mxu0 %vm2135_vm11, %v2112_v58  ;;  %v2007_v45 = vpop.permute.xlu1 %2006 }
 0x240   : > { %2081 = vst.msk [vmem:[#allocation3 + $0xb0] sm:$0xff] %vm2058_vm10, %v2007_v45 }
 0x242   : > { %v1816_v15 = vpop.permute.xlu0 %1815 }
 0x243   : > { %1889 = vst.msk [vmem:[#allocation3 + $0xb8] sm:$0xff] %vm1865_vm9, %v1816_v15  ;;  %v1432_v39 = vpop.permute.xlu1 %1431 }
 0x244   : > { %1504 = vst.msk [vmem:[#allocation3 + $0xc0] sm:$0xff] %vm1479_vm7, %v1432_v39 }
 0x246   : > { %v1241_v33 = vpop.permute.xlu0 %1240 }
 0x247   : > { %1312 = vst.msk [vmem:[#allocation3 + $0xc8] sm:$0xff] %vm1286_vm6, %v1241_v33  ;;  %v1434_v43 = vpop.permute.xlu1 %1433  ;;  %v2113_v57 = vld [vmem:[#allocation3 + $0xb0] sm:$0xff] }
 0x248   : > { %1505 = vst.msk [vmem:[#allocation3 + $0xc8] sm:$0xff] %vm1479_vm7, %v1434_v43  ;;  %5577 = vmatprep.mubr.msk.f32.mxu0 %vm2135_vm11, %v2113_v57 }
 0x24a   : > { %v2009_v11 = vpop.permute.xlu0 %2008 }
 0x24b   : > { %2082 = vst.msk [vmem:[#allocation3 + $0xb8] sm:$0xff] %vm2058_vm10, %v2009_v11  ;;  %v1627_v21 = vpop.permute.xlu1 %1626 }
 0x24c   : > { %1698 = vst.msk [vmem:[#allocation3 + $0xc8] sm:$0xff] %vm1672_vm8, %v1627_v21  ;;  %v6842_v21 = vld [vmem:[%s8800_s2] ss:$0 sm:$0xff] }
 0x24e   : > { %v1625_v14 = vpop.permute.xlu0 %1624 }
 0x24f   : > { %1697 = vst.msk [vmem:[#allocation3 + $0xc0] sm:$0xff] %vm1672_vm8, %v1625_v14  ;;  %v1243_v38 = vpop.permute.xlu1 %1242 }
 0x250   : > { %1313 = vst.msk [vmem:[#allocation3 + $0xd0] sm:$0xff] %vm1286_vm6, %v1243_v38 }
 0x252   : > { %v1818_v37 = vpop.permute.xlu0 %1817  ;;  %v2114_v30 = vld [vmem:[#allocation3 + $0xb8] sm:$0xff] }
 0x253   : > { %1890 = vst.msk [vmem:[#allocation3 + $0xc0] sm:$0xff] %vm1865_vm9, %v1818_v37  ;;  %5578 = vmatmul.mubr.msk.f32.gmra.mrb[22].mxu0 %vm2135_vm11, %v2114_v30  ;;  %v6769_v48 = vpop.f32.mrb[0].mxu0  ;;  %v2011_v42 = vpop.permute.xlu1 %2010 }
 0x254   : > { %v6772_v25 = vpop.f32.mrb[1].mxu0  ;;  %2083 = vst.msk [vmem:[#allocation3 + $0xc0] sm:$0xff] %vm2058_vm10, %v2011_v42  ;;  %v6848_v38 = vadd.f32 %v6769_v48, %v6842_v21 }
 0x256   : > { %v1820_v9 = vpop.permute.xlu0 %1819  ;;  %v2462_v48 = vsel %vm366_vm0, %v6848_v38, 0.0 }
 0x257   : > { %1891 = vst.msk [vmem:[#allocation3 + $0xc8] sm:$0xff] %vm1865_vm9, %v1820_v9  ;;  %v1436_v28 = vpop.permute.xlu1 %1435  ;;  %v6854_v9 = vadd.f32 %v6842_v21, %v6772_v25 }
 0x258   : > { %1506 = vst.msk [vmem:[#allocation3 + $0xd0] sm:$0xff] %vm1479_vm7, %v1436_v28 }
 0x259   : > { %v2530_v28 = vmul.f32 %v6854_v9, %v6854_v9 }
 0x25a   : > { %v1245_v10 = vpop.permute.xlu0 %1244 }
 0x25b   : > { %1314 = vst.msk [vmem:[#allocation3 + $0xd8] sm:$0xff] %vm1286_vm6, %v1245_v10  ;;  %v1438_v24 = vpop.permute.xlu1 %1437  ;;  %v2115_v31 = vld [vmem:[#allocation3 + $0xc0] sm:$0xff]  ;;  %v2531_v10 = vmul.f32 %v6848_v38, %v6848_v38 }
 0x25c   : > { %1507 = vst.msk [vmem:[#allocation3 + $0xd8] sm:$0xff] %vm1479_vm7, %v1438_v24  ;;  %5580 = vmatprep.mubr.msk.f32.mxu0 %vm2135_vm11, %v2115_v31  ;;  %v2562_v31 = vsel %vm366_vm0, %v2530_v28, 0.0 }
 0x25d   : > { %v2563_v24 = vsel %vm366_vm0, %v2531_v10, 0.0 }
 0x25e   : > { %v2013_v46 = vpop.permute.xlu0 %2012 }
 0x25f   : > { %2084 = vst.msk [vmem:[#allocation3 + $0xc8] sm:$0xff] %vm2058_vm10, %v2013_v46  ;;  %v1631_v27 = vpop.permute.xlu1 %1630  ;;  %v2461_v46 = vsel %vm366_vm0, %v6854_v9, 0.0 }
 0x260   : > { %1700 = vst.msk [vmem:[#allocation3 + $0xd8] sm:$0xff] %vm1672_vm8, %v1631_v27 }
 0x262   : > { %v1629_v26 = vpop.permute.xlu0 %1628 }
 0x263   : > { %1699 = vst.msk [vmem:[#allocation3 + $0xd0] sm:$0xff] %vm1672_vm8, %v1629_v26  ;;  %v6782_v20 = vpop.f32.mrb[2].mxu0  ;;  %v1247_v35 = vpop.permute.xlu1 %1246 }
 0x264   : > { %v6785_v44 = vpop.f32.mrb[3].mxu0  ;;  %1315 = vst.msk [vmem:[#allocation3 + $0xe0] sm:$0xff] %vm1286_vm6, %v1247_v35  ;;  %v6874_v26 = vadd.f32 %v6782_v20, %v6842_v21 }
 0x265   : > { %v6858_v42 = vadd.f32 %v6842_v21, %v6785_v44  ;;  %v2564_v44 = vadd.f32 %v2563_v24, %v2562_v31 }
 0x266   : > { %v1822_v49 = vpop.permute.xlu0 %1821  ;;  %v2116_v51 = vld [vmem:[#allocation3 + $0xc8] sm:$0xff] }
 0x267   : > { %1892 = vst.msk [vmem:[#allocation3 + $0xd0] sm:$0xff] %vm1865_vm9, %v1822_v49  ;;  %5581 = vmatmul.mubr.msk.f32.gmra.mrb[24].mxu0 %vm2135_vm11, %v2116_v51  ;;  %v2015_v63 = vpop.permute.xlu1 %2014  ;;  %v2532_v25 = vmul.f32 %v6858_v42, %v6858_v42  ;;  %v2464_v27 = vsel %vm366_vm0, %v6858_v42, 0.0  ;;  %v2463_v51 = vadd.f32 %v2462_v48, %v2461_v46 }
 0x268   : > { %2085 = vst.msk [vmem:[#allocation3 + $0xd0] sm:$0xff] %vm2058_vm10, %v2015_v63  ;;  %v2533_v63 = vmul.f32 %v6874_v26, %v6874_v26 }
 0x269   : > { %v2565_v35 = vsel %vm366_vm0, %v2532_v25, 0.0 }
 0x26a   : > { %v1824_v29 = vpop.permute.xlu0 %1823  ;;  %v2566_v20 = vadd.f32 %v2565_v35, %v2564_v44 }
 0x26b   : > { %1893 = vst.msk [vmem:[#allocation3 + $0xd8] sm:$0xff] %vm1865_vm9, %v1824_v29  ;;  %v1440_v32 = vpop.permute.xlu1 %1439  ;;  %v2465_v29 = vadd.f32 %v2464_v27, %v2463_v51 }
 0x26c   : > { %1508 = vst.msk [vmem:[#allocation3 + $0xe0] sm:$0xff] %vm1479_vm7, %v1440_v32  ;;  %v2466_v32 = vsel %vm366_vm0, %v6874_v26, 0.0 }
 0x26e   : > { %v1249_v18 = vpop.permute.xlu0 %1248 }
 0x26f   : > { %1316 = vst.msk [vmem:[#allocation3 + $0xe8] sm:$0xff] %vm1286_vm6, %v1249_v18  ;;  %v1442_v59 = vpop.permute.xlu1 %1441  ;;  %v2117_v36 = vld [vmem:[#allocation3 + $0xd0] sm:$0xff] }
 0x270   : > { %1509 = vst.msk [vmem:[#allocation3 + $0xe8] sm:$0xff] %vm1479_vm7, %v1442_v59  ;;  %5583 = vmatprep.mubr.msk.f32.mxu0 %vm2135_vm11, %v2117_v36 }
 0x272   : > { %v2017_v50 = vpop.permute.xlu0 %2016 }
 0x273   : > { %2086 = vst.msk [vmem:[#allocation3 + $0xd8] sm:$0xff] %vm2058_vm10, %v2017_v50  ;;  %v6796_v41 = vpop.f32.mrb[4].mxu0  ;;  %v1635_v55 = vpop.permute.xlu1 %1634 }
 0x274   : > { %v6799_v56 = vpop.f32.mrb[5].mxu0  ;;  %1702 = vst.msk [vmem:[#allocation3 + $0xe8] sm:$0xff] %vm1672_vm8, %v1635_v55  ;;  %v6891_v50 = vadd.f32 %v6796_v41, %v6842_v21  ;;  %v2567_v55 = vsel %vm366_vm0, %v2533_v63, 0.0 }
 0x275   : > { %v6880_v49 = vadd.f32 %v6842_v21, %v6799_v56 }
 0x276   : > { %v1633_v13 = vpop.permute.xlu0 %1632 }
 0x277   : > { %1701 = vst.msk [vmem:[#allocation3 + $0xe0] sm:$0xff] %vm1672_vm8, %v1633_v13  ;;  %v1251_v12 = vpop.permute.xlu1 %1250  ;;  %v2534_v18 = vmul.f32 %v6880_v49, %v6880_v49  ;;  %v2468_v59 = vsel %vm366_vm0, %v6880_v49, 0.0  ;;  %v2467_v13 = vadd.f32 %v2466_v32, %v2465_v29 }
 0x278   : > { %1317 = vst.msk [vmem:[#allocation3 + $0xf0] sm:$0xff] %vm1286_vm6, %v1251_v12  ;;  %v2535_v12 = vmul.f32 %v6891_v50, %v6891_v50 }
 0x279   : > { %v2569_v56 = vsel %vm366_vm0, %v2534_v18, 0.0 }
 0x27a   : > { %v1826_v6 = vpop.permute.xlu0 %1825  ;;  %v2118_v17 = vld [vmem:[#allocation3 + $0xd8] sm:$0xff] }
 0x27b   : > { %1894 = vst.msk [vmem:[#allocation3 + $0xe0] sm:$0xff] %vm1865_vm9, %v1826_v6  ;;  %5584 = vmatmul.mubr.msk.f32.gmra.mrb[26].mxu0 %vm2135_vm11, %v2118_v17  ;;  %v2019_v5 = vpop.permute.xlu1 %2018  ;;  %v2469_v6 = vadd.f32 %v2468_v59, %v2467_v13  ;;  %v2568_v17 = vadd.f32 %v2567_v55, %v2566_v20 }
 0x27c   : > { %2087 = vst.msk [vmem:[#allocation3 + $0xe0] sm:$0xff] %vm2058_vm10, %v2019_v5 }
 0x27d   : > { %v2570_v5 = vadd.f32 %v2569_v56, %v2568_v17 }
 0x27e   : > { %v1828_v53 = vpop.permute.xlu0 %1827 }
 0x27f   : > { %1895 = vst.msk [vmem:[#allocation3 + $0xe8] sm:$0xff] %vm1865_vm9, %v1828_v53  ;;  %v1444_v54 = vpop.permute.xlu1 %1443 }
 0x280   : > { %1510 = vst.msk [vmem:[#allocation3 + $0xf0] sm:$0xff] %vm1479_vm7, %v1444_v54  ;;  %v2470_v54 = vsel %vm366_vm0, %v6891_v50, 0.0 }
 0x282   : > { %v1253_v8 = vpop.permute.xlu0 %1252 }
 0x283   : > { %1318 = vst.msk [vmem:[#allocation3 + $0xf8] sm:$0xff] %vm1286_vm6, %v1253_v8  ;;  %v6809_v0 = vpop.f32.mrb[6].mxu0  ;;  %v1446_v4 = vpop.permute.xlu1 %1445  ;;  %v2119_v61 = vld [vmem:[#allocation3 + $0xe0] sm:$0xff] }
 0x284   : > { %v2332_v40 = vpop.f32.mrb[7].mxu0  ;;  %1511 = vst.msk [vmem:[#allocation3 + $0xf8] sm:$0xff] %vm1479_vm7, %v1446_v4  ;;  %5586 = vmatprep.mubr.msk.f32.mxu0 %vm2135_vm11, %v2119_v61  ;;  %v2471_v61 = vadd.f32 %v2470_v54, %v2469_v6 }
 0x285   : > { %v6896_v36 = vadd.f32 %v6842_v21, %v2332_v40 }
 0x286   : > { %v2021_v19 = vpop.permute.xlu0 %2020 }
 0x287   : > { %2088 = vst.msk [vmem:[#allocation3 + $0xe8] sm:$0xff] %vm2058_vm10, %v2021_v19  ;;  %v1639_v7 = vpop.permute.xlu1 %1638  ;;  %v2536_v41 = vmul.f32 %v6896_v36, %v6896_v36  ;;  %v6912_v19 = vadd.f32 %v6809_v0, %v6842_v21  ;;  %v2472_v4 = vsel %vm366_vm0, %v6896_v36, 0.0 }
 0x288   : > { %1704 = vst.msk [vmem:[#allocation3 + $0xf8] sm:$0xff] %vm1672_vm8, %v1639_v7 }
 0x289   : > { %v2573_v7 = vsel %vm366_vm0, %v2536_v41, 0.0 }
 0x28a   : > { %v1637_v62 = vpop.permute.xlu0 %1636 }
 0x28b   : > { %1703 = vst.msk [vmem:[#allocation3 + $0xf0] sm:$0xff] %vm1672_vm8, %v1637_v62  ;;  %v1832_v22 = vpop.permute.xlu1 %1831  ;;  %v2571_v62 = vsel %vm366_vm0, %v2535_v12, 0.0 }
 0x28c   : > { %1897 = vst.msk [vmem:[#allocation3 + $0xf8] sm:$0xff] %vm1865_vm9, %v1832_v22  ;;  %v2537_v22 = vmul.f32 %v6912_v19, %v6912_v19 }
 0x28e   : > { %v1830_v23 = vpop.permute.xlu0 %1829  ;;  %v2120_v60 = vld [vmem:[#allocation3 + $0xe8] sm:$0xff]  ;;  %v2575_v28 = vsel %vm366_vm0, %v2537_v22, 0.0 }
 0x28f   : > { %1896 = vst.msk [vmem:[#allocation3 + $0xf0] sm:$0xff] %vm1865_vm9, %v1830_v23  ;;  %5587 = vmatmul.mubr.msk.f32.gmra.mrb[28].mxu0 %vm2135_vm11, %v2120_v60  ;;  %v2025_v52 = vpop.permute.xlu1 %2024  ;;  %v2473_v23 = vadd.f32 %v2472_v4, %v2471_v61  ;;  %v2572_v60 = vadd.f32 %v2571_v62, %v2570_v5 }
 0x290   : > { %2090 = vst.msk [vmem:[#allocation3 + $0xf8] sm:$0xff] %vm2058_vm10, %v2025_v52  ;;  %v2474_v52 = vsel %vm366_vm0, %v6912_v19, 0.0 }
 0x291   : > { %v2475_v10 = vadd.f32 %v2474_v52, %v2473_v23 }
 0x292   : > { %v2023_v47 = vpop.permute.xlu0 %2022 }
 0x293   : > { %2089 = vst.msk [vmem:[#allocation3 + $0xf0] sm:$0xff] %vm2058_vm10, %v2023_v47  ;;  %v2574_v47 = vadd.f32 %v2573_v7, %v2572_v60 }
 0x295   : > { %v2576_v25 = vadd.f32 %v2575_v28, %v2574_v47 }
 0x297   : > { %v2122_v58 = vld [vmem:[#allocation3 + $0xf8] sm:$0xff] }
 0x29a   : > { %v6821_v16 = vpop.f32.mrb[8].mxu0  ;;  %v2121_v34 = vld [vmem:[#allocation3 + $0xf0] sm:$0xff] }
 0x29b   : > { %v2342_v2 = vpop.f32.mrb[9].mxu0  ;;  %5589 = vmatprep.mubr.msk.f32.mxu0 %vm2135_vm11, %v2121_v34  ;;  %v6929_v34 = vadd.f32 %v6821_v16, %v6842_v21 }
 0x29c   : > { %5590 = vmatmul.mubr.msk.f32.gmra.mrb[30].mxu0 %vm2135_vm11, %v2122_v58  ;;  %v6917_v40 = vadd.f32 %v6842_v21, %v2342_v2 }
 0x29d   : > { %v2539_v24 = vmul.f32 %v6929_v34, %v6929_v34  ;;  %v2478_v27 = vsel %vm366_vm0, %v6929_v34, 0.0 }
 0x29e   : > { %v2538_v0 = vmul.f32 %v6917_v40, %v6917_v40  ;;  %v2476_v2 = vsel %vm366_vm0, %v6917_v40, 0.0 }
 0x29f   : > { %v2477_v46 = vadd.f32 %v2476_v2, %v2475_v10  ;;  %v2579_v29 = vsel %vm366_vm0, %v2539_v24, 0.0 }
 0x2a0   : > { %v2577_v48 = vsel %vm366_vm0, %v2538_v0, 0.0 }
 0x2a1   : > { %v2578_v31 = vadd.f32 %v2577_v48, %v2576_v25  ;;  %v2479_v44 = vadd.f32 %v2478_v27, %v2477_v46 }
 0x2a3   : > { %v2580_v20 = vadd.f32 %v2579_v29, %v2578_v31 }
 0x2ae   : > { %v6825_v15 = vpop.f32.mrb[10].mxu0 }
 0x2af   : > { %v2352_v45 = vpop.f32.mrb[11].mxu0 }
 0x2b0   : > { %v6934_v58 = vadd.f32 %v6842_v21, %v2352_v45  ;;  %v6946_v45 = vadd.f32 %v6825_v15, %v6842_v21 }
 0x2b2   : > { %v2540_v16 = vmul.f32 %v6934_v58, %v6934_v58  ;;  %v2480_v51 = vsel %vm366_vm0, %v6934_v58, 0.0  ;;  %v2541_v32 = vmul.f32 %v6946_v45, %v6946_v45  ;;  %v2482_v13 = vsel %vm366_vm0, %v6946_v45, 0.0 }
 0x2b3   : > { %v2481_v18 = vadd.f32 %v2480_v51, %v2479_v44 }
 0x2b4   : > { %v2581_v63 = vsel %vm366_vm0, %v2540_v16, 0.0  ;;  %v2583_v41 = vsel %vm366_vm0, %v2541_v32, 0.0 }
 0x2b5   : > { %v2582_v59 = vadd.f32 %v2581_v63, %v2580_v20  ;;  %v2483_v17 = vadd.f32 %v2482_v13, %v2481_v18 }
 0x2b7   : > { %v2584_v4 = vadd.f32 %v2583_v41, %v2582_v59 }
 0x2c2   : > { %v6827_v33 = vpop.f32.mrb[12].mxu0 }
 0x2c3   : > { %v6829_v39 = vpop.f32.mrb[13].mxu0 }
 0x2c4   : > { %v6952_v35 = vadd.f32 %v6842_v21, %v6829_v39  ;;  %v6964_v39 = vadd.f32 %v6827_v33, %v6842_v21 }
 0x2c6   : > { %v2542_v15 = vmul.f32 %v6952_v35, %v6952_v35  ;;  %v2484_v55 = vsel %vm366_vm0, %v6952_v35, 0.0  ;;  %v2543_v33 = vmul.f32 %v6964_v39, %v6964_v39 }
 0x2c7   : > { %v2485_v54 = vadd.f32 %v2484_v55, %v2483_v17 }
 0x2c8   : > { %v2585_v5 = vsel %vm366_vm0, %v2542_v15, 0.0  ;;  %v2587_v0 = vsel %vm366_vm0, %v2543_v33, 0.0 }
 0x2c9   : > { %v2586_v62 = vadd.f32 %v2585_v5, %v2584_v4 }
 0x2cb   : > { %v2588_v2 = vadd.f32 %v2587_v0, %v2586_v62 }
 0x2d6   : > { %v6831_v11 = vpop.f32.mrb[14].mxu0 }
 0x2d7   : > { %v6833_v43 = vpop.f32.mrb[15].mxu0  ;;  %v6982_v7 = vadd.f32 %v6831_v11, %v6842_v21 }
 0x2d8   : > { %v6970_v56 = vadd.f32 %v6842_v21, %v6833_v43  ;;  %v2486_v43 = vsel %vm366_vm0, %v6964_v39, 0.0 }
 0x2d9   : > { %v2487_v22 = vadd.f32 %v2486_v43, %v2485_v54  ;;  %v2545_v10 = vmul.f32 %v6982_v7, %v6982_v7  ;;  %v2490_v48 = vsel %vm366_vm0, %v6982_v7, 0.0 }
 0x2da   : > { %v2544_v61 = vmul.f32 %v6970_v56, %v6970_v56  ;;  %v2488_v23 = vsel %vm366_vm0, %v6970_v56, 0.0 }
 0x2db   : > { %v2489_v52 = vadd.f32 %v2488_v23, %v2487_v22  ;;  %v2591_v16 = vsel %vm366_vm0, %v2545_v10, 0.0 }
 0x2dc   : > { %v2589_v47 = vsel %vm366_vm0, %v2544_v61, 0.0 }
 0x2dd   : > { %v2590_v28 = vadd.f32 %v2589_v47, %v2588_v2  ;;  %v2491_v24 = vadd.f32 %v2490_v48, %v2489_v52 }
 0x2df   : > { %v2592_v51 = vadd.f32 %v2591_v16, %v2590_v28 }
 0x2ea   : > { %v6835_v57 = vpop.f32.mrb[16].mxu0 }
 0x2eb   : > { %v6837_v14 = vpop.f32.mrb[17].mxu0 }
 0x2ec   : > { %v6988_v60 = vadd.f32 %v6842_v21, %v6837_v14  ;;  %v7000_v14 = vadd.f32 %v6835_v57, %v6842_v21 }
 0x2ee   : > { %v2546_v11 = vmul.f32 %v6988_v60, %v6988_v60  ;;  %v2492_v46 = vsel %vm366_vm0, %v6988_v60, 0.0  ;;  %v2547_v44 = vmul.f32 %v7000_v14, %v7000_v14  ;;  %v2494_v63 = vsel %vm366_vm0, %v7000_v14, 0.0 }
 0x2ef   : > { %v2493_v27 = vadd.f32 %v2492_v46, %v2491_v24 }
 0x2f0   : > { %v2593_v31 = vsel %vm366_vm0, %v2546_v11, 0.0  ;;  %v2595_v15 = vsel %vm366_vm0, %v2547_v44, 0.0 }
 0x2f1   : > { %v2594_v29 = vadd.f32 %v2593_v31, %v2592_v51  ;;  %v2495_v32 = vadd.f32 %v2494_v63, %v2493_v27 }
 0x2f3   : > { %v2596_v17 = vadd.f32 %v2595_v15, %v2594_v29 }
 0x2fe   : > { %v6844_v37 = vpop.f32.mrb[18].mxu0 }
 0x2ff   : > { %v6850_v30 = vpop.f32.mrb[19].mxu0 }
 0x300   : > { %v7006_v25 = vadd.f32 %v6842_v21, %v6850_v30  ;;  %v7018_v30 = vadd.f32 %v6844_v37, %v6842_v21 }
 0x302   : > { %v2548_v57 = vmul.f32 %v7006_v25, %v7006_v25  ;;  %v2496_v18 = vsel %vm366_vm0, %v7006_v25, 0.0  ;;  %v2549_v37 = vmul.f32 %v7018_v30, %v7018_v30 }
 0x303   : > { %v2497_v55 = vadd.f32 %v2496_v18, %v2495_v32 }
 0x304   : > { %v2597_v59 = vsel %vm366_vm0, %v2548_v57, 0.0  ;;  %v2599_v43 = vsel %vm366_vm0, %v2549_v37, 0.0 }
 0x305   : > { %v2598_v54 = vadd.f32 %v2597_v59, %v2596_v17 }
 0x307   : > { %v2600_v0 = vadd.f32 %v2599_v43, %v2598_v54 }
 0x312   : > { %v6904_v53 = vpop.f32.mrb[20].mxu0 }
 0x313   : > { %v6906_v8 = vpop.f32.mrb[21].mxu0  ;;  %v7036_v4 = vadd.f32 %v6904_v53, %v6842_v21 }
 0x314   : > { %v7024_v20 = vadd.f32 %v6842_v21, %v6906_v8  ;;  %v2498_v8 = vsel %vm366_vm0, %v7018_v30, 0.0 }
 0x315   : > { %v2499_v62 = vadd.f32 %v2498_v8, %v2497_v55  ;;  %v2551_v47 = vmul.f32 %v7036_v4, %v7036_v4  ;;  %v2502_v2 = vsel %vm366_vm0, %v7036_v4, 0.0 }
 0x316   : > { %v2550_v5 = vmul.f32 %v7024_v20, %v7024_v20  ;;  %v2500_v33 = vsel %vm366_vm0, %v7024_v20, 0.0 }
 0x317   : > { %v2501_v22 = vadd.f32 %v2500_v33, %v2499_v62  ;;  %v2603_v48 = vsel %vm366_vm0, %v2551_v47, 0.0 }
 0x318   : > { %v2601_v23 = vsel %vm366_vm0, %v2550_v5, 0.0 }
 0x319   : > { %v2602_v52 = vadd.f32 %v2601_v23, %v2600_v0  ;;  %v2503_v28 = vadd.f32 %v2502_v2, %v2501_v22 }
 0x31b   : > { %v2604_v16 = vadd.f32 %v2603_v48, %v2602_v52 }
 0x326   : > { %v5579_v6 = vpop.f32.mrb[22].mxu0 }
 0x327   : > { %v2412_v12 = vpop.f32.mrb[23].mxu0 }
 0x328   : > { %v7041_v61 = vadd.f32 %v6842_v21, %v2412_v12  ;;  %v7052_v12 = vadd.f32 %v5579_v6, %v6842_v21 }
 0x32a   : > { %v2552_v53 = vmul.f32 %v7041_v61, %v7041_v61  ;;  %v2504_v10 = vsel %vm366_vm0, %v7041_v61, 0.0  ;;  %v2553_v31 = vmul.f32 %v7052_v12, %v7052_v12  ;;  %v2506_v51 = vsel %vm366_vm0, %v7052_v12, 0.0 }
 0x32b   : > { %v2505_v24 = vadd.f32 %v2504_v10, %v2503_v28 }
 0x32c   : > { %v2605_v46 = vsel %vm366_vm0, %v2552_v53, 0.0  ;;  %v2607_v63 = vsel %vm366_vm0, %v2553_v31, 0.0 }
 0x32d   : > { %v2606_v27 = vadd.f32 %v2605_v46, %v2604_v16  ;;  %v2507_v29 = vadd.f32 %v2506_v51, %v2505_v24 }
 0x32f   : > { %v2608_v15 = vadd.f32 %v2607_v63, %v2606_v27 }
 0x33a   : > { %v5582_v13 = vpop.f32.mrb[24].mxu0 }
 0x33b   : > { %v2422_v41 = vpop.f32.mrb[25].mxu0  ;;  %v7068_v44 = vadd.f32 %v5582_v13, %v6842_v21 }
 0x33c   : > { %v7057_v11 = vadd.f32 %v6842_v21, %v2422_v41 }
 0x33d   : > { %v2555_v59 = vmul.f32 %v7068_v44, %v7068_v44  ;;  %v2510_v37 = vsel %vm366_vm0, %v7068_v44, 0.0 }
 0x33e   : > { %v2554_v6 = vmul.f32 %v7057_v11, %v7057_v11  ;;  %v2508_v57 = vsel %vm366_vm0, %v7057_v11, 0.0 }
 0x33f   : > { %v2509_v32 = vadd.f32 %v2508_v57, %v2507_v29  ;;  %v2611_v8 = vsel %vm366_vm0, %v2555_v59, 0.0 }
 0x340   : > { %v2609_v18 = vsel %vm366_vm0, %v2554_v6, 0.0 }
 0x341   : > { %v2610_v17 = vadd.f32 %v2609_v18, %v2608_v15  ;;  %v2511_v54 = vadd.f32 %v2510_v37, %v2509_v32 }
 0x343   : > { %v2612_v22 = vadd.f32 %v2611_v8, %v2610_v17 }
 0x34e   : > { %v5585_v55 = vpop.f32.mrb[26].mxu0 }
 0x34f   : > { %v7077_v41 = vadd.f32 %v5585_v55, %v6842_v21  ;;  %v2432_v13 = vpop.f32.mrb[27].mxu0 }
 0x350   : > { %v7082_v5 = vadd.f32 %v6842_v21, %v2432_v13 }
 0x351   : > { %v2557_v33 = vmul.f32 %v7077_v41, %v7077_v41  ;;  %v2514_v0 = vsel %vm366_vm0, %v7077_v41, 0.0 }
 0x352   : > { %v2512_v62 = vsel %vm366_vm0, %v7082_v5, 0.0  ;;  %v2556_v43 = vmul.f32 %v7082_v5, %v7082_v5 }
 0x353   : > { %v2513_v23 = vadd.f32 %v2512_v62, %v2511_v54  ;;  %v2615_v2 = vsel %vm366_vm0, %v2557_v33, 0.0 }
 0x354   : > { %v2613_v47 = vsel %vm366_vm0, %v2556_v43, 0.0 }
 0x355   : > { %v2614_v53 = vadd.f32 %v2613_v47, %v2612_v22  ;;  %v2515_v52 = vadd.f32 %v2514_v0, %v2513_v23 }
 0x357   : > { %v2616_v10 = vadd.f32 %v2615_v2, %v2614_v53 }
 0x362   : > { %v5588_v28 = vpop.f32.mrb[28].mxu0 }
 0x363   : > { %v7096_v48 = vadd.f32 %v5588_v28, %v6842_v21  ;;  %v2442_v46 = vpop.f32.mrb[29].mxu0 }
 0x364   : > { %v7099_v24 = vadd.f32 %v6842_v21, %v2442_v46 }
 0x365   : > { %v2559_v16 = vmul.f32 %v7096_v48, %v7096_v48  ;;  %v2518_v51 = vsel %vm366_vm0, %v7096_v48, 0.0 }
 0x366   : > { %v2516_v31 = vsel %vm366_vm0, %v7099_v24, 0.0  ;;  %v2558_v6 = vmul.f32 %v7099_v24, %v7099_v24 }
 0x367   : > { %v2517_v27 = vadd.f32 %v2516_v31, %v2515_v52  ;;  %v2619_v18 = vsel %vm366_vm0, %v2559_v16, 0.0 }
 0x368   : > { %v2617_v57 = vsel %vm366_vm0, %v2558_v6, 0.0 }
 0x369   : > { %v2618_v29 = vadd.f32 %v2617_v57, %v2616_v10  ;;  %v2519_v63 = vadd.f32 %v2518_v51, %v2517_v27 }
 0x36b   : > { %v2620_v32 = vadd.f32 %v2619_v18, %v2618_v29 }
 0x36f   : > { %v5591_v15 = vpop.f32.mrb[30].mxu0 }
 0x370   : > { %v7112_v59 = vadd.f32 %v5591_v15, %v6842_v21  ;;  %v2452_v55 = vpop.f32.mrb[31].mxu0 }
 0x371   : > { %v7115_v17 = vadd.f32 %v6842_v21, %v2452_v55 }
 0x372   : > { %v2561_v13 = vmul.f32 %v7112_v59, %v7112_v59  ;;  %v2522_v33 = vsel %vm366_vm0, %v7112_v59, 0.0 }
 0x373   : > { %v2520_v37 = vsel %vm366_vm0, %v7115_v17, 0.0  ;;  %v2560_v54 = vmul.f32 %v7115_v17, %v7115_v17 }
 0x374   : > { %v2521_v8 = vadd.f32 %v2520_v37, %v2519_v63  ;;  %v2623_v21 = vsel %vm366_vm0, %v2561_v13, 0.0 }
 0x375   : > { %v2621_v62 = vsel %vm366_vm0, %v2560_v54, 0.0 }
 0x376   : > { %v2523_v43 = vadd.f32 %v2522_v33, %v2521_v8  ;;  %v2622_v23 = vadd.f32 %v2621_v62, %v2620_v32 }
 0x378   : > { %v2524_v22 = vrot.slane %v2523_v43, 4  ;;  %v2624_v0 = vadd.f32 %v2623_v21, %v2622_v23 }
 0x37a   : > { %v2525_v47 = vadd.f32 %v2524_v22, %v2523_v43  ;;  %v2625_v53 = vrot.slane %v2624_v0, 4 }
 0x37c   : > { %v2526_v52 = vrot.slane %v2525_v47, 2  ;;  %v2626_v2 = vadd.f32 %v2625_v53, %v2624_v0 }
 0x37e   : > { %v2527_v10 = vadd.f32 %v2526_v52, %v2525_v47  ;;  %v2627_v28 = vrot.slane %v2626_v2, 2  ;;  %v7203_v52 = vld [vmem:[%s8802_s4] ss:$0 sm:$0xff] }
 0x380   : > { %v2528_v46 = vrot.slane %v2527_v10, 1  ;;  %v2628_v16 = vadd.f32 %v2627_v28, %v2626_v2 }
 0x382   : > { %v2529_v31 = vadd.f32 %v2528_v46, %v2527_v10  ;;  %v2629_v6 = vrot.slane %v2628_v16, 1 }
 0x384   : > { %v2630_v27 = vadd.f32 %v2629_v6, %v2628_v16  ;;  %v7127_v51 = vmul.f32 0.00390625, %v2529_v31 }
 0x386   : > { %v2632_v57 = vmul.f32 0.00390625, %v2630_v27  ;;  %v2633_v29 = vmul.f32 %v7127_v51, %v7127_v51  ;;  %v2666_v63 = vsub.f32 %v7115_v17, %v7127_v51  ;;  %v2662_v55 = vsub.f32 %v7082_v5, %v7127_v51 }
 0x387   : > { %v2663_v13 = vsub.f32 %v7077_v41, %v7127_v51  ;;  %v2664_v37 = vsub.f32 %v7099_v24, %v7127_v51  ;;  %v2665_v54 = vsub.f32 %v7096_v48, %v7127_v51  ;;  %v2667_v8 = vsub.f32 %v7112_v59, %v7127_v51 }
 0x388   : > { %v2634_v18 = vsub.f32 %v2632_v57, %v2633_v29  ;;  %v2636_v17 = vsub.f32 %v6854_v9, %v7127_v51  ;;  %v2637_v33 = vsub.f32 %v6848_v38, %v7127_v51  ;;  %v2638_v62 = vsub.f32 %v6858_v42, %v7127_v51 }
 0x389   : > { %v2639_v43 = vsub.f32 %v6874_v26, %v7127_v51  ;;  %v2640_v23 = vsub.f32 %v6880_v49, %v7127_v51  ;;  %v2641_v21 = vsub.f32 %v6891_v50, %v7127_v51  ;;  %v2642_v22 = vsub.f32 %v6896_v36, %v7127_v51 }
 0x38a   : > { %v2635_v32 = vmax.f32 %v2634_v18, 0.0  ;;  %v2643_v9 = vsub.f32 %v6912_v19, %v7127_v51  ;;  %v2644_v38 = vsub.f32 %v6917_v40, %v7127_v51  ;;  %v2645_v42 = vsub.f32 %v6929_v34, %v7127_v51 }
 0x38b   : > { %v2646_v26 = vsub.f32 %v6934_v58, %v7127_v51  ;;  %v2647_v49 = vsub.f32 %v6946_v45, %v7127_v51  ;;  %v2648_v50 = vsub.f32 %v6952_v35, %v7127_v51  ;;  %v2649_v36 = vsub.f32 %v6964_v39, %v7127_v51 }
 0x38c   : > { %v2668_v15 = vadd.f32 1e-05, %v2635_v32  ;;  %v2650_v19 = vsub.f32 %v6970_v56, %v7127_v51  ;;  %v2651_v40 = vsub.f32 %v6982_v7, %v7127_v51  ;;  %v2652_v34 = vsub.f32 %v6988_v60, %v7127_v51  ;;  %v7190_v7 = vld [vmem:[%s8801_s3] ss:$0 sm:$0xff] }
 0x38d   : > { %v2653_v58 = vsub.f32 %v7000_v14, %v7127_v51  ;;  %v2654_v45 = vsub.f32 %v7006_v25, %v7127_v51  ;;  %v2655_v35 = vsub.f32 %v7018_v30, %v7127_v51  ;;  %v2656_v39 = vsub.f32 %v7024_v20, %v7127_v51 }
 0x38e   : > { %5682 = vrsqrt.f32 %v2668_v15  ;;  %v2657_v56 = vsub.f32 %v7036_v4, %v7127_v51  ;;  %v2658_v60 = vsub.f32 %v7041_v61, %v7127_v51  ;;  %v2659_v14 = vsub.f32 %v7052_v12, %v7127_v51 }
 0x38f   : > { %v2660_v25 = vsub.f32 %v7057_v11, %v7127_v51  ;;  %v2661_v30 = vsub.f32 %v7068_v44, %v7127_v51 }
 0x398   : > { %v5683_v0 = vpop.eup %5682 }
 0x399   : > { %v2700_v20 = vmul.f32 %v5683_v0, %v2666_v63  ;;  %v2673_v4 = vmul.f32 %v5683_v0, %v2639_v43  ;;  %v2670_v47 = vmul.f32 %v5683_v0, %v2636_v17  ;;  %v2671_v53 = vmul.f32 %v5683_v0, %v2637_v33 }
 0x39a   : > { %v2672_v2 = vmul.f32 %v5683_v0, %v2638_v62  ;;  %v2674_v61 = vmul.f32 %v5683_v0, %v2640_v23  ;;  %v2675_v10 = vmul.f32 %v5683_v0, %v2641_v21  ;;  %v2676_v28 = vmul.f32 %v5683_v0, %v2642_v22 }
 0x39b   : > { %v2739_v12 = vmul.f32 %v7190_v7, %v2700_v20  ;;  %v2712_v11 = vmul.f32 %v7190_v7, %v2673_v4  ;;  %v2677_v46 = vmul.f32 %v5683_v0, %v2643_v9  ;;  %v2678_v16 = vmul.f32 %v5683_v0, %v2644_v38 }
 0x39c   : > { %v2679_v44 = vmul.f32 %v5683_v0, %v2645_v42  ;;  %v2680_v31 = vmul.f32 %v5683_v0, %v2646_v26  ;;  %v2681_v6 = vmul.f32 %v5683_v0, %v2647_v49  ;;  %v2682_v27 = vmul.f32 %v5683_v0, %v2648_v50 }
 0x39d   : > { %v2778_v57 = vadd.f32 %v7203_v52, %v2739_v12  ;;  %v2751_v29 = vadd.f32 %v7203_v52, %v2712_v11  ;;  %v2683_v63 = vmul.f32 %v5683_v0, %v2649_v36  ;;  %v2684_v18 = vmul.f32 %v5683_v0, %v2650_v19 }
 0x39e   : > { %v2685_v32 = vmul.f32 %v5683_v0, %v2651_v40  ;;  %v2686_v15 = vmul.f32 %v5683_v0, %v2652_v34  ;;  %v2687_v17 = vmul.f32 %v5683_v0, %v2653_v58  ;;  %v2688_v33 = vmul.f32 %v5683_v0, %v2654_v45 }
 0x39f   : > { %v2810_v62 = vmax.f32 %v2778_v57, 0.0  ;;  %v2783_v43 = vmax.f32 %v2751_v29, 0.0  ;;  %v2689_v23 = vmul.f32 %v5683_v0, %v2655_v35  ;;  %v2690_v21 = vmul.f32 %v5683_v0, %v2656_v39 }
 0x3a0   : > { %v2691_v22 = vmul.f32 %v5683_v0, %v2657_v56  ;;  %v2692_v9 = vmul.f32 %v5683_v0, %v2658_v60  ;;  %v2693_v38 = vmul.f32 %v5683_v0, %v2659_v14  ;;  %v2694_v42 = vmul.f32 %v5683_v0, %v2660_v25 }
 0x3a1   : > { %2855 = vst.msk [vmem:[#allocation2 + $0x181] sm:$0xff] %vm366_vm0, %v2810_v62  ;;  %2815 = vst.msk [vmem:[#allocation2 + $0x39] sm:$0xff] %vm366_vm0, %v2783_v43  ;;  %v2695_v26 = vmul.f32 %v5683_v0, %v2661_v30  ;;  %v2696_v49 = vmul.f32 %v5683_v0, %v2662_v55  ;;  %v2697_v50 = vmul.f32 %v5683_v0, %v2663_v13 }
 0x3a2   : > { %v2698_v36 = vmul.f32 %v5683_v0, %v2664_v37  ;;  %v2699_v19 = vmul.f32 %v5683_v0, %v2665_v54  ;;  %v2701_v40 = vmul.f32 %v5683_v0, %v2667_v8  ;;  %v2711_v34 = vmul.f32 %v7190_v7, %v2672_v2 }
 0x3a3   : > { %v2709_v5 = vmul.f32 %v7190_v7, %v2670_v47  ;;  %v2710_v55 = vmul.f32 %v7190_v7, %v2671_v53  ;;  %v2713_v41 = vmul.f32 %v7190_v7, %v2674_v61  ;;  %v2714_v13 = vmul.f32 %v7190_v7, %v2675_v10 }
 0x3a4   : > { %v2715_v24 = vmul.f32 %v7190_v7, %v2676_v28  ;;  %v2750_v37 = vadd.f32 %v7203_v52, %v2711_v34  ;;  %v2716_v48 = vmul.f32 %v7190_v7, %v2677_v46  ;;  %v2717_v54 = vmul.f32 %v7190_v7, %v2678_v16 }
 0x3a5   : > { %v2718_v59 = vmul.f32 %v7190_v7, %v2679_v44  ;;  %v2719_v51 = vmul.f32 %v7190_v7, %v2680_v31  ;;  %v2720_v8 = vmul.f32 %v7190_v7, %v2681_v6  ;;  %v2721_v58 = vmul.f32 %v7190_v7, %v2682_v27 }
 0x3a6   : > { %v2722_v45 = vmul.f32 %v7190_v7, %v2683_v63  ;;  %v2782_v35 = vmax.f32 %v2750_v37, 0.0  ;;  %v2723_v39 = vmul.f32 %v7190_v7, %v2684_v18  ;;  %v2724_v56 = vmul.f32 %v7190_v7, %v2685_v32 }
 0x3a7   : > { %v2725_v0 = vmul.f32 %v7190_v7, %v2686_v15  ;;  %v2726_v60 = vmul.f32 %v7190_v7, %v2687_v17  ;;  %v2727_v14 = vmul.f32 %v7190_v7, %v2688_v33  ;;  %v2728_v25 = vmul.f32 %v7190_v7, %v2689_v23 }
 0x3a8   : > { %v2729_v30 = vmul.f32 %v7190_v7, %v2690_v21  ;;  %v7247_v20 = vld [vmem:[#allocation2 + $0x39] sm:$0xff]  ;;  %2814 = vst.msk [vmem:[#allocation2 + $0x31] sm:$0xff] %vm366_vm0, %v2782_v35  ;;  %v2730_v4 = vmul.f32 %v7190_v7, %v2691_v22  ;;  %v2731_v47 = vmul.f32 %v7190_v7, %v2692_v9  ;;  %v2732_v53 = vmul.f32 %v7190_v7, %v2693_v38  ;;  %v2881_v10 = vld [vmem:[#allocation2 + $0x182] sm:$0x1] }
 0x3a9   : > { %v2733_v2 = vmul.f32 %v7190_v7, %v2694_v42  ;;  %v2903_v61 = vld [vmem:[#allocation2 + $0x3f] sm:$0x1]  ;;  %2860 = vst.msk [vmem:[#allocation2 + $0x9] sm:$0xff] %vm366_vm0, %v7247_v20  ;;  %v2734_v28 = vmul.f32 %v7190_v7, %v2695_v26  ;;  %v2735_v12 = vmul.f32 %v7190_v7, %v2696_v49  ;;  %v2736_v11 = vmul.f32 %v7190_v7, %v2697_v50 }
 0x3aa   : > { %v2737_v46 = vmul.f32 %v7190_v7, %v2698_v36  ;;  %2921 = vst.msk [vmem:[#allocation2 + $0x41] sm:$0x1] %vm428_vm1, %v2903_v61  ;;  %2899 = vst.msk [vmem:[#allocation2 + $0x180] sm:$0x1] %vm428_vm1, %v2881_v10  ;;  %v2738_v16 = vmul.f32 %v7190_v7, %v2699_v19  ;;  %v2740_v44 = vmul.f32 %v7190_v7, %v2701_v40 }
 0x3ab   : > { %v2749_v31 = vadd.f32 %v7203_v52, %v2710_v55  ;;  %v2748_v6 = vadd.f32 %v7203_v52, %v2709_v5  ;;  %v2752_v27 = vadd.f32 %v7203_v52, %v2713_v41  ;;  %v2753_v57 = vadd.f32 %v7203_v52, %v2714_v13 }
 0x3ac   : > { %v2754_v29 = vadd.f32 %v7203_v52, %v2715_v24  ;;  %v2755_v63 = vadd.f32 %v7203_v52, %v2716_v48  ;;  %v2756_v32 = vadd.f32 %v7203_v52, %v2717_v54  ;;  %v2757_v15 = vadd.f32 %v7203_v52, %v2718_v59 }
 0x3ad   : > { %v2781_v18 = vmax.f32 %v2749_v31, 0.0  ;;  %v2758_v17 = vadd.f32 %v7203_v52, %v2719_v51  ;;  %v2759_v7 = vadd.f32 %v7203_v52, %v2720_v8  ;;  %v2760_v33 = vadd.f32 %v7203_v52, %v2721_v58 }
 0x3ae   : > { %v2761_v62 = vadd.f32 %v7203_v52, %v2722_v45  ;;  %v2762_v43 = vadd.f32 %v7203_v52, %v2723_v39  ;;  %v7279_v23 = vadd.f32 %v7203_v52, %v2724_v56  ;;  %v7282_v21 = vadd.f32 %v7203_v52, %v2725_v0 }
 0x3af   : > { %2813 = vst.msk [vmem:[#allocation2 + $0x21] sm:$0xff] %vm366_vm0, %v2781_v18  ;;  %v7285_v22 = vadd.f32 %v7203_v52, %v2726_v60  ;;  %v7288_v9 = vadd.f32 %v7203_v52, %v2727_v14  ;;  %v7290_v38 = vld [vmem:[#allocation2 + $0x31] sm:$0xff]  ;;  %v7293_v42 = vadd.f32 %v7203_v52, %v2728_v25  ;;  %v7296_v26 = vadd.f32 %v7203_v52, %v2729_v30 }
 0x3b0   : > { %v7299_v49 = vadd.f32 %v7203_v52, %v2730_v4  ;;  %v7302_v50 = vadd.f32 %v7203_v52, %v2731_v47  ;;  %v7304_v36 = vld [vmem:[#allocation2 + $0x38] sm:$0xff]  ;;  %v3002_v19 = vld [vmem:[#allocation2 + $0x9] sm:$0xff]  ;;  %2859 = vst.msk [vmem:[#allocation2 + $0x1] sm:$0xff] %vm366_vm0, %v7290_v38  ;;  %v7309_v40 = vadd.f32 %v7203_v52, %v2732_v53  ;;  %v7312_v34 = vadd.f32 %v7203_v52, %v2733_v2  ;;  %v2867_v54 = vld [vmem:[#allocation2 + $0x32] sm:$0x1] }
 0x3b1   : > { %v7315_v5 = vadd.f32 %v7203_v52, %v2734_v28  ;;  %v7318_v55 = vadd.f32 %v7203_v52, %v2735_v12  ;;  %v2901_v41 = vld [vmem:[#allocation2 + $0xf] sm:$0x1]  ;;  %2974 = vst.msk [vmem:[#allocation3 + $0x28] sm:$0xff] %vm366_vm0, %v7304_v36  ;;  %3067 = vrot.lane.b32.xlu1 %v3002_v19, %s5694_s15  ;;  %v7324_v13 = vadd.f32 %v7203_v52, %v2736_v11  ;;  %v2780_v59 = vmax.f32 %v2748_v6, 0.0 }
 0x3b2   : > { %v7327_v24 = vadd.f32 %v7203_v52, %v2737_v46  ;;  %v7330_v37 = vadd.f32 %v7203_v52, %v2738_v16  ;;  %v7333_v48 = vadd.f32 %v7203_v52, %v2740_v44  ;;  %2919 = vst.msk [vmem:[#allocation2 + $0x11] sm:$0x1] %vm428_vm1, %v2901_v41  ;;  %v2784_v51 = vmax.f32 %v2752_v27, 0.0  ;;  %2885 = vst.msk [vmem:[#allocation2 + $0x30] sm:$0x1] %vm428_vm1, %v2867_v54 }
 0x3b3   : > { %v2785_v8 = vmax.f32 %v2753_v57, 0.0  ;;  %v2786_v58 = vmax.f32 %v2754_v29, 0.0  ;;  %v2787_v45 = vmax.f32 %v2755_v63, 0.0  ;;  %v2788_v35 = vmax.f32 %v2756_v32, 0.0  ;;  %2812 = vst.msk [vmem:[#allocation2 + $0x19] sm:$0xff] %vm366_vm0, %v2780_v59 }
 0x3b4   : > { %v2789_v39 = vmax.f32 %v2757_v15, 0.0  ;;  %v2790_v56 = vmax.f32 %v2758_v17, 0.0  ;;  %v2791_v0 = vmax.f32 %v2759_v7, 0.0  ;;  %v2792_v60 = vmax.f32 %v2760_v33, 0.0  ;;  %2817 = vst.msk [vmem:[#allocation2 + $0x49] sm:$0xff] %vm366_vm0, %v2784_v51 }
 0x3b5   : > { %v2793_v14 = vmax.f32 %v2761_v62, 0.0  ;;  %v2794_v52 = vmax.f32 %v2762_v43, 0.0  ;;  %2818 = vst.msk [vmem:[#allocation2 + $0x51] sm:$0xff] %vm366_vm0, %v2785_v8  ;;  %2820 = vst.msk [vmem:[#allocation2 + $0x61] sm:$0xff] %vm366_vm0, %v2786_v58  ;;  %v2795_v30 = vmax.f32 %v7279_v23, 0.0  ;;  %v2796_v4 = vmax.f32 %v7282_v21, 0.0 }
 0x3b6   : > { %v7341_v25 = vld [vmem:[#allocation2 + $0x21] sm:$0xff]  ;;  %v2797_v47 = vmax.f32 %v7285_v22, 0.0  ;;  %v2798_v53 = vmax.f32 %v7288_v9, 0.0  ;;  %2821 = vst.msk [vmem:[#allocation2 + $0x69] sm:$0xff] %vm366_vm0, %v2787_v45  ;;  %2823 = vst.msk [vmem:[#allocation2 + $0x79] sm:$0xff] %vm366_vm0, %v2788_v35  ;;  %v2799_v2 = vmax.f32 %v7293_v42, 0.0 }
 0x3b7   : > { %2824 = vst.msk [vmem:[#allocation2 + $0x81] sm:$0xff] %vm366_vm0, %v2789_v39  ;;  %2826 = vst.msk [vmem:[#allocation2 + $0x91] sm:$0xff] %vm366_vm0, %v2790_v56  ;;  %3071 = vrot.lane.b32.xlu1 %v7341_v25, %s5694_s15  ;;  %v2800_v61 = vmax.f32 %v7296_v26, 0.0  ;;  %v2801_v10 = vmax.f32 %v7299_v49, 0.0  ;;  %v2802_v28 = vmax.f32 %v7302_v50, 0.0  ;;  %v3001_v11 = vld [vmem:[#allocation2 + $0x1] sm:$0xff] }
 0x3b8   : > { %2827 = vst.msk [vmem:[#allocation2 + $0x99] sm:$0xff] %vm366_vm0, %v2791_v0  ;;  %2829 = vst.msk [vmem:[#allocation2 + $0xa9] sm:$0xff] %vm366_vm0, %v2792_v60  ;;  %v2902_v12 = vld [vmem:[#allocation2 + $0x27] sm:$0x1]  ;;  %v2803_v46 = vmax.f32 %v7309_v40, 0.0  ;;  %v2804_v16 = vmax.f32 %v7312_v34, 0.0  ;;  %3065 = vrot.lane.b32.xlu0 %v3001_v11, %s5694_s15 }
 0x3b9   : > { %2830 = vst.msk [vmem:[#allocation2 + $0xb1] sm:$0xff] %vm366_vm0, %v2793_v14  ;;  %2832 = vst.msk [vmem:[#allocation2 + $0xc1] sm:$0xff] %vm366_vm0, %v2794_v52  ;;  %v2805_v44 = vmax.f32 %v7315_v5, 0.0  ;;  %v2806_v31 = vmax.f32 %v7318_v55, 0.0  ;;  %v2807_v6 = vmax.f32 %v7324_v13, 0.0  ;;  %v2808_v27 = vmax.f32 %v7327_v24, 0.0 }
 0x3ba   : > { %2833 = vst.msk [vmem:[#allocation2 + $0xc9] sm:$0xff] %vm366_vm0, %v2795_v30  ;;  %2835 = vst.msk [vmem:[#allocation2 + $0xd9] sm:$0xff] %vm366_vm0, %v2796_v4  ;;  %v2809_v57 = vmax.f32 %v7330_v37, 0.0  ;;  %v2811_v29 = vmax.f32 %v7333_v48, 0.0  ;;  %v2938_v63 = vld [vmem:[#allocation2 + $0x8] sm:$0xff]  ;;  %v7384_v32 = vld [vmem:[#allocation2 + $0x30] sm:$0xff] }
 0x3bb   : > { %2836 = vst.msk [vmem:[#allocation2 + $0xe1] sm:$0xff] %vm366_vm0, %v2797_v47  ;;  %2838 = vst.msk [vmem:[#allocation2 + $0xf1] sm:$0xff] %vm366_vm0, %v2798_v53  ;;  %v2865_v18 = vld [vmem:[#allocation2 + $0x2] sm:$0x1]  ;;  %3075 = vrot.lane.b32.xlu1 %v7247_v20, %s5694_s15  ;;  %v7395_v15 = vld [vmem:[#allocation2 + $0x19] sm:$0xff] }
 0x3bc   : > { %2920 = vst.msk [vmem:[#allocation2 + $0x29] sm:$0x1] %vm428_vm1, %v2902_v12  ;;  %2883 = vst.msk [vmem:[#allocation2] sm:$0x1] %vm428_vm1, %v2865_v18  ;;  %3069 = vrot.lane.b32.xlu0 %v7395_v15, %s5694_s15  ;;  %v7399_v17 = vld [vmem:[#allocation2 + $0x51] sm:$0xff]  ;;  %v7409_v33 = vld [vmem:[#allocation2 + $0x49] sm:$0xff] }
 0x3bd   : > { %2839 = vst.msk [vmem:[#allocation2 + $0xf9] sm:$0xff] %vm366_vm0, %v2799_v2  ;;  %2841 = vst.msk [vmem:[#allocation2 + $0x109] sm:$0xff] %vm366_vm0, %v2800_v61  ;;  %v7405_v7 = vld [vmem:[#allocation2 + $0x69] sm:$0xff]  ;;  %v2904_v62 = vld [vmem:[#allocation2 + $0x57] sm:$0x1] }
 0x3be   : > { %2842 = vst.msk [vmem:[#allocation2 + $0x111] sm:$0xff] %vm366_vm0, %v2801_v10  ;;  %2844 = vst.msk [vmem:[#allocation2 + $0x121] sm:$0xff] %vm366_vm0, %v2802_v28  ;;  %v7413_v43 = vld [vmem:[#allocation2 + $0x81] sm:$0xff]  ;;  %v2905_v23 = vld [vmem:[#allocation2 + $0x6f] sm:$0x1] }
 0x3bf   : > { %2845 = vst.msk [vmem:[#allocation2 + $0x129] sm:$0xff] %vm366_vm0, %v2803_v46  ;;  %2847 = vst.msk [vmem:[#allocation2 + $0x139] sm:$0xff] %vm366_vm0, %v2804_v16  ;;  %3079 = vrot.lane.b32.xlu1 %v7399_v17, %s5694_s15  ;;  %v2906_v21 = vld [vmem:[#allocation2 + $0x87] sm:$0x1]  ;;  %v2907_v22 = vld [vmem:[#allocation2 + $0x9f] sm:$0x1] }
 0x3c0   : > { %2848 = vst.msk [vmem:[#allocation2 + $0x141] sm:$0xff] %vm366_vm0, %v2805_v44  ;;  %2850 = vst.msk [vmem:[#allocation2 + $0x151] sm:$0xff] %vm366_vm0, %v2806_v31  ;;  %3073 = vrot.lane.b32.xlu0 %v7290_v38, %s5694_s15  ;;  %v7419_v9 = vld [vmem:[#allocation2 + $0x61] sm:$0xff]  ;;  %v2908_v42 = vld [vmem:[#allocation2 + $0xb7] sm:$0x1] }
 0x3c1   : > { %2970 = vst.msk [vmem:[#allocation3 + $0x8] sm:$0xff] %vm366_vm0, %v2938_v63  ;;  %2851 = vst.msk [vmem:[#allocation2 + $0x159] sm:$0xff] %vm366_vm0, %v2807_v6  ;;  %v2909_v26 = vld [vmem:[#allocation2 + $0xcf] sm:$0x1]  ;;  %v7426_v50 = vld [vmem:[#allocation2 + $0x99] sm:$0xff] }
 0x3c2   : > { %2852 = vst.msk [vmem:[#allocation2 + $0x169] sm:$0xff] %vm366_vm0, %v2808_v27  ;;  %2853 = vst.msk [vmem:[#allocation2 + $0x171] sm:$0xff] %vm366_vm0, %v2809_v57  ;;  %v2910_v49 = vld [vmem:[#allocation2 + $0xe7] sm:$0x1]  ;;  %v7433_v5 = vld [vmem:[#allocation2 + $0x79] sm:$0xff] }
 0x3c3   : > { %2856 = vst.msk [vmem:[#allocation2 + $0x189] sm:$0xff] %vm366_vm0, %v2811_v29  ;;  %2973 = vst.msk [vmem:[#allocation3 + $0x20] sm:$0xff] %vm366_vm0, %v7384_v32  ;;  %3083 = vrot.lane.b32.xlu1 %v7405_v7, %s5694_s15  ;;  %v2937_v55 = vld [vmem:[#allocation2] sm:$0xff]  ;;  %v2866_v41 = vld [vmem:[#allocation2 + $0x1a] sm:$0x1] }
 0x3c4   : > { %3077 = vrot.lane.b32.xlu0 %v7409_v33, %s5694_s15  ;;  %2922 = vst.msk [vmem:[#allocation2 + $0x59] sm:$0x1] %vm428_vm1, %v2904_v62  ;;  %2923 = vst.msk [vmem:[#allocation2 + $0x71] sm:$0x1] %vm428_vm1, %v2905_v23  ;;  %v2911_v19 = vld [vmem:[#allocation2 + $0xff] sm:$0x1] }
 0x3c5   : > { %2924 = vst.msk [vmem:[#allocation2 + $0x89] sm:$0x1] %vm428_vm1, %v2906_v21  ;;  %2925 = vst.msk [vmem:[#allocation2 + $0xa1] sm:$0x1] %vm428_vm1, %v2907_v22  ;;  %v2912_v40 = vld [vmem:[#allocation2 + $0x117] sm:$0x1] }
 0x3c6   : > { %2926 = vst.msk [vmem:[#allocation2 + $0xb9] sm:$0x1] %vm428_vm1, %v2908_v42  ;;  %2927 = vst.msk [vmem:[#allocation2 + $0xd1] sm:$0x1] %vm428_vm1, %v2909_v26  ;;  %v2913_v34 = vld [vmem:[#allocation2 + $0x12f] sm:$0x1] }
 0x3c7   : > { %3087 = vrot.lane.b32.xlu1 %v7413_v43, %s5694_s15  ;;  %2928 = vst.msk [vmem:[#allocation2 + $0xe9] sm:$0x1] %vm428_vm1, %v2910_v49  ;;  %2929 = vst.msk [vmem:[#allocation2 + $0x101] sm:$0x1] %vm428_vm1, %v2911_v19  ;;  %v7440_v13 = vld [vmem:[#allocation2 + $0x20] sm:$0xff]  ;;  %v7442_v24 = vld [vmem:[#allocation2 + $0xb1] sm:$0xff] }
 0x3c8   : > { %3081 = vrot.lane.b32.xlu0 %v7419_v9, %s5694_s15  ;;  %2930 = vst.msk [vmem:[#allocation2 + $0x119] sm:$0x1] %vm428_vm1, %v2912_v40  ;;  %2931 = vst.msk [vmem:[#allocation2 + $0x131] sm:$0x1] %vm428_vm1, %v2913_v34  ;;  %v7447_v37 = vld [vmem:[#allocation2 + $0x50] sm:$0xff]  ;;  %v7454_v54 = vld [vmem:[#allocation2 + $0x68] sm:$0xff] }
 0x3c9   : > { %2969 = vst.msk [vmem:[#allocation3] sm:$0xff] %vm366_vm0, %v2937_v55  ;;  %2972 = vst.msk [vmem:[#allocation3 + $0x18] sm:$0xff] %vm366_vm0, %v7440_v13  ;;  %v2868_v48 = vld [vmem:[#allocation2 + $0x4a] sm:$0x1]  ;;  %v7456_v59 = vld [vmem:[#allocation2 + $0x91] sm:$0xff] }
 0x3ca   : > { %2884 = vst.msk [vmem:[#allocation2 + $0x18] sm:$0x1] %vm428_vm1, %v2866_v41  ;;  %2886 = vst.msk [vmem:[#allocation2 + $0x48] sm:$0x1] %vm428_vm1, %v2868_v48  ;;  %v2869_v51 = vld [vmem:[#allocation2 + $0x62] sm:$0x1] }
 0x3cb   : > { %3091 = vrot.lane.b32.xlu1 %v7426_v50, %s5694_s15  ;;  %2976 = vst.msk [vmem:[#allocation3 + $0x38] sm:$0xff] %vm366_vm0, %v7447_v37  ;;  %2978 = vst.msk [vmem:[#allocation3 + $0x48] sm:$0xff] %vm366_vm0, %v7454_v54  ;;  %v7460_v8 = vld [vmem:[#allocation2 + $0x80] sm:$0xff]  ;;  %v2870_v58 = vld [vmem:[#allocation2 + $0x7a] sm:$0x1] }
 0x3cc   : > { %3085 = vrot.lane.b32.xlu0 %v7433_v5, %s5694_s15  ;;  %2887 = vst.msk [vmem:[#allocation2 + $0x60] sm:$0x1] %vm428_vm1, %v2869_v51  ;;  %v3018_v45 = vld [vmem:[#allocation2 + $0xc9] sm:$0xff]  ;;  %2888 = vst.msk [vmem:[#allocation2 + $0x78] sm:$0x1] %vm428_vm1, %v2870_v58  ;;  %v7468_v35 = vld [vmem:[#allocation2 + $0x98] sm:$0xff] }
 0x3cd   : > { %2980 = vst.msk [vmem:[#allocation3 + $0x58] sm:$0xff] %vm366_vm0, %v7460_v8  ;;  %v2871_v39 = vld [vmem:[#allocation2 + $0x92] sm:$0x1]  ;;  %v7470_v56 = vld [vmem:[#allocation2 + $0xa9] sm:$0xff]  ;;  %2982 = vst.msk [vmem:[#allocation3 + $0x68] sm:$0xff] %vm366_vm0, %v7468_v35 }
 0x3ce   : > { %2889 = vst.msk [vmem:[#allocation2 + $0x90] sm:$0x1] %vm428_vm1, %v2871_v39  ;;  %v7476_v0 = vld [vmem:[#allocation2 + $0xb0] sm:$0xff]  ;;  %v3020_v60 = vld [vmem:[#allocation2 + $0xe1] sm:$0xff]  ;;  %v2872_v14 = vld [vmem:[#allocation2 + $0xaa] sm:$0x1] }
 0x3cf   : > { %3095 = vrot.lane.b32.xlu1 %v7442_v24, %s5694_s15  ;;  %2984 = vst.msk [vmem:[#allocation3 + $0x78] sm:$0xff] %vm366_vm0, %v7476_v0  ;;  %v7480_v52 = vld [vmem:[#allocation2 + $0xc8] sm:$0xff]  ;;  %v2873_v30 = vld [vmem:[#allocation2 + $0xc2] sm:$0x1]  ;;  %v2874_v53 = vld [vmem:[#allocation2 + $0xda] sm:$0x1] }
 0x3d0   : > { %3089 = vrot.lane.b32.xlu0 %v7456_v59, %s5694_s15  ;;  %2890 = vst.msk [vmem:[#allocation2 + $0xa8] sm:$0x1] %vm428_vm1, %v2872_v14  ;;  %2891 = vst.msk [vmem:[#allocation2 + $0xc0] sm:$0x1] %vm428_vm1, %v2873_v30  ;;  %v7490_v47 = vld [vmem:[#allocation2 + $0xe0] sm:$0xff]  ;;  %v7499_v10 = vld [vmem:[#allocation2 + $0xf8] sm:$0xff] }
 0x3d1   : > { %v7484_v4 = vld [vmem:[#allocation2 + $0x18] sm:$0xff]  ;;  %2986 = vst.msk [vmem:[#allocation3 + $0x88] sm:$0xff] %vm366_vm0, %v7480_v52  ;;  %v3017_v2 = vld [vmem:[#allocation2 + $0xc1] sm:$0xff]  ;;  %2988 = vst.msk [vmem:[#allocation3 + $0x98] sm:$0xff] %vm366_vm0, %v7490_v47 }
 0x3d2   : > { %2971 = vst.msk [vmem:[#allocation3 + $0x10] sm:$0xff] %vm366_vm0, %v7484_v4  ;;  %v7494_v61 = vld [vmem:[#allocation2 + $0x48] sm:$0xff]  ;;  %v2875_v28 = vld [vmem:[#allocation2 + $0xf2] sm:$0x1]  ;;  %2990 = vst.msk [vmem:[#allocation3 + $0xa8] sm:$0xff] %vm366_vm0, %v7499_v10 }
 0x3d3   : > { %3099 = vrot.lane.b32.xlu1 %v3018_v45, %s5694_s15  ;;  %2892 = vst.msk [vmem:[#allocation2 + $0xd8] sm:$0x1] %vm428_vm1, %v2874_v53  ;;  %2893 = vst.msk [vmem:[#allocation2 + $0xf0] sm:$0x1] %vm428_vm1, %v2875_v28  ;;  %v7507_v12 = vld [vmem:[#allocation2 + $0x110] sm:$0xff]  ;;  %v7509_v46 = vld [vmem:[#allocation2 + $0x128] sm:$0xff] }
 0x3d4   : > { %3093 = vrot.lane.b32.xlu0 %v7470_v56, %s5694_s15  ;;  %2975 = vst.msk [vmem:[#allocation3 + $0x30] sm:$0xff] %vm366_vm0, %v7494_v61  ;;  %v2876_v11 = vld [vmem:[#allocation2 + $0x10a] sm:$0x1]  ;;  %v3022_v16 = vld [vmem:[#allocation2 + $0xf9] sm:$0xff]  ;;  %2992 = vst.msk [vmem:[#allocation3 + $0xb8] sm:$0xff] %vm366_vm0, %v7507_v12 }
 0x3d5   : > { %v7511_v44 = vld [vmem:[#allocation2 + $0x60] sm:$0xff]  ;;  %2894 = vst.msk [vmem:[#allocation2 + $0x108] sm:$0x1] %vm428_vm1, %v2876_v11  ;;  %v7521_v27 = vld [vmem:[#allocation2 + $0x78] sm:$0xff]  ;;  %v7527_v63 = vld [vmem:[#allocation2 + $0x90] sm:$0xff] }
 0x3d6   : > { %2994 = vst.msk [vmem:[#allocation3 + $0xc8] sm:$0xff] %vm366_vm0, %v7509_v46  ;;  %v2877_v31 = vld [vmem:[#allocation2 + $0x122] sm:$0x1]  ;;  %2977 = vst.msk [vmem:[#allocation3 + $0x40] sm:$0xff] %vm366_vm0, %v7511_v44  ;;  %v2878_v57 = vld [vmem:[#allocation2 + $0x13a] sm:$0x1] }
 0x3d7   : > { %3103 = vrot.lane.b32.xlu1 %v3020_v60, %s5694_s15  ;;  %v2964_v6 = vld [vmem:[#allocation2 + $0x140] sm:$0xff]  ;;  %2895 = vst.msk [vmem:[#allocation2 + $0x120] sm:$0x1] %vm428_vm1, %v2877_v31  ;;  %v2966_v29 = vld [vmem:[#allocation2 + $0x158] sm:$0xff]  ;;  %2896 = vst.msk [vmem:[#allocation2 + $0x138] sm:$0x1] %vm428_vm1, %v2878_v57 }
 0x3d8   : > { %3097 = vrot.lane.b32.xlu0 %v3017_v2, %s5694_s15  ;;  %2996 = vst.msk [vmem:[#allocation3 + $0xd8] sm:$0xff] %vm366_vm0, %v2964_v6  ;;  %2979 = vst.msk [vmem:[#allocation3 + $0x50] sm:$0xff] %vm366_vm0, %v7521_v27  ;;  %v2879_v18 = vld [vmem:[#allocation2 + $0x152] sm:$0x1]  ;;  %v2880_v23 = vld [vmem:[#allocation2 + $0x16a] sm:$0x1] }
 0x3d9   : > { %2998 = vst.msk [vmem:[#allocation3 + $0xe8] sm:$0xff] %vm366_vm0, %v2966_v29  ;;  %v2968_v62 = vld [vmem:[#allocation2 + $0x170] sm:$0xff]  ;;  %2981 = vst.msk [vmem:[#allocation3 + $0x60] sm:$0xff] %vm366_vm0, %v7527_v63  ;;  %v3019_v21 = vld [vmem:[#allocation2 + $0xd9] sm:$0xff] }
 0x3da   : > { %2897 = vst.msk [vmem:[#allocation2 + $0x150] sm:$0x1] %vm428_vm1, %v2879_v18  ;;  %v7536_v22 = vld [vmem:[#allocation2 + $0xa8] sm:$0xff]  ;;  %v7538_v42 = vld [vmem:[#allocation2 + $0xc0] sm:$0xff]  ;;  %2898 = vst.msk [vmem:[#allocation2 + $0x168] sm:$0x1] %vm428_vm1, %v2880_v23 }
 0x3db   : > { %3107 = vrot.lane.b32.xlu1 %v3022_v16, %s5694_s15  ;;  %3000 = vst.msk [vmem:[#allocation3 + $0xf8] sm:$0xff] %vm366_vm0, %v2968_v62  ;;  %2983 = vst.msk [vmem:[#allocation3 + $0x70] sm:$0xff] %vm366_vm0, %v7536_v22  ;;  %v7546_v26 = vld [vmem:[#allocation2 + $0xd8] sm:$0xff]  ;;  %v7550_v19 = vld [vmem:[#allocation2 + $0xf0] sm:$0xff] }
 0x3dc   : > { %3101 = vrot.lane.b32.xlu0 %v3019_v21, %s5694_s15  ;;  %2985 = vst.msk [vmem:[#allocation3 + $0x80] sm:$0xff] %vm366_vm0, %v7538_v42  ;;  %v3024_v49 = vld [vmem:[#allocation2 + $0x111] sm:$0xff]  ;;  %2987 = vst.msk [vmem:[#allocation3 + $0x90] sm:$0xff] %vm366_vm0, %v7546_v26  ;;  %v7555_v40 = vld [vmem:[#allocation2 + $0x108] sm:$0xff] }
 0x3dd   : > { %2989 = vst.msk [vmem:[#allocation3 + $0xa0] sm:$0xff] %vm366_vm0, %v7550_v19  ;;  %v3021_v34 = vld [vmem:[#allocation2 + $0xf1] sm:$0xff]  ;;  %2991 = vst.msk [vmem:[#allocation3 + $0xb0] sm:$0xff] %vm366_vm0, %v7555_v40  ;;  %v3026_v48 = vld [vmem:[#allocation2 + $0x129] sm:$0xff] }
 0x3de   : > { %v7559_v55 = vld [vmem:[#allocation2 + $0x120] sm:$0xff]  ;;  %v7564_v41 = vld [vmem:[#allocation2 + $0x138] sm:$0xff]  ;;  %v3023_v45 = vld [vmem:[#allocation2 + $0x109] sm:$0xff] }
 0x3df   : > { %3111 = vrot.lane.b32.xlu1 %v3024_v49, %s5694_s15  ;;  %2993 = vst.msk [vmem:[#allocation3 + $0xc0] sm:$0xff] %vm366_vm0, %v7559_v55  ;;  %2995 = vst.msk [vmem:[#allocation3 + $0xd0] sm:$0xff] %vm366_vm0, %v7564_v41  ;;  %v3028_v39 = vld [vmem:[#allocation2 + $0x141] sm:$0xff]  ;;  %v2915_v30 = vld [vmem:[#allocation2 + $0x15f] sm:$0x1] }
 0x3e0   : > { %3105 = vrot.lane.b32.xlu0 %v3021_v34, %s5694_s15  ;;  %v2914_v60 = vld [vmem:[#allocation2 + $0x147] sm:$0x1]  ;;  %2933 = vst.msk [vmem:[#allocation2 + $0x161] sm:$0x1] %vm428_vm1, %v2915_v30  ;;  %v7576_v53 = vld [vmem:[#allocation2 + $0x169] sm:$0xff]  ;;  %v7578_v2 = vld [vmem:[#allocation2 + $0x171] sm:$0xff] }
 0x3e1   : > { %v2965_v51 = vld [vmem:[#allocation2 + $0x150] sm:$0xff]  ;;  %v2967_v58 = vld [vmem:[#allocation2 + $0x168] sm:$0xff]  ;;  %2932 = vst.msk [vmem:[#allocation2 + $0x149] sm:$0x1] %vm428_vm1, %v2914_v60  ;;  %v3030_v28 = vld [vmem:[#allocation2 + $0x159] sm:$0xff] }
 0x3e2   : > { %2997 = vst.msk [vmem:[#allocation3 + $0xe0] sm:$0xff] %vm366_vm0, %v2965_v51  ;;  %2999 = vst.msk [vmem:[#allocation3 + $0xf0] sm:$0xff] %vm366_vm0, %v2967_v58  ;;  %v3025_v14 = vld [vmem:[#allocation2 + $0x121] sm:$0xff]  ;;  %v2916_v11 = vld [vmem:[#allocation2 + $0x177] sm:$0x1] }
 0x3e3   : > { %3115 = vrot.lane.b32.xlu1 %v3026_v48, %s5694_s15  ;;  %2863 = vst.msk [vmem:[#allocation2 + $0x199] sm:$0xff] %vm366_vm0, %v7576_v53  ;;  %2864 = vst.msk [vmem:[#allocation2 + $0x1a1] sm:$0xff] %vm366_vm0, %v7578_v2  ;;  %v2917_v16 = vld [vmem:[#allocation2 + $0x18f] sm:$0x1]  ;;  %v3027_v31 = vld [vmem:[#allocation2 + $0x139] sm:$0xff] }
 0x3e4   : > { %3109 = vrot.lane.b32.xlu0 %v3023_v45, %s5694_s15  ;;  %2934 = vst.msk [vmem:[#allocation2 + $0x179] sm:$0x1] %vm428_vm1, %v2916_v11  ;;  %2935 = vst.msk [vmem:[#allocation2 + $0x191] sm:$0x1] %vm428_vm1, %v2917_v16  ;;  %v3032_v6 = vld [vmem:[#allocation2 + $0x171] sm:$0xff]  ;;  %v3031_v23 = vld [vmem:[#allocation2 + $0x169] sm:$0xff] }
 0x3e5   : > { %v3029_v57 = vld [vmem:[#allocation2 + $0x151] sm:$0xff]  ;;  %v7594_v21 = vld [vmem:[#allocation2 + $0x22] sm:$0xff]  ;;  %v7599_v34 = vld [vmem:[#allocation2 + $0x3a] sm:$0xff] }
 0x3e6   : > { %v3194_v18 = vld [vmem:[#allocation2 + $0xa] sm:$0xff]  ;;  %v3193_v49 = vld [vmem:[#allocation2 + $0x2] sm:$0xff]  ;;  %v3195_v48 = vld [vmem:[#allocation2 + $0x1a] sm:$0xff] }
 0x3e7   : > { %3119 = vrot.lane.b32.xlu1 %v3028_v39, %s5694_s15  ;;  %v7604_v51 = vld [vmem:[#allocation2 + $0x52] sm:$0xff]  ;;  %v7612_v45 = vld [vmem:[#allocation2 + $0x6a] sm:$0xff]  ;;  %v7620_v60 = vld [vmem:[#allocation2 + $0x82] sm:$0xff] }
 0x3e8   : > { %3113 = vrot.lane.b32.xlu0 %v3025_v14, %s5694_s15  ;;  %v7608_v58 = vld [vmem:[#allocation2 + $0x32] sm:$0xff]  ;;  %v7616_v39 = vld [vmem:[#allocation2 + $0x4a] sm:$0xff]  ;;  %v7624_v14 = vld [vmem:[#allocation2 + $0x62] sm:$0xff] }
 0x3e9   : > { %v7628_v30 = vld [vmem:[#allocation2 + $0x9a] sm:$0xff]  ;;  %v7636_v11 = vld [vmem:[#allocation2 + $0xb2] sm:$0xff]  ;;  %v3218_v3 = vld [vmem:[#allocation2 + $0x12a] sm:$0xff] }
 0x3ea   : > { %v2882_v29 = vld [vmem:[#allocation2 + $0x19a] sm:$0x1]  ;;  %v2918_v62 = vld [vmem:[#allocation2 + $0x1a7] sm:$0x1]  ;;  %v7640_v16 = vld [vmem:[#allocation2 + $0x92] sm:$0xff] }
 0x3eb   : > { %3123 = vrot.lane.b32.xlu1 %v3030_v28, %s5694_s15  ;;  %2900 = vst.msk [vmem:[#allocation2 + $0x198] sm:$0x1] %vm428_vm1, %v2882_v29  ;;  %2936 = vst.msk [vmem:[#allocation2 + $0x1a9] sm:$0x1] %vm428_vm1, %v2918_v62  ;;  %v7632_v28 = vld [vmem:[#allocation2 + $0x7a] sm:$0xff]  ;;  %v7653_v29 = vld [vmem:[#allocation2 + $0xc2] sm:$0xff] }
 0x3ec   : > { %3117 = vrot.lane.b32.xlu0 %v3027_v31, %s5694_s15  ;;  %v7644_v31 = vld [vmem:[#allocation2 + $0xca] sm:$0xff]  ;;  %v3211_v62 = vld [vmem:[#allocation2 + $0xda] sm:$0xff] }
 0x3ef   : > { %3127 = vrot.lane.b32.xlu1 %v3032_v6, %s5694_s15  ;;  %v7648_v6 = vld [vmem:[#allocation2 + $0xaa] sm:$0xff] }
 0x3f0   : > { %3121 = vrot.lane.b32.xlu0 %v3029_v57, %s5694_s15  ;;  %v3212_v57 = vld [vmem:[#allocation2 + $0xe2] sm:$0xff] }
 0x3f3   : > { %3259 = vrot.lane.b32.xlu1 %v3194_v18, %s5695_s16  ;;  %v3214_v18 = vld [vmem:[#allocation2 + $0xfa] sm:$0xff] }
 0x3f4   : > { %3125 = vrot.lane.b32.xlu0 %v3031_v23, %s5694_s15  ;;  %v3216_v23 = vld [vmem:[#allocation2 + $0x112] sm:$0xff]  ;;  %s8705_s15 = scalar_lea.vmem %s8807_s9, %s5458_s11 }
 0x3f7   : > { %3263 = vrot.lane.b32.xlu1 %v7594_v21, %s5695_s16 }
 0x3f8   : > { %3257 = vrot.lane.b32.xlu0 %v3193_v49, %s5695_s16  ;;  %v3213_v49 = vld [vmem:[#allocation2 + $0xf2] sm:$0xff] }
 0x3fb   : > { %3267 = vrot.lane.b32.xlu1 %v7599_v34, %s5695_s16 }
 0x3fc   : > { %3261 = vrot.lane.b32.xlu0 %v3195_v48, %s5695_s16 }
 0x3ff   : > { %3271 = vrot.lane.b32.xlu1 %v7604_v51, %s5695_s16 }
 0x400   : > { %3265 = vrot.lane.b32.xlu0 %v7608_v58, %s5695_s16 }
 0x403   : > { %3275 = vrot.lane.b32.xlu1 %v7612_v45, %s5695_s16 }
 0x404   : > { %3269 = vrot.lane.b32.xlu0 %v7616_v39, %s5695_s16 }
 0x407   : > { %3279 = vrot.lane.b32.xlu1 %v7620_v60, %s5695_s16 }
 0x408   : > { %3273 = vrot.lane.b32.xlu0 %v7624_v14, %s5695_s16 }
 0x40b   : > { %3283 = vrot.lane.b32.xlu1 %v7628_v30, %s5695_s16 }
 0x40c   : > { %3277 = vrot.lane.b32.xlu0 %v7632_v28, %s5695_s16 }
 0x40f   : > { %3287 = vrot.lane.b32.xlu1 %v7636_v11, %s5695_s16 }
 0x410   : > { %3281 = vrot.lane.b32.xlu0 %v7640_v16, %s5695_s16 }
 0x413   : > { %3291 = vrot.lane.b32.xlu1 %v7644_v31, %s5695_s16 }
 0x414   : > { %3285 = vrot.lane.b32.xlu0 %v7648_v6, %s5695_s16 }
 0x417   : > { %3295 = vrot.lane.b32.xlu1 %v3212_v57, %s5695_s16  ;;  %v3215_v57 = vld [vmem:[#allocation2 + $0x10a] sm:$0xff] }
 0x418   : > { %3289 = vrot.lane.b32.xlu0 %v7653_v29, %s5695_s16 }
 0x41b   : > { %3299 = vrot.lane.b32.xlu1 %v3214_v18, %s5695_s16  ;;  %v3217_v18 = vld [vmem:[#allocation2 + $0x122] sm:$0xff] }
 0x41c   : > { %3293 = vrot.lane.b32.xlu0 %v3211_v62, %s5695_s16 }
 0x41f   : > { %3303 = vrot.lane.b32.xlu1 %v3216_v23, %s5695_s16 }
 0x420   : > { %3297 = vrot.lane.b32.xlu0 %v3213_v49, %s5695_s16 }
 0x423   : > { %3307 = vrot.lane.b32.xlu1 %v3218_v3, %s5695_s16  ;;  %v3068_v1 = vpop.permute.xlu1 %3067  ;;  %v3219_v3 = vld [vmem:[#allocation2 + $0x13a] sm:$0xff] }
 0x424   : > { %3301 = vrot.lane.b32.xlu0 %v3215_v57, %s5695_s16  ;;  %3162 = vst.msk [vmem:[#allocation3 + $0x8] sm:$0xff] %vm707_vm2, %v3068_v1 }
 0x427   : > { %3449 = vrot.lane.b32.xlu1 %v7484_v4, %s5696_s17 }
 0x428   : > { %3305 = vrot.lane.b32.xlu0 %v3217_v18, %s5695_s16 }
 0x429   : > { %v3072_v62 = vpop.permute.xlu1 %3071 }
 0x42a   : > { %3164 = vst.msk [vmem:[#allocation3 + $0x18] sm:$0xff] %vm707_vm2, %v3072_v62  ;;  %v3066_v23 = vpop.permute.xlu0 %3065  ;;  %v4569_v62 = vld [vmem:[%s8803_s5] sm:$0xff] }
 0x42b   : > { %3641 = vrot.lane.b32.xlu1 %v7395_v15, %s5697_s18  ;;  %3161 = vst.msk [vmem:[#allocation3] sm:$0xff] %vm707_vm2, %v3066_v23 }
 0x42c   : > { %3309 = vrot.lane.b32.xlu0 %v3219_v3, %s5695_s16 }
 0x42d   : > { %v3076_v49 = vpop.permute.xlu1 %3075 }
 0x42e   : > { %3166 = vst.msk [vmem:[#allocation3 + $0x28] sm:$0xff] %vm707_vm2, %v3076_v49  ;;  %v3070_v1 = vpop.permute.xlu0 %3069  ;;  %v4572_v49 = vld [vmem:[%s8803_s5 + $0x18] sm:$0xff] }
 0x42f   : > { %3833 = vrot.lane.b32.xlu1 %v3195_v48, %s5698_s23  ;;  %3163 = vst.msk [vmem:[#allocation3 + $0x10] sm:$0xff] %vm707_vm2, %v3070_v1 }
 0x430   : > { %3451 = vrot.lane.b32.xlu0 %v7440_v13, %s5696_s17 }
 0x431   : > { %v3080_v4 = vpop.permute.xlu1 %3079 }
 0x432   : > { %3168 = vst.msk [vmem:[#allocation3 + $0x38] sm:$0xff] %vm707_vm2, %v3080_v4  ;;  %v3074_v15 = vpop.permute.xlu0 %3073 }
 0x433   : > { %4025 = vrot.lane.b32.xlu1 %v7384_v32, %s5699_s28  ;;  %3165 = vst.msk [vmem:[#allocation3 + $0x20] sm:$0xff] %vm707_vm2, %v3074_v15 }
 0x434   : > { %3643 = vrot.lane.b32.xlu0 %v7341_v25, %s5697_s18 }
 0x435   : > { %v3084_v57 = vpop.permute.xlu1 %3083 }
 0x436   : > { %3170 = vst.msk [vmem:[#allocation3 + $0x48] sm:$0xff] %vm707_vm2, %v3084_v57  ;;  %v3078_v48 = vpop.permute.xlu0 %3077  ;;  %v4573_v57 = vld [vmem:[%s8803_s5 + $0x20] sm:$0xf] }
 0x437   : > { %4027 = vrot.lane.b32.xlu1 %v7304_v36, %s5699_s28  ;;  %3167 = vst.msk [vmem:[#allocation3 + $0x30] sm:$0xff] %vm707_vm2, %v3078_v48 }
 0x438   : > { %3835 = vrot.lane.b32.xlu0 %v7594_v21, %s5698_s23  ;;  %v4570_v21 = vld [vmem:[%s8803_s5 + $0x8] sm:$0xff] }
 0x439   : > { %v3088_v13 = vpop.permute.xlu1 %3087  ;;  %v5658_v23 = vpack.c.bf16 %v4570_v21, %v4569_v62 }
 0x43a   : > { %3172 = vst.msk [vmem:[#allocation3 + $0x58] sm:$0xff] %vm707_vm2, %v3088_v13  ;;  %v3082_v18 = vpop.permute.xlu0 %3081 }
 0x43b   : > { %3455 = vrot.lane.b32.xlu1 %v7304_v36, %s5696_s17  ;;  %3169 = vst.msk [vmem:[#allocation3 + $0x40] sm:$0xff] %vm707_vm2, %v3082_v18  ;;  %5659 = vmatprep.subr.bf16.mxu1 %v5658_v23 }
 0x43c   : > { %3453 = vrot.lane.b32.xlu0 %v7384_v32, %s5696_s17  ;;  %5661 = vmatpush3.bf16.msra.mxu1 %v5658_v23  ;;  %v4571_v32 = vld [vmem:[%s8803_s5 + $0x10] sm:$0xff] }
 0x43d   : > { %v3092_v25 = vpop.permute.xlu1 %3091  ;;  %v5662_v1 = vpack.c.bf16 %v4572_v49, %v4571_v32 }
 0x43e   : > { %3174 = vst.msk [vmem:[#allocation3 + $0x68] sm:$0xff] %vm707_vm2, %v3092_v25  ;;  %v3086_v3 = vpop.permute.xlu0 %3085 }
 0x43f   : > { %4219 = vrot.lane.b32.xlu1 %v7247_v20, %s5700_s29  ;;  %3171 = vst.msk [vmem:[#allocation3 + $0x50] sm:$0xff] %vm707_vm2, %v3086_v3  ;;  %5663 = vmatprep.subr.bf16.mxu1 %v5662_v1 }
 0x440   : > { %4217 = vrot.lane.b32.xlu0 %v7290_v38, %s5700_s29  ;;  %5665 = vmatpush3.bf16.msra.mxu1 %v5662_v1 }
 0x441   : > { %v3096_v36 = vpop.permute.xlu1 %3095  ;;  %5600 = vmatprep.subr.msk.mxu1 %vm2232_vm4, %v4573_v57 }
 0x442   : > { %3176 = vst.msk [vmem:[#allocation3 + $0x78] sm:$0xff] %vm707_vm2, %v3096_v36  ;;  %v3090_v4 = vpop.permute.xlu0 %3089 }
 0x443   : > { %3647 = vrot.lane.b32.xlu1 %v7247_v20, %s5697_s18  ;;  %3173 = vst.msk [vmem:[#allocation3 + $0x60] sm:$0xff] %vm707_vm2, %v3090_v4 }
 0x444   : > { %3645 = vrot.lane.b32.xlu0 %v7290_v38, %s5697_s18  ;;  %5601 = vmatpush3.msk.msra.mxu1 %vm2232_vm4, %v4573_v57 }
 0x445   : > { %v3100_v15 = vpop.permute.xlu1 %3099 }
 0x446   : > { %3178 = vst.msk [vmem:[#allocation3 + $0x88] sm:$0xff] %vm707_vm2, %v3100_v15  ;;  %v3094_v48 = vpop.permute.xlu0 %3093 }
 0x447   : > { %4411 = vrot.lane.b32.xlu1 %v7599_v34, %s5701_s14  ;;  %3175 = vst.msk [vmem:[#allocation3 + $0x70] sm:$0xff] %vm707_vm2, %v3094_v48 }
 0x448   : > { %4409 = vrot.lane.b32.xlu0 %v7608_v58, %s5701_s14 }
 0x449   : > { %v3104_v20 = vpop.permute.xlu1 %3103 }
 0x44a   : > { %3180 = vst.msk [vmem:[#allocation3 + $0x98] sm:$0xff] %vm707_vm2, %v3104_v20  ;;  %v3098_v38 = vpop.permute.xlu0 %3097 }
 0x44b   : > { %4029 = vrot.lane.b32.xlu1 %v7494_v61, %s5699_s28  ;;  %3177 = vst.msk [vmem:[#allocation3 + $0x80] sm:$0xff] %vm707_vm2, %v3098_v38 }
 0x44c   : > { %3837 = vrot.lane.b32.xlu0 %v7608_v58, %s5698_s23 }
 0x44d   : > { %v3108_v13 = vpop.permute.xlu1 %3107 }
 0x44e   : > { %3182 = vst.msk [vmem:[#allocation3 + $0xa8] sm:$0xff] %vm707_vm2, %v3108_v13  ;;  %v3102_v18 = vpop.permute.xlu0 %3101 }
 0x44f   : > { %4031 = vrot.lane.b32.xlu1 %v7447_v37, %s5699_s28  ;;  %3179 = vst.msk [vmem:[#allocation3 + $0x90] sm:$0xff] %vm707_vm2, %v3102_v18 }
 0x450   : > { %3839 = vrot.lane.b32.xlu0 %v7599_v34, %s5698_s23 }
 0x451   : > { %v3112_v25 = vpop.permute.xlu1 %3111 }
 0x452   : > { %3184 = vst.msk [vmem:[#allocation3 + $0xb8] sm:$0xff] %vm707_vm2, %v3112_v25  ;;  %v3106_v62 = vpop.permute.xlu0 %3105 }
 0x453   : > { %3459 = vrot.lane.b32.xlu1 %v7447_v37, %s5696_s17  ;;  %3181 = vst.msk [vmem:[#allocation3 + $0xa0] sm:$0xff] %vm707_vm2, %v3106_v62 }
 0x454   : > { %3457 = vrot.lane.b32.xlu0 %v7494_v61, %s5696_s17 }
 0x455   : > { %v3116_v58 = vpop.permute.xlu1 %3115 }
 0x456   : > { %3186 = vst.msk [vmem:[#allocation3 + $0xc8] sm:$0xff] %vm707_vm2, %v3116_v58  ;;  %v3110_v21 = vpop.permute.xlu0 %3109 }
 0x457   : > { %4223 = vrot.lane.b32.xlu1 %v7399_v17, %s5700_s29  ;;  %3183 = vst.msk [vmem:[#allocation3 + $0xb0] sm:$0xff] %vm707_vm2, %v3110_v21 }
 0x458   : > { %4221 = vrot.lane.b32.xlu0 %v7409_v33, %s5700_s29 }
 0x459   : > { %v3120_v34 = vpop.permute.xlu1 %3119 }
 0x45a   : > { %3188 = vst.msk [vmem:[#allocation3 + $0xd8] sm:$0xff] %vm707_vm2, %v3120_v34  ;;  %v3114_v37 = vpop.permute.xlu0 %3113 }
 0x45b   : > { %3651 = vrot.lane.b32.xlu1 %v7399_v17, %s5697_s18  ;;  %3185 = vst.msk [vmem:[#allocation3 + $0xc0] sm:$0xff] %vm707_vm2, %v3114_v37 }
 0x45c   : > { %3649 = vrot.lane.b32.xlu0 %v7409_v33, %s5697_s18 }
 0x45d   : > { %v3124_v61 = vpop.permute.xlu1 %3123 }
 0x45e   : > { %3190 = vst.msk [vmem:[#allocation3 + $0xe8] sm:$0xff] %vm707_vm2, %v3124_v61  ;;  %v3118_v23 = vpop.permute.xlu0 %3117 }
 0x45f   : > { %4415 = vrot.lane.b32.xlu1 %v7604_v51, %s5701_s14  ;;  %3187 = vst.msk [vmem:[#allocation3 + $0xd0] sm:$0xff] %vm707_vm2, %v3118_v23 }
 0x460   : > { %4413 = vrot.lane.b32.xlu0 %v7616_v39, %s5701_s14 }
 0x461   : > { %v3128_v3 = vpop.permute.xlu1 %3127 }
 0x462   : > { %3192 = vst.msk [vmem:[#allocation3 + $0xf8] sm:$0xff] %vm707_vm2, %v3128_v3  ;;  %v3122_v17 = vpop.permute.xlu0 %3121 }
 0x463   : > { %4033 = vrot.lane.b32.xlu1 %v7511_v44, %s5699_s28  ;;  %3189 = vst.msk [vmem:[#allocation3 + $0xe0] sm:$0xff] %vm707_vm2, %v3122_v17 }
 0x464   : > { %3841 = vrot.lane.b32.xlu0 %v7616_v39, %s5698_s23 }
 0x465   : > { %v3260_v33 = vpop.permute.xlu1 %3259 }
 0x466   : > { %3354 = vst.msk [vmem:[#allocation3 + $0x8] sm:$0xff] %vm900_vm3, %v3260_v33  ;;  %v3126_v36 = vpop.permute.xlu0 %3125 }
 0x467   : > { %4035 = vrot.lane.b32.xlu1 %v7454_v54, %s5699_s28  ;;  %3191 = vst.msk [vmem:[#allocation3 + $0xf0] sm:$0xff] %vm707_vm2, %v3126_v36 }
 0x468   : > { %3843 = vrot.lane.b32.xlu0 %v7604_v51, %s5698_s23 }
 0x469   : > { %v3264_v32 = vpop.permute.xlu1 %3263 }
 0x46a   : > { %3356 = vst.msk [vmem:[#allocation3 + $0x18] sm:$0xff] %vm900_vm3, %v3264_v32  ;;  %v3258_v49 = vpop.permute.xlu0 %3257 }
 0x46b   : > { %3463 = vrot.lane.b32.xlu1 %v7454_v54, %s5696_s17  ;;  %3353 = vst.msk [vmem:[#allocation3] sm:$0xff] %vm900_vm3, %v3258_v49 }
 0x46c   : > { %3461 = vrot.lane.b32.xlu0 %v7511_v44, %s5696_s17 }
 0x46d   : > { %v3268_v39 = vpop.permute.xlu1 %3267 }
 0x46e   : > { %3358 = vst.msk [vmem:[#allocation3 + $0x28] sm:$0xff] %vm900_vm3, %v3268_v39  ;;  %v3262_v1 = vpop.permute.xlu0 %3261 }
 0x46f   : > { %4227 = vrot.lane.b32.xlu1 %v7405_v7, %s5700_s29  ;;  %3355 = vst.msk [vmem:[#allocation3 + $0x10] sm:$0xff] %vm900_vm3, %v3262_v1 }
 0x470   : > { %4225 = vrot.lane.b32.xlu0 %v7419_v9, %s5700_s29 }
 0x471   : > { %v3272_v51 = vpop.permute.xlu1 %3271 }
 0x472   : > { %3360 = vst.msk [vmem:[#allocation3 + $0x38] sm:$0xff] %vm900_vm3, %v3272_v51  ;;  %v3266_v54 = vpop.permute.xlu0 %3265 }
 0x473   : > { %3655 = vrot.lane.b32.xlu1 %v7405_v7, %s5697_s18  ;;  %3357 = vst.msk [vmem:[#allocation3 + $0x20] sm:$0xff] %vm900_vm3, %v3266_v54 }
 0x474   : > { %3653 = vrot.lane.b32.xlu0 %v7419_v9, %s5697_s18 }
 0x475   : > { %v3276_v44 = vpop.permute.xlu1 %3275 }
 0x476   : > { %3362 = vst.msk [vmem:[#allocation3 + $0x48] sm:$0xff] %vm900_vm3, %v3276_v44  ;;  %v3270_v4 = vpop.permute.xlu0 %3269  ;;  %v4166_v44 = vld [vmem:[#allocation2 + $0xc9] sm:$0xff] }
 0x477   : > { %4419 = vrot.lane.b32.xlu1 %v7612_v45, %s5701_s14  ;;  %3359 = vst.msk [vmem:[#allocation3 + $0x30] sm:$0xff] %vm900_vm3, %v3270_v4 }
 0x478   : > { %4417 = vrot.lane.b32.xlu0 %v7624_v14, %s5701_s14 }
 0x479   : > { %v3280_v15 = vpop.permute.xlu1 %3279 }
 0x47a   : > { %3364 = vst.msk [vmem:[#allocation3 + $0x58] sm:$0xff] %vm900_vm3, %v3280_v15  ;;  %v3274_v7 = vpop.permute.xlu0 %3273 }
 0x47b   : > { %4037 = vrot.lane.b32.xlu1 %v7521_v27, %s5699_s28  ;;  %3361 = vst.msk [vmem:[#allocation3 + $0x40] sm:$0xff] %vm900_vm3, %v3274_v7 }
 0x47c   : > { %3845 = vrot.lane.b32.xlu0 %v7624_v14, %s5698_s23 }
 0x47d   : > { %v3284_v9 = vpop.permute.xlu1 %3283 }
 0x47e   : > { %3366 = vst.msk [vmem:[#allocation3 + $0x68] sm:$0xff] %vm900_vm3, %v3284_v9  ;;  %v3278_v57 = vpop.permute.xlu0 %3277 }
 0x47f   : > { %4039 = vrot.lane.b32.xlu1 %v7460_v8, %s5699_s28  ;;  %3363 = vst.msk [vmem:[#allocation3 + $0x50] sm:$0xff] %vm900_vm3, %v3278_v57 }
 0x480   : > { %3847 = vrot.lane.b32.xlu0 %v7612_v45, %s5698_s23 }
 0x481   : > { %v3288_v48 = vpop.permute.xlu1 %3287 }
 0x482   : > { %3368 = vst.msk [vmem:[#allocation3 + $0x78] sm:$0xff] %vm900_vm3, %v3288_v48  ;;  %v3282_v20 = vpop.permute.xlu0 %3281 }
 0x483   : > { %3467 = vrot.lane.b32.xlu1 %v7460_v8, %s5696_s17  ;;  %3365 = vst.msk [vmem:[#allocation3 + $0x60] sm:$0xff] %vm900_vm3, %v3282_v20 }
 0x484   : > { %3465 = vrot.lane.b32.xlu0 %v7521_v27, %s5696_s17 }
 0x485   : > { %v3292_v14 = vpop.permute.xlu1 %3291 }
 0x486   : > { %3370 = vst.msk [vmem:[#allocation3 + $0x88] sm:$0xff] %vm900_vm3, %v3292_v14  ;;  %v3286_v38 = vpop.permute.xlu0 %3285 }
 0x487   : > { %4231 = vrot.lane.b32.xlu1 %v7413_v43, %s5700_s29  ;;  %3367 = vst.msk [vmem:[#allocation3 + $0x70] sm:$0xff] %vm900_vm3, %v3286_v38 }
 0x488   : > { %4229 = vrot.lane.b32.xlu0 %v7433_v5, %s5700_s29 }
 0x489   : > { %v3296_v45 = vpop.permute.xlu1 %3295 }
 0x48a   : > { %3372 = vst.msk [vmem:[#allocation3 + $0x98] sm:$0xff] %vm900_vm3, %v3296_v45  ;;  %v3290_v8 = vpop.permute.xlu0 %3289 }
 0x48b   : > { %3659 = vrot.lane.b32.xlu1 %v7413_v43, %s5697_s18  ;;  %3369 = vst.msk [vmem:[#allocation3 + $0x80] sm:$0xff] %vm900_vm3, %v3290_v8 }
 0x48c   : > { %3657 = vrot.lane.b32.xlu0 %v7433_v5, %s5697_s18 }
 0x48d   : > { %v3300_v27 = vpop.permute.xlu1 %3299 }
 0x48e   : > { %3374 = vst.msk [vmem:[#allocation3 + $0xa8] sm:$0xff] %vm900_vm3, %v3300_v27  ;;  %v3294_v13 = vpop.permute.xlu0 %3293  ;;  %v4168_v27 = vld [vmem:[#allocation2 + $0xe1] sm:$0xff] }
 0x48f   : > { %4423 = vrot.lane.b32.xlu1 %v7620_v60, %s5701_s14  ;;  %3371 = vst.msk [vmem:[#allocation3 + $0x90] sm:$0xff] %vm900_vm3, %v3294_v13 }
 0x490   : > { %4421 = vrot.lane.b32.xlu0 %v7632_v28, %s5701_s14 }
 0x491   : > { %v3304_v18 = vpop.permute.xlu1 %3303 }
 0x492   : > { %3376 = vst.msk [vmem:[#allocation3 + $0xb8] sm:$0xff] %vm900_vm3, %v3304_v18  ;;  %v3298_v43 = vpop.permute.xlu0 %3297 }
 0x493   : > { %4041 = vrot.lane.b32.xlu1 %v7527_v63, %s5699_s28  ;;  %3373 = vst.msk [vmem:[#allocation3 + $0xa0] sm:$0xff] %vm900_vm3, %v3298_v43  ;;  %v4360_v43 = vld [vmem:[#allocation2 + $0xe2] sm:$0xff] }
 0x494   : > { %3849 = vrot.lane.b32.xlu0 %v7632_v28, %s5698_s23 }
 0x495   : > { %v3308_v5 = vpop.permute.xlu1 %3307 }
 0x496   : > { %3378 = vst.msk [vmem:[#allocation3 + $0xc8] sm:$0xff] %vm900_vm3, %v3308_v5  ;;  %v3302_v25 = vpop.permute.xlu0 %3301 }
 0x497   : > { %4043 = vrot.lane.b32.xlu1 %v7468_v35, %s5699_s28  ;;  %3375 = vst.msk [vmem:[#allocation3 + $0xb0] sm:$0xff] %vm900_vm3, %v3302_v25  ;;  %v4359_v25 = vld [vmem:[#allocation2 + $0xda] sm:$0xff] }
 0x498   : > { %3851 = vrot.lane.b32.xlu0 %v7620_v60, %s5698_s23 }
 0x499   : > { %v3450_v62 = vpop.permute.xlu1 %3449 }
 0x49a   : > { %3545 = vst.msk [vmem:[#allocation3] sm:$0xff] %vm1093_vm5, %v3450_v62  ;;  %v3306_v58 = vpop.permute.xlu0 %3305 }
 0x49b   : > { %3471 = vrot.lane.b32.xlu1 %v7468_v35, %s5696_s17  ;;  %3377 = vst.msk [vmem:[#allocation3 + $0xc0] sm:$0xff] %vm900_vm3, %v3306_v58 }
 0x49c   : > { %3469 = vrot.lane.b32.xlu0 %v7527_v63, %s5696_s17 }
 0x49d   : > { %v3642_v28 = vpop.permute.xlu1 %3641 }
 0x49e   : > { %3737 = vst.msk [vmem:[#allocation3] sm:$0xff] %vm1286_vm6, %v3642_v28  ;;  %v3310_v21 = vpop.permute.xlu0 %3309 }
 0x49f   : > { %4235 = vrot.lane.b32.xlu1 %v7426_v50, %s5700_s29  ;;  %3379 = vst.msk [vmem:[#allocation3 + $0xd0] sm:$0xff] %vm900_vm3, %v3310_v21 }
 0x4a0   : > { %4233 = vrot.lane.b32.xlu0 %v7456_v59, %s5700_s29 }
 0x4a1   : > { %v3834_v60 = vpop.permute.xlu1 %3833 }
 0x4a2   : > { %3929 = vst.msk [vmem:[#allocation3] sm:$0xff] %vm1479_vm7, %v3834_v60  ;;  %v3452_v35 = vpop.permute.xlu0 %3451 }
 0x4a3   : > { %3663 = vrot.lane.b32.xlu1 %v7426_v50, %s5697_s18  ;;  %3546 = vst.msk [vmem:[#allocation3 + $0x8] sm:$0xff] %vm1093_vm5, %v3452_v35 }
 0x4a4   : > { %3661 = vrot.lane.b32.xlu0 %v7456_v59, %s5697_s18 }
 0x4a5   : > { %v4026_v63 = vpop.permute.xlu1 %4025 }
 0x4a6   : > { %4121 = vst.msk [vmem:[#allocation3] sm:$0xff] %vm1672_vm8, %v4026_v63  ;;  %v3644_v34 = vpop.permute.xlu0 %3643 }
 0x4a7   : > { %4427 = vrot.lane.b32.xlu1 %v7628_v30, %s5701_s14  ;;  %3738 = vst.msk [vmem:[#allocation3 + $0x8] sm:$0xff] %vm1286_vm6, %v3644_v34 }
 0x4a8   : > { %4425 = vrot.lane.b32.xlu0 %v7640_v16, %s5701_s14 }
 0x4a9   : > { %v4028_v37 = vpop.permute.xlu1 %4027 }
 0x4aa   : > { %v3836_v61 = vpop.permute.xlu0 %3835 }
 0x4ab   : > { %4045 = vrot.lane.b32.xlu1 %v7536_v22, %s5699_s28  ;;  %3930 = vst.msk [vmem:[#allocation3 + $0x8] sm:$0xff] %vm1479_vm7, %v3836_v61  ;;  %v4170_v61 = vld [vmem:[#allocation2 + $0xf9] sm:$0xff] }
 0x4ac   : > { %3853 = vrot.lane.b32.xlu0 %v7640_v16, %s5698_s23  ;;  %4122 = vst.msk [vmem:[#allocation3 + $0x8] sm:$0xff] %vm1672_vm8, %v4028_v37 }
 0x4ad   : > { %v3456_v50 = vpop.permute.xlu1 %3455 }
 0x4ae   : > { %3548 = vst.msk [vmem:[#allocation3 + $0x18] sm:$0xff] %vm1093_vm5, %v3456_v50  ;;  %v3454_v59 = vpop.permute.xlu0 %3453 }
 0x4af   : > { %4047 = vrot.lane.b32.xlu1 %v7476_v0, %s5699_s28  ;;  %3547 = vst.msk [vmem:[#allocation3 + $0x10] sm:$0xff] %vm1093_vm5, %v3454_v59  ;;  %v4169_v59 = vld [vmem:[#allocation2 + $0xf1] sm:$0xff] }
 0x4b0   : > { %3855 = vrot.lane.b32.xlu0 %v7628_v30, %s5698_s23 }
 0x4b1   : > { %v4220_v23 = vpop.permute.xlu1 %4219 }
 0x4b2   : > { %4314 = vst.msk [vmem:[#allocation3 + $0x8] sm:$0xff] %vm1865_vm9, %v4220_v23  ;;  %v4218_v3 = vpop.permute.xlu0 %4217 }
 0x4b3   : > { %3475 = vrot.lane.b32.xlu1 %v7476_v0, %s5696_s17  ;;  %4313 = vst.msk [vmem:[#allocation3] sm:$0xff] %vm1865_vm9, %v4218_v3  ;;  %v3590_v0 = vld [vmem:[#allocation2 + $0xb1] sm:$0xff]  ;;  %v4362_v3 = vld [vmem:[#allocation2 + $0xfa] sm:$0xff] }
 0x4b4   : > { %3473 = vrot.lane.b32.xlu0 %v7536_v22, %s5696_s17 }
 0x4b5   : > { %v3648_v16 = vpop.permute.xlu1 %3647 }
 0x4b6   : > { %3740 = vst.msk [vmem:[#allocation3 + $0x18] sm:$0xff] %vm1286_vm6, %v3648_v16  ;;  %v3646_v17 = vpop.permute.xlu0 %3645 }
 0x4b7   : > { %4239 = vrot.lane.b32.xlu1 %v7442_v24, %s5700_s29  ;;  %3739 = vst.msk [vmem:[#allocation3 + $0x10] sm:$0xff] %vm1286_vm6, %v3646_v17  ;;  %v4361_v17 = vld [vmem:[#allocation2 + $0xf2] sm:$0xff] }
 0x4b8   : > { %4237 = vrot.lane.b32.xlu0 %v7470_v56, %s5700_s29 }
 0x4b9   : > { %v4412_v30 = vpop.permute.xlu1 %4411 }
 0x4ba   : > { %4506 = vst.msk [vmem:[#allocation3 + $0x8] sm:$0xff] %vm2058_vm10, %v4412_v30  ;;  %v4410_v33 = vpop.permute.xlu0 %4409 }
 0x4bb   : > { %3667 = vrot.lane.b32.xlu1 %v3590_v0, %s5697_s18  ;;  %4505 = vst.msk [vmem:[#allocation3] sm:$0xff] %vm2058_vm10, %v4410_v33 }
 0x4bc   : > { %3665 = vrot.lane.b32.xlu0 %v7470_v56, %s5697_s18 }
 0x4bd   : > { %v4030_v22 = vpop.permute.xlu1 %4029 }
 0x4be   : > { %v3838_v36 = vpop.permute.xlu0 %3837 }
 0x4bf   : > { %4431 = vrot.lane.b32.xlu1 %v7636_v11, %s5701_s14  ;;  %3931 = vst.msk [vmem:[#allocation3 + $0x10] sm:$0xff] %vm1479_vm7, %v3838_v36 }
 0x4c0   : > { %4429 = vrot.lane.b32.xlu0 %v7648_v6, %s5701_s14  ;;  %4123 = vst.msk [vmem:[#allocation3 + $0x10] sm:$0xff] %vm1672_vm8, %v4030_v22 }
 0x4c1   : > { %v4032_v24 = vpop.permute.xlu1 %4031  ;;  %v4538_v32 = vld [vmem:[#allocation3 + $0x8] sm:$0xff] }
 0x4c2   : > { %v3840_v49 = vpop.permute.xlu0 %3839  ;;  %v4537_v39 = vld [vmem:[#allocation3] sm:$0xff] }
 0x4c3   : > { %4049 = vrot.lane.b32.xlu1 %v7538_v42, %s5699_s28  ;;  %3932 = vst.msk [vmem:[#allocation3 + $0x18] sm:$0xff] %vm1479_vm7, %v3840_v49  ;;  %5602 = vmatprep.mubr.msk.f32.mxu1 %vm2135_vm11, %v4537_v39 }
 0x4c4   : > { %3857 = vrot.lane.b32.xlu0 %v7648_v6, %s5698_s23  ;;  %4124 = vst.msk [vmem:[#allocation3 + $0x18] sm:$0xff] %vm1672_vm8, %v4032_v24  ;;  %5603 = vmatmul.mubr.msk.f32.vlgmr.msra.gmra.mrb[0].mxu1 %vm2135_vm11, %v4538_v32 }
 0x4c5   : > { %v3460_v56 = vpop.permute.xlu1 %3459 }
 0x4c6   : > { %3550 = vst.msk [vmem:[#allocation3 + $0x28] sm:$0xff] %vm1093_vm5, %v3460_v56  ;;  %v3458_v1 = vpop.permute.xlu0 %3457  ;;  %v4172_v56 = vld [vmem:[#allocation2 + $0x111] sm:$0xff] }
 0x4c7   : > { %4051 = vrot.lane.b32.xlu1 %v7480_v52, %s5699_s28  ;;  %3549 = vst.msk [vmem:[#allocation3 + $0x20] sm:$0xff] %vm1093_vm5, %v3458_v1 }
 0x4c8   : > { %3859 = vrot.lane.b32.xlu0 %v7636_v11, %s5698_s23  ;;  %v4165_v11 = vld [vmem:[#allocation2 + $0xc1] sm:$0xff] }
 0x4c9   : > { %v4224_v51 = vpop.permute.xlu1 %4223 }
 0x4ca   : > { %4316 = vst.msk [vmem:[#allocation3 + $0x18] sm:$0xff] %vm1865_vm9, %v4224_v51  ;;  %v4222_v6 = vpop.permute.xlu0 %4221  ;;  %v4171_v51 = vld [vmem:[#allocation2 + $0x109] sm:$0xff] }
 0x4cb   : > { %3479 = vrot.lane.b32.xlu1 %v7480_v52, %s5696_s17  ;;  %4315 = vst.msk [vmem:[#allocation3 + $0x10] sm:$0xff] %vm1865_vm9, %v4222_v6 }
 0x4cc   : > { %3477 = vrot.lane.b32.xlu0 %v7538_v42, %s5696_s17 }
 0x4cd   : > { %v3652_v54 = vpop.permute.xlu1 %3651 }
 0x4ce   : > { %3742 = vst.msk [vmem:[#allocation3 + $0x28] sm:$0xff] %vm1286_vm6, %v3652_v54  ;;  %v3650_v4 = vpop.permute.xlu0 %3649  ;;  %v4364_v54 = vld [vmem:[#allocation2 + $0x112] sm:$0xff] }
 0x4cf   : > { %4243 = vrot.lane.b32.xlu1 %v4166_v44, %s5700_s29  ;;  %3741 = vst.msk [vmem:[#allocation3 + $0x20] sm:$0xff] %vm1286_vm6, %v3650_v4  ;;  %v4363_v4 = vld [vmem:[#allocation2 + $0x10a] sm:$0xff] }
 0x4d0   : > { %4241 = vrot.lane.b32.xlu0 %v4165_v11, %s5700_s29 }
 0x4d1   : > { %v4416_v15 = vpop.permute.xlu1 %4415 }
 0x4d2   : > { %4508 = vst.msk [vmem:[#allocation3 + $0x18] sm:$0xff] %vm2058_vm10, %v4416_v15  ;;  %v4414_v52 = vpop.permute.xlu0 %4413 }
 0x4d3   : > { %3671 = vrot.lane.b32.xlu1 %v4166_v44, %s5697_s18  ;;  %4507 = vst.msk [vmem:[#allocation3 + $0x10] sm:$0xff] %vm2058_vm10, %v4414_v52 }
 0x4d4   : > { %3669 = vrot.lane.b32.xlu0 %v4165_v11, %s5697_s18 }
 0x4d5   : > { %v4034_v42 = vpop.permute.xlu1 %4033 }
 0x4d6   : > { %v3842_v7 = vpop.permute.xlu0 %3841 }
 0x4d7   : > { %4435 = vrot.lane.b32.xlu1 %v7644_v31, %s5701_s14  ;;  %3933 = vst.msk [vmem:[#allocation3 + $0x20] sm:$0xff] %vm1479_vm7, %v3842_v7 }
 0x4d8   : > { %4433 = vrot.lane.b32.xlu0 %v7653_v29, %s5701_s14  ;;  %4125 = vst.msk [vmem:[#allocation3 + $0x20] sm:$0xff] %vm1672_vm8, %v4034_v42 }
 0x4d9   : > { %v4036_v9 = vpop.permute.xlu1 %4035  ;;  %v4540_v57 = vld [vmem:[#allocation3 + $0x18] sm:$0xff] }
 0x4da   : > { %v3844_v48 = vpop.permute.xlu0 %3843  ;;  %v4539_v20 = vld [vmem:[#allocation3 + $0x10] sm:$0xff] }
 0x4db   : > { %4053 = vrot.lane.b32.xlu1 %v7546_v26, %s5699_s28  ;;  %3934 = vst.msk [vmem:[#allocation3 + $0x28] sm:$0xff] %vm1479_vm7, %v3844_v48  ;;  %5605 = vmatprep.mubr.msk.f32.mxu1 %vm2135_vm11, %v4539_v20 }
 0x4dc   : > { %3861 = vrot.lane.b32.xlu0 %v7653_v29, %s5698_s23  ;;  %4126 = vst.msk [vmem:[#allocation3 + $0x28] sm:$0xff] %vm1672_vm8, %v4036_v9  ;;  %5606 = vmatmul.mubr.msk.f32.gmra.mrb[2].mxu1 %vm2135_vm11, %v4540_v57 }
 0x4dd   : > { %v3464_v14 = vpop.permute.xlu1 %3463 }
 0x4de   : > { %3552 = vst.msk [vmem:[#allocation3 + $0x38] sm:$0xff] %vm1093_vm5, %v3464_v14  ;;  %v3462_v38 = vpop.permute.xlu0 %3461  ;;  %v4174_v14 = vld [vmem:[#allocation2 + $0x129] sm:$0xff] }
 0x4df   : > { %4055 = vrot.lane.b32.xlu1 %v7490_v47, %s5699_s28  ;;  %3551 = vst.msk [vmem:[#allocation3 + $0x30] sm:$0xff] %vm1093_vm5, %v3462_v38 }
 0x4e0   : > { %3863 = vrot.lane.b32.xlu0 %v7644_v31, %s5698_s23  ;;  %v4167_v31 = vld [vmem:[#allocation2 + $0xd9] sm:$0xff] }
 0x4e1   : > { %v4228_v45 = vpop.permute.xlu1 %4227 }
 0x4e2   : > { %4318 = vst.msk [vmem:[#allocation3 + $0x28] sm:$0xff] %vm1865_vm9, %v4228_v45  ;;  %v4226_v29 = vpop.permute.xlu0 %4225  ;;  %v4173_v45 = vld [vmem:[#allocation2 + $0x121] sm:$0xff] }
 0x4e3   : > { %3483 = vrot.lane.b32.xlu1 %v7490_v47, %s5696_s17  ;;  %4317 = vst.msk [vmem:[#allocation3 + $0x20] sm:$0xff] %vm1865_vm9, %v4226_v29 }
 0x4e4   : > { %3481 = vrot.lane.b32.xlu0 %v7546_v26, %s5696_s17 }
 0x4e5   : > { %v3656_v8 = vpop.permute.xlu1 %3655 }
 0x4e6   : > { %3744 = vst.msk [vmem:[#allocation3 + $0x38] sm:$0xff] %vm1286_vm6, %v3656_v8  ;;  %v3654_v13 = vpop.permute.xlu0 %3653  ;;  %v4366_v8 = vld [vmem:[#allocation2 + $0x12a] sm:$0xff] }
 0x4e7   : > { %4247 = vrot.lane.b32.xlu1 %v4168_v27, %s5700_s29  ;;  %3743 = vst.msk [vmem:[#allocation3 + $0x30] sm:$0xff] %vm1286_vm6, %v3654_v13  ;;  %v4365_v13 = vld [vmem:[#allocation2 + $0x122] sm:$0xff] }
 0x4e8   : > { %4245 = vrot.lane.b32.xlu0 %v4167_v31, %s5700_s29 }
 0x4e9   : > { %v4420_v18 = vpop.permute.xlu1 %4419 }
 0x4ea   : > { %4510 = vst.msk [vmem:[#allocation3 + $0x28] sm:$0xff] %vm2058_vm10, %v4420_v18  ;;  %v4418_v47 = vpop.permute.xlu0 %4417 }
 0x4eb   : > { %3675 = vrot.lane.b32.xlu1 %v4168_v27, %s5697_s18  ;;  %4509 = vst.msk [vmem:[#allocation3 + $0x20] sm:$0xff] %vm2058_vm10, %v4418_v47 }
 0x4ec   : > { %3673 = vrot.lane.b32.xlu0 %v4167_v31, %s5697_s18 }
 0x4ed   : > { %v4038_v26 = vpop.permute.xlu1 %4037 }
 0x4ee   : > { %v3846_v5 = vpop.permute.xlu0 %3845 }
 0x4ef   : > { %4439 = vrot.lane.b32.xlu1 %v4360_v43, %s5701_s14  ;;  %3935 = vst.msk [vmem:[#allocation3 + $0x30] sm:$0xff] %vm1479_vm7, %v3846_v5  ;;  %v3984_v5 = vld [vmem:[#allocation2 + $0x140] sm:$0xff] }
 0x4f0   : > { %4437 = vrot.lane.b32.xlu0 %v4359_v25, %s5701_s14  ;;  %4127 = vst.msk [vmem:[#allocation3 + $0x30] sm:$0xff] %vm1672_vm8, %v4038_v26 }
 0x4f1   : > { %v4040_v62 = vpop.permute.xlu1 %4039  ;;  %v4542_v58 = vld [vmem:[#allocation3 + $0x28] sm:$0xff] }
 0x4f2   : > { %v3848_v28 = vpop.permute.xlu0 %3847  ;;  %v4541_v21 = vld [vmem:[#allocation3 + $0x20] sm:$0xff] }
 0x4f3   : > { %4057 = vrot.lane.b32.xlu1 %v7550_v19, %s5699_s28  ;;  %3936 = vst.msk [vmem:[#allocation3 + $0x38] sm:$0xff] %vm1479_vm7, %v3848_v28  ;;  %5608 = vmatprep.mubr.msk.f32.mxu1 %vm2135_vm11, %v4541_v21  ;;  %v4176_v21 = vld [vmem:[#allocation2 + $0x141] sm:$0xff] }
 0x4f4   : > { %3865 = vrot.lane.b32.xlu0 %v4359_v25, %s5698_s23  ;;  %4128 = vst.msk [vmem:[#allocation3 + $0x38] sm:$0xff] %vm1672_vm8, %v4040_v62  ;;  %5609 = vmatmul.mubr.msk.f32.gmra.mrb[4].mxu1 %vm2135_vm11, %v4542_v58 }
 0x4f5   : > { %v3468_v60 = vpop.permute.xlu1 %3467 }
 0x4f6   : > { %3554 = vst.msk [vmem:[#allocation3 + $0x48] sm:$0xff] %vm1093_vm5, %v3468_v60  ;;  %v3466_v35 = vpop.permute.xlu0 %3465 }
 0x4f7   : > { %4059 = vrot.lane.b32.xlu1 %v7499_v10, %s5699_s28  ;;  %3553 = vst.msk [vmem:[#allocation3 + $0x40] sm:$0xff] %vm1093_vm5, %v3466_v35  ;;  %v4175_v35 = vld [vmem:[#allocation2 + $0x139] sm:$0xff] }
 0x4f8   : > { %3867 = vrot.lane.b32.xlu0 %v4360_v43, %s5698_s23 }
 0x4f9   : > { %v4232_v63 = vpop.permute.xlu1 %4231 }
 0x4fa   : > { %4320 = vst.msk [vmem:[#allocation3 + $0x38] sm:$0xff] %vm1865_vm9, %v4232_v63  ;;  %v4230_v34 = vpop.permute.xlu0 %4229 }
 0x4fb   : > { %3487 = vrot.lane.b32.xlu1 %v7499_v10, %s5696_s17  ;;  %4319 = vst.msk [vmem:[#allocation3 + $0x30] sm:$0xff] %vm1865_vm9, %v4230_v34 }
 0x4fc   : > { %3485 = vrot.lane.b32.xlu0 %v7550_v19, %s5696_s17 }
 0x4fd   : > { %v3660_v37 = vpop.permute.xlu1 %3659 }
 0x4fe   : > { %3746 = vst.msk [vmem:[#allocation3 + $0x48] sm:$0xff] %vm1286_vm6, %v3660_v37  ;;  %v3658_v50 = vpop.permute.xlu0 %3657  ;;  %v4368_v37 = vld [vmem:[#allocation2 + $0x142] sm:$0xff] }
 0x4ff   : > { %4251 = vrot.lane.b32.xlu1 %v4170_v61, %s5700_s29  ;;  %3745 = vst.msk [vmem:[#allocation3 + $0x40] sm:$0xff] %vm1286_vm6, %v3658_v50  ;;  %v4367_v50 = vld [vmem:[#allocation2 + $0x13a] sm:$0xff] }
 0x500   : > { %4249 = vrot.lane.b32.xlu0 %v4169_v59, %s5700_s29 }
 0x501   : > { %v4424_v23 = vpop.permute.xlu1 %4423 }
 0x502   : > { %4512 = vst.msk [vmem:[#allocation3 + $0x38] sm:$0xff] %vm2058_vm10, %v4424_v23  ;;  %v4422_v10 = vpop.permute.xlu0 %4421 }
 0x503   : > { %3679 = vrot.lane.b32.xlu1 %v4170_v61, %s5697_s18  ;;  %4511 = vst.msk [vmem:[#allocation3 + $0x30] sm:$0xff] %vm2058_vm10, %v4422_v10  ;;  %v3985_v10 = vld [vmem:[#allocation2 + $0x150] sm:$0xff] }
 0x504   : > { %3677 = vrot.lane.b32.xlu0 %v4169_v59, %s5697_s18 }
 0x505   : > { %v4042_v19 = vpop.permute.xlu1 %4041 }
 0x506   : > { %v3850_v16 = vpop.permute.xlu0 %3849 }
 0x507   : > { %4443 = vrot.lane.b32.xlu1 %v4362_v3, %s5701_s14  ;;  %3937 = vst.msk [vmem:[#allocation3 + $0x40] sm:$0xff] %vm1479_vm7, %v3850_v16 }
 0x508   : > { %4441 = vrot.lane.b32.xlu0 %v4361_v17, %s5701_s14  ;;  %4129 = vst.msk [vmem:[#allocation3 + $0x40] sm:$0xff] %vm1672_vm8, %v4042_v19 }
 0x509   : > { %v4044_v30 = vpop.permute.xlu1 %4043  ;;  %v4544_v0 = vld [vmem:[#allocation3 + $0x38] sm:$0xff] }
 0x50a   : > { %v3852_v33 = vpop.permute.xlu0 %3851  ;;  %v4543_v22 = vld [vmem:[#allocation3 + $0x30] sm:$0xff] }
 0x50b   : > { %4061 = vrot.lane.b32.xlu1 %v7555_v40, %s5699_s28  ;;  %3938 = vst.msk [vmem:[#allocation3 + $0x48] sm:$0xff] %vm1479_vm7, %v3852_v33  ;;  %5611 = vmatprep.mubr.msk.f32.mxu1 %vm2135_vm11, %v4543_v22 }
 0x50c   : > { %3869 = vrot.lane.b32.xlu0 %v4361_v17, %s5698_s23  ;;  %4130 = vst.msk [vmem:[#allocation3 + $0x48] sm:$0xff] %vm1672_vm8, %v4044_v30  ;;  %5612 = vmatmul.mubr.msk.f32.gmra.mrb[6].mxu1 %vm2135_vm11, %v4544_v0  ;;  %v4177_v0 = vld [vmem:[#allocation2 + $0x151] sm:$0xff] }
 0x50d   : > { %v3472_v36 = vpop.permute.xlu1 %3471 }
 0x50e   : > { %3556 = vst.msk [vmem:[#allocation3 + $0x58] sm:$0xff] %vm1093_vm5, %v3472_v36  ;;  %v3470_v24 = vpop.permute.xlu0 %3469 }
 0x50f   : > { %4063 = vrot.lane.b32.xlu1 %v7507_v12, %s5699_s28  ;;  %3555 = vst.msk [vmem:[#allocation3 + $0x50] sm:$0xff] %vm1093_vm5, %v3470_v24  ;;  %v3986_v24 = vld [vmem:[#allocation2 + $0x158] sm:$0xff] }
 0x510   : > { %3871 = vrot.lane.b32.xlu0 %v4362_v3, %s5698_s23 }
 0x511   : > { %v4236_v32 = vpop.permute.xlu1 %4235 }
 0x512   : > { %4322 = vst.msk [vmem:[#allocation3 + $0x48] sm:$0xff] %vm1865_vm9, %v4236_v32  ;;  %v4234_v49 = vpop.permute.xlu0 %4233 }
 0x513   : > { %3491 = vrot.lane.b32.xlu1 %v7507_v12, %s5696_s17  ;;  %4321 = vst.msk [vmem:[#allocation3 + $0x40] sm:$0xff] %vm1865_vm9, %v4234_v49  ;;  %v4369_v49 = vld [vmem:[#allocation2 + $0x152] sm:$0xff] }
 0x514   : > { %3489 = vrot.lane.b32.xlu0 %v7555_v40, %s5696_s17 }
 0x515   : > { %v3664_v39 = vpop.permute.xlu1 %3663 }
 0x516   : > { %3748 = vst.msk [vmem:[#allocation3 + $0x58] sm:$0xff] %vm1286_vm6, %v3664_v39  ;;  %v3662_v1 = vpop.permute.xlu0 %3661 }
 0x517   : > { %4255 = vrot.lane.b32.xlu1 %v4172_v56, %s5700_s29  ;;  %3747 = vst.msk [vmem:[#allocation3 + $0x50] sm:$0xff] %vm1286_vm6, %v3662_v1 }
 0x518   : > { %4253 = vrot.lane.b32.xlu0 %v4171_v51, %s5700_s29 }
 0x519   : > { %v4428_v6 = vpop.permute.xlu1 %4427 }
 0x51a   : > { %4514 = vst.msk [vmem:[#allocation3 + $0x48] sm:$0xff] %vm2058_vm10, %v4428_v6  ;;  %v4426_v12 = vpop.permute.xlu0 %4425 }
 0x51b   : > { %3683 = vrot.lane.b32.xlu1 %v4172_v56, %s5697_s18  ;;  %4513 = vst.msk [vmem:[#allocation3 + $0x40] sm:$0xff] %vm2058_vm10, %v4426_v12 }
 0x51c   : > { %3681 = vrot.lane.b32.xlu0 %v4171_v51, %s5697_s18  ;;  %v4178_v51 = vld [vmem:[#allocation2 + $0x159] sm:$0xff] }
 0x51d   : > { %v4046_v40 = vpop.permute.xlu1 %4045 }
 0x51e   : > { %v3854_v44 = vpop.permute.xlu0 %3853 }
 0x51f   : > { %4447 = vrot.lane.b32.xlu1 %v4364_v54, %s5701_s14  ;;  %3939 = vst.msk [vmem:[#allocation3 + $0x50] sm:$0xff] %vm1479_vm7, %v3854_v44 }
 0x520   : > { %4445 = vrot.lane.b32.xlu0 %v4363_v4, %s5701_s14  ;;  %4131 = vst.msk [vmem:[#allocation3 + $0x50] sm:$0xff] %vm1672_vm8, %v4046_v40 }
 0x521   : > { %v4048_v11 = vpop.permute.xlu1 %4047  ;;  %v4546_v15 = vld [vmem:[#allocation3 + $0x48] sm:$0xff] }
 0x522   : > { %v3856_v52 = vpop.permute.xlu0 %3855  ;;  %v4545_v42 = vld [vmem:[#allocation3 + $0x40] sm:$0xff] }
 0x523   : > { %4065 = vrot.lane.b32.xlu1 %v7559_v55, %s5699_s28  ;;  %3940 = vst.msk [vmem:[#allocation3 + $0x58] sm:$0xff] %vm1479_vm7, %v3856_v52  ;;  %5614 = vmatprep.mubr.msk.f32.mxu1 %vm2135_vm11, %v4545_v42 }
 0x524   : > { %3873 = vrot.lane.b32.xlu0 %v4363_v4, %s5698_s23  ;;  %4132 = vst.msk [vmem:[#allocation3 + $0x58] sm:$0xff] %vm1672_vm8, %v4048_v11  ;;  %5615 = vmatmul.mubr.msk.f32.gmra.mrb[8].mxu1 %vm2135_vm11, %v4546_v15  ;;  %v3987_v4 = vld [vmem:[#allocation2 + $0x168] sm:$0xff]  ;;  %v4370_v15 = vld [vmem:[#allocation2 + $0x15a] sm:$0xff] }
 0x525   : > { %v3476_v7 = vpop.permute.xlu1 %3475 }
 0x526   : > { %3558 = vst.msk [vmem:[#allocation3 + $0x68] sm:$0xff] %vm1093_vm5, %v3476_v7  ;;  %v3474_v9 = vpop.permute.xlu0 %3473 }
 0x527   : > { %4067 = vrot.lane.b32.xlu1 %v7509_v46, %s5699_s28  ;;  %3557 = vst.msk [vmem:[#allocation3 + $0x60] sm:$0xff] %vm1093_vm5, %v3474_v9 }
 0x528   : > { %3875 = vrot.lane.b32.xlu0 %v4364_v54, %s5698_s23 }
 0x529   : > { %v4240_v57 = vpop.permute.xlu1 %4239 }
 0x52a   : > { %4324 = vst.msk [vmem:[#allocation3 + $0x58] sm:$0xff] %vm1865_vm9, %v4240_v57  ;;  %v4238_v48 = vpop.permute.xlu0 %4237 }
 0x52b   : > { %3495 = vrot.lane.b32.xlu1 %v7509_v46, %s5696_s17  ;;  %4323 = vst.msk [vmem:[#allocation3 + $0x50] sm:$0xff] %vm1865_vm9, %v4238_v48 }
 0x52c   : > { %3493 = vrot.lane.b32.xlu0 %v7559_v55, %s5696_s17 }
 0x52d   : > { %v3668_v20 = vpop.permute.xlu1 %3667 }
 0x52e   : > { %3750 = vst.msk [vmem:[#allocation3 + $0x68] sm:$0xff] %vm1286_vm6, %v3668_v20  ;;  %v3666_v38 = vpop.permute.xlu0 %3665  ;;  %v3988_v20 = vld [vmem:[#allocation2 + $0x170] sm:$0xff] }
 0x52f   : > { %4259 = vrot.lane.b32.xlu1 %v4174_v14, %s5700_s29  ;;  %3749 = vst.msk [vmem:[#allocation3 + $0x60] sm:$0xff] %vm1286_vm6, %v3666_v38  ;;  %v4371_v38 = vld [vmem:[#allocation2 + $0x16a] sm:$0xff] }
 0x530   : > { %4257 = vrot.lane.b32.xlu0 %v4173_v45, %s5700_s29 }
 0x531   : > { %v4432_v29 = vpop.permute.xlu1 %4431 }
 0x532   : > { %4516 = vst.msk [vmem:[#allocation3 + $0x58] sm:$0xff] %vm2058_vm10, %v4432_v29  ;;  %v4430_v46 = vpop.permute.xlu0 %4429 }
 0x533   : > { %3687 = vrot.lane.b32.xlu1 %v4174_v14, %s5697_s18  ;;  %4515 = vst.msk [vmem:[#allocation3 + $0x50] sm:$0xff] %vm2058_vm10, %v4430_v46 }
 0x534   : > { %3685 = vrot.lane.b32.xlu0 %v4173_v45, %s5697_s18 }
 0x535   : > { %v4050_v55 = vpop.permute.xlu1 %4049 }
 0x536   : > { %v3858_v27 = vpop.permute.xlu0 %3857 }
 0x537   : > { %4451 = vrot.lane.b32.xlu1 %v4366_v8, %s5701_s14  ;;  %3941 = vst.msk [vmem:[#allocation3 + $0x60] sm:$0xff] %vm1479_vm7, %v3858_v27 }
 0x538   : > { %4449 = vrot.lane.b32.xlu0 %v4365_v13, %s5701_s14  ;;  %4133 = vst.msk [vmem:[#allocation3 + $0x60] sm:$0xff] %vm1672_vm8, %v4050_v55 }
 0x539   : > { %v4052_v31 = vpop.permute.xlu1 %4051  ;;  %v4548_v18 = vld [vmem:[#allocation3 + $0x58] sm:$0xff] }
 0x53a   : > { %v3860_v47 = vpop.permute.xlu0 %3859  ;;  %v4547_v26 = vld [vmem:[#allocation3 + $0x50] sm:$0xff] }
 0x53b   : > { %4069 = vrot.lane.b32.xlu1 %v7564_v41, %s5699_s28  ;;  %3942 = vst.msk [vmem:[#allocation3 + $0x68] sm:$0xff] %vm1479_vm7, %v3860_v47  ;;  %5617 = vmatprep.mubr.msk.f32.mxu1 %vm2135_vm11, %v4547_v26  ;;  %v4372_v47 = vld [vmem:[#allocation2 + $0x172] sm:$0xff] }
 0x53c   : > { %3877 = vrot.lane.b32.xlu0 %v4365_v13, %s5698_s23  ;;  %4134 = vst.msk [vmem:[#allocation3 + $0x68] sm:$0xff] %vm1672_vm8, %v4052_v31  ;;  %5618 = vmatmul.mubr.msk.f32.gmra.mrb[10].mxu1 %vm2135_vm11, %v4548_v18  ;;  %v3989_v31 = vld [vmem:[#allocation2 + $0x180] sm:$0xff] }
 0x53d   : > { %v3480_v43 = vpop.permute.xlu1 %3479 }
 0x53e   : > { %3560 = vst.msk [vmem:[#allocation3 + $0x78] sm:$0xff] %vm1093_vm5, %v3480_v43  ;;  %v3478_v25 = vpop.permute.xlu0 %3477 }
 0x53f   : > { %4071 = vrot.lane.b32.xlu1 %v3984_v5, %s5699_s28  ;;  %3559 = vst.msk [vmem:[#allocation3 + $0x70] sm:$0xff] %vm1093_vm5, %v3478_v25 }
 0x540   : > { %3879 = vrot.lane.b32.xlu0 %v4366_v8, %s5698_s23 }
 0x541   : > { %v4244_v62 = vpop.permute.xlu1 %4243 }
 0x542   : > { %4326 = vst.msk [vmem:[#allocation3 + $0x68] sm:$0xff] %vm1865_vm9, %v4244_v62  ;;  %v4242_v58 = vpop.permute.xlu0 %4241 }
 0x543   : > { %3499 = vrot.lane.b32.xlu1 %v3984_v5, %s5696_s17  ;;  %4325 = vst.msk [vmem:[#allocation3 + $0x60] sm:$0xff] %vm1865_vm9, %v4242_v58  ;;  %v4181_v5 = vld [vmem:[#allocation2 + $0x181] sm:$0xff] }
 0x544   : > { %3497 = vrot.lane.b32.xlu0 %v7564_v41, %s5696_s17 }
 0x545   : > { %v3672_v28 = vpop.permute.xlu1 %3671 }
 0x546   : > { %3752 = vst.msk [vmem:[#allocation3 + $0x78] sm:$0xff] %vm1286_vm6, %v3672_v28  ;;  %v3670_v60 = vpop.permute.xlu0 %3669  ;;  %v3990_v28 = vld [vmem:[#allocation2 + $0x188] sm:$0xff] }
 0x547   : > { %4263 = vrot.lane.b32.xlu1 %v4176_v21, %s5700_s29  ;;  %3751 = vst.msk [vmem:[#allocation3 + $0x70] sm:$0xff] %vm1286_vm6, %v3670_v60 }
 0x548   : > { %4261 = vrot.lane.b32.xlu0 %v4175_v35, %s5700_s29 }
 0x549   : > { %v4436_v63 = vpop.permute.xlu1 %4435 }
 0x54a   : > { %4518 = vst.msk [vmem:[#allocation3 + $0x68] sm:$0xff] %vm2058_vm10, %v4436_v63  ;;  %v4434_v34 = vpop.permute.xlu0 %4433 }
 0x54b   : > { %3691 = vrot.lane.b32.xlu1 %v4176_v21, %s5697_s18  ;;  %4517 = vst.msk [vmem:[#allocation3 + $0x60] sm:$0xff] %vm2058_vm10, %v4434_v34  ;;  %v4373_v34 = vld [vmem:[#allocation2 + $0x182] sm:$0xff] }
 0x54c   : > { %3689 = vrot.lane.b32.xlu0 %v4175_v35, %s5697_s18 }
 0x54d   : > { %v4054_v41 = vpop.permute.xlu1 %4053 }
 0x54e   : > { %v3862_v61 = vpop.permute.xlu0 %3861 }
 0x54f   : > { %4455 = vrot.lane.b32.xlu1 %v4368_v37, %s5701_s14  ;;  %3943 = vst.msk [vmem:[#allocation3 + $0x70] sm:$0xff] %vm1479_vm7, %v3862_v61 }
 0x550   : > { %4453 = vrot.lane.b32.xlu0 %v4367_v50, %s5701_s14  ;;  %4135 = vst.msk [vmem:[#allocation3 + $0x70] sm:$0xff] %vm1672_vm8, %v4054_v41 }
 0x551   : > { %v4056_v59 = vpop.permute.xlu1 %4055  ;;  %v4550_v23 = vld [vmem:[#allocation3 + $0x68] sm:$0xff] }
 0x552   : > { %v3864_v19 = vpop.permute.xlu0 %3863  ;;  %v4549_v3 = vld [vmem:[#allocation3 + $0x60] sm:$0xff] }
 0x553   : > { %4073 = vrot.lane.b32.xlu1 %v3985_v10, %s5699_s28  ;;  %3944 = vst.msk [vmem:[#allocation3 + $0x78] sm:$0xff] %vm1479_vm7, %v3864_v19  ;;  %5620 = vmatprep.mubr.msk.f32.mxu1 %vm2135_vm11, %v4549_v3 }
 0x554   : > { %3881 = vrot.lane.b32.xlu0 %v4367_v50, %s5698_s23  ;;  %4136 = vst.msk [vmem:[#allocation3 + $0x78] sm:$0xff] %vm1672_vm8, %v4056_v59  ;;  %5621 = vmatmul.mubr.msk.f32.gmra.mrb[12].mxu1 %vm2135_vm11, %v4550_v23  ;;  %v4182_v59 = vld [vmem:[#allocation2 + $0x189] sm:$0xff] }
 0x555   : > { %v3484_v16 = vpop.permute.xlu1 %3483 }
 0x556   : > { %3562 = vst.msk [vmem:[#allocation3 + $0x88] sm:$0xff] %vm1093_vm5, %v3484_v16  ;;  %v3482_v17 = vpop.permute.xlu0 %3481  ;;  %v3992_v16 = vld [vmem:[#allocation2 + $0x1a0] sm:$0xff] }
 0x557   : > { %3501 = vrot.lane.b32.xlu1 %v3985_v10, %s5696_s17  ;;  %3561 = vst.msk [vmem:[#allocation3 + $0x80] sm:$0xff] %vm1093_vm5, %v3482_v17  ;;  %v4374_v10 = vld [vmem:[#allocation2 + $0x18a] sm:$0xff] }
 0x558   : > { %3883 = vrot.lane.b32.xlu0 %v4368_v37, %s5698_s23 }
 0x559   : > { %v4248_v30 = vpop.permute.xlu1 %4247 }
 0x55a   : > { %4328 = vst.msk [vmem:[#allocation3 + $0x78] sm:$0xff] %vm1865_vm9, %v4248_v30  ;;  %v4246_v33 = vpop.permute.xlu0 %4245 }
 0x55b   : > { %4265 = vrot.lane.b32.xlu1 %v4177_v0, %s5700_s29  ;;  %4327 = vst.msk [vmem:[#allocation3 + $0x70] sm:$0xff] %vm1865_vm9, %v4246_v33 }
 0x55c   : > { %3311 = vrot.lane.b32.xlu0 %v4368_v37, %s5695_s16 }
 0x55d   : > { %v3676_v22 = vpop.permute.xlu1 %3675 }
 0x55e   : > { %3754 = vst.msk [vmem:[#allocation3 + $0x88] sm:$0xff] %vm1286_vm6, %v3676_v22  ;;  %v3674_v36 = vpop.permute.xlu0 %3673  ;;  %v3991_v22 = vld [vmem:[#allocation2 + $0x198] sm:$0xff] }
 0x55f   : > { %3693 = vrot.lane.b32.xlu1 %v4177_v0, %s5697_s18  ;;  %3753 = vst.msk [vmem:[#allocation3 + $0x80] sm:$0xff] %vm1286_vm6, %v3674_v36  ;;  %v4184_v0 = vld [vmem:[#allocation2 + $0x1a1] sm:$0xff] }
 0x560   : > { %4075 = vrot.lane.b32.xlu0 %v3986_v24, %s5699_s28 }
 0x561   : > { %v4440_v32 = vpop.permute.xlu1 %4439 }
 0x562   : > { %4520 = vst.msk [vmem:[#allocation3 + $0x78] sm:$0xff] %vm2058_vm10, %v4440_v32  ;;  %v4438_v39 = vpop.permute.xlu0 %4437 }
 0x563   : > { %4457 = vrot.lane.b32.xlu1 %v4369_v49, %s5701_s14  ;;  %4519 = vst.msk [vmem:[#allocation3 + $0x70] sm:$0xff] %vm2058_vm10, %v4438_v39 }
 0x564   : > { %3503 = vrot.lane.b32.xlu0 %v3986_v24, %s5696_s17  ;;  %v4376_v24 = vld [vmem:[#allocation2 + $0x1a2] sm:$0xff] }
 0x565   : > { %v4058_v56 = vpop.permute.xlu1 %4057 }
 0x566   : > { %v3866_v1 = vpop.permute.xlu0 %3865 }
 0x567   : > { %3885 = vrot.lane.b32.xlu1 %v4369_v49, %s5698_s23  ;;  %3945 = vst.msk [vmem:[#allocation3 + $0x80] sm:$0xff] %vm1479_vm7, %v3866_v1 }
 0x568   : > { %4267 = vrot.lane.b32.xlu0 %v4178_v51, %s5700_s29  ;;  %4137 = vst.msk [vmem:[#allocation3 + $0x80] sm:$0xff] %vm1672_vm8, %v4058_v56 }
 0x569   : > { %v4060_v6 = vpop.permute.xlu1 %4059  ;;  %v4552_v12 = vld [vmem:[#allocation3 + $0x78] sm:$0xff] }
 0x56a   : > { %v3868_v40 = vpop.permute.xlu0 %3867  ;;  %v4551_v54 = vld [vmem:[#allocation3 + $0x70] sm:$0xff] }
 0x56b   : > { %3313 = vrot.lane.b32.xlu1 %v4369_v49, %s5695_s16  ;;  %3946 = vst.msk [vmem:[#allocation3 + $0x88] sm:$0xff] %vm1479_vm7, %v3868_v40  ;;  %5623 = vmatprep.mubr.msk.f32.mxu1 %vm2135_vm11, %v4551_v54  ;;  %v4183_v49 = vld [vmem:[#allocation2 + $0x199] sm:$0xff] }
 0x56c   : > { %3695 = vrot.lane.b32.xlu0 %v4178_v51, %s5697_s18  ;;  %4138 = vst.msk [vmem:[#allocation3 + $0x88] sm:$0xff] %vm1672_vm8, %v4060_v6  ;;  %5624 = vmatmul.mubr.msk.f32.gmra.mrb[14].mxu1 %vm2135_vm11, %v4552_v12  ;;  %v4375_v40 = vld [vmem:[#allocation2 + $0x19a] sm:$0xff] }
 0x56d   : > { %v3488_v44 = vpop.permute.xlu1 %3487 }
 0x56e   : > { %3564 = vst.msk [vmem:[#allocation3 + $0x98] sm:$0xff] %vm1093_vm5, %v3488_v44  ;;  %v3486_v11 = vpop.permute.xlu0 %3485 }
 0x56f   : > { %4077 = vrot.lane.b32.xlu1 %v3987_v4, %s5699_s28  ;;  %3563 = vst.msk [vmem:[#allocation3 + $0x90] sm:$0xff] %vm1093_vm5, %v3486_v11 }
 0x570   : > { %4459 = vrot.lane.b32.xlu0 %v4370_v15, %s5701_s14 }
 0x571   : > { %v4252_v52 = vpop.permute.xlu1 %4251 }
 0x572   : > { %4330 = vst.msk [vmem:[#allocation3 + $0x88] sm:$0xff] %vm1865_vm9, %v4252_v52  ;;  %v4250_v42 = vpop.permute.xlu0 %4249 }
 0x573   : > { %3505 = vrot.lane.b32.xlu1 %v3987_v4, %s5696_s17  ;;  %4329 = vst.msk [vmem:[#allocation3 + $0x80] sm:$0xff] %vm1865_vm9, %v4250_v42 }
 0x574   : > { %3887 = vrot.lane.b32.xlu0 %v4370_v15, %s5698_s23 }
 0x575   : > { %v3680_v7 = vpop.permute.xlu1 %3679 }
 0x576   : > { %3756 = vst.msk [vmem:[#allocation3 + $0x98] sm:$0xff] %vm1286_vm6, %v3680_v7  ;;  %v3678_v9 = vpop.permute.xlu0 %3677 }
 0x577   : > { %4269 = vrot.lane.b32.xlu1 %v7576_v53, %s5700_s29  ;;  %3755 = vst.msk [vmem:[#allocation3 + $0x90] sm:$0xff] %vm1286_vm6, %v3678_v9 }
 0x578   : > { %3315 = vrot.lane.b32.xlu0 %v4370_v15, %s5695_s16 }
 0x579   : > { %v4444_v57 = vpop.permute.xlu1 %4443 }
 0x57a   : > { %4522 = vst.msk [vmem:[#allocation3 + $0x88] sm:$0xff] %vm2058_vm10, %v4444_v57  ;;  %v4442_v48 = vpop.permute.xlu0 %4441 }
 0x57b   : > { %3697 = vrot.lane.b32.xlu1 %v7576_v53, %s5697_s18  ;;  %4521 = vst.msk [vmem:[#allocation3 + $0x80] sm:$0xff] %vm2058_vm10, %v4442_v48 }
 0x57c   : > { %4079 = vrot.lane.b32.xlu0 %v3988_v20, %s5699_s28 }
 0x57d   : > { %v4062_v14 = vpop.permute.xlu1 %4061 }
 0x57e   : > { %v3870_v45 = vpop.permute.xlu0 %3869 }
 0x57f   : > { %4461 = vrot.lane.b32.xlu1 %v4371_v38, %s5701_s14  ;;  %3947 = vst.msk [vmem:[#allocation3 + $0x90] sm:$0xff] %vm1479_vm7, %v3870_v45 }
 0x580   : > { %3507 = vrot.lane.b32.xlu0 %v3988_v20, %s5696_s17  ;;  %4139 = vst.msk [vmem:[#allocation3 + $0x90] sm:$0xff] %vm1672_vm8, %v4062_v14 }
 0x581   : > { %v4064_v29 = vpop.permute.xlu1 %4063  ;;  %v4554_v46 = vld [vmem:[#allocation3 + $0x88] sm:$0xff] }
 0x582   : > { %v3872_v55 = vpop.permute.xlu0 %3871  ;;  %v4553_v53 = vld [vmem:[#allocation3 + $0x80] sm:$0xff] }
 0x583   : > { %3889 = vrot.lane.b32.xlu1 %v4371_v38, %s5698_s23  ;;  %3948 = vst.msk [vmem:[#allocation3 + $0x98] sm:$0xff] %vm1479_vm7, %v3872_v55  ;;  %5626 = vmatprep.mubr.msk.f32.mxu1 %vm2135_vm11, %v4553_v53 }
 0x584   : > { %4271 = vrot.lane.b32.xlu0 %v7578_v2, %s5700_s29  ;;  %4140 = vst.msk [vmem:[#allocation3 + $0x98] sm:$0xff] %vm1672_vm8, %v4064_v29  ;;  %5627 = vmatmul.mubr.msk.f32.gmra.mrb[16].mxu1 %vm2135_vm11, %v4554_v46 }
 0x585   : > { %v3492_v8 = vpop.permute.xlu1 %3491 }
 0x586   : > { %3566 = vst.msk [vmem:[#allocation3 + $0xa8] sm:$0xff] %vm1093_vm5, %v3492_v8  ;;  %v3490_v27 = vpop.permute.xlu0 %3489 }
 0x587   : > { %3317 = vrot.lane.b32.xlu1 %v4371_v38, %s5695_s16  ;;  %3565 = vst.msk [vmem:[#allocation3 + $0xa0] sm:$0xff] %vm1093_vm5, %v3490_v27 }
 0x588   : > { %3699 = vrot.lane.b32.xlu0 %v7578_v2, %s5697_s18 }
 0x589   : > { %v4256_v13 = vpop.permute.xlu1 %4255 }
 0x58a   : > { %4332 = vst.msk [vmem:[#allocation3 + $0x98] sm:$0xff] %vm1865_vm9, %v4256_v13  ;;  %v4254_v18 = vpop.permute.xlu0 %4253 }
 0x58b   : > { %4081 = vrot.lane.b32.xlu1 %v3989_v31, %s5699_s28  ;;  %4331 = vst.msk [vmem:[#allocation3 + $0x90] sm:$0xff] %vm1865_vm9, %v4254_v18 }
 0x58c   : > { %4463 = vrot.lane.b32.xlu0 %v4372_v47, %s5701_s14 }
 0x58d   : > { %v3684_v26 = vpop.permute.xlu1 %3683 }
 0x58e   : > { %3758 = vst.msk [vmem:[#allocation3 + $0xa8] sm:$0xff] %vm1286_vm6, %v3684_v26  ;;  %v3682_v43 = vpop.permute.xlu0 %3681 }
 0x58f   : > { %3509 = vrot.lane.b32.xlu1 %v3989_v31, %s5696_s17  ;;  %3757 = vst.msk [vmem:[#allocation3 + $0xa0] sm:$0xff] %vm1286_vm6, %v3682_v43 }
 0x590   : > { %3891 = vrot.lane.b32.xlu0 %v4372_v47, %s5698_s23 }
 0x591   : > { %v4448_v2 = vpop.permute.xlu1 %4447 }
 0x592   : > { %4524 = vst.msk [vmem:[#allocation3 + $0x98] sm:$0xff] %vm2058_vm10, %v4448_v2  ;;  %v4446_v25 = vpop.permute.xlu0 %4445 }
 0x593   : > { %4273 = vrot.lane.b32.xlu1 %v4181_v5, %s5700_s29  ;;  %4523 = vst.msk [vmem:[#allocation3 + $0x90] sm:$0xff] %vm2058_vm10, %v4446_v25 }
 0x594   : > { %3319 = vrot.lane.b32.xlu0 %v4372_v47, %s5695_s16 }
 0x595   : > { %v4066_v62 = vpop.permute.xlu1 %4065 }
 0x596   : > { %v3874_v58 = vpop.permute.xlu0 %3873 }
 0x597   : > { %3701 = vrot.lane.b32.xlu1 %v4181_v5, %s5697_s18  ;;  %3949 = vst.msk [vmem:[#allocation3 + $0xa0] sm:$0xff] %vm1479_vm7, %v3874_v58  ;;  %v8173_v21 = vpop.f32.mrb[0].mxu1 }
 0x598   : > { %4083 = vrot.lane.b32.xlu0 %v3990_v28, %s5699_s28  ;;  %4141 = vst.msk [vmem:[#allocation3 + $0xa0] sm:$0xff] %vm1672_vm8, %v4066_v62  ;;  %v8177_v60 = vpop.f32.mrb[1].mxu1 }
 0x599   : > { %v4068_v35 = vpop.permute.xlu1 %4067  ;;  %v4556_v63 = vld [vmem:[#allocation3 + $0x98] sm:$0xff] }
 0x59a   : > { %v3876_v41 = vpop.permute.xlu0 %3875  ;;  %v4555_v37 = vld [vmem:[#allocation3 + $0x90] sm:$0xff] }
 0x59b   : > { %4465 = vrot.lane.b32.xlu1 %v4373_v34, %s5701_s14  ;;  %3950 = vst.msk [vmem:[#allocation3 + $0xa8] sm:$0xff] %vm1479_vm7, %v3876_v41  ;;  %5629 = vmatprep.mubr.msk.f32.mxu1 %vm2135_vm11, %v4555_v37 }
 0x59c   : > { %3511 = vrot.lane.b32.xlu0 %v3990_v28, %s5696_s17  ;;  %4142 = vst.msk [vmem:[#allocation3 + $0xa8] sm:$0xff] %vm1672_vm8, %v4068_v35  ;;  %5630 = vmatmul.mubr.msk.f32.gmra.mrb[18].mxu1 %vm2135_vm11, %v4556_v63 }
 0x59d   : > { %v3496_v61 = vpop.permute.xlu1 %3495 }
 0x59e   : > { %3568 = vst.msk [vmem:[#allocation3 + $0xb8] sm:$0xff] %vm1093_vm5, %v3496_v61  ;;  %v3494_v50 = vpop.permute.xlu0 %3493 }
 0x59f   : > { %3893 = vrot.lane.b32.xlu1 %v4373_v34, %s5698_s23  ;;  %3567 = vst.msk [vmem:[#allocation3 + $0xb0] sm:$0xff] %vm1093_vm5, %v3494_v50 }
 0x5a0   : > { %4275 = vrot.lane.b32.xlu0 %v4182_v59, %s5700_s29 }
 0x5a1   : > { %v4260_v23 = vpop.permute.xlu1 %4259 }
 0x5a2   : > { %4334 = vst.msk [vmem:[#allocation3 + $0xa8] sm:$0xff] %vm1865_vm9, %v4260_v23  ;;  %v4258_v19 = vpop.permute.xlu0 %4257 }
 0x5a3   : > { %3895 = vrot.lane.b32.xlu1 %v4374_v10, %s5698_s23  ;;  %4333 = vst.msk [vmem:[#allocation3 + $0xa0] sm:$0xff] %vm1865_vm9, %v4258_v19 }
 0x5a4   : > { %3703 = vrot.lane.b32.xlu0 %v4182_v59, %s5697_s18 }
 0x5a5   : > { %v3688_v3 = vpop.permute.xlu1 %3687 }
 0x5a6   : > { %3760 = vst.msk [vmem:[#allocation3 + $0xb8] sm:$0xff] %vm1286_vm6, %v3688_v3  ;;  %v3686_v17 = vpop.permute.xlu0 %3685 }
 0x5a7   : > { %4087 = vrot.lane.b32.xlu1 %v3992_v16, %s5699_s28  ;;  %3759 = vst.msk [vmem:[#allocation3 + $0xb0] sm:$0xff] %vm1286_vm6, %v3686_v17 }
 0x5a8   : > { %4467 = vrot.lane.b32.xlu0 %v4374_v10, %s5701_s14 }
 0x5a9   : > { %v4452_v30 = vpop.permute.xlu1 %4451 }
 0x5aa   : > { %4526 = vst.msk [vmem:[#allocation3 + $0xa8] sm:$0xff] %vm2058_vm10, %v4452_v30  ;;  %v4450_v33 = vpop.permute.xlu0 %4449 }
 0x5ab   : > { %4279 = vrot.lane.b32.xlu1 %v4184_v0, %s5700_s29  ;;  %4525 = vst.msk [vmem:[#allocation3 + $0xa0] sm:$0xff] %vm2058_vm10, %v4450_v33 }
 0x5ac   : > { %4085 = vrot.lane.b32.xlu0 %v3991_v22, %s5699_s28 }
 0x5ad   : > { %v4070_v36 = vpop.permute.xlu1 %4069 }
 0x5ae   : > { %v3878_v32 = vpop.permute.xlu0 %3877 }
 0x5af   : > { %4471 = vrot.lane.b32.xlu1 %v4376_v24, %s5701_s14  ;;  %3951 = vst.msk [vmem:[#allocation3 + $0xb0] sm:$0xff] %vm1479_vm7, %v3878_v32  ;;  %v8203_v39 = vpop.f32.mrb[2].mxu1 }
 0x5b0   : > { %4277 = vrot.lane.b32.xlu0 %v4183_v49, %s5700_s29  ;;  %4143 = vst.msk [vmem:[#allocation3 + $0xb0] sm:$0xff] %vm1672_vm8, %v4070_v36  ;;  %v8207_v56 = vpop.f32.mrb[3].mxu1 }
 0x5b1   : > { %v4072_v1 = vpop.permute.xlu1 %4071  ;;  %v4558_v51 = vld [vmem:[#allocation3 + $0xa8] sm:$0xff] }
 0x5b2   : > { %v3880_v6 = vpop.permute.xlu0 %3879  ;;  %v4557_v12 = vld [vmem:[#allocation3 + $0xa0] sm:$0xff] }
 0x5b3   : > { %3952 = vst.msk [vmem:[#allocation3 + $0xb8] sm:$0xff] %vm1479_vm7, %v3880_v6  ;;  %5632 = vmatprep.mubr.msk.f32.mxu1 %vm2135_vm11, %v4557_v12 }
 0x5b4   : > { %4469 = vrot.lane.b32.xlu0 %v4375_v40, %s5701_s14  ;;  %4144 = vst.msk [vmem:[#allocation3 + $0xb8] sm:$0xff] %vm1672_vm8, %v4072_v1  ;;  %5633 = vmatmul.mubr.msk.f32.gmra.mrb[20].mxu1 %vm2135_vm11, %v4558_v51 }
 0x5b5   : > { %v3500_v54 = vpop.permute.xlu1 %3499 }
 0x5b6   : > { %3570 = vst.msk [vmem:[#allocation3 + $0xc8] sm:$0xff] %vm1093_vm5, %v3500_v54  ;;  %v3498_v44 = vpop.permute.xlu0 %3497 }
 0x5b7   : > { %3569 = vst.msk [vmem:[#allocation3 + $0xc0] sm:$0xff] %vm1093_vm5, %v3498_v44 }
 0x5b9   : > { %v4264_v4 = vpop.permute.xlu1 %4263 }
 0x5ba   : > { %4336 = vst.msk [vmem:[#allocation3 + $0xb8] sm:$0xff] %vm1865_vm9, %v4264_v4  ;;  %v4262_v11 = vpop.permute.xlu0 %4261 }
 0x5bb   : > { %4335 = vst.msk [vmem:[#allocation3 + $0xb0] sm:$0xff] %vm1865_vm9, %v4262_v11 }
 0x5bd   : > { %v3692_v15 = vpop.permute.xlu1 %3691 }
 0x5be   : > { %3762 = vst.msk [vmem:[#allocation3 + $0xc8] sm:$0xff] %vm1286_vm6, %v3692_v15  ;;  %v3690_v52 = vpop.permute.xlu0 %3689 }
 0x5bf   : > { %3761 = vst.msk [vmem:[#allocation3 + $0xc0] sm:$0xff] %vm1286_vm6, %v3690_v52 }
 0x5c1   : > { %v4456_v42 = vpop.permute.xlu1 %4455 }
 0x5c2   : > { %4528 = vst.msk [vmem:[#allocation3 + $0xb8] sm:$0xff] %vm2058_vm10, %v4456_v42  ;;  %v4454_v7 = vpop.permute.xlu0 %4453 }
 0x5c3   : > { %4527 = vst.msk [vmem:[#allocation3 + $0xb0] sm:$0xff] %vm2058_vm10, %v4454_v7 }
 0x5c5   : > { %v4074_v9 = vpop.permute.xlu1 %4073 }
 0x5c6   : > { %v3882_v57 = vpop.permute.xlu0 %3881 }
 0x5c7   : > { %3953 = vst.msk [vmem:[#allocation3 + $0xc0] sm:$0xff] %vm1479_vm7, %v3882_v57  ;;  %v8223_v48 = vpop.f32.mrb[4].mxu1 }
 0x5c8   : > { %4145 = vst.msk [vmem:[#allocation3 + $0xc0] sm:$0xff] %vm1672_vm8, %v4074_v9  ;;  %v8226_v20 = vpop.f32.mrb[5].mxu1 }
 0x5c9   : > { %v3502_v14 = vpop.permute.xlu1 %3501  ;;  %v4560_v38 = vld [vmem:[#allocation3 + $0xb8] sm:$0xff] }
 0x5ca   : > { %3571 = vst.msk [vmem:[#allocation3 + $0xd0] sm:$0xff] %vm1093_vm5, %v3502_v14  ;;  %v3884_v45 = vpop.permute.xlu0 %3883  ;;  %v4559_v29 = vld [vmem:[#allocation3 + $0xb0] sm:$0xff] }
 0x5cb   : > { %3954 = vst.msk [vmem:[#allocation3 + $0xc8] sm:$0xff] %vm1479_vm7, %v3884_v45  ;;  %5635 = vmatprep.mubr.msk.f32.mxu1 %vm2135_vm11, %v4559_v29 }
 0x5cc   : > { %5636 = vmatmul.mubr.msk.f32.gmra.mrb[22].mxu1 %vm2135_vm11, %v4560_v38 }
 0x5cd   : > { %v4266_v46 = vpop.permute.xlu1 %4265 }
 0x5ce   : > { %4337 = vst.msk [vmem:[#allocation3 + $0xc0] sm:$0xff] %vm1865_vm9, %v4266_v46  ;;  %v3312_v55 = vpop.permute.xlu0 %3311 }
 0x5cf   : > { %3380 = vst.msk [vmem:[#allocation3 + $0xd8] sm:$0xff] %vm900_vm3, %v3312_v55 }
 0x5d1   : > { %v3694_v53 = vpop.permute.xlu1 %3693 }
 0x5d2   : > { %3763 = vst.msk [vmem:[#allocation3 + $0xd0] sm:$0xff] %vm1286_vm6, %v3694_v53  ;;  %v4076_v8 = vpop.permute.xlu0 %4075 }
 0x5d3   : > { %4146 = vst.msk [vmem:[#allocation3 + $0xc8] sm:$0xff] %vm1672_vm8, %v4076_v8  ;;  %v8304_v8 = vld [vmem:[%s8804_s6] ss:$0 sm:$0xff] }
 0x5d5   : > { %v4458_v27 = vpop.permute.xlu1 %4457 }
 0x5d6   : > { %4529 = vst.msk [vmem:[#allocation3 + $0xc0] sm:$0xff] %vm2058_vm10, %v4458_v27  ;;  %v3504_v13 = vpop.permute.xlu0 %3503  ;;  %v8308_v27 = vadd.f32 %v8173_v21, %v8304_v8 }
 0x5d7   : > { %3572 = vst.msk [vmem:[#allocation3 + $0xd8] sm:$0xff] %vm1093_vm5, %v3504_v13  ;;  %v8312_v13 = vadd.f32 %v8304_v8, %v8177_v60 }
 0x5d9   : > { %v3886_v31 = vpop.permute.xlu1 %3885  ;;  %v4905_v21 = vsel %vm366_vm0, %v8312_v13, 0.0 }
 0x5da   : > { %3955 = vst.msk [vmem:[#allocation3 + $0xd0] sm:$0xff] %vm1479_vm7, %v3886_v31  ;;  %v4268_v18 = vpop.permute.xlu0 %4267  ;;  %v8316_v31 = vadd.f32 %v8304_v8, %v8207_v56 }
 0x5db   : > { %4338 = vst.msk [vmem:[#allocation3 + $0xc8] sm:$0xff] %vm1865_vm9, %v4268_v18  ;;  %v4975_v18 = vmul.f32 %v8308_v27, %v8308_v27 }
 0x5dc   : > { %v4976_v60 = vmul.f32 %v8316_v31, %v8316_v31 }
 0x5dd   : > { %v3314_v47 = vpop.permute.xlu1 %3313  ;;  %v4561_v26 = vld [vmem:[#allocation3 + $0xc0] sm:$0xff]  ;;  %v5007_v56 = vsel %vm366_vm0, %v4975_v18, 0.0 }
 0x5de   : > { %3381 = vst.msk [vmem:[#allocation3 + $0xe0] sm:$0xff] %vm900_vm3, %v3314_v47  ;;  %5638 = vmatprep.mubr.msk.f32.mxu1 %vm2135_vm11, %v4561_v26  ;;  %v3696_v43 = vpop.permute.xlu0 %3695  ;;  %v4974_v47 = vmul.f32 %v8312_v13, %v8312_v13  ;;  %v4906_v26 = vsel %vm366_vm0, %v8308_v27, 0.0 }
 0x5df   : > { %3764 = vst.msk [vmem:[#allocation3 + $0xd8] sm:$0xff] %vm1286_vm6, %v3696_v43  ;;  %v8243_v2 = vpop.f32.mrb[6].mxu1 }
 0x5e0   : > { %v8245_v5 = vpop.f32.mrb[7].mxu1 }
 0x5e1   : > { %v4078_v25 = vpop.permute.xlu1 %4077 }
 0x5e2   : > { %4147 = vst.msk [vmem:[#allocation3 + $0xd0] sm:$0xff] %vm1672_vm8, %v4078_v25  ;;  %v4460_v62 = vpop.permute.xlu0 %4459 }
 0x5e3   : > { %4530 = vst.msk [vmem:[#allocation3 + $0xc8] sm:$0xff] %vm2058_vm10, %v4460_v62  ;;  %v5006_v62 = vsel %vm366_vm0, %v4974_v47, 0.0 }
 0x5e5   : > { %v3506_v58 = vpop.permute.xlu1 %3505 }
 0x5e6   : > { %3573 = vst.msk [vmem:[#allocation3 + $0xe0] sm:$0xff] %vm1093_vm5, %v3506_v58  ;;  %v3888_v28 = vpop.permute.xlu0 %3887  ;;  %v8336_v58 = vadd.f32 %v8203_v39, %v8304_v8 }
 0x5e7   : > { %3956 = vst.msk [vmem:[#allocation3 + $0xd8] sm:$0xff] %vm1479_vm7, %v3888_v28  ;;  %v4908_v28 = vsel %vm366_vm0, %v8316_v31, 0.0 }
 0x5e9   : > { %v4270_v35 = vpop.permute.xlu1 %4269 }
 0x5ea   : > { %4339 = vst.msk [vmem:[#allocation3 + $0xd0] sm:$0xff] %vm1865_vm9, %v4270_v35  ;;  %v3316_v63 = vpop.permute.xlu0 %3315  ;;  %v4562_v34 = vld [vmem:[#allocation3 + $0xc8] sm:$0xff]  ;;  %v8342_v35 = vadd.f32 %v8304_v8, %v8226_v20 }
 0x5eb   : > { %3382 = vst.msk [vmem:[#allocation3 + $0xe8] sm:$0xff] %vm900_vm3, %v3316_v63  ;;  %5639 = vmatmul.mubr.msk.f32.gmra.mrb[24].mxu1 %vm2135_vm11, %v4562_v34  ;;  %v4907_v63 = vadd.f32 %v4906_v26, %v4905_v21  ;;  %v5009_v34 = vsel %vm366_vm0, %v4976_v60, 0.0 }
 0x5ec   : > { %v4912_v20 = vsel %vm366_vm0, %v8342_v35, 0.0 }
 0x5ed   : > { %v3698_v41 = vpop.permute.xlu1 %3697 }
 0x5ee   : > { %3765 = vst.msk [vmem:[#allocation3 + $0xe0] sm:$0xff] %vm1286_vm6, %v3698_v41  ;;  %v4080_v37 = vpop.permute.xlu0 %4079  ;;  %v5008_v41 = vadd.f32 %v5007_v56, %v5006_v62 }
 0x5ef   : > { %4148 = vst.msk [vmem:[#allocation3 + $0xd8] sm:$0xff] %vm1672_vm8, %v4080_v37  ;;  %v4909_v37 = vadd.f32 %v4908_v28, %v4907_v63 }
 0x5f0   : > { %v5010_v39 = vadd.f32 %v5009_v34, %v5008_v41 }
 0x5f1   : > { %v4462_v61 = vpop.permute.xlu1 %4461 }
 0x5f2   : > { %4531 = vst.msk [vmem:[#allocation3 + $0xd0] sm:$0xff] %vm2058_vm10, %v4462_v61  ;;  %v3508_v50 = vpop.permute.xlu0 %3507  ;;  %v4977_v61 = vmul.f32 %v8336_v58, %v8336_v58 }
 0x5f3   : > { %3574 = vst.msk [vmem:[#allocation3 + $0xe8] sm:$0xff] %vm1093_vm5, %v3508_v50  ;;  %v4978_v50 = vmul.f32 %v8342_v35, %v8342_v35 }
 0x5f5   : > { %v3890_v59 = vpop.permute.xlu1 %3889 }
 0x5f6   : > { %3957 = vst.msk [vmem:[#allocation3 + $0xe0] sm:$0xff] %vm1479_vm7, %v3890_v59  ;;  %v4272_v23 = vpop.permute.xlu0 %4271  ;;  %v4910_v59 = vsel %vm366_vm0, %v8336_v58, 0.0 }
 0x5f7   : > { %4340 = vst.msk [vmem:[#allocation3 + $0xd8] sm:$0xff] %vm1865_vm9, %v4272_v23  ;;  %v8260_v10 = vpop.f32.mrb[8].mxu1  ;;  %v8353_v23 = vadd.f32 %v8223_v48, %v8304_v8 }
 0x5f8   : > { %v8262_v19 = vpop.f32.mrb[9].mxu1 }
 0x5f9   : > { %v3318_v3 = vpop.permute.xlu1 %3317  ;;  %v4563_v16 = vld [vmem:[#allocation3 + $0xd0] sm:$0xff] }
 0x5fa   : > { %3383 = vst.msk [vmem:[#allocation3 + $0xf0] sm:$0xff] %vm900_vm3, %v3318_v3  ;;  %5641 = vmatprep.mubr.msk.f32.mxu1 %vm2135_vm11, %v4563_v16  ;;  %v3700_v17 = vpop.permute.xlu0 %3699  ;;  %v8359_v3 = vadd.f32 %v8304_v8, %v8245_v5  ;;  %v4911_v16 = vadd.f32 %v4910_v59, %v4909_v37  ;;  %v8371_v5 = vadd.f32 %v8243_v2, %v8304_v8 }
 0x5fb   : > { %3766 = vst.msk [vmem:[#allocation3 + $0xe8] sm:$0xff] %vm1286_vm6, %v3700_v17  ;;  %v5011_v17 = vsel %vm366_vm0, %v4977_v61, 0.0 }
 0x5fc   : > { %v4980_v48 = vmul.f32 %v8359_v3, %v8359_v3 }
 0x5fd   : > { %v4082_v30 = vpop.permute.xlu1 %4081 }
 0x5fe   : > { %4149 = vst.msk [vmem:[#allocation3 + $0xe0] sm:$0xff] %vm1672_vm8, %v4082_v30  ;;  %v4464_v0 = vpop.permute.xlu0 %4463  ;;  %v5013_v30 = vsel %vm366_vm0, %v4978_v50, 0.0 }
 0x5ff   : > { %4532 = vst.msk [vmem:[#allocation3 + $0xd8] sm:$0xff] %vm2058_vm10, %v4464_v0  ;;  %v4913_v0 = vadd.f32 %v4912_v20, %v4911_v16 }
 0x601   : > { %v3510_v33 = vpop.permute.xlu1 %3509 }
 0x602   : > { %3575 = vst.msk [vmem:[#allocation3 + $0xf0] sm:$0xff] %vm1093_vm5, %v3510_v33  ;;  %v3892_v22 = vpop.permute.xlu0 %3891  ;;  %v5012_v33 = vadd.f32 %v5011_v17, %v5010_v39 }
 0x603   : > { %3958 = vst.msk [vmem:[#allocation3 + $0xe8] sm:$0xff] %vm1479_vm7, %v3892_v22  ;;  %v4979_v22 = vmul.f32 %v8353_v23, %v8353_v23 }
 0x605   : > { %v4274_v36 = vpop.permute.xlu1 %4273 }
 0x606   : > { %4341 = vst.msk [vmem:[#allocation3 + $0xe0] sm:$0xff] %vm1865_vm9, %v4274_v36  ;;  %v3320_v24 = vpop.permute.xlu0 %3319  ;;  %v4564_v32 = vld [vmem:[#allocation3 + $0xd8] sm:$0xff]  ;;  %v5014_v36 = vadd.f32 %v5013_v30, %v5012_v33 }
 0x607   : > { %3384 = vst.msk [vmem:[#allocation3 + $0xf8] sm:$0xff] %vm900_vm3, %v3320_v24  ;;  %5642 = vmatmul.mubr.msk.f32.gmra.mrb[26].mxu1 %vm2135_vm11, %v4564_v32  ;;  %v4914_v24 = vsel %vm366_vm0, %v8353_v23, 0.0  ;;  %v4916_v32 = vsel %vm366_vm0, %v8359_v3, 0.0 }
 0x609   : > { %v3702_v49 = vpop.permute.xlu1 %3701 }
 0x60a   : > { %3767 = vst.msk [vmem:[#allocation3 + $0xf0] sm:$0xff] %vm1286_vm6, %v3702_v49  ;;  %v4084_v1 = vpop.permute.xlu0 %4083  ;;  %v8377_v49 = vadd.f32 %v8304_v8, %v8262_v19  ;;  %v8389_v19 = vadd.f32 %v8260_v10, %v8304_v8 }
 0x60b   : > { %4150 = vst.msk [vmem:[#allocation3 + $0xe8] sm:$0xff] %vm1672_vm8, %v4084_v1  ;;  %v4915_v1 = vadd.f32 %v4914_v24, %v4913_v0 }
 0x60c   : > { %v4982_v2 = vmul.f32 %v8377_v49, %v8377_v49 }
 0x60d   : > { %v4466_v51 = vpop.permute.xlu1 %4465 }
 0x60e   : > { %4533 = vst.msk [vmem:[#allocation3 + $0xe0] sm:$0xff] %vm2058_vm10, %v4466_v51  ;;  %v3512_v6 = vpop.permute.xlu0 %3511  ;;  %v5015_v51 = vsel %vm366_vm0, %v4979_v22, 0.0 }
 0x60f   : > { %3576 = vst.msk [vmem:[#allocation3 + $0xf8] sm:$0xff] %vm1093_vm5, %v3512_v6  ;;  %v8278_v12 = vpop.f32.mrb[10].mxu1  ;;  %v5017_v6 = vsel %vm366_vm0, %v4980_v48, 0.0 }
 0x610   : > { %v8280_v40 = vpop.f32.mrb[11].mxu1  ;;  %v8407_v47 = vadd.f32 %v8278_v12, %v8304_v8 }
 0x611   : > { %v3894_v54 = vpop.permute.xlu1 %3893 }
 0x612   : > { %3959 = vst.msk [vmem:[#allocation3 + $0xf0] sm:$0xff] %vm1479_vm7, %v3894_v54  ;;  %v4276_v44 = vpop.permute.xlu0 %4275  ;;  %v4917_v54 = vadd.f32 %v4916_v32, %v4915_v1  ;;  %v4985_v34 = vmul.f32 %v8407_v47, %v8407_v47  ;;  %v4926_v37 = vsel %vm366_vm0, %v8407_v47, 0.0 }
 0x613   : > { %4342 = vst.msk [vmem:[#allocation3 + $0xe8] sm:$0xff] %vm1865_vm9, %v4276_v44  ;;  %v5016_v44 = vadd.f32 %v5015_v51, %v5014_v36 }
 0x614   : > { %v5027_v59 = vsel %vm366_vm0, %v4985_v34, 0.0 }
 0x615   : > { %v3896_v4 = vpop.permute.xlu1 %3895  ;;  %v4565_v11 = vld [vmem:[#allocation3 + $0xe0] sm:$0xff] }
 0x616   : > { %5644 = vmatprep.mubr.msk.f32.mxu1 %vm2135_vm11, %v4565_v11  ;;  %v3704_v15 = vpop.permute.xlu0 %3703  ;;  %v5018_v11 = vadd.f32 %v5017_v6, %v5016_v44 }
 0x617   : > { %3768 = vst.msk [vmem:[#allocation3 + $0xf8] sm:$0xff] %vm1286_vm6, %v3704_v15  ;;  %v4918_v15 = vsel %vm366_vm0, %v8371_v5, 0.0 }
 0x618   : > { %3960 = vst.msk [vmem:[#allocation3 + $0xf8] sm:$0xff] %vm1479_vm7, %v3896_v4  ;;  %v4981_v4 = vmul.f32 %v8371_v5, %v8371_v5 }
 0x619   : > { %v4088_v52 = vpop.permute.xlu1 %4087 }
 0x61a   : > { %4152 = vst.msk [vmem:[#allocation3 + $0xf8] sm:$0xff] %vm1672_vm8, %v4088_v52  ;;  %v4468_v42 = vpop.permute.xlu0 %4467  ;;  %v4920_v52 = vsel %vm366_vm0, %v8377_v49, 0.0 }
 0x61b   : > { %4534 = vst.msk [vmem:[#allocation3 + $0xe8] sm:$0xff] %vm2058_vm10, %v4468_v42  ;;  %v8395_v42 = vadd.f32 %v8304_v8, %v8280_v40  ;;  %v4922_v40 = vsel %vm366_vm0, %v8389_v19, 0.0 }
 0x61d   : > { %v4280_v7 = vpop.permute.xlu1 %4279  ;;  %v4984_v10 = vmul.f32 %v8395_v42, %v8395_v42  ;;  %v4924_v26 = vsel %vm366_vm0, %v8395_v42, 0.0 }
 0x61e   : > { %4344 = vst.msk [vmem:[#allocation3 + $0xf8] sm:$0xff] %vm1865_vm9, %v4280_v7  ;;  %v4086_v9 = vpop.permute.xlu0 %4085  ;;  %v4919_v7 = vadd.f32 %v4918_v15, %v4917_v54 }
 0x61f   : > { %4151 = vst.msk [vmem:[#allocation3 + $0xf0] sm:$0xff] %vm1672_vm8, %v4086_v9  ;;  %v5019_v9 = vsel %vm366_vm0, %v4981_v4, 0.0  ;;  %v5025_v62 = vsel %vm366_vm0, %v4984_v10, 0.0 }
 0x621   : > { %v4472_v57 = vpop.permute.xlu1 %4471 }
 0x622   : > { %4536 = vst.msk [vmem:[#allocation3 + $0xf8] sm:$0xff] %vm2058_vm10, %v4472_v57  ;;  %v4278_v14 = vpop.permute.xlu0 %4277  ;;  %v4566_v38 = vld [vmem:[#allocation3 + $0xe8] sm:$0xff]  ;;  %v5021_v57 = vsel %vm366_vm0, %v4982_v2, 0.0 }
 0x623   : > { %4343 = vst.msk [vmem:[#allocation3 + $0xf0] sm:$0xff] %vm1865_vm9, %v4278_v14  ;;  %5645 = vmatmul.mubr.msk.f32.gmra.mrb[28].mxu1 %vm2135_vm11, %v4566_v38  ;;  %v4921_v14 = vadd.f32 %v4920_v52, %v4919_v7  ;;  %v5020_v38 = vadd.f32 %v5019_v9, %v5018_v11 }
 0x625   : > { %v4923_v60 = vadd.f32 %v4922_v40, %v4921_v14 }
 0x626   : > { %v4470_v45 = vpop.permute.xlu0 %4469 }
 0x627   : > { %4535 = vst.msk [vmem:[#allocation3 + $0xf0] sm:$0xff] %vm2058_vm10, %v4470_v45  ;;  %v8295_v29 = vpop.f32.mrb[12].mxu1  ;;  %v4983_v45 = vmul.f32 %v8389_v19, %v8389_v19  ;;  %v4925_v28 = vadd.f32 %v4924_v26, %v4923_v60 }
 0x628   : > { %v8297_v46 = vpop.f32.mrb[13].mxu1 }
 0x629   : > { %v4568_v55 = vld [vmem:[#allocation3 + $0xf8] sm:$0xff]  ;;  %v8413_v21 = vadd.f32 %v8304_v8, %v8297_v46  ;;  %v5023_v56 = vsel %vm366_vm0, %v4983_v45, 0.0  ;;  %v8425_v46 = vadd.f32 %v8295_v29, %v8304_v8  ;;  %v4927_v39 = vadd.f32 %v4926_v37, %v4925_v28 }
 0x62b   : > { %v4986_v12 = vmul.f32 %v8413_v21, %v8413_v21  ;;  %v4928_v61 = vsel %vm366_vm0, %v8413_v21, 0.0  ;;  %v4987_v30 = vmul.f32 %v8425_v46, %v8425_v46  ;;  %v4930_v33 = vsel %vm366_vm0, %v8425_v46, 0.0 }
 0x62c   : > { %v4929_v16 = vadd.f32 %v4928_v61, %v4927_v39 }
 0x62d   : > { %v5029_v20 = vsel %vm366_vm0, %v4986_v12, 0.0  ;;  %v5031_v24 = vsel %vm366_vm0, %v4987_v30, 0.0 }
 0x62e   : > { %v4567_v53 = vld [vmem:[#allocation3 + $0xf0] sm:$0xff]  ;;  %v4931_v36 = vadd.f32 %v4930_v33, %v4929_v16 }
 0x62f   : > { %5647 = vmatprep.mubr.msk.f32.mxu1 %vm2135_vm11, %v4567_v53  ;;  %v5022_v53 = vadd.f32 %v5021_v57, %v5020_v38 }
 0x630   : > { %5648 = vmatmul.mubr.msk.f32.gmra.mrb[30].mxu1 %vm2135_vm11, %v4568_v55 }
 0x631   : > { %v5024_v63 = vadd.f32 %v5023_v56, %v5022_v53 }
 0x633   : > { %v5026_v41 = vadd.f32 %v5025_v62, %v5024_v63 }
 0x635   : > { %v5028_v17 = vadd.f32 %v5027_v59, %v5026_v41 }
 0x637   : > { %v5030_v0 = vadd.f32 %v5029_v20, %v5028_v17 }
 0x639   : > { %v5032_v51 = vadd.f32 %v5031_v24, %v5030_v0 }
 0x63f   : > { %v8328_v43 = vpop.f32.mrb[14].mxu1 }
 0x640   : > { %v8331_v25 = vpop.f32.mrb[15].mxu1 }
 0x641   : > { %v8431_v50 = vadd.f32 %v8304_v8, %v8331_v25  ;;  %v8443_v25 = vadd.f32 %v8328_v43, %v8304_v8 }
 0x643   : > { %v4988_v29 = vmul.f32 %v8431_v50, %v8431_v50  ;;  %v4932_v22 = vsel %vm366_vm0, %v8431_v50, 0.0  ;;  %v4989_v6 = vmul.f32 %v8443_v25, %v8443_v25  ;;  %v4934_v44 = vsel %vm366_vm0, %v8443_v25, 0.0 }
 0x644   : > { %v4933_v1 = vadd.f32 %v4932_v22, %v4931_v36 }
 0x645   : > { %v5033_v32 = vsel %vm366_vm0, %v4988_v29, 0.0  ;;  %v5035_v15 = vsel %vm366_vm0, %v4989_v6, 0.0 }
 0x646   : > { %v5034_v54 = vadd.f32 %v5033_v32, %v5032_v51  ;;  %v4935_v11 = vadd.f32 %v4934_v44, %v4933_v1 }
 0x648   : > { %v5036_v9 = vadd.f32 %v5035_v15, %v5034_v54 }
 0x657   : > { %v5628_v55 = vpop.f32.mrb[16].mxu1 }
 0x658   : > { %v4826_v18 = vpop.f32.mrb[17].mxu1  ;;  %v8459_v4 = vadd.f32 %v5628_v55, %v8304_v8 }
 0x659   : > { %v8448_v48 = vadd.f32 %v8304_v8, %v4826_v18 }
 0x65a   : > { %v4991_v57 = vmul.f32 %v8459_v4, %v8459_v4  ;;  %v4938_v55 = vsel %vm366_vm0, %v8459_v4, 0.0 }
 0x65b   : > { %v4990_v43 = vmul.f32 %v8448_v48, %v8448_v48  ;;  %v4936_v2 = vsel %vm366_vm0, %v8448_v48, 0.0 }
 0x65c   : > { %v4937_v7 = vadd.f32 %v4936_v2, %v4935_v11  ;;  %v5039_v40 = vsel %vm366_vm0, %v4991_v57, 0.0 }
 0x65d   : > { %v5037_v52 = vsel %vm366_vm0, %v4990_v43, 0.0 }
 0x65e   : > { %v5038_v38 = vadd.f32 %v5037_v52, %v5036_v9  ;;  %v4939_v18 = vadd.f32 %v4938_v55, %v4937_v7 }
 0x660   : > { %v5040_v28 = vadd.f32 %v5039_v40, %v5038_v38 }
 0x66f   : > { %v5631_v14 = vpop.f32.mrb[18].mxu1 }
 0x670   : > { %v8468_v45 = vadd.f32 %v5631_v14, %v8304_v8  ;;  %v4836_v10 = vpop.f32.mrb[19].mxu1 }
 0x671   : > { %v8473_v53 = vadd.f32 %v8304_v8, %v4836_v10 }
 0x672   : > { %v4993_v26 = vmul.f32 %v8468_v45, %v8468_v45  ;;  %v4942_v63 = vsel %vm366_vm0, %v8468_v45, 0.0 }
 0x673   : > { %v4940_v60 = vsel %vm366_vm0, %v8473_v53, 0.0  ;;  %v4992_v56 = vmul.f32 %v8473_v53, %v8473_v53 }
 0x674   : > { %v4941_v62 = vadd.f32 %v4940_v60, %v4939_v18  ;;  %v5043_v37 = vsel %vm366_vm0, %v4993_v26, 0.0 }
 0x675   : > { %v5041_v34 = vsel %vm366_vm0, %v4992_v56, 0.0 }
 0x676   : > { %v5042_v12 = vadd.f32 %v5041_v34, %v5040_v28  ;;  %v4943_v41 = vadd.f32 %v4942_v63, %v4941_v62 }
 0x678   : > { %v5044_v61 = vadd.f32 %v5043_v37, %v5042_v12 }
 0x687   : > { %v5634_v39 = vpop.f32.mrb[20].mxu1 }
 0x688   : > { %v8487_v59 = vadd.f32 %v5634_v39, %v8304_v8  ;;  %v4846_v20 = vpop.f32.mrb[21].mxu1 }
 0x689   : > { %v8490_v16 = vadd.f32 %v8304_v8, %v4846_v20 }
 0x68a   : > { %v4995_v17 = vmul.f32 %v8487_v59, %v8487_v59  ;;  %v4946_v33 = vsel %vm366_vm0, %v8487_v59, 0.0 }
 0x68b   : > { %v4944_v30 = vsel %vm366_vm0, %v8490_v16, 0.0  ;;  %v4994_v29 = vmul.f32 %v8490_v16, %v8490_v16 }
 0x68c   : > { %v4945_v0 = vadd.f32 %v4944_v30, %v4943_v41  ;;  %v5047_v32 = vsel %vm366_vm0, %v4995_v17, 0.0 }
 0x68d   : > { %v5045_v22 = vsel %vm366_vm0, %v4994_v29, 0.0 }
 0x68e   : > { %v5046_v36 = vadd.f32 %v5045_v22, %v5044_v61  ;;  %v4947_v24 = vadd.f32 %v4946_v33, %v4945_v0 }
 0x690   : > { %v5048_v1 = vadd.f32 %v5047_v32, %v5046_v36 }
 0x69f   : > { %v5637_v51 = vpop.f32.mrb[22].mxu1 }
 0x6a0   : > { %v8503_v6 = vadd.f32 %v5637_v51, %v8304_v8  ;;  %v4856_v43 = vpop.f32.mrb[23].mxu1 }
 0x6a1   : > { %v8506_v54 = vadd.f32 %v8304_v8, %v4856_v43 }
 0x6a2   : > { %v4997_v44 = vmul.f32 %v8503_v6, %v8503_v6  ;;  %v4950_v52 = vsel %vm366_vm0, %v8503_v6, 0.0 }
 0x6a3   : > { %v4948_v2 = vsel %vm366_vm0, %v8506_v54, 0.0  ;;  %v4996_v11 = vmul.f32 %v8506_v54, %v8506_v54 }
 0x6a4   : > { %v4949_v15 = vadd.f32 %v4948_v2, %v4947_v24  ;;  %v5051_v14 = vsel %vm366_vm0, %v4997_v44, 0.0 }
 0x6a5   : > { %v5049_v7 = vsel %vm366_vm0, %v4996_v11, 0.0 }
 0x6a6   : > { %v5050_v9 = vadd.f32 %v5049_v7, %v5048_v1  ;;  %v4951_v57 = vadd.f32 %v4950_v52, %v4949_v15 }
 0x6a8   : > { %v5052_v38 = vadd.f32 %v5051_v14, %v5050_v9 }
 0x6be   : > { %v5640_v10 = vpop.f32.mrb[24].mxu1 }
 0x6bf   : > { %v8519_v55 = vadd.f32 %v5640_v10, %v8304_v8  ;;  %v4866_v18 = vpop.f32.mrb[25].mxu1 }
 0x6c0   : > { %v8522_v40 = vadd.f32 %v8304_v8, %v4866_v18 }
 0x6c1   : > { %v4999_v26 = vmul.f32 %v8519_v55, %v8519_v55  ;;  %v4954_v28 = vsel %vm366_vm0, %v8519_v55, 0.0 }
 0x6c2   : > { %v4952_v60 = vsel %vm366_vm0, %v8522_v40, 0.0  ;;  %v4998_v56 = vmul.f32 %v8522_v40, %v8522_v40 }
 0x6c3   : > { %v4953_v62 = vadd.f32 %v4952_v60, %v4951_v57  ;;  %v5055_v41 = vsel %vm366_vm0, %v4999_v26, 0.0 }
 0x6c4   : > { %v5053_v63 = vsel %vm366_vm0, %v4998_v56, 0.0 }
 0x6c5   : > { %v5054_v34 = vadd.f32 %v5053_v63, %v5052_v38  ;;  %v4955_v12 = vadd.f32 %v4954_v28, %v4953_v62 }
 0x6c7   : > { %v5056_v37 = vadd.f32 %v5055_v41, %v5054_v34 }
 0x6da   : > { %v5643_v61 = vpop.f32.mrb[26].mxu1 }
 0x6db   : > { %v8535_v39 = vadd.f32 %v5643_v61, %v8304_v8  ;;  %v4876_v20 = vpop.f32.mrb[27].mxu1 }
 0x6dc   : > { %v8538_v17 = vadd.f32 %v8304_v8, %v4876_v20 }
 0x6dd   : > { %v5001_v30 = vmul.f32 %v8535_v39, %v8535_v39  ;;  %v4958_v22 = vsel %vm366_vm0, %v8535_v39, 0.0 }
 0x6de   : > { %v4956_v29 = vsel %vm366_vm0, %v8538_v17, 0.0  ;;  %v5000_v0 = vmul.f32 %v8538_v17, %v8538_v17 }
 0x6df   : > { %v4957_v33 = vadd.f32 %v4956_v29, %v4955_v12  ;;  %v5059_v1 = vsel %vm366_vm0, %v5001_v30, 0.0 }
 0x6e0   : > { %v5057_v36 = vsel %vm366_vm0, %v5000_v0, 0.0 }
 0x6e1   : > { %v5058_v24 = vadd.f32 %v5057_v36, %v5056_v37  ;;  %v4959_v32 = vadd.f32 %v4958_v22, %v4957_v33 }
 0x6e3   : > { %v5060_v51 = vadd.f32 %v5059_v1, %v5058_v24 }
 0x6f6   : > { %v5646_v43 = vpop.f32.mrb[28].mxu1 }
 0x6f7   : > { %v8551_v44 = vadd.f32 %v5646_v43, %v8304_v8  ;;  %v4886_v2 = vpop.f32.mrb[29].mxu1 }
 0x6f8   : > { %v8554_v11 = vadd.f32 %v8304_v8, %v4886_v2 }
 0x6f9   : > { %v5003_v15 = vmul.f32 %v8551_v44, %v8551_v44  ;;  %v4962_v57 = vsel %vm366_vm0, %v8551_v44, 0.0 }
 0x6fa   : > { %v4960_v52 = vsel %vm366_vm0, %v8554_v11, 0.0  ;;  %v5002_v7 = vmul.f32 %v8554_v11, %v8554_v11 }
 0x6fb   : > { %v4961_v9 = vadd.f32 %v4960_v52, %v4959_v32  ;;  %v5063_v18 = vsel %vm366_vm0, %v5003_v15, 0.0 }
 0x6fc   : > { %v5061_v14 = vsel %vm366_vm0, %v5002_v7, 0.0 }
 0x6fd   : > { %v5062_v38 = vadd.f32 %v5061_v14, %v5060_v51  ;;  %v4963_v10 = vadd.f32 %v4962_v57, %v4961_v9 }
 0x6ff   : > { %v5064_v26 = vadd.f32 %v5063_v18, %v5062_v38 }
 0x703   : > { %v5649_v60 = vpop.f32.mrb[30].mxu1 }
 0x704   : > { %v8567_v56 = vadd.f32 %v5649_v60, %v8304_v8  ;;  %v4896_v62 = vpop.f32.mrb[31].mxu1 }
 0x705   : > { %v8570_v28 = vadd.f32 %v8304_v8, %v4896_v62 }
 0x706   : > { %v5005_v63 = vmul.f32 %v8567_v56, %v8567_v56  ;;  %v4966_v37 = vsel %vm366_vm0, %v8567_v56, 0.0 }
 0x707   : > { %v4964_v34 = vsel %vm366_vm0, %v8570_v28, 0.0  ;;  %v5004_v12 = vmul.f32 %v8570_v28, %v8570_v28 }
 0x708   : > { %v4965_v41 = vadd.f32 %v4964_v34, %v4963_v10  ;;  %v5067_v8 = vsel %vm366_vm0, %v5005_v63, 0.0 }
 0x709   : > { %v5065_v61 = vsel %vm366_vm0, %v5004_v12, 0.0 }
 0x70a   : > { %v4967_v20 = vadd.f32 %v4966_v37, %v4965_v41  ;;  %v5066_v30 = vadd.f32 %v5065_v61, %v5064_v26 }
 0x70c   : > { %v4968_v29 = vrot.slane %v4967_v20, 4  ;;  %v5068_v0 = vadd.f32 %v5067_v8, %v5066_v30 }
 0x70e   : > { %v4969_v33 = vadd.f32 %v4968_v29, %v4967_v20  ;;  %v5069_v22 = vrot.slane %v5068_v0, 4 }
 0x710   : > { %v4970_v36 = vrot.slane %v4969_v33, 2  ;;  %v5070_v24 = vadd.f32 %v5069_v22, %v5068_v0 }
 0x712   : > { %v4971_v32 = vadd.f32 %v4970_v36, %v4969_v33  ;;  %v5071_v1 = vrot.slane %v5070_v24, 2 }
 0x714   : > { %v4972_v51 = vrot.slane %v4971_v32, 1  ;;  %v5072_v43 = vadd.f32 %v5071_v1, %v5070_v24 }
 0x716   : > { %v4973_v2 = vadd.f32 %v4972_v51, %v4971_v32  ;;  %v5073_v15 = vrot.slane %v5072_v43, 1 }
 0x718   : > { %v5074_v52 = vadd.f32 %v5073_v15, %v5072_v43  ;;  %v8582_v7 = vmul.f32 0.00390625, %v4973_v2 }
 0x71a   : > { %v5076_v9 = vmul.f32 0.00390625, %v5074_v52  ;;  %v5077_v57 = vmul.f32 %v8582_v7, %v8582_v7  ;;  %v5098_v10 = vsub.f32 %v8473_v53, %v8582_v7  ;;  %v5099_v18 = vsub.f32 %v8468_v45, %v8582_v7  ;;  %v5454_v52 = vld [vmem:[%s8805_s7] ss:$0 sm:$0xff] }
 0x71b   : > { %v5100_v26 = vsub.f32 %v8490_v16, %v8582_v7  ;;  %v5101_v60 = vsub.f32 %v8487_v59, %v8582_v7  ;;  %v5102_v62 = vsub.f32 %v8506_v54, %v8582_v7  ;;  %v5103_v63 = vsub.f32 %v8503_v6, %v8582_v7 }
 0x71c   : > { %v5078_v14 = vsub.f32 %v5076_v9, %v5077_v57  ;;  %v5104_v34 = vsub.f32 %v8522_v40, %v8582_v7  ;;  %v5105_v53 = vsub.f32 %v8519_v55, %v8582_v7  ;;  %v5106_v45 = vsub.f32 %v8538_v17, %v8582_v7 }
 0x71d   : > { %v5107_v16 = vsub.f32 %v8535_v39, %v8582_v7  ;;  %v5108_v59 = vsub.f32 %v8554_v11, %v8582_v7  ;;  %v5109_v54 = vsub.f32 %v8551_v44, %v8582_v7  ;;  %v5110_v6 = vsub.f32 %v8570_v28, %v8582_v7 }
 0x71e   : > { %v5079_v38 = vmax.f32 %v5078_v14, 0.0  ;;  %v5111_v40 = vsub.f32 %v8567_v56, %v8582_v7  ;;  %v5080_v55 = vsub.f32 %v8312_v13, %v8582_v7  ;;  %v5081_v39 = vsub.f32 %v8308_v27, %v8582_v7 }
 0x71f   : > { %v5082_v17 = vsub.f32 %v8316_v31, %v8582_v7  ;;  %v5083_v44 = vsub.f32 %v8336_v58, %v8582_v7  ;;  %v5084_v11 = vsub.f32 %v8342_v35, %v8582_v7  ;;  %v5085_v56 = vsub.f32 %v8353_v23, %v8582_v7 }
 0x720   : > { %v5112_v12 = vadd.f32 1e-05, %v5079_v38  ;;  %v5086_v28 = vsub.f32 %v8359_v3, %v8582_v7  ;;  %v5087_v13 = vsub.f32 %v8371_v5, %v8582_v7  ;;  %v5088_v27 = vsub.f32 %v8377_v49, %v8582_v7 }
 0x721   : > { %v5089_v31 = vsub.f32 %v8389_v19, %v8582_v7  ;;  %v5090_v58 = vsub.f32 %v8395_v42, %v8582_v7  ;;  %v5091_v35 = vsub.f32 %v8407_v47, %v8582_v7  ;;  %v5092_v23 = vsub.f32 %v8413_v21, %v8582_v7 }
 0x722   : > { %5684 = vrsqrt.f32 %v5112_v12  ;;  %v5093_v3 = vsub.f32 %v8425_v46, %v8582_v7  ;;  %v5094_v5 = vsub.f32 %v8431_v50, %v8582_v7  ;;  %v5095_v49 = vsub.f32 %v8443_v25, %v8582_v7 }
 0x723   : > { %v5096_v19 = vsub.f32 %v8448_v48, %v8582_v7  ;;  %v5097_v42 = vsub.f32 %v8459_v4, %v8582_v7 }
 0x72c   : > { %v5685_v41 = vpop.eup %5684 }
 0x72d   : > { %v5114_v47 = vmul.f32 %v5685_v41, %v5080_v55  ;;  %v5115_v37 = vmul.f32 %v5685_v41, %v5081_v39  ;;  %v5116_v61 = vmul.f32 %v5685_v41, %v5082_v17  ;;  %v5117_v21 = vmul.f32 %v5685_v41, %v5083_v44 }
 0x72e   : > { %v5118_v20 = vmul.f32 %v5685_v41, %v5084_v11  ;;  %v5119_v30 = vmul.f32 %v5685_v41, %v5085_v56  ;;  %v5120_v46 = vmul.f32 %v5685_v41, %v5086_v28  ;;  %v5121_v8 = vmul.f32 %v5685_v41, %v5087_v13 }
 0x72f   : > { %v5122_v29 = vmul.f32 %v5685_v41, %v5088_v27  ;;  %v5123_v0 = vmul.f32 %v5685_v41, %v5089_v31  ;;  %v5124_v50 = vmul.f32 %v5685_v41, %v5090_v58  ;;  %v5125_v33 = vmul.f32 %v5685_v41, %v5091_v35 }
 0x730   : > { %v5126_v22 = vmul.f32 %v5685_v41, %v5092_v23  ;;  %v5127_v25 = vmul.f32 %v5685_v41, %v5093_v3  ;;  %v5128_v36 = vmul.f32 %v5685_v41, %v5094_v5  ;;  %v5129_v24 = vmul.f32 %v5685_v41, %v5095_v49  ;;  %v5455_v23 = vld [vmem:[%s8806_s8] ss:$0 sm:$0xff] }
 0x731   : > { %v5130_v48 = vmul.f32 %v5685_v41, %v5096_v19  ;;  %v5131_v32 = vmul.f32 %v5685_v41, %v5097_v42  ;;  %v5132_v1 = vmul.f32 %v5685_v41, %v5098_v10  ;;  %v5133_v4 = vmul.f32 %v5685_v41, %v5099_v18 }
 0x732   : > { %v5134_v51 = vmul.f32 %v5685_v41, %v5100_v26  ;;  %v5135_v43 = vmul.f32 %v5685_v41, %v5101_v60  ;;  %v5136_v2 = vmul.f32 %v5685_v41, %v5102_v62  ;;  %v5137_v15 = vmul.f32 %v5685_v41, %v5103_v63 }
 0x733   : > { %v5138_v7 = vmul.f32 %v5685_v41, %v5104_v34  ;;  %v5139_v9 = vmul.f32 %v5685_v41, %v5105_v53  ;;  %v5140_v57 = vmul.f32 %v5685_v41, %v5106_v45  ;;  %v5141_v14 = vmul.f32 %v5685_v41, %v5107_v16 }
 0x734   : > { %v5142_v38 = vmul.f32 %v5685_v41, %v5108_v59  ;;  %v5143_v12 = vmul.f32 %v5685_v41, %v5109_v54  ;;  %v5144_v55 = vmul.f32 %v5685_v41, %v5110_v6  ;;  %v5145_v39 = vmul.f32 %v5685_v41, %v5111_v40 }
 0x735   : > { %v5153_v17 = vmul.f32 %v5454_v52, %v5114_v47  ;;  %v5154_v44 = vmul.f32 %v5454_v52, %v5115_v37  ;;  %v5155_v10 = vmul.f32 %v5454_v52, %v5116_v61  ;;  %v5156_v18 = vmul.f32 %v5454_v52, %v5117_v21 }
 0x736   : > { %v5157_v26 = vmul.f32 %v5454_v52, %v5118_v20  ;;  %v5158_v60 = vmul.f32 %v5454_v52, %v5119_v30  ;;  %v5159_v62 = vmul.f32 %v5454_v52, %v5120_v46  ;;  %v5160_v63 = vmul.f32 %v5454_v52, %v5121_v8 }
 0x737   : > { %v5161_v11 = vmul.f32 %v5454_v52, %v5122_v29  ;;  %v5162_v56 = vmul.f32 %v5454_v52, %v5123_v0  ;;  %v5163_v28 = vmul.f32 %v5454_v52, %v5124_v50  ;;  %v5164_v13 = vmul.f32 %v5454_v52, %v5125_v33 }
 0x738   : > { %v5165_v34 = vmul.f32 %v5454_v52, %v5126_v22  ;;  %v5166_v53 = vmul.f32 %v5454_v52, %v5127_v25  ;;  %v5167_v45 = vmul.f32 %v5454_v52, %v5128_v36  ;;  %v5168_v16 = vmul.f32 %v5454_v52, %v5129_v24 }
 0x739   : > { %v5169_v59 = vmul.f32 %v5454_v52, %v5130_v48  ;;  %v5170_v54 = vmul.f32 %v5454_v52, %v5131_v32  ;;  %v5171_v6 = vmul.f32 %v5454_v52, %v5132_v1  ;;  %v5172_v40 = vmul.f32 %v5454_v52, %v5133_v4 }
 0x73a   : > { %v5173_v27 = vmul.f32 %v5454_v52, %v5134_v51  ;;  %v5174_v31 = vmul.f32 %v5454_v52, %v5135_v43  ;;  %v5175_v58 = vmul.f32 %v5454_v52, %v5136_v2  ;;  %v5176_v35 = vmul.f32 %v5454_v52, %v5137_v15 }
 0x73b   : > { %v5177_v3 = vmul.f32 %v5454_v52, %v5138_v7  ;;  %v5178_v41 = vmul.f32 %v5454_v52, %v5139_v9  ;;  %v5179_v5 = vmul.f32 %v5454_v52, %v5140_v57  ;;  %v5180_v49 = vmul.f32 %v5454_v52, %v5141_v14 }
 0x73c   : > { %v5181_v19 = vmul.f32 %v5454_v52, %v5142_v38  ;;  %v5182_v42 = vmul.f32 %v5454_v52, %v5143_v12  ;;  %v5183_v47 = vmul.f32 %v5454_v52, %v5144_v55  ;;  %v5184_v37 = vmul.f32 %v5454_v52, %v5145_v39 }
 0x73d   : > { %v5192_v61 = vadd.f32 %v5455_v23, %v5153_v17  ;;  %v5193_v21 = vadd.f32 %v5455_v23, %v5154_v44  ;;  %v5194_v20 = vadd.f32 %v5455_v23, %v5155_v10  ;;  %v5195_v30 = vadd.f32 %v5455_v23, %v5156_v18  ;;  %v8872_v44 = vld [vmem:[#allocation5_spill] sm:$0xff]  ;;  %v8873_v18 = vld [vmem:[#allocation7_spill] sm:$0xff] }
 0x73e   : > { %v5196_v46 = vadd.f32 %v5455_v23, %v5157_v26  ;;  %v5197_v8 = vadd.f32 %v5455_v23, %v5158_v60  ;;  %v5198_v29 = vadd.f32 %v5455_v23, %v5159_v62  ;;  %v5199_v0 = vadd.f32 %v5455_v23, %v5160_v63  ;;  %v8874_v60 = vld [vmem:[#allocation4_spill] sm:$0xff]  ;;  %v8875_v63 = vld [vmem:[#allocation9_spill] sm:$0xff] }
 0x73f   : > { %v5200_v50 = vadd.f32 %v5455_v23, %v5161_v11  ;;  %v5201_v33 = vadd.f32 %v5455_v23, %v5162_v56  ;;  %v5202_v22 = vadd.f32 %v5455_v23, %v5163_v28  ;;  %v5203_v25 = vadd.f32 %v5455_v23, %v5164_v13  ;;  %v8876_v56 = vld [vmem:[#allocation6_spill] sm:$0xff]  ;;  %v8877_v13 = vld [vmem:[#allocation11_spill] sm:$0xff] }
 0x740   : > { %v5204_v36 = vadd.f32 %v5455_v23, %v5165_v34  ;;  %v5205_v24 = vadd.f32 %v5455_v23, %v5166_v53  ;;  %v5206_v48 = vadd.f32 %v5455_v23, %v5167_v45  ;;  %v5207_v32 = vadd.f32 %v5455_v23, %v5168_v16  ;;  %v8878_v53 = vld [vmem:[#allocation8_spill] sm:$0xff] }
 0x741   : > { %v5208_v1 = vadd.f32 %v5455_v23, %v5169_v59  ;;  %v5209_v4 = vadd.f32 %v5455_v23, %v5170_v54  ;;  %v5210_v51 = vadd.f32 %v5455_v23, %v5171_v6  ;;  %v5211_v43 = vadd.f32 %v5455_v23, %v5172_v40  ;;  %v8879_v16 = vld [vmem:[#allocation12_spill] sm:$0xff]  ;;  %v8880_v54 = vld [vmem:[#allocation10_spill] sm:$0xff]  ;;  %v8881_v40 = vld [vmem:[#allocation13_spill] sm:$0xff] }
 0x742   : > { %v5212_v2 = vadd.f32 %v5455_v23, %v5173_v27  ;;  %v5213_v15 = vadd.f32 %v5455_v23, %v5174_v31  ;;  %v5214_v52 = vadd.f32 %v5455_v23, %v5175_v58  ;;  %v5215_v7 = vadd.f32 %v5455_v23, %v5176_v35  ;;  %v8882_v31 = vld [vmem:[#allocation14_spill] sm:$0xff]  ;;  %v8883_v35 = vld [vmem:[#allocation15_spill] sm:$0xff] }
 0x743   : > { %v5216_v9 = vadd.f32 %v5455_v23, %v5177_v3  ;;  %v5217_v57 = vadd.f32 %v5455_v23, %v5178_v41  ;;  %v5218_v14 = vadd.f32 %v5455_v23, %v5179_v5  ;;  %v5219_v38 = vadd.f32 %v5455_v23, %v5180_v49  ;;  %v8884_v3 = vld [vmem:[#allocation16_spill] sm:$0xff]  ;;  %v8885_v5 = vld [vmem:[#allocation17_spill] sm:$0xff] }
 0x744   : > { %v5220_v12 = vadd.f32 %v5455_v23, %v5181_v19  ;;  %v5221_v55 = vadd.f32 %v5455_v23, %v5182_v42  ;;  %v5222_v39 = vadd.f32 %v5455_v23, %v5183_v47  ;;  %v5223_v17 = vadd.f32 %v5455_v23, %v5184_v37  ;;  %v8886_v19 = vld [vmem:[#allocation18_spill] sm:$0xff]  ;;  %v8887_v47 = vld [vmem:[#allocation19_spill] sm:$0xff] }
 0x745   : > { %v5224_v10 = vadd.f32 %v5192_v61, %v8872_v44  ;;  %v5225_v26 = vadd.f32 %v5193_v21, %v8873_v18  ;;  %v5226_v62 = vadd.f32 %v5194_v20, %v8874_v60  ;;  %v5227_v11 = vadd.f32 %v5195_v30, %v8875_v63  ;;  %v8888_v61 = vld [vmem:[#allocation20_spill] sm:$0xff]  ;;  %v8889_v20 = vld [vmem:[#allocation21_spill] sm:$0xff]  ;;  %v8903_v63 = vld [vmem:[#allocation35_spill] sm:$0xff] }
 0x746   : > { %v5228_v28 = vadd.f32 %v5196_v46, %v8876_v56  ;;  %v5229_v34 = vadd.f32 %v5197_v8, %v8877_v13  ;;  %v5230_v45 = vadd.f32 %v5198_v29, %v8878_v53  ;;  %v5231_v59 = vadd.f32 %v5199_v0, %v8879_v16  ;;  %v8890_v46 = vld [vmem:[#allocation22_spill] sm:$0xff]  ;;  %v8891_v29 = vld [vmem:[#allocation23_spill] sm:$0xff] }
 0x747   : > { %v5232_v6 = vadd.f32 %v5200_v50, %v8880_v54  ;;  %v5233_v27 = vadd.f32 %v5201_v33, %v8881_v40  ;;  %v5234_v58 = vadd.f32 %v5202_v22, %v8882_v31  ;;  %v5235_v23 = vadd.f32 %v5203_v25, %v8883_v35  ;;  %v8892_v50 = vld [vmem:[#allocation24_spill] sm:$0xff]  ;;  %v8893_v22 = vld [vmem:[#allocation25_spill] sm:$0xff] }
 0x748   : > { %v5236_v41 = vadd.f32 %v5204_v36, %v8884_v3  ;;  %v5237_v49 = vadd.f32 %v5205_v24, %v8885_v5  ;;  %v5238_v42 = vadd.f32 %v5206_v48, %v8886_v19  ;;  %v5239_v37 = vadd.f32 %v5207_v32, %v8887_v47  ;;  %v8894_v36 = vld [vmem:[#allocation26_spill] sm:$0xff]  ;;  %v8895_v48 = vld [vmem:[#allocation27_spill] sm:$0xff]  ;;  %v8896_v32 = vld [vmem:[#allocation28_spill] sm:$0xff] }
 0x749   : > { %v5240_v21 = vadd.f32 %v5208_v1, %v8888_v61  ;;  %v5241_v30 = vadd.f32 %v5209_v4, %v8889_v20  ;;  %v5242_v8 = vadd.f32 %v5210_v51, %v8890_v46  ;;  %v5243_v0 = vadd.f32 %v5211_v43, %v8891_v29  ;;  %v8897_v4 = vld [vmem:[#allocation29_spill] sm:$0xff]  ;;  %v8898_v51 = vld [vmem:[#allocation30_spill] sm:$0xff] }
 0x74a   : > { %v8677_v33 = vadd.f32 %v5212_v2, %v8892_v50  ;;  %v8680_v25 = vadd.f32 %v5213_v15, %v8893_v22  ;;  %v8683_v24 = vadd.f32 %v5214_v52, %v8894_v36  ;;  %v8686_v44 = vadd.f32 %v5215_v7, %v8895_v48  ;;  %v8899_v2 = vld [vmem:[#allocation31_spill] sm:$0xff]  ;;  %v8900_v15 = vld [vmem:[#allocation32_spill] sm:$0xff]  ;;  %v8901_v7 = vld [vmem:[#allocation33_spill] sm:$0xff] }
 0x74b   : > { %v8689_v1 = vadd.f32 %v5216_v9, %v8896_v32  ;;  %v8692_v18 = vadd.f32 %v5217_v57, %v8897_v4  ;;  %v8695_v43 = vadd.f32 %v5218_v14, %v8898_v51  ;;  %v8698_v60 = vadd.f32 %v5219_v38, %v8899_v2  ;;  %v8902_v57 = vld [vmem:[#allocation34_spill] sm:$0xff] }
 0x74c   : > { %v8708_v52 = vadd.f32 %v5220_v12, %v8900_v15  ;;  %v8711_v9 = vadd.f32 %v5221_v55, %v8901_v7  ;;  %v8714_v14 = vadd.f32 %v5222_v39, %v8902_v57  ;;  %v8717_v38 = vadd.f32 %v5223_v17, %v8903_v63 }
 0x74d   : > { %v5256_v56 = vmax.f32 %v5224_v10, 0.0  ;;  %v5257_v13 = vmax.f32 %v5225_v26, 0.0  ;;  %v5258_v53 = vmax.f32 %v5226_v62, 0.0  ;;  %v5259_v16 = vmax.f32 %v5227_v11, 0.0 }
 0x74e   : > { %v5260_v54 = vmax.f32 %v5228_v28, 0.0  ;;  %v5261_v12 = vmax.f32 %v5229_v34, 0.0  ;;  %v5262_v40 = vmax.f32 %v5230_v45, 0.0  ;;  %v5263_v55 = vmax.f32 %v5231_v59, 0.0 }
 0x74f   : > { %v5264_v31 = vmax.f32 %v5232_v6, 0.0  ;;  %v5265_v39 = vmax.f32 %v5233_v27, 0.0  ;;  %v5266_v35 = vmax.f32 %v5234_v58, 0.0  ;;  %v5267_v3 = vmax.f32 %v5235_v23, 0.0  ;;  %5288 = vst.msk [vmem:[%s8705_s15] sm:$0xff] %vm366_vm0, %v5256_v56  ;;  %5289 = vst.msk [vmem:[%s8705_s15 + $0x8] sm:$0xff] %vm366_vm0, %v5257_v13 }
 0x750   : > { %5290 = vst.msk [vmem:[%s8705_s15 + $0x10] sm:$0xff] %vm366_vm0, %v5258_v53  ;;  %5291 = vst.msk [vmem:[%s8705_s15 + $0x18] sm:$0xff] %vm366_vm0, %v5259_v16  ;;  %v5268_v17 = vmax.f32 %v5236_v41, 0.0  ;;  %v5269_v10 = vmax.f32 %v5237_v49, 0.0  ;;  %v5270_v26 = vmax.f32 %v5238_v42, 0.0  ;;  %v5271_v62 = vmax.f32 %v5239_v37, 0.0 }
 0x751   : > { %5292 = vst.msk [vmem:[%s8705_s15 + $0x20] sm:$0xff] %vm366_vm0, %v5260_v54  ;;  %5293 = vst.msk [vmem:[%s8705_s15 + $0x28] sm:$0xff] %vm366_vm0, %v5261_v12  ;;  %v5272_v11 = vmax.f32 %v5240_v21, 0.0  ;;  %v5273_v28 = vmax.f32 %v5241_v30, 0.0  ;;  %v5274_v34 = vmax.f32 %v5242_v8, 0.0  ;;  %v5275_v45 = vmax.f32 %v5243_v0, 0.0 }
 0x752   : > { %5294 = vst.msk [vmem:[%s8705_s15 + $0x30] sm:$0xff] %vm366_vm0, %v5262_v40  ;;  %5295 = vst.msk [vmem:[%s8705_s15 + $0x38] sm:$0xff] %vm366_vm0, %v5263_v55  ;;  %v5276_v59 = vmax.f32 %v8677_v33, 0.0  ;;  %v5277_v6 = vmax.f32 %v8680_v25, 0.0  ;;  %v5278_v27 = vmax.f32 %v8683_v24, 0.0  ;;  %v5279_v58 = vmax.f32 %v8686_v44, 0.0 }
 0x753   : > { %5296 = vst.msk [vmem:[%s8705_s15 + $0x40] sm:$0xff] %vm366_vm0, %v5264_v31  ;;  %5297 = vst.msk [vmem:[%s8705_s15 + $0x48] sm:$0xff] %vm366_vm0, %v5265_v39  ;;  %v5280_v23 = vmax.f32 %v8689_v1, 0.0  ;;  %v5281_v41 = vmax.f32 %v8692_v18, 0.0  ;;  %v5282_v5 = vmax.f32 %v8695_v43, 0.0  ;;  %v5283_v49 = vmax.f32 %v8698_v60, 0.0 }
 0x754   : > { %5298 = vst.msk [vmem:[%s8705_s15 + $0x50] sm:$0xff] %vm366_vm0, %v5266_v35  ;;  %5299 = vst.msk [vmem:[%s8705_s15 + $0x58] sm:$0xff] %vm366_vm0, %v5267_v3  ;;  %v5284_v19 = vmax.f32 %v8708_v52, 0.0  ;;  %v5285_v42 = vmax.f32 %v8711_v9, 0.0  ;;  %v5286_v47 = vmax.f32 %v8714_v14, 0.0  ;;  %v5287_v37 = vmax.f32 %v8717_v38, 0.0 }
 0x755   : > { %5300 = vst.msk [vmem:[%s8705_s15 + $0x60] sm:$0xff] %vm366_vm0, %v5268_v17  ;;  %5301 = vst.msk [vmem:[%s8705_s15 + $0x68] sm:$0xff] %vm366_vm0, %v5269_v10 }
 0x756   : > { %5302 = vst.msk [vmem:[%s8705_s15 + $0x70] sm:$0xff] %vm366_vm0, %v5270_v26  ;;  %5303 = vst.msk [vmem:[%s8705_s15 + $0x78] sm:$0xff] %vm366_vm0, %v5271_v62 }
 0x757   : > { %5304 = vst.msk [vmem:[%s8705_s15 + $0x80] sm:$0xff] %vm366_vm0, %v5272_v11  ;;  %5305 = vst.msk [vmem:[%s8705_s15 + $0x88] sm:$0xff] %vm366_vm0, %v5273_v28 }
 0x758   : > { %5306 = vst.msk [vmem:[%s8705_s15 + $0x90] sm:$0xff] %vm366_vm0, %v5274_v34  ;;  %5307 = vst.msk [vmem:[%s8705_s15 + $0x98] sm:$0xff] %vm366_vm0, %v5275_v45 }
 0x759   : > { %5308 = vst.msk [vmem:[%s8705_s15 + $0xa0] sm:$0xff] %vm366_vm0, %v5276_v59  ;;  %5309 = vst.msk [vmem:[%s8705_s15 + $0xa8] sm:$0xff] %vm366_vm0, %v5277_v6 }
 0x75a   : > { %5310 = vst.msk [vmem:[%s8705_s15 + $0xb0] sm:$0xff] %vm366_vm0, %v5278_v27  ;;  %5311 = vst.msk [vmem:[%s8705_s15 + $0xb8] sm:$0xff] %vm366_vm0, %v5279_v58 }
 0x75b   : > { %5312 = vst.msk [vmem:[%s8705_s15 + $0xc0] sm:$0xff] %vm366_vm0, %v5280_v23  ;;  %5313 = vst.msk [vmem:[%s8705_s15 + $0xc8] sm:$0xff] %vm366_vm0, %v5281_v41 }
 0x75c   : > { %5314 = vst.msk [vmem:[%s8705_s15 + $0xd0] sm:$0xff] %vm366_vm0, %v5282_v5  ;;  %5315 = vst.msk [vmem:[%s8705_s15 + $0xd8] sm:$0xff] %vm366_vm0, %v5283_v49 }
 0x75d   : > { %5316 = vst.msk [vmem:[%s8705_s15 + $0xe0] sm:$0xff] %vm366_vm0, %v5284_v19  ;;  %5317 = vst.msk [vmem:[%s8705_s15 + $0xe8] sm:$0xff] %vm366_vm0, %v5285_v42 }
 0x75e   : > { %5318 = vst.msk [vmem:[%s8705_s15 + $0xf0] sm:$0xff] %vm366_vm0, %v5286_v47  ;;  %5319 = vst.msk [vmem:[%s8705_s15 + $0xf8] sm:$0xff] %vm366_vm0, %v5287_v37 }
 0x75f PF: > { %s19_s30 = sadd.s32 1, %s5692_s30  }
 0x760   : > { %p16_p4 = scmp.ge.s32.totalorder %s19_s30, 4  }
 0x762   :  { %18 = sbr.rel (!%p16_p4) target bundleno = 1 (0x1), region = 103 }

</bundles_post_ra>
